<compile_context>
chip_gen: v6e
topology: v6e:2x2x1
jax: 0.10.0
libtpu: 0.0.40
codegen_flags: <defaults>
</compile_context>

<pallas_src>
import functools

import jax
import jax.numpy as jnp
from jax import lax
from jax.experimental import pallas as pl
from jax.experimental.pallas import tpu as pltpu


def _round_up(x, m):
    return (x + m - 1) // m * m


# ----------------------------------------------------------------------------
# Pallas kernel: one (batch-block, timestep) grid point of a ConvLSTM layer.
#   xcols_ref : (1, 1, H*W, KH*KW*Cin)    bf16  im2col'd input frame (this t)
#   wx_ref    : (KH*KW*Cin, 4*hidden)     bf16  input->gates weight
#   wh_ref    : (KH*KW, hidden, 4*hidden) bf16  hidden->gates weight (per tap)
#   b_ref     : (1, 4*hidden)             f32   conv bias
#   hseq_ref  : (1, 1, H*W, hidden)       f32   per-step output h_t
#   clast_ref : (1, H*W, hidden)          f32   resident cell state (same block
#                                               for every t -> carried in VMEM)
#   hpad_ref  : (Hp, Wp, hidden)          f32   scratch: zero-padded h_{t-1}
#   acc_ref   : (H*W, 4*hidden)           f32   scratch: conv/gate accumulator
# ----------------------------------------------------------------------------
def _convlstm_layer_kernel(xcols_ref, wx_ref, wh_ref, b_ref,
                           hseq_ref, clast_ref, hpad_ref, acc_ref,
                           *, H, W, KH, KW, hidden, w_off):
    t = pl.program_id(1)
    ph, pw = KH // 2, KW // 2
    M = H * W

    # New batch block (grid order: b outer, t inner) -> reset recurrent state.
    @pl.when(t == 0)
    def _():
        hpad_ref[...] = jnp.zeros_like(hpad_ref)
        clast_ref[...] = jnp.zeros_like(clast_ref)

    # conv(x_t): one fat MXU matmul over the pre-im2col'd frame, bias folded in.
    acc_ref[...] = (
        jnp.dot(xcols_ref[0, 0], wx_ref[...],
                preferred_element_type=jnp.float32)
        + b_ref[...])

    # conv(h_{t-1}): KH*KW taps out of the zero-padded VMEM-resident state,
    # accumulated into the VMEM scratch (keeps vreg pressure low).
    for ky in range(KH):
        for kx in range(KW):
            c0 = w_off - pw + kx
            patch = hpad_ref[ky:ky + H, c0:c0 + W, :]           # (H, W, hid) f32
            patch = patch.reshape(M, hidden).astype(jnp.bfloat16)
            acc_ref[...] += jnp.dot(patch, wh_ref[ky * KW + kx],
                                    preferred_element_type=jnp.float32)

    # LSTM gate math (torch.split order: i, f, o, g), f32 on VPU/EUP.
    i = jax.nn.sigmoid(acc_ref[:, 0 * hidden:1 * hidden])
    f = jax.nn.sigmoid(acc_ref[:, 1 * hidden:2 * hidden])
    o = jax.nn.sigmoid(acc_ref[:, 2 * hidden:3 * hidden])
    g = jnp.tanh(acc_ref[:, 3 * hidden:4 * hidden])

    c_next = f * clast_ref[0] + i * g
    h_next = o * jnp.tanh(c_next)

    clast_ref[0] = c_next
    hseq_ref[0, 0] = h_next
    # Interior of the padded state starts at a sublane-aligned column (w_off is
    # a multiple of 8), so this store is unmasked; pad rows/cols stay zero.
    hpad_ref[ph:ph + H, w_off:w_off + W, :] = h_next.reshape(H, W, hidden)


def _convlstm_layer(xcols, wx, wh, b, *, H, W, KH, KW, hidden):
    """Run one ConvLSTM layer over the whole sequence in a single pallas_call."""
    B, T, M, Kx = xcols.shape
    ph, pw = KH // 2, KW // 2
    w_off = _round_up(max(pw, 1), 8)                  # aligned interior col start
    Hp = H + 2 * ph
    Wp = _round_up(w_off + W + (KW - 1 - pw), 8)      # padded width of h scratch

    kernel = functools.partial(_convlstm_layer_kernel, H=H, W=W, KH=KH, KW=KW,
                               hidden=hidden, w_off=w_off)
    hseq, c_last = pl.pallas_call(
        kernel,
        out_shape=(jax.ShapeDtypeStruct((B, T, M, hidden), jnp.float32),
                   jax.ShapeDtypeStruct((B, M, hidden), jnp.float32)),
        grid_spec=pltpu.PrefetchScalarGridSpec(
            num_scalar_prefetch=0,
            grid=(B, T),
            in_specs=[
                pl.BlockSpec((1, 1, M, Kx), lambda bb, tt: (bb, tt, 0, 0)),
                pl.BlockSpec((Kx, 4 * hidden), lambda bb, tt: (0, 0)),
                pl.BlockSpec((KH * KW, hidden, 4 * hidden),
                             lambda bb, tt: (0, 0, 0)),
                pl.BlockSpec((1, 4 * hidden), lambda bb, tt: (0, 0)),
            ],
            out_specs=[
                pl.BlockSpec((1, 1, M, hidden), lambda bb, tt: (bb, tt, 0, 0)),
                pl.BlockSpec((1, M, hidden), lambda bb, tt: (bb, 0, 0)),
            ],
            scratch_shapes=[
                pltpu.VMEM((Hp, Wp, hidden), jnp.float32),   # padded h state
                pltpu.VMEM((M, 4 * hidden), jnp.float32),    # conv accumulator
            ]),
        compiler_params=pltpu.CompilerParams(
            dimension_semantics=("parallel", "arbitrary"),
            vmem_limit_bytes=32 * 1024 * 1024),
    )(xcols, wx, wh, b)
    return hseq, c_last


def _im2col(x, KH, KW):
    """(B, T, H, W, C) -> (B, T, H*W, KH*KW*C) with zero 'same' padding."""
    B, T, H, W, C = x.shape
    ph, pw = KH // 2, KW // 2
    xp = jnp.pad(x, ((0, 0), (0, 0), (ph, ph), (pw, pw), (0, 0)))
    taps = [xp[:, :, ky:ky + H, kx:kx + W, :]
            for ky in range(KH) for kx in range(KW)]
    cols = jnp.concatenate(taps, axis=-1)
    return cols.reshape(B, T, H * W, KH * KW * C)


# ----------------------------------------------------------------------------
# Parameters and multi-layer forward (matches the PyTorch ConvLSTM module).
# ----------------------------------------------------------------------------
def init_convlstm_params(key, input_dim, hidden_dims, kernel_sizes):
    """Deterministic init; keeps both kernel-layout and torch-layout weights."""
    params = []
    cur_in = input_dim
    for hd, (KH, KW) in zip(hidden_dims, kernel_sizes):
        ctot = cur_in + hd
        key, kw_key, kb_key = jax.random.split(key, 3)
        w_torch = jax.random.normal(kw_key, (4 * hd, ctot, KH, KW),
                                    jnp.float32) * 0.05
        b_torch = jax.random.normal(kb_key, (4 * hd,), jnp.float32) * 0.05
        # Split into input->gates and hidden->gates, kernel layouts:
        #   wx: (KH*KW*cur_in, 4*hd)  rows ordered (ky, kx, cin)
        #   wh: (KH*KW, hd, 4*hd)     taps ordered ky*KW + kx
        wx = jnp.transpose(w_torch[:, :cur_in], (2, 3, 1, 0)).reshape(
            KH * KW * cur_in, 4 * hd).astype(jnp.bfloat16)
        wh = jnp.transpose(w_torch[:, cur_in:], (2, 3, 1, 0)).reshape(
            KH * KW, hd, 4 * hd).astype(jnp.bfloat16)
        b2d = b_torch.reshape(1, 4 * hd)
        params.append((wx, wh, b2d, w_torch, b_torch))
        cur_in = hd
    return params


@functools.partial(jax.jit, static_argnames=("hidden_dims", "kernel_sizes",
                                              "batch_first",
                                              "return_all_layers"))
def convlstm_forward(x, params, *, hidden_dims, kernel_sizes,
                     batch_first=True, return_all_layers=False):
    """x: (B, T, C, H, W) if batch_first else (T, B, C, H, W) (torch layout)."""
    if not batch_first:
        x = jnp.transpose(x, (1, 0, 2, 3, 4))
    B, T, C, H, W = x.shape
    cur = jnp.transpose(x, (0, 1, 3, 4, 2))          # (B, T, H, W, C)

    layer_outputs, last_states = [], []
    for li, (wx, wh, b2d, _, _) in enumerate(params):
        hd = hidden_dims[li]
        KH, KW = kernel_sizes[li]
        # im2col once per layer (not per timestep) so all in-kernel x slices
        # are tile-aligned and the x-conv is one fat matmul per step.
        xcols = _im2col(cur, KH, KW).astype(jnp.bfloat16)
        hseq, c_last = _convlstm_layer(xcols, wx, wh, b2d,
                                       H=H, W=W, KH=KH, KW=KW, hidden=hd)
        cur = hseq.reshape(B, T, H, W, hd)
        layer_outputs.append(jnp.transpose(cur, (0, 1, 4, 2, 3)))   # (B,T,hd,H,W)
        h_last = jnp.transpose(cur[:, -1], (0, 3, 1, 2))            # (B,hd,H,W)
        c_last = jnp.transpose(c_last.reshape(B, H, W, hd), (0, 3, 1, 2))
        last_states.append((h_last, c_last))
    if not return_all_layers:
        layer_outputs = layer_outputs[-1:]
        last_states = last_states[-1:]
    return layer_outputs, last_states


# ----------------------------------------------------------------------------
# Pure-JAX reference (lax.conv).  conv_input_dtype=jnp.bfloat16 mirrors the
# kernel's precision policy (bf16 MXU operands, f32 accumulation/gates).
# ----------------------------------------------------------------------------
def convlstm_forward_ref(x, params, hidden_dims, kernel_sizes,
                         batch_first=True, return_all_layers=False,
                         conv_input_dtype=None):
    if not batch_first:
        x = jnp.transpose(x, (1, 0, 2, 3, 4))
    B, T, C, H, W = x.shape
    cur = x
    layer_outputs, last_states = [], []
    for li, (_, _, _, w_torch, b_torch) in enumerate(params):
        hd = hidden_dims[li]
        KH, KW = kernel_sizes[li]
        w = w_torch if conv_input_dtype is None else w_torch.astype(conv_input_dtype)
        h = jnp.zeros((B, hd, H, W), jnp.float32)
        c = jnp.zeros((B, hd, H, W), jnp.float32)
        outs = []
        for t in range(T):
            combined = jnp.concatenate([cur[:, t], h], axis=1)
            if conv_input_dtype is not None:
                combined = combined.astype(conv_input_dtype)
            cc = lax.conv_general_dilated(
                combined, w, window_strides=(1, 1),
                padding=((KH // 2, KH // 2), (KW // 2, KW // 2)),
                dimension_numbers=("NCHW", "OIHW", "NCHW"),
                preferred_element_type=jnp.float32)
            cc = cc + b_torch[None, :, None, None]
            i = jax.nn.sigmoid(cc[:, 0 * hd:1 * hd])
            f = jax.nn.sigmoid(cc[:, 1 * hd:2 * hd])
            o = jax.nn.sigmoid(cc[:, 2 * hd:3 * hd])
            g = jnp.tanh(cc[:, 3 * hd:4 * hd])
            c = f * c + i * g
            h = o * jnp.tanh(c)
            outs.append(h)
        cur = jnp.stack(outs, axis=1)
        layer_outputs.append(cur)
        last_states.append((h, c))
    if not return_all_layers:
        layer_outputs = layer_outputs[-1:]
        last_states = last_states[-1:]
    return layer_outputs, last_states


if __name__ == "__main__":
    # ConvLSTM(input_dim=4, hidden_dim=[32, 32], kernel_size=(3, 3),
    #          num_layers=2, batch_first=True, bias=True)
    B, T, C, H, W = 2, 8, 4, 16, 16
    hidden_dims = (32, 32)
    kernel_sizes = ((3, 3), (3, 3))

    key = jax.random.PRNGKey(0)
    key, xk = jax.random.split(key)
    x = jax.random.normal(xk, (B, T, C, H, W), jnp.float32)

    params = init_convlstm_params(key, C, hidden_dims, kernel_sizes)

    layer_outputs, last_states = convlstm_forward(
        x, params, hidden_dims=hidden_dims, kernel_sizes=kernel_sizes,
        batch_first=True, return_all_layers=False)
    jax.block_until_ready(layer_outputs[0])
    jax.block_until_ready(last_states[0][0])
    jax.block_until_ready(last_states[0][1])

    assert layer_outputs[0].shape == (B, T, hidden_dims[-1], H, W)
    assert last_states[0][0].shape == (B, hidden_dims[-1], H, W)
    assert last_states[0][1].shape == (B, hidden_dims[-1], H, W)

    # Strict check vs. a reference with the same precision policy
    # (bf16 conv operands, f32 accumulation / gate math).
    qout, qstates = convlstm_forward_ref(
        x, params, hidden_dims, kernel_sizes, batch_first=True,
        return_all_layers=False, conv_input_dtype=jnp.bfloat16)
    assert bool(jnp.allclose(layer_outputs[0], qout[0], atol=1e-3, rtol=1e-3))
    assert bool(jnp.allclose(last_states[0][0], qstates[0][0], atol=1e-3, rtol=1e-3))
    assert bool(jnp.allclose(last_states[0][1], qstates[0][1], atol=1e-3, rtol=1e-3))

    # Looser sanity check vs. the pure-f32 reference (bf16 MXU operands add a
    # small, bounded quantization difference).
    fout, fstates = convlstm_forward_ref(
        x, params, hidden_dims, kernel_sizes, batch_first=True,
        return_all_layers=False, conv_input_dtype=None)
    assert bool(jnp.allclose(layer_outputs[0], fout[0], atol=5e-2, rtol=5e-2))
    assert bool(jnp.allclose(last_states[0][0], fstates[0][0], atol=5e-2, rtol=5e-2))
    assert bool(jnp.allclose(last_states[0][1], fstates[0][1], atol=5e-2, rtol=5e-2))

    print("KERNEL_OK")
</pallas_src>

<mosaic_0001>
module attributes {stable_mosaic.version = 11 : i64} {
  func.func @_convlstm_layer_kernel(%arg0: i32, %arg1: i32, %arg2: memref<1x1x256x36xbf16, #tpu.memory_space<vmem>>, %arg3: memref<36x128xbf16, #tpu.memory_space<vmem>>, %arg4: memref<9x32x128xbf16, #tpu.memory_space<vmem>>, %arg5: memref<1x128xf32, #tpu.memory_space<vmem>>, %arg6: memref<1x1x256x32xf32, #tpu.memory_space<vmem>>, %arg7: memref<1x256x32xf32, #tpu.memory_space<vmem>>, %arg8: memref<18x32x32xf32, #tpu.memory_space<vmem>>, %arg9: memref<256x128xf32, #tpu.memory_space<vmem>>) attributes {dimension_semantics = [#tpu.dimension_semantics<parallel>, #tpu.dimension_semantics<arbitrary>], iteration_bounds = array<i64: 2, 8>, scalar_prefetch = 0 : i64, scratch_operands = 2 : i64, tpu.core_type = #tpu.core_type<tc>, window_params = [{transform_indices = @transform_0, window_bounds = array<i64: 1, 1, 256, 36>}, {pipeline_mode = #tpu.pipeline_mode<synchronous>, transform_indices = @transform_1, window_bounds = array<i64: 36, 128>}, {pipeline_mode = #tpu.pipeline_mode<synchronous>, transform_indices = @transform_2, window_bounds = array<i64: 9, 32, 128>}, {pipeline_mode = #tpu.pipeline_mode<synchronous>, transform_indices = @transform_3, window_bounds = array<i64: 1, 128>}, {transform_indices = @transform_4, window_bounds = array<i64: 1, 1, 256, 32>}, {transform_indices = @transform_5, window_bounds = array<i64: 1, 256, 32>}]} {
    %c0_i32 = arith.constant 0 : i32
    %0 = arith.cmpi eq, %arg1, %c0_i32 : i32
    %1 = arith.extui %0 : i1 to i32
    %c0_i32_0 = arith.constant 0 : i32
    %2 = arith.cmpi ne, %1, %c0_i32_0 : i32
    scf.if %2 {
      %cst_121 = arith.constant 0.000000e+00 : f32
      %127 = vector.broadcast %cst_121 : f32 to vector<18x32x32xf32>
      %c0_122 = arith.constant 0 : index
      %c0_123 = arith.constant 0 : index
      %c0_124 = arith.constant 0 : index
      %128 = vector.load %arg8[%c0_122, %c0_123, %c0_124] : memref<18x32x32xf32, #tpu.memory_space<vmem>>, vector<18x32x32xf32>
      tpu.vector_store %arg8[%c0_122, %c0_123, %c0_124], %127 {strides = array<i32>} : memref<18x32x32xf32, #tpu.memory_space<vmem>>, vector<18x32x32xf32>,
      %cst_125 = arith.constant 0.000000e+00 : f32
      %129 = vector.broadcast %cst_125 : f32 to vector<1x256x32xf32>
      %c0_126 = arith.constant 0 : index
      %c0_127 = arith.constant 0 : index
      %c0_128 = arith.constant 0 : index
      %130 = vector.load %arg7[%c0_126, %c0_127, %c0_128] : memref<1x256x32xf32, #tpu.memory_space<vmem>>, vector<1x256x32xf32>
      tpu.vector_store %arg7[%c0_126, %c0_127, %c0_128], %129 {strides = array<i32>} : memref<1x256x32xf32, #tpu.memory_space<vmem>>, vector<1x256x32xf32>,
    } else {
    }
    %c0 = arith.constant 0 : index
    %c0_1 = arith.constant 0 : index
    %c0_2 = arith.constant 0 : index
    %c0_3 = arith.constant 0 : index
    %3 = vector.load %arg2[%c0, %c0_1, %c0_2, %c0_3] : memref<1x1x256x36xbf16, #tpu.memory_space<vmem>>, vector<1x1x256x36xbf16>
    %4 = vector.shape_cast %3 : vector<1x1x256x36xbf16> to vector<256x36xbf16>
    %c0_4 = arith.constant 0 : index
    %c0_5 = arith.constant 0 : index
    %5 = vector.load %arg3[%c0_4, %c0_5] : memref<36x128xbf16, #tpu.memory_space<vmem>>, vector<36x128xbf16>
    %cst = arith.constant dense<0.000000e+00> : vector<256x128xf32>
    %6 = tpu.matmul %4, %5, %cst {dimension_numbers = #tpu.dot_dimension_numbers<[1], [0], [0], [1], [0, 0, 1, 1], [], []>} : vector<256x36xbf16>, vector<36x128xbf16>, vector<256x128xf32> -> vector<256x128xf32>
    %c0_6 = arith.constant 0 : index
    %c0_7 = arith.constant 0 : index
    %7 = vector.load %arg5[%c0_6, %c0_7] : memref<1x128xf32, #tpu.memory_space<vmem>>, vector<1x128xf32>
    %8 = vector.broadcast %7 : vector<1x128xf32> to vector<256x128xf32>
    %9 = arith.addf %6, %8 : vector<256x128xf32>
    %c0_8 = arith.constant 0 : index
    %c0_9 = arith.constant 0 : index
    %10 = vector.load %arg9[%c0_8, %c0_9] : memref<256x128xf32, #tpu.memory_space<vmem>>, vector<256x128xf32>
    tpu.vector_store %arg9[%c0_8, %c0_9], %9 {strides = array<i32>} : memref<256x128xf32, #tpu.memory_space<vmem>>, vector<256x128xf32>,
    %c0_10 = arith.constant 0 : index
    %c7 = arith.constant 7 : index
    %c0_11 = arith.constant 0 : index
    %11 = vector.load %arg8[%c0_10, %c7, %c0_11] : memref<18x32x32xf32, #tpu.memory_space<vmem>>, vector<16x16x32xf32>
    %12 = vector.shape_cast %11 : vector<16x16x32xf32> to vector<256x32xf32>
    %13 = arith.truncf %12 : vector<256x32xf32> to vector<256x32xbf16>
    %c0_12 = arith.constant 0 : index
    %c0_13 = arith.constant 0 : index
    %14 = vector.load %arg9[%c0_12, %c0_13] : memref<256x128xf32, #tpu.memory_space<vmem>>, vector<256x128xf32>
    %c0_14 = arith.constant 0 : index
    %c0_15 = arith.constant 0 : index
    %c0_16 = arith.constant 0 : index
    %15 = vector.load %arg4[%c0_14, %c0_15, %c0_16] : memref<9x32x128xbf16, #tpu.memory_space<vmem>>, vector<1x32x128xbf16>
    %16 = vector.shape_cast %15 : vector<1x32x128xbf16> to vector<32x128xbf16>
    %cst_17 = arith.constant dense<0.000000e+00> : vector<256x128xf32>
    %17 = tpu.matmul %13, %16, %cst_17 {dimension_numbers = #tpu.dot_dimension_numbers<[1], [0], [0], [1], [0, 0, 1, 1], [], []>} : vector<256x32xbf16>, vector<32x128xbf16>, vector<256x128xf32> -> vector<256x128xf32>
    %18 = arith.addf %14, %17 : vector<256x128xf32>
    %c0_18 = arith.constant 0 : index
    %c0_19 = arith.constant 0 : index
    %19 = vector.load %arg9[%c0_18, %c0_19] : memref<256x128xf32, #tpu.memory_space<vmem>>, vector<256x128xf32>
    tpu.vector_store %arg9[%c0_18, %c0_19], %18 {strides = array<i32>} : memref<256x128xf32, #tpu.memory_space<vmem>>, vector<256x128xf32>,
    %c0_20 = arith.constant 0 : index
    %c8 = arith.constant 8 : index
    %c0_21 = arith.constant 0 : index
    %20 = vector.load %arg8[%c0_20, %c8, %c0_21] : memref<18x32x32xf32, #tpu.memory_space<vmem>>, vector<16x16x32xf32>
    %21 = vector.shape_cast %20 : vector<16x16x32xf32> to vector<256x32xf32>
    %22 = arith.truncf %21 : vector<256x32xf32> to vector<256x32xbf16>
    %c0_22 = arith.constant 0 : index
    %c0_23 = arith.constant 0 : index
    %23 = vector.load %arg9[%c0_22, %c0_23] : memref<256x128xf32, #tpu.memory_space<vmem>>, vector<256x128xf32>
    %c1 = arith.constant 1 : index
    %c0_24 = arith.constant 0 : index
    %c0_25 = arith.constant 0 : index
    %24 = vector.load %arg4[%c1, %c0_24, %c0_25] : memref<9x32x128xbf16, #tpu.memory_space<vmem>>, vector<1x32x128xbf16>
    %25 = vector.shape_cast %24 : vector<1x32x128xbf16> to vector<32x128xbf16>
    %cst_26 = arith.constant dense<0.000000e+00> : vector<256x128xf32>
    %26 = tpu.matmul %22, %25, %cst_26 {dimension_numbers = #tpu.dot_dimension_numbers<[1], [0], [0], [1], [0, 0, 1, 1], [], []>} : vector<256x32xbf16>, vector<32x128xbf16>, vector<256x128xf32> -> vector<256x128xf32>
    %27 = arith.addf %23, %26 : vector<256x128xf32>
    %c0_27 = arith.constant 0 : index
    %c0_28 = arith.constant 0 : index
    %28 = vector.load %arg9[%c0_27, %c0_28] : memref<256x128xf32, #tpu.memory_space<vmem>>, vector<256x128xf32>
    tpu.vector_store %arg9[%c0_27, %c0_28], %27 {strides = array<i32>} : memref<256x128xf32, #tpu.memory_space<vmem>>, vector<256x128xf32>,
    %c0_29 = arith.constant 0 : index
    %c9 = arith.constant 9 : index
    %c0_30 = arith.constant 0 : index
    %29 = vector.load %arg8[%c0_29, %c9, %c0_30] : memref<18x32x32xf32, #tpu.memory_space<vmem>>, vector<16x16x32xf32>
    %30 = vector.shape_cast %29 : vector<16x16x32xf32> to vector<256x32xf32>
    %31 = arith.truncf %30 : vector<256x32xf32> to vector<256x32xbf16>
    %c0_31 = arith.constant 0 : index
    %c0_32 = arith.constant 0 : index
    %32 = vector.load %arg9[%c0_31, %c0_32] : memref<256x128xf32, #tpu.memory_space<vmem>>, vector<256x128xf32>
    %c2 = arith.constant 2 : index
    %c0_33 = arith.constant 0 : index
    %c0_34 = arith.constant 0 : index
    %33 = vector.load %arg4[%c2, %c0_33, %c0_34] : memref<9x32x128xbf16, #tpu.memory_space<vmem>>, vector<1x32x128xbf16>
    %34 = vector.shape_cast %33 : vector<1x32x128xbf16> to vector<32x128xbf16>
    %cst_35 = arith.constant dense<0.000000e+00> : vector<256x128xf32>
    %35 = tpu.matmul %31, %34, %cst_35 {dimension_numbers = #tpu.dot_dimension_numbers<[1], [0], [0], [1], [0, 0, 1, 1], [], []>} : vector<256x32xbf16>, vector<32x128xbf16>, vector<256x128xf32> -> vector<256x128xf32>
    %36 = arith.addf %32, %35 : vector<256x128xf32>
    %c0_36 = arith.constant 0 : index
    %c0_37 = arith.constant 0 : index
    %37 = vector.load %arg9[%c0_36, %c0_37] : memref<256x128xf32, #tpu.memory_space<vmem>>, vector<256x128xf32>
    tpu.vector_store %arg9[%c0_36, %c0_37], %36 {strides = array<i32>} : memref<256x128xf32, #tpu.memory_space<vmem>>, vector<256x128xf32>,
    %c1_38 = arith.constant 1 : index
    %c7_39 = arith.constant 7 : index
    %c0_40 = arith.constant 0 : index
    %38 = vector.load %arg8[%c1_38, %c7_39, %c0_40] : memref<18x32x32xf32, #tpu.memory_space<vmem>>, vector<16x16x32xf32>
    %39 = vector.shape_cast %38 : vector<16x16x32xf32> to vector<256x32xf32>
    %40 = arith.truncf %39 : vector<256x32xf32> to vector<256x32xbf16>
    %c0_41 = arith.constant 0 : index
    %c0_42 = arith.constant 0 : index
    %41 = vector.load %arg9[%c0_41, %c0_42] : memref<256x128xf32, #tpu.memory_space<vmem>>, vector<256x128xf32>
    %c3 = arith.constant 3 : index
    %c0_43 = arith.constant 0 : index
    %c0_44 = arith.constant 0 : index
    %42 = vector.load %arg4[%c3, %c0_43, %c0_44] : memref<9x32x128xbf16, #tpu.memory_space<vmem>>, vector<1x32x128xbf16>
    %43 = vector.shape_cast %42 : vector<1x32x128xbf16> to vector<32x128xbf16>
    %cst_45 = arith.constant dense<0.000000e+00> : vector<256x128xf32>
    %44 = tpu.matmul %40, %43, %cst_45 {dimension_numbers = #tpu.dot_dimension_numbers<[1], [0], [0], [1], [0, 0, 1, 1], [], []>} : vector<256x32xbf16>, vector<32x128xbf16>, vector<256x128xf32> -> vector<256x128xf32>
    %45 = arith.addf %41, %44 : vector<256x128xf32>
    %c0_46 = arith.constant 0 : index
    %c0_47 = arith.constant 0 : index
    %46 = vector.load %arg9[%c0_46, %c0_47] : memref<256x128xf32, #tpu.memory_space<vmem>>, vector<256x128xf32>
    tpu.vector_store %arg9[%c0_46, %c0_47], %45 {strides = array<i32>} : memref<256x128xf32, #tpu.memory_space<vmem>>, vector<256x128xf32>,
    %c1_48 = arith.constant 1 : index
    %c8_49 = arith.constant 8 : index
    %c0_50 = arith.constant 0 : index
    %47 = vector.load %arg8[%c1_48, %c8_49, %c0_50] : memref<18x32x32xf32, #tpu.memory_space<vmem>>, vector<16x16x32xf32>
    %48 = vector.shape_cast %47 : vector<16x16x32xf32> to vector<256x32xf32>
    %49 = arith.truncf %48 : vector<256x32xf32> to vector<256x32xbf16>
    %c0_51 = arith.constant 0 : index
    %c0_52 = arith.constant 0 : index
    %50 = vector.load %arg9[%c0_51, %c0_52] : memref<256x128xf32, #tpu.memory_space<vmem>>, vector<256x128xf32>
    %c4 = arith.constant 4 : index
    %c0_53 = arith.constant 0 : index
    %c0_54 = arith.constant 0 : index
    %51 = vector.load %arg4[%c4, %c0_53, %c0_54] : memref<9x32x128xbf16, #tpu.memory_space<vmem>>, vector<1x32x128xbf16>
    %52 = vector.shape_cast %51 : vector<1x32x128xbf16> to vector<32x128xbf16>
    %cst_55 = arith.constant dense<0.000000e+00> : vector<256x128xf32>
    %53 = tpu.matmul %49, %52, %cst_55 {dimension_numbers = #tpu.dot_dimension_numbers<[1], [0], [0], [1], [0, 0, 1, 1], [], []>} : vector<256x32xbf16>, vector<32x128xbf16>, vector<256x128xf32> -> vector<256x128xf32>
    %54 = arith.addf %50, %53 : vector<256x128xf32>
    %c0_56 = arith.constant 0 : index
    %c0_57 = arith.constant 0 : index
    %55 = vector.load %arg9[%c0_56, %c0_57] : memref<256x128xf32, #tpu.memory_space<vmem>>, vector<256x128xf32>
    tpu.vector_store %arg9[%c0_56, %c0_57], %54 {strides = array<i32>} : memref<256x128xf32, #tpu.memory_space<vmem>>, vector<256x128xf32>,
    %c1_58 = arith.constant 1 : index
    %c9_59 = arith.constant 9 : index
    %c0_60 = arith.constant 0 : index
    %56 = vector.load %arg8[%c1_58, %c9_59, %c0_60] : memref<18x32x32xf32, #tpu.memory_space<vmem>>, vector<16x16x32xf32>
    %57 = vector.shape_cast %56 : vector<16x16x32xf32> to vector<256x32xf32>
    %58 = arith.truncf %57 : vector<256x32xf32> to vector<256x32xbf16>
    %c0_61 = arith.constant 0 : index
    %c0_62 = arith.constant 0 : index
    %59 = vector.load %arg9[%c0_61, %c0_62] : memref<256x128xf32, #tpu.memory_space<vmem>>, vector<256x128xf32>
    %c5 = arith.constant 5 : index
    %c0_63 = arith.constant 0 : index
    %c0_64 = arith.constant 0 : index
    %60 = vector.load %arg4[%c5, %c0_63, %c0_64] : memref<9x32x128xbf16, #tpu.memory_space<vmem>>, vector<1x32x128xbf16>
    %61 = vector.shape_cast %60 : vector<1x32x128xbf16> to vector<32x128xbf16>
    %cst_65 = arith.constant dense<0.000000e+00> : vector<256x128xf32>
    %62 = tpu.matmul %58, %61, %cst_65 {dimension_numbers = #tpu.dot_dimension_numbers<[1], [0], [0], [1], [0, 0, 1, 1], [], []>} : vector<256x32xbf16>, vector<32x128xbf16>, vector<256x128xf32> -> vector<256x128xf32>
    %63 = arith.addf %59, %62 : vector<256x128xf32>
    %c0_66 = arith.constant 0 : index
    %c0_67 = arith.constant 0 : index
    %64 = vector.load %arg9[%c0_66, %c0_67] : memref<256x128xf32, #tpu.memory_space<vmem>>, vector<256x128xf32>
    tpu.vector_store %arg9[%c0_66, %c0_67], %63 {strides = array<i32>} : memref<256x128xf32, #tpu.memory_space<vmem>>, vector<256x128xf32>,
    %c2_68 = arith.constant 2 : index
    %c7_69 = arith.constant 7 : index
    %c0_70 = arith.constant 0 : index
    %65 = vector.load %arg8[%c2_68, %c7_69, %c0_70] : memref<18x32x32xf32, #tpu.memory_space<vmem>>, vector<16x16x32xf32>
    %66 = vector.shape_cast %65 : vector<16x16x32xf32> to vector<256x32xf32>
    %67 = arith.truncf %66 : vector<256x32xf32> to vector<256x32xbf16>
    %c0_71 = arith.constant 0 : index
    %c0_72 = arith.constant 0 : index
    %68 = vector.load %arg9[%c0_71, %c0_72] : memref<256x128xf32, #tpu.memory_space<vmem>>, vector<256x128xf32>
    %c6 = arith.constant 6 : index
    %c0_73 = arith.constant 0 : index
    %c0_74 = arith.constant 0 : index
    %69 = vector.load %arg4[%c6, %c0_73, %c0_74] : memref<9x32x128xbf16, #tpu.memory_space<vmem>>, vector<1x32x128xbf16>
    %70 = vector.shape_cast %69 : vector<1x32x128xbf16> to vector<32x128xbf16>
    %cst_75 = arith.constant dense<0.000000e+00> : vector<256x128xf32>
    %71 = tpu.matmul %67, %70, %cst_75 {dimension_numbers = #tpu.dot_dimension_numbers<[1], [0], [0], [1], [0, 0, 1, 1], [], []>} : vector<256x32xbf16>, vector<32x128xbf16>, vector<256x128xf32> -> vector<256x128xf32>
    %72 = arith.addf %68, %71 : vector<256x128xf32>
    %c0_76 = arith.constant 0 : index
    %c0_77 = arith.constant 0 : index
    %73 = vector.load %arg9[%c0_76, %c0_77] : memref<256x128xf32, #tpu.memory_space<vmem>>, vector<256x128xf32>
    tpu.vector_store %arg9[%c0_76, %c0_77], %72 {strides = array<i32>} : memref<256x128xf32, #tpu.memory_space<vmem>>, vector<256x128xf32>,
    %c2_78 = arith.constant 2 : index
    %c8_79 = arith.constant 8 : index
    %c0_80 = arith.constant 0 : index
    %74 = vector.load %arg8[%c2_78, %c8_79, %c0_80] : memref<18x32x32xf32, #tpu.memory_space<vmem>>, vector<16x16x32xf32>
    %75 = vector.shape_cast %74 : vector<16x16x32xf32> to vector<256x32xf32>
    %76 = arith.truncf %75 : vector<256x32xf32> to vector<256x32xbf16>
    %c0_81 = arith.constant 0 : index
    %c0_82 = arith.constant 0 : index
    %77 = vector.load %arg9[%c0_81, %c0_82] : memref<256x128xf32, #tpu.memory_space<vmem>>, vector<256x128xf32>
    %c7_83 = arith.constant 7 : index
    %c0_84 = arith.constant 0 : index
    %c0_85 = arith.constant 0 : index
    %78 = vector.load %arg4[%c7_83, %c0_84, %c0_85] : memref<9x32x128xbf16, #tpu.memory_space<vmem>>, vector<1x32x128xbf16>
    %79 = vector.shape_cast %78 : vector<1x32x128xbf16> to vector<32x128xbf16>
    %cst_86 = arith.constant dense<0.000000e+00> : vector<256x128xf32>
    %80 = tpu.matmul %76, %79, %cst_86 {dimension_numbers = #tpu.dot_dimension_numbers<[1], [0], [0], [1], [0, 0, 1, 1], [], []>} : vector<256x32xbf16>, vector<32x128xbf16>, vector<256x128xf32> -> vector<256x128xf32>
    %81 = arith.addf %77, %80 : vector<256x128xf32>
    %c0_87 = arith.constant 0 : index
    %c0_88 = arith.constant 0 : index
    %82 = vector.load %arg9[%c0_87, %c0_88] : memref<256x128xf32, #tpu.memory_space<vmem>>, vector<256x128xf32>
    tpu.vector_store %arg9[%c0_87, %c0_88], %81 {strides = array<i32>} : memref<256x128xf32, #tpu.memory_space<vmem>>, vector<256x128xf32>,
    %c2_89 = arith.constant 2 : index
    %c9_90 = arith.constant 9 : index
    %c0_91 = arith.constant 0 : index
    %83 = vector.load %arg8[%c2_89, %c9_90, %c0_91] : memref<18x32x32xf32, #tpu.memory_space<vmem>>, vector<16x16x32xf32>
    %84 = vector.shape_cast %83 : vector<16x16x32xf32> to vector<256x32xf32>
    %85 = arith.truncf %84 : vector<256x32xf32> to vector<256x32xbf16>
    %c0_92 = arith.constant 0 : index
    %c0_93 = arith.constant 0 : index
    %86 = vector.load %arg9[%c0_92, %c0_93] : memref<256x128xf32, #tpu.memory_space<vmem>>, vector<256x128xf32>
    %c8_94 = arith.constant 8 : index
    %c0_95 = arith.constant 0 : index
    %c0_96 = arith.constant 0 : index
    %87 = vector.load %arg4[%c8_94, %c0_95, %c0_96] : memref<9x32x128xbf16, #tpu.memory_space<vmem>>, vector<1x32x128xbf16>
    %88 = vector.shape_cast %87 : vector<1x32x128xbf16> to vector<32x128xbf16>
    %cst_97 = arith.constant dense<0.000000e+00> : vector<256x128xf32>
    %89 = tpu.matmul %85, %88, %cst_97 {dimension_numbers = #tpu.dot_dimension_numbers<[1], [0], [0], [1], [0, 0, 1, 1], [], []>} : vector<256x32xbf16>, vector<32x128xbf16>, vector<256x128xf32> -> vector<256x128xf32>
    %90 = arith.addf %86, %89 : vector<256x128xf32>
    %c0_98 = arith.constant 0 : index
    %c0_99 = arith.constant 0 : index
    %91 = vector.load %arg9[%c0_98, %c0_99] : memref<256x128xf32, #tpu.memory_space<vmem>>, vector<256x128xf32>
    tpu.vector_store %arg9[%c0_98, %c0_99], %90 {strides = array<i32>} : memref<256x128xf32, #tpu.memory_space<vmem>>, vector<256x128xf32>,
    %c0_100 = arith.constant 0 : index
    %c0_101 = arith.constant 0 : index
    %92 = vector.load %arg9[%c0_100, %c0_101] : memref<256x128xf32, #tpu.memory_space<vmem>>, vector<256x32xf32>
    %93 = arith.negf %92 : vector<256x32xf32>
    %94 = math.exp %93 : vector<256x32xf32>
    %cst_102 = arith.constant 1.000000e+00 : f32
    %95 = vector.broadcast %cst_102 : f32 to vector<256x32xf32>
    %96 = arith.addf %95, %94 : vector<256x32xf32>
    %97 = arith.divf %95, %96 : vector<256x32xf32>
    %c0_103 = arith.constant 0 : index
    %c32 = arith.constant 32 : index
    %98 = vector.load %arg9[%c0_103, %c32] : memref<256x128xf32, #tpu.memory_space<vmem>>, vector<256x32xf32>
    %99 = arith.negf %98 : vector<256x32xf32>
    %100 = math.exp %99 : vector<256x32xf32>
    %cst_104 = arith.constant 1.000000e+00 : f32
    %101 = vector.broadcast %cst_104 : f32 to vector<256x32xf32>
    %102 = arith.addf %101, %100 : vector<256x32xf32>
    %103 = arith.divf %101, %102 : vector<256x32xf32>
    %c0_105 = arith.constant 0 : index
    %c64 = arith.constant 64 : index
    %104 = vector.load %arg9[%c0_105, %c64] : memref<256x128xf32, #tpu.memory_space<vmem>>, vector<256x32xf32>
    %105 = arith.negf %104 : vector<256x32xf32>
    %106 = math.exp %105 : vector<256x32xf32>
    %cst_106 = arith.constant 1.000000e+00 : f32
    %107 = vector.broadcast %cst_106 : f32 to vector<256x32xf32>
    %108 = arith.addf %107, %106 : vector<256x32xf32>
    %109 = arith.divf %107, %108 : vector<256x32xf32>
    %c0_107 = arith.constant 0 : index
    %c96 = arith.constant 96 : index
    %110 = vector.load %arg9[%c0_107, %c96] : memref<256x128xf32, #tpu.memory_space<vmem>>, vector<256x32xf32>
    %111 = math.tanh %110 : vector<256x32xf32>
    %c0_108 = arith.constant 0 : index
    %c0_109 = arith.constant 0 : index
    %c0_110 = arith.constant 0 : index
    %112 = vector.load %arg7[%c0_108, %c0_109, %c0_110] : memref<1x256x32xf32, #tpu.memory_space<vmem>>, vector<1x256x32xf32>
    %113 = vector.shape_cast %112 : vector<1x256x32xf32> to vector<256x32xf32>
    %114 = arith.mulf %103, %113 : vector<256x32xf32>
    %115 = arith.mulf %97, %111 : vector<256x32xf32>
    %116 = arith.addf %114, %115 : vector<256x32xf32>
    %117 = math.tanh %116 : vector<256x32xf32>
    %118 = arith.mulf %109, %117 : vector<256x32xf32>
    %c0_111 = arith.constant 0 : index
    %c0_112 = arith.constant 0 : index
    %c0_113 = arith.constant 0 : index
    %119 = vector.load %arg7[%c0_111, %c0_112, %c0_113] : memref<1x256x32xf32, #tpu.memory_space<vmem>>, vector<1x256x32xf32>
    %120 = vector.shape_cast %119 : vector<1x256x32xf32> to vector<256x32xf32>
    %121 = vector.shape_cast %116 : vector<256x32xf32> to vector<1x256x32xf32>
    tpu.vector_store %arg7[%c0_111, %c0_112, %c0_113], %121 {strides = array<i32>} : memref<1x256x32xf32, #tpu.memory_space<vmem>>, vector<1x256x32xf32>,
    %c0_114 = arith.constant 0 : index
    %c0_115 = arith.constant 0 : index
    %c0_116 = arith.constant 0 : index
    %c0_117 = arith.constant 0 : index
    %122 = vector.load %arg6[%c0_114, %c0_115, %c0_116, %c0_117] : memref<1x1x256x32xf32, #tpu.memory_space<vmem>>, vector<1x1x256x32xf32>
    %123 = vector.shape_cast %122 : vector<1x1x256x32xf32> to vector<256x32xf32>
    %124 = vector.shape_cast %118 : vector<256x32xf32> to vector<1x1x256x32xf32>
    tpu.vector_store %arg6[%c0_114, %c0_115, %c0_116, %c0_117], %124 {strides = array<i32>} : memref<1x1x256x32xf32, #tpu.memory_space<vmem>>, vector<1x1x256x32xf32>,
    %125 = vector.shape_cast %118 : vector<256x32xf32> to vector<16x16x32xf32>
    %c1_118 = arith.constant 1 : index
    %c8_119 = arith.constant 8 : index
    %c0_120 = arith.constant 0 : index
    %126 = vector.load %arg8[%c1_118, %c8_119, %c0_120] : memref<18x32x32xf32, #tpu.memory_space<vmem>>, vector<16x16x32xf32>
    tpu.vector_store %arg8[%c1_118, %c8_119, %c0_120], %125 {strides = array<i32>} : memref<18x32x32xf32, #tpu.memory_space<vmem>>, vector<16x16x32xf32>,
    return
  }
  func.func @transform_0(%arg0: i32, %arg1: i32) -> (i32, i32, i32, i32) {
    %c0_i32 = arith.constant 0 : i32
    %c0_i32_0 = arith.constant 0 : i32
    %c0_i32_1 = arith.constant 0 : i32
    return %arg0, %arg1, %c0_i32, %c0_i32_0 : i32, i32, i32, i32
  }
  func.func @transform_1(%arg0: i32, %arg1: i32) -> (i32, i32) {
    %c0_i32 = arith.constant 0 : i32
    %c0_i32_0 = arith.constant 0 : i32
    %c0_i32_1 = arith.constant 0 : i32
    return %c0_i32, %c0_i32_0 : i32, i32
  }
  func.func @transform_2(%arg0: i32, %arg1: i32) -> (i32, i32, i32) {
    %c0_i32 = arith.constant 0 : i32
    %c0_i32_0 = arith.constant 0 : i32
    %c0_i32_1 = arith.constant 0 : i32
    %c0_i32_2 = arith.constant 0 : i32
    return %c0_i32, %c0_i32_0, %c0_i32_1 : i32, i32, i32
  }
  func.func @transform_3(%arg0: i32, %arg1: i32) -> (i32, i32) {
    %c0_i32 = arith.constant 0 : i32
    %c0_i32_0 = arith.constant 0 : i32
    %c0_i32_1 = arith.constant 0 : i32
    return %c0_i32, %c0_i32_0 : i32, i32
  }
  func.func @transform_4(%arg0: i32, %arg1: i32) -> (i32, i32, i32, i32) {
    %c0_i32 = arith.constant 0 : i32
    %c0_i32_0 = arith.constant 0 : i32
    %c0_i32_1 = arith.constant 0 : i32
    return %arg0, %arg1, %c0_i32, %c0_i32_0 : i32, i32, i32, i32
  }
  func.func @transform_5(%arg0: i32, %arg1: i32) -> (i32, i32, i32) {
    %c0_i32 = arith.constant 0 : i32
    %c0_i32_0 = arith.constant 0 : i32
    %c0_i32_1 = arith.constant 0 : i32
    return %arg0, %c0_i32, %c0_i32_0 : i32, i32, i32
  }
}

module attributes {stable_mosaic.version = 11 : i64} {
  func.func @_convlstm_layer_kernel(%arg0: i32, %arg1: i32, %arg2: memref<1x1x256x288xbf16, #tpu.memory_space<vmem>>, %arg3: memref<288x128xbf16, #tpu.memory_space<vmem>>, %arg4: memref<9x32x128xbf16, #tpu.memory_space<vmem>>, %arg5: memref<1x128xf32, #tpu.memory_space<vmem>>, %arg6: memref<1x1x256x32xf32, #tpu.memory_space<vmem>>, %arg7: memref<1x256x32xf32, #tpu.memory_space<vmem>>, %arg8: memref<18x32x32xf32, #tpu.memory_space<vmem>>, %arg9: memref<256x128xf32, #tpu.memory_space<vmem>>) attributes {dimension_semantics = [#tpu.dimension_semantics<parallel>, #tpu.dimension_semantics<arbitrary>], iteration_bounds = array<i64: 2, 8>, scalar_prefetch = 0 : i64, scratch_operands = 2 : i64, tpu.core_type = #tpu.core_type<tc>, window_params = [{transform_indices = @transform_0, window_bounds = array<i64: 1, 1, 256, 288>}, {pipeline_mode = #tpu.pipeline_mode<synchronous>, transform_indices = @transform_1, window_bounds = array<i64: 288, 128>}, {pipeline_mode = #tpu.pipeline_mode<synchronous>, transform_indices = @transform_2, window_bounds = array<i64: 9, 32, 128>}, {pipeline_mode = #tpu.pipeline_mode<synchronous>, transform_indices = @transform_3, window_bounds = array<i64: 1, 128>}, {transform_indices = @transform_4, window_bounds = array<i64: 1, 1, 256, 32>}, {transform_indices = @transform_5, window_bounds = array<i64: 1, 256, 32>}]} {
    %c0_i32 = arith.constant 0 : i32
    %0 = arith.cmpi eq, %arg1, %c0_i32 : i32
    %1 = arith.extui %0 : i1 to i32
    %c0_i32_0 = arith.constant 0 : i32
    %2 = arith.cmpi ne, %1, %c0_i32_0 : i32
    scf.if %2 {
      %cst_121 = arith.constant 0.000000e+00 : f32
      %127 = vector.broadcast %cst_121 : f32 to vector<18x32x32xf32>
      %c0_122 = arith.constant 0 : index
      %c0_123 = arith.constant 0 : index
      %c0_124 = arith.constant 0 : index
      %128 = vector.load %arg8[%c0_122, %c0_123, %c0_124] : memref<18x32x32xf32, #tpu.memory_space<vmem>>, vector<18x32x32xf32>
      tpu.vector_store %arg8[%c0_122, %c0_123, %c0_124], %127 {strides = array<i32>} : memref<18x32x32xf32, #tpu.memory_space<vmem>>, vector<18x32x32xf32>,
      %cst_125 = arith.constant 0.000000e+00 : f32
      %129 = vector.broadcast %cst_125 : f32 to vector<1x256x32xf32>
      %c0_126 = arith.constant 0 : index
      %c0_127 = arith.constant 0 : index
      %c0_128 = arith.constant 0 : index
      %130 = vector.load %arg7[%c0_126, %c0_127, %c0_128] : memref<1x256x32xf32, #tpu.memory_space<vmem>>, vector<1x256x32xf32>
      tpu.vector_store %arg7[%c0_126, %c0_127, %c0_128], %129 {strides = array<i32>} : memref<1x256x32xf32, #tpu.memory_space<vmem>>, vector<1x256x32xf32>,
    } else {
    }
    %c0 = arith.constant 0 : index
    %c0_1 = arith.constant 0 : index
    %c0_2 = arith.constant 0 : index
    %c0_3 = arith.constant 0 : index
    %3 = vector.load %arg2[%c0, %c0_1, %c0_2, %c0_3] : memref<1x1x256x288xbf16, #tpu.memory_space<vmem>>, vector<1x1x256x288xbf16>
    %4 = vector.shape_cast %3 : vector<1x1x256x288xbf16> to vector<256x288xbf16>
    %c0_4 = arith.constant 0 : index
    %c0_5 = arith.constant 0 : index
    %5 = vector.load %arg3[%c0_4, %c0_5] : memref<288x128xbf16, #tpu.memory_space<vmem>>, vector<288x128xbf16>
    %cst = arith.constant dense<0.000000e+00> : vector<256x128xf32>
    %6 = tpu.matmul %4, %5, %cst {dimension_numbers = #tpu.dot_dimension_numbers<[1], [0], [0], [1], [0, 0, 1, 1], [], []>} : vector<256x288xbf16>, vector<288x128xbf16>, vector<256x128xf32> -> vector<256x128xf32>
    %c0_6 = arith.constant 0 : index
    %c0_7 = arith.constant 0 : index
    %7 = vector.load %arg5[%c0_6, %c0_7] : memref<1x128xf32, #tpu.memory_space<vmem>>, vector<1x128xf32>
    %8 = vector.broadcast %7 : vector<1x128xf32> to vector<256x128xf32>
    %9 = arith.addf %6, %8 : vector<256x128xf32>
    %c0_8 = arith.constant 0 : index
    %c0_9 = arith.constant 0 : index
    %10 = vector.load %arg9[%c0_8, %c0_9] : memref<256x128xf32, #tpu.memory_space<vmem>>, vector<256x128xf32>
    tpu.vector_store %arg9[%c0_8, %c0_9], %9 {strides = array<i32>} : memref<256x128xf32, #tpu.memory_space<vmem>>, vector<256x128xf32>,
    %c0_10 = arith.constant 0 : index
    %c7 = arith.constant 7 : index
    %c0_11 = arith.constant 0 : index
    %11 = vector.load %arg8[%c0_10, %c7, %c0_11] : memref<18x32x32xf32, #tpu.memory_space<vmem>>, vector<16x16x32xf32>
    %12 = vector.shape_cast %11 : vector<16x16x32xf32> to vector<256x32xf32>
    %13 = arith.truncf %12 : vector<256x32xf32> to vector<256x32xbf16>
    %c0_12 = arith.constant 0 : index
    %c0_13 = arith.constant 0 : index
    %14 = vector.load %arg9[%c0_12, %c0_13] : memref<256x128xf32, #tpu.memory_space<vmem>>, vector<256x128xf32>
    %c0_14 = arith.constant 0 : index
    %c0_15 = arith.constant 0 : index
    %c0_16 = arith.constant 0 : index
    %15 = vector.load %arg4[%c0_14, %c0_15, %c0_16] : memref<9x32x128xbf16, #tpu.memory_space<vmem>>, vector<1x32x128xbf16>
    %16 = vector.shape_cast %15 : vector<1x32x128xbf16> to vector<32x128xbf16>
    %cst_17 = arith.constant dense<0.000000e+00> : vector<256x128xf32>
    %17 = tpu.matmul %13, %16, %cst_17 {dimension_numbers = #tpu.dot_dimension_numbers<[1], [0], [0], [1], [0, 0, 1, 1], [], []>} : vector<256x32xbf16>, vector<32x128xbf16>, vector<256x128xf32> -> vector<256x128xf32>
    %18 = arith.addf %14, %17 : vector<256x128xf32>
    %c0_18 = arith.constant 0 : index
    %c0_19 = arith.constant 0 : index
    %19 = vector.load %arg9[%c0_18, %c0_19] : memref<256x128xf32, #tpu.memory_space<vmem>>, vector<256x128xf32>
    tpu.vector_store %arg9[%c0_18, %c0_19], %18 {strides = array<i32>} : memref<256x128xf32, #tpu.memory_space<vmem>>, vector<256x128xf32>,
    %c0_20 = arith.constant 0 : index
    %c8 = arith.constant 8 : index
    %c0_21 = arith.constant 0 : index
    %20 = vector.load %arg8[%c0_20, %c8, %c0_21] : memref<18x32x32xf32, #tpu.memory_space<vmem>>, vector<16x16x32xf32>
    %21 = vector.shape_cast %20 : vector<16x16x32xf32> to vector<256x32xf32>
    %22 = arith.truncf %21 : vector<256x32xf32> to vector<256x32xbf16>
    %c0_22 = arith.constant 0 : index
    %c0_23 = arith.constant 0 : index
    %23 = vector.load %arg9[%c0_22, %c0_23] : memref<256x128xf32, #tpu.memory_space<vmem>>, vector<256x128xf32>
    %c1 = arith.constant 1 : index
    %c0_24 = arith.constant 0 : index
    %c0_25 = arith.constant 0 : index
    %24 = vector.load %arg4[%c1, %c0_24, %c0_25] : memref<9x32x128xbf16, #tpu.memory_space<vmem>>, vector<1x32x128xbf16>
    %25 = vector.shape_cast %24 : vector<1x32x128xbf16> to vector<32x128xbf16>
    %cst_26 = arith.constant dense<0.000000e+00> : vector<256x128xf32>
    %26 = tpu.matmul %22, %25, %cst_26 {dimension_numbers = #tpu.dot_dimension_numbers<[1], [0], [0], [1], [0, 0, 1, 1], [], []>} : vector<256x32xbf16>, vector<32x128xbf16>, vector<256x128xf32> -> vector<256x128xf32>
    %27 = arith.addf %23, %26 : vector<256x128xf32>
    %c0_27 = arith.constant 0 : index
    %c0_28 = arith.constant 0 : index
    %28 = vector.load %arg9[%c0_27, %c0_28] : memref<256x128xf32, #tpu.memory_space<vmem>>, vector<256x128xf32>
    tpu.vector_store %arg9[%c0_27, %c0_28], %27 {strides = array<i32>} : memref<256x128xf32, #tpu.memory_space<vmem>>, vector<256x128xf32>,
    %c0_29 = arith.constant 0 : index
    %c9 = arith.constant 9 : index
    %c0_30 = arith.constant 0 : index
    %29 = vector.load %arg8[%c0_29, %c9, %c0_30] : memref<18x32x32xf32, #tpu.memory_space<vmem>>, vector<16x16x32xf32>
    %30 = vector.shape_cast %29 : vector<16x16x32xf32> to vector<256x32xf32>
    %31 = arith.truncf %30 : vector<256x32xf32> to vector<256x32xbf16>
    %c0_31 = arith.constant 0 : index
    %c0_32 = arith.constant 0 : index
    %32 = vector.load %arg9[%c0_31, %c0_32] : memref<256x128xf32, #tpu.memory_space<vmem>>, vector<256x128xf32>
    %c2 = arith.constant 2 : index
    %c0_33 = arith.constant 0 : index
    %c0_34 = arith.constant 0 : index
    %33 = vector.load %arg4[%c2, %c0_33, %c0_34] : memref<9x32x128xbf16, #tpu.memory_space<vmem>>, vector<1x32x128xbf16>
    %34 = vector.shape_cast %33 : vector<1x32x128xbf16> to vector<32x128xbf16>
    %cst_35 = arith.constant dense<0.000000e+00> : vector<256x128xf32>
    %35 = tpu.matmul %31, %34, %cst_35 {dimension_numbers = #tpu.dot_dimension_numbers<[1], [0], [0], [1], [0, 0, 1, 1], [], []>} : vector<256x32xbf16>, vector<32x128xbf16>, vector<256x128xf32> -> vector<256x128xf32>
    %36 = arith.addf %32, %35 : vector<256x128xf32>
    %c0_36 = arith.constant 0 : index
    %c0_37 = arith.constant 0 : index
    %37 = vector.load %arg9[%c0_36, %c0_37] : memref<256x128xf32, #tpu.memory_space<vmem>>, vector<256x128xf32>
    tpu.vector_store %arg9[%c0_36, %c0_37], %36 {strides = array<i32>} : memref<256x128xf32, #tpu.memory_space<vmem>>, vector<256x128xf32>,
    %c1_38 = arith.constant 1 : index
    %c7_39 = arith.constant 7 : index
    %c0_40 = arith.constant 0 : index
    %38 = vector.load %arg8[%c1_38, %c7_39, %c0_40] : memref<18x32x32xf32, #tpu.memory_space<vmem>>, vector<16x16x32xf32>
    %39 = vector.shape_cast %38 : vector<16x16x32xf32> to vector<256x32xf32>
    %40 = arith.truncf %39 : vector<256x32xf32> to vector<256x32xbf16>
    %c0_41 = arith.constant 0 : index
    %c0_42 = arith.constant 0 : index
    %41 = vector.load %arg9[%c0_41, %c0_42] : memref<256x128xf32, #tpu.memory_space<vmem>>, vector<256x128xf32>
    %c3 = arith.constant 3 : index
    %c0_43 = arith.constant 0 : index
    %c0_44 = arith.constant 0 : index
    %42 = vector.load %arg4[%c3, %c0_43, %c0_44] : memref<9x32x128xbf16, #tpu.memory_space<vmem>>, vector<1x32x128xbf16>
    %43 = vector.shape_cast %42 : vector<1x32x128xbf16> to vector<32x128xbf16>
    %cst_45 = arith.constant dense<0.000000e+00> : vector<256x128xf32>
    %44 = tpu.matmul %40, %43, %cst_45 {dimension_numbers = #tpu.dot_dimension_numbers<[1], [0], [0], [1], [0, 0, 1, 1], [], []>} : vector<256x32xbf16>, vector<32x128xbf16>, vector<256x128xf32> -> vector<256x128xf32>
    %45 = arith.addf %41, %44 : vector<256x128xf32>
    %c0_46 = arith.constant 0 : index
    %c0_47 = arith.constant 0 : index
    %46 = vector.load %arg9[%c0_46, %c0_47] : memref<256x128xf32, #tpu.memory_space<vmem>>, vector<256x128xf32>
    tpu.vector_store %arg9[%c0_46, %c0_47], %45 {strides = array<i32>} : memref<256x128xf32, #tpu.memory_space<vmem>>, vector<256x128xf32>,
    %c1_48 = arith.constant 1 : index
    %c8_49 = arith.constant 8 : index
    %c0_50 = arith.constant 0 : index
    %47 = vector.load %arg8[%c1_48, %c8_49, %c0_50] : memref<18x32x32xf32, #tpu.memory_space<vmem>>, vector<16x16x32xf32>
    %48 = vector.shape_cast %47 : vector<16x16x32xf32> to vector<256x32xf32>
    %49 = arith.truncf %48 : vector<256x32xf32> to vector<256x32xbf16>
    %c0_51 = arith.constant 0 : index
    %c0_52 = arith.constant 0 : index
    %50 = vector.load %arg9[%c0_51, %c0_52] : memref<256x128xf32, #tpu.memory_space<vmem>>, vector<256x128xf32>
    %c4 = arith.constant 4 : index
    %c0_53 = arith.constant 0 : index
    %c0_54 = arith.constant 0 : index
    %51 = vector.load %arg4[%c4, %c0_53, %c0_54] : memref<9x32x128xbf16, #tpu.memory_space<vmem>>, vector<1x32x128xbf16>
    %52 = vector.shape_cast %51 : vector<1x32x128xbf16> to vector<32x128xbf16>
    %cst_55 = arith.constant dense<0.000000e+00> : vector<256x128xf32>
    %53 = tpu.matmul %49, %52, %cst_55 {dimension_numbers = #tpu.dot_dimension_numbers<[1], [0], [0], [1], [0, 0, 1, 1], [], []>} : vector<256x32xbf16>, vector<32x128xbf16>, vector<256x128xf32> -> vector<256x128xf32>
    %54 = arith.addf %50, %53 : vector<256x128xf32>
    %c0_56 = arith.constant 0 : index
    %c0_57 = arith.constant 0 : index
    %55 = vector.load %arg9[%c0_56, %c0_57] : memref<256x128xf32, #tpu.memory_space<vmem>>, vector<256x128xf32>
    tpu.vector_store %arg9[%c0_56, %c0_57], %54 {strides = array<i32>} : memref<256x128xf32, #tpu.memory_space<vmem>>, vector<256x128xf32>,
    %c1_58 = arith.constant 1 : index
    %c9_59 = arith.constant 9 : index
    %c0_60 = arith.constant 0 : index
    %56 = vector.load %arg8[%c1_58, %c9_59, %c0_60] : memref<18x32x32xf32, #tpu.memory_space<vmem>>, vector<16x16x32xf32>
    %57 = vector.shape_cast %56 : vector<16x16x32xf32> to vector<256x32xf32>
    %58 = arith.truncf %57 : vector<256x32xf32> to vector<256x32xbf16>
    %c0_61 = arith.constant 0 : index
    %c0_62 = arith.constant 0 : index
    %59 = vector.load %arg9[%c0_61, %c0_62] : memref<256x128xf32, #tpu.memory_space<vmem>>, vector<256x128xf32>
    %c5 = arith.constant 5 : index
    %c0_63 = arith.constant 0 : index
    %c0_64 = arith.constant 0 : index
    %60 = vector.load %arg4[%c5, %c0_63, %c0_64] : memref<9x32x128xbf16, #tpu.memory_space<vmem>>, vector<1x32x128xbf16>
    %61 = vector.shape_cast %60 : vector<1x32x128xbf16> to vector<32x128xbf16>
    %cst_65 = arith.constant dense<0.000000e+00> : vector<256x128xf32>
    %62 = tpu.matmul %58, %61, %cst_65 {dimension_numbers = #tpu.dot_dimension_numbers<[1], [0], [0], [1], [0, 0, 1, 1], [], []>} : vector<256x32xbf16>, vector<32x128xbf16>, vector<256x128xf32> -> vector<256x128xf32>
    %63 = arith.addf %59, %62 : vector<256x128xf32>
    %c0_66 = arith.constant 0 : index
    %c0_67 = arith.constant 0 : index
    %64 = vector.load %arg9[%c0_66, %c0_67] : memref<256x128xf32, #tpu.memory_space<vmem>>, vector<256x128xf32>
    tpu.vector_store %arg9[%c0_66, %c0_67], %63 {strides = array<i32>} : memref<256x128xf32, #tpu.memory_space<vmem>>, vector<256x128xf32>,
    %c2_68 = arith.constant 2 : index
    %c7_69 = arith.constant 7 : index
    %c0_70 = arith.constant 0 : index
    %65 = vector.load %arg8[%c2_68, %c7_69, %c0_70] : memref<18x32x32xf32, #tpu.memory_space<vmem>>, vector<16x16x32xf32>
    %66 = vector.shape_cast %65 : vector<16x16x32xf32> to vector<256x32xf32>
    %67 = arith.truncf %66 : vector<256x32xf32> to vector<256x32xbf16>
    %c0_71 = arith.constant 0 : index
    %c0_72 = arith.constant 0 : index
    %68 = vector.load %arg9[%c0_71, %c0_72] : memref<256x128xf32, #tpu.memory_space<vmem>>, vector<256x128xf32>
    %c6 = arith.constant 6 : index
    %c0_73 = arith.constant 0 : index
    %c0_74 = arith.constant 0 : index
    %69 = vector.load %arg4[%c6, %c0_73, %c0_74] : memref<9x32x128xbf16, #tpu.memory_space<vmem>>, vector<1x32x128xbf16>
    %70 = vector.shape_cast %69 : vector<1x32x128xbf16> to vector<32x128xbf16>
    %cst_75 = arith.constant dense<0.000000e+00> : vector<256x128xf32>
    %71 = tpu.matmul %67, %70, %cst_75 {dimension_numbers = #tpu.dot_dimension_numbers<[1], [0], [0], [1], [0, 0, 1, 1], [], []>} : vector<256x32xbf16>, vector<32x128xbf16>, vector<256x128xf32> -> vector<256x128xf32>
    %72 = arith.addf %68, %71 : vector<256x128xf32>
    %c0_76 = arith.constant 0 : index
    %c0_77 = arith.constant 0 : index
    %73 = vector.load %arg9[%c0_76, %c0_77] : memref<256x128xf32, #tpu.memory_space<vmem>>, vector<256x128xf32>
    tpu.vector_store %arg9[%c0_76, %c0_77], %72 {strides = array<i32>} : memref<256x128xf32, #tpu.memory_space<vmem>>, vector<256x128xf32>,
    %c2_78 = arith.constant 2 : index
    %c8_79 = arith.constant 8 : index
    %c0_80 = arith.constant 0 : index
    %74 = vector.load %arg8[%c2_78, %c8_79, %c0_80] : memref<18x32x32xf32, #tpu.memory_space<vmem>>, vector<16x16x32xf32>
    %75 = vector.shape_cast %74 : vector<16x16x32xf32> to vector<256x32xf32>
    %76 = arith.truncf %75 : vector<256x32xf32> to vector<256x32xbf16>
    %c0_81 = arith.constant 0 : index
    %c0_82 = arith.constant 0 : index
    %77 = vector.load %arg9[%c0_81, %c0_82] : memref<256x128xf32, #tpu.memory_space<vmem>>, vector<256x128xf32>
    %c7_83 = arith.constant 7 : index
    %c0_84 = arith.constant 0 : index
    %c0_85 = arith.constant 0 : index
    %78 = vector.load %arg4[%c7_83, %c0_84, %c0_85] : memref<9x32x128xbf16, #tpu.memory_space<vmem>>, vector<1x32x128xbf16>
    %79 = vector.shape_cast %78 : vector<1x32x128xbf16> to vector<32x128xbf16>
    %cst_86 = arith.constant dense<0.000000e+00> : vector<256x128xf32>
    %80 = tpu.matmul %76, %79, %cst_86 {dimension_numbers = #tpu.dot_dimension_numbers<[1], [0], [0], [1], [0, 0, 1, 1], [], []>} : vector<256x32xbf16>, vector<32x128xbf16>, vector<256x128xf32> -> vector<256x128xf32>
    %81 = arith.addf %77, %80 : vector<256x128xf32>
    %c0_87 = arith.constant 0 : index
    %c0_88 = arith.constant 0 : index
    %82 = vector.load %arg9[%c0_87, %c0_88] : memref<256x128xf32, #tpu.memory_space<vmem>>, vector<256x128xf32>
    tpu.vector_store %arg9[%c0_87, %c0_88], %81 {strides = array<i32>} : memref<256x128xf32, #tpu.memory_space<vmem>>, vector<256x128xf32>,
    %c2_89 = arith.constant 2 : index
    %c9_90 = arith.constant 9 : index
    %c0_91 = arith.constant 0 : index
    %83 = vector.load %arg8[%c2_89, %c9_90, %c0_91] : memref<18x32x32xf32, #tpu.memory_space<vmem>>, vector<16x16x32xf32>
    %84 = vector.shape_cast %83 : vector<16x16x32xf32> to vector<256x32xf32>
    %85 = arith.truncf %84 : vector<256x32xf32> to vector<256x32xbf16>
    %c0_92 = arith.constant 0 : index
    %c0_93 = arith.constant 0 : index
    %86 = vector.load %arg9[%c0_92, %c0_93] : memref<256x128xf32, #tpu.memory_space<vmem>>, vector<256x128xf32>
    %c8_94 = arith.constant 8 : index
    %c0_95 = arith.constant 0 : index
    %c0_96 = arith.constant 0 : index
    %87 = vector.load %arg4[%c8_94, %c0_95, %c0_96] : memref<9x32x128xbf16, #tpu.memory_space<vmem>>, vector<1x32x128xbf16>
    %88 = vector.shape_cast %87 : vector<1x32x128xbf16> to vector<32x128xbf16>
    %cst_97 = arith.constant dense<0.000000e+00> : vector<256x128xf32>
    %89 = tpu.matmul %85, %88, %cst_97 {dimension_numbers = #tpu.dot_dimension_numbers<[1], [0], [0], [1], [0, 0, 1, 1], [], []>} : vector<256x32xbf16>, vector<32x128xbf16>, vector<256x128xf32> -> vector<256x128xf32>
    %90 = arith.addf %86, %89 : vector<256x128xf32>
    %c0_98 = arith.constant 0 : index
    %c0_99 = arith.constant 0 : index
    %91 = vector.load %arg9[%c0_98, %c0_99] : memref<256x128xf32, #tpu.memory_space<vmem>>, vector<256x128xf32>
    tpu.vector_store %arg9[%c0_98, %c0_99], %90 {strides = array<i32>} : memref<256x128xf32, #tpu.memory_space<vmem>>, vector<256x128xf32>,
    %c0_100 = arith.constant 0 : index
    %c0_101 = arith.constant 0 : index
    %92 = vector.load %arg9[%c0_100, %c0_101] : memref<256x128xf32, #tpu.memory_space<vmem>>, vector<256x32xf32>
    %93 = arith.negf %92 : vector<256x32xf32>
    %94 = math.exp %93 : vector<256x32xf32>
    %cst_102 = arith.constant 1.000000e+00 : f32
    %95 = vector.broadcast %cst_102 : f32 to vector<256x32xf32>
    %96 = arith.addf %95, %94 : vector<256x32xf32>
    %97 = arith.divf %95, %96 : vector<256x32xf32>
    %c0_103 = arith.constant 0 : index
    %c32 = arith.constant 32 : index
    %98 = vector.load %arg9[%c0_103, %c32] : memref<256x128xf32, #tpu.memory_space<vmem>>, vector<256x32xf32>
    %99 = arith.negf %98 : vector<256x32xf32>
    %100 = math.exp %99 : vector<256x32xf32>
    %cst_104 = arith.constant 1.000000e+00 : f32
    %101 = vector.broadcast %cst_104 : f32 to vector<256x32xf32>
    %102 = arith.addf %101, %100 : vector<256x32xf32>
    %103 = arith.divf %101, %102 : vector<256x32xf32>
    %c0_105 = arith.constant 0 : index
    %c64 = arith.constant 64 : index
    %104 = vector.load %arg9[%c0_105, %c64] : memref<256x128xf32, #tpu.memory_space<vmem>>, vector<256x32xf32>
    %105 = arith.negf %104 : vector<256x32xf32>
    %106 = math.exp %105 : vector<256x32xf32>
    %cst_106 = arith.constant 1.000000e+00 : f32
    %107 = vector.broadcast %cst_106 : f32 to vector<256x32xf32>
    %108 = arith.addf %107, %106 : vector<256x32xf32>
    %109 = arith.divf %107, %108 : vector<256x32xf32>
    %c0_107 = arith.constant 0 : index
    %c96 = arith.constant 96 : index
    %110 = vector.load %arg9[%c0_107, %c96] : memref<256x128xf32, #tpu.memory_space<vmem>>, vector<256x32xf32>
    %111 = math.tanh %110 : vector<256x32xf32>
    %c0_108 = arith.constant 0 : index
    %c0_109 = arith.constant 0 : index
    %c0_110 = arith.constant 0 : index
    %112 = vector.load %arg7[%c0_108, %c0_109, %c0_110] : memref<1x256x32xf32, #tpu.memory_space<vmem>>, vector<1x256x32xf32>
    %113 = vector.shape_cast %112 : vector<1x256x32xf32> to vector<256x32xf32>
    %114 = arith.mulf %103, %113 : vector<256x32xf32>
    %115 = arith.mulf %97, %111 : vector<256x32xf32>
    %116 = arith.addf %114, %115 : vector<256x32xf32>
    %117 = math.tanh %116 : vector<256x32xf32>
    %118 = arith.mulf %109, %117 : vector<256x32xf32>
    %c0_111 = arith.constant 0 : index
    %c0_112 = arith.constant 0 : index
    %c0_113 = arith.constant 0 : index
    %119 = vector.load %arg7[%c0_111, %c0_112, %c0_113] : memref<1x256x32xf32, #tpu.memory_space<vmem>>, vector<1x256x32xf32>
    %120 = vector.shape_cast %119 : vector<1x256x32xf32> to vector<256x32xf32>
    %121 = vector.shape_cast %116 : vector<256x32xf32> to vector<1x256x32xf32>
    tpu.vector_store %arg7[%c0_111, %c0_112, %c0_113], %121 {strides = array<i32>} : memref<1x256x32xf32, #tpu.memory_space<vmem>>, vector<1x256x32xf32>,
    %c0_114 = arith.constant 0 : index
    %c0_115 = arith.constant 0 : index
    %c0_116 = arith.constant 0 : index
    %c0_117 = arith.constant 0 : index
    %122 = vector.load %arg6[%c0_114, %c0_115, %c0_116, %c0_117] : memref<1x1x256x32xf32, #tpu.memory_space<vmem>>, vector<1x1x256x32xf32>
    %123 = vector.shape_cast %122 : vector<1x1x256x32xf32> to vector<256x32xf32>
    %124 = vector.shape_cast %118 : vector<256x32xf32> to vector<1x1x256x32xf32>
    tpu.vector_store %arg6[%c0_114, %c0_115, %c0_116, %c0_117], %124 {strides = array<i32>} : memref<1x1x256x32xf32, #tpu.memory_space<vmem>>, vector<1x1x256x32xf32>,
    %125 = vector.shape_cast %118 : vector<256x32xf32> to vector<16x16x32xf32>
    %c1_118 = arith.constant 1 : index
    %c8_119 = arith.constant 8 : index
    %c0_120 = arith.constant 0 : index
    %126 = vector.load %arg8[%c1_118, %c8_119, %c0_120] : memref<18x32x32xf32, #tpu.memory_space<vmem>>, vector<16x16x32xf32>
    tpu.vector_store %arg8[%c1_118, %c8_119, %c0_120], %125 {strides = array<i32>} : memref<18x32x32xf32, #tpu.memory_space<vmem>>, vector<16x16x32xf32>,
    return
  }
  func.func @transform_0(%arg0: i32, %arg1: i32) -> (i32, i32, i32, i32) {
    %c0_i32 = arith.constant 0 : i32
    %c0_i32_0 = arith.constant 0 : i32
    %c0_i32_1 = arith.constant 0 : i32
    return %arg0, %arg1, %c0_i32, %c0_i32_0 : i32, i32, i32, i32
  }
  func.func @transform_1(%arg0: i32, %arg1: i32) -> (i32, i32) {
    %c0_i32 = arith.constant 0 : i32
    %c0_i32_0 = arith.constant 0 : i32
    %c0_i32_1 = arith.constant 0 : i32
    return %c0_i32, %c0_i32_0 : i32, i32
  }
  func.func @transform_2(%arg0: i32, %arg1: i32) -> (i32, i32, i32) {
    %c0_i32 = arith.constant 0 : i32
    %c0_i32_0 = arith.constant 0 : i32
    %c0_i32_1 = arith.constant 0 : i32
    %c0_i32_2 = arith.constant 0 : i32
    return %c0_i32, %c0_i32_0, %c0_i32_1 : i32, i32, i32
  }
  func.func @transform_3(%arg0: i32, %arg1: i32) -> (i32, i32) {
    %c0_i32 = arith.constant 0 : i32
    %c0_i32_0 = arith.constant 0 : i32
    %c0_i32_1 = arith.constant 0 : i32
    return %c0_i32, %c0_i32_0 : i32, i32
  }
  func.func @transform_4(%arg0: i32, %arg1: i32) -> (i32, i32, i32, i32) {
    %c0_i32 = arith.constant 0 : i32
    %c0_i32_0 = arith.constant 0 : i32
    %c0_i32_1 = arith.constant 0 : i32
    return %arg0, %arg1, %c0_i32, %c0_i32_0 : i32, i32, i32, i32
  }
  func.func @transform_5(%arg0: i32, %arg1: i32) -> (i32, i32, i32) {
    %c0_i32 = arith.constant 0 : i32
    %c0_i32_0 = arith.constant 0 : i32
    %c0_i32_1 = arith.constant 0 : i32
    return %arg0, %c0_i32, %c0_i32_0 : i32, i32, i32
  }
}

</mosaic_0001>

<bundles_post_ra>
// kernel: convlstm_forward.2
= control target key start
LH: loop header
LB: loop body
LE: loop exit
PB: predicated region body
PF: predicated region fallthrough
CT: control target
= control target key end

     0   :  { %11 = vsyncpa [#allocation5], 0  ;;  %s8942_s0 = inlined_call_operand.vmem [shape: bf16[2,8,256,36], index: 0, kind: input, shape index: {}]   ;;  %s8943_s1 = inlined_call_operand.vmem [shape: bf16[36,128], index: 1, kind: input, shape index: {}]   ;;  %s8944_s2 = inlined_call_operand.vmem [shape: bf16[9,32,128], index: 2, kind: input, shape index: {}]   ;;  %s8945_s3 = inlined_call_operand.vmem [shape: f32[1,128], index: 3, kind: input, shape index: {}]   ;;  %s8946_s4 = inlined_call_operand.vmem [shape: f32[2,8,256,32], index: 4, kind: output, shape index: {0}]   ;;  %s8947_s5 = inlined_call_operand.hbm [shape: f32[2,256,32], index: 5, kind: output, shape index: {1}]  }
   0x1   :  { %13 = vsyncpa [#allocation5 + $0x1], 0  ;;  %s6886_s18 = smov 0   ;;  %s6888_s19 = smov 0  }
   0x2   :  { %s6890_s20 = smov 0   ;;  %s6892_s21 = smov 0  }
   0x3   :  { %s6894_s22 = smov 0   ;;  %s6896_s23 = smov 0  }
   0x4   :  { %s6898_s24 = smov 0   ;;  %s6900_s25 = smov 0  }
   0x5 LB: > { %8959 = sst [smem:[#allocation7_spill]] %s6839_s23  ;;  %s5560_s26 = sadd.s32 4294967295, %s6847_s25   ;;  %s6847_s25 = sphi %s6900_s25, %s19_s25   ;;  %s6843_s24 = sphi %s6898_s24, %s8990_s24   ;;  %s6839_s23 = sphi %s6896_s23, %s8989_s23   ;;  %s6835_s22 = sphi %s6894_s22, %s8988_s22   ;;  %s6831_s21 = sphi %s6892_s21, %s8987_s21   ;;  %s6827_s20 = sphi %s6890_s20, %s8993_s20   ;;  %s6823_s19 = sphi %s6888_s19, %s8992_s19   ;;  %s6819_s18 = sphi %s6886_s18, %s8991_s18  }
   0x6   : > { %8960 = sst [smem:[#allocation8_spill]] %s6843_s24  ;;  %s5561_s27 = sadd.s32 4294967294, %s6847_s25  }
   0x7   : > { %s28_s28 = sadd.s32 1, %s6839_s23  ;;  %s31_s29 = sadd.s32 1, %s6843_s24 }
   0x8   : > { %p29_p0 = scmp.ge.s32.totalorder %s28_s28, 8  ;;  %p167_p1 = scmp.ne.s32.totalorder %s6827_s20, %s6823_s19 }
   0x9   : > { %p168_p2 = scmp.eq.s32.totalorder %s5560_s26, 15  ;;  %p173_p4 = scmp.ne.s32.totalorder %s6823_s19, %s6819_s18 }
   0xa   : > { %s8995_s28 = smov (%p29_p0, %s28_s28), 0  ;;  %s8997_s29 = smov (!%p29_p0, %s31_s29), %s6843_s24 }
   0xb   : > { %8961 = sst [smem:[#allocation9_spill]] %s8995_s28  ;;  %p6935_p3 = por %p168_p2, %p167_p1 }
   0xc   : > { %p33_p5 = scmp.ge.s32.totalorder %s8997_s29, 2  ;;  %p174_p6 = scmp.eq.s32.totalorder %s5561_s27, 15 }
   0xd   : > { %p5564_p7 = scmp.ge.s32.totalorder %s6847_s25, 1  ;;  %p213_p8 = scmp.lt.s32.totalorder %s6847_s25, 17 }
   0xe   : > { %s8999_s29 = smov (%p33_p5, %s8997_s29), 0  ;;  %p6945_p9 = por %p174_p6, %p173_p4 }
   0xf   : > { %8963 = sst [smem:[#allocation10_spill]] %s8999_s29  ;;  %p214_p10 = pnand %p5564_p7, %p213_p8 }
  0x10   : > { %s154_s7 = ssub.s32 %s6843_s24, %s8999_s29  ;;  %s157_s8 = sadd.s32 1, %s6827_s20 }
  0x11   : > { %p155_p11 = scmp.eq.s32.totalorder %s154_s7, 0  ;;  %217 = sbr.rel (%p214_p10) target bundleno = 1175 (0x497), region = 36 }
  0x13   : > { %s6953_s9 = scalar_select %p155_p11, %s6827_s20, %s157_s8  }
  0x16   : > { %s251_s10 = sand.u32 1, %s6823_s19   ;;  %p254_p12 = scmp.lt.s32.totalorder %s6835_s22, 1 }
  0x17   : > { %s5565_s11 = sshll.u32 %s251_s10, 8  ;;  %p256_p13 = scmp.lt.s32.totalorder %s6831_s21, 7 }
  0x18   : > { %s255_s12 = scalar_select %p254_p12, %s6835_s22, 1 }
  0x19   : > { %s257_s13 = scalar_select %p256_p13, %s6831_s21, 7 }
  0x1a   : > { %s5567_s14 = sshll.u32 %s255_s12, 8  ;;  %s6972_s23 = scalar_lea.vmem [#allocation4], %s5565_s11 }
  0x1b   : > { %s5566_s15 = sshll.u32 %s257_s13, 5  ;;  %p5572_p0 = scmp.ne.s32.totalorder %s6831_s21, 0 }
  0x1c   : > { %s260_s16 = sadd.s32 %s5567_s14, %s5566_s15 }
  0x1d   : > { %s5568_s17 = sshll.u32 %s260_s16, 2  ;;  %s5571_s26 = sshll.u32 %s260_s16, 3 }
  0x1e   : > { %s6965_s8 = scalar_lea.vmem %s8942_s0, %s5568_s17  ;;  %s6970_s24 = scalar_lea.vmem %s8946_s4, %s5571_s26 }
  0x1f   : > { %276 = sbr.rel (%p5572_p0) target bundleno = 89 (0x59), region = 40 }
  0x24   : > { %vm277_vm0 = vcmask 261120   ;;  %v6849_v0 = vmov 0.0  }
  0x25   : > { %278 = vst.msk [vmem:[#allocation2] sm:$0xff] %vm277_vm0, %v6849_v0  ;;  %279 = vst.msk [vmem:[#allocation2 + $0x8] sm:$0xff] %vm277_vm0, %v6849_v0 }
  0x26   : > { %280 = vst.msk [vmem:[#allocation2 + $0x10] sm:$0xff] %vm277_vm0, %v6849_v0  ;;  %281 = vst.msk [vmem:[#allocation2 + $0x18] sm:$0xff] %vm277_vm0, %v6849_v0 }
  0x27   : > { %282 = vst.msk [vmem:[#allocation2 + $0x20] sm:$0xff] %vm277_vm0, %v6849_v0  ;;  %283 = vst.msk [vmem:[#allocation2 + $0x28] sm:$0xff] %vm277_vm0, %v6849_v0 }
  0x28   : > { %284 = vst.msk [vmem:[#allocation2 + $0x30] sm:$0xff] %vm277_vm0, %v6849_v0  ;;  %285 = vst.msk [vmem:[#allocation2 + $0x38] sm:$0xff] %vm277_vm0, %v6849_v0 }
  0x29   : > { %286 = vst.msk [vmem:[#allocation2 + $0x40] sm:$0xff] %vm277_vm0, %v6849_v0  ;;  %287 = vst.msk [vmem:[#allocation2 + $0x48] sm:$0xff] %vm277_vm0, %v6849_v0 }
  0x2a   : > { %288 = vst.msk [vmem:[#allocation2 + $0x50] sm:$0xff] %vm277_vm0, %v6849_v0  ;;  %289 = vst.msk [vmem:[#allocation2 + $0x58] sm:$0xff] %vm277_vm0, %v6849_v0 }
  0x2b   : > { %290 = vst.msk [vmem:[#allocation2 + $0x60] sm:$0xff] %vm277_vm0, %v6849_v0  ;;  %291 = vst.msk [vmem:[#allocation2 + $0x68] sm:$0xff] %vm277_vm0, %v6849_v0 }
  0x2c   : > { %292 = vst.msk [vmem:[#allocation2 + $0x70] sm:$0xff] %vm277_vm0, %v6849_v0  ;;  %293 = vst.msk [vmem:[#allocation2 + $0x78] sm:$0xff] %vm277_vm0, %v6849_v0 }
  0x2d   : > { %294 = vst.msk [vmem:[#allocation2 + $0x80] sm:$0xff] %vm277_vm0, %v6849_v0  ;;  %295 = vst.msk [vmem:[#allocation2 + $0x88] sm:$0xff] %vm277_vm0, %v6849_v0 }
  0x2e   : > { %296 = vst.msk [vmem:[#allocation2 + $0x90] sm:$0xff] %vm277_vm0, %v6849_v0  ;;  %297 = vst.msk [vmem:[#allocation2 + $0x98] sm:$0xff] %vm277_vm0, %v6849_v0 }
  0x2f   : > { %298 = vst.msk [vmem:[#allocation2 + $0xa0] sm:$0xff] %vm277_vm0, %v6849_v0  ;;  %299 = vst.msk [vmem:[#allocation2 + $0xa8] sm:$0xff] %vm277_vm0, %v6849_v0 }
  0x30   : > { %300 = vst.msk [vmem:[#allocation2 + $0xb0] sm:$0xff] %vm277_vm0, %v6849_v0  ;;  %301 = vst.msk [vmem:[#allocation2 + $0xb8] sm:$0xff] %vm277_vm0, %v6849_v0 }
  0x31   : > { %302 = vst.msk [vmem:[#allocation2 + $0xc0] sm:$0xff] %vm277_vm0, %v6849_v0  ;;  %303 = vst.msk [vmem:[#allocation2 + $0xc8] sm:$0xff] %vm277_vm0, %v6849_v0 }
  0x32   : > { %304 = vst.msk [vmem:[#allocation2 + $0xd0] sm:$0xff] %vm277_vm0, %v6849_v0  ;;  %305 = vst.msk [vmem:[#allocation2 + $0xd8] sm:$0xff] %vm277_vm0, %v6849_v0 }
  0x33   : > { %306 = vst.msk [vmem:[#allocation2 + $0xe0] sm:$0xff] %vm277_vm0, %v6849_v0  ;;  %307 = vst.msk [vmem:[#allocation2 + $0xe8] sm:$0xff] %vm277_vm0, %v6849_v0 }
  0x34   : > { %308 = vst.msk [vmem:[#allocation2 + $0xf0] sm:$0xff] %vm277_vm0, %v6849_v0  ;;  %309 = vst.msk [vmem:[#allocation2 + $0xf8] sm:$0xff] %vm277_vm0, %v6849_v0 }
  0x35   : > { %310 = vst.msk [vmem:[#allocation2 + $0x100] sm:$0xff] %vm277_vm0, %v6849_v0  ;;  %311 = vst.msk [vmem:[#allocation2 + $0x108] sm:$0xff] %vm277_vm0, %v6849_v0 }
  0x36   : > { %312 = vst.msk [vmem:[#allocation2 + $0x110] sm:$0xff] %vm277_vm0, %v6849_v0  ;;  %313 = vst.msk [vmem:[#allocation2 + $0x118] sm:$0xff] %vm277_vm0, %v6849_v0 }
  0x37   : > { %314 = vst.msk [vmem:[#allocation2 + $0x120] sm:$0xff] %vm277_vm0, %v6849_v0  ;;  %315 = vst.msk [vmem:[#allocation2 + $0x128] sm:$0xff] %vm277_vm0, %v6849_v0 }
  0x38   : > { %316 = vst.msk [vmem:[#allocation2 + $0x130] sm:$0xff] %vm277_vm0, %v6849_v0  ;;  %317 = vst.msk [vmem:[#allocation2 + $0x138] sm:$0xff] %vm277_vm0, %v6849_v0 }
  0x39   : > { %318 = vst.msk [vmem:[#allocation2 + $0x140] sm:$0xff] %vm277_vm0, %v6849_v0  ;;  %319 = vst.msk [vmem:[#allocation2 + $0x148] sm:$0xff] %vm277_vm0, %v6849_v0 }
  0x3a   : > { %320 = vst.msk [vmem:[#allocation2 + $0x150] sm:$0xff] %vm277_vm0, %v6849_v0  ;;  %321 = vst.msk [vmem:[#allocation2 + $0x158] sm:$0xff] %vm277_vm0, %v6849_v0 }
  0x3b   : > { %322 = vst.msk [vmem:[#allocation2 + $0x160] sm:$0xff] %vm277_vm0, %v6849_v0  ;;  %323 = vst.msk [vmem:[#allocation2 + $0x168] sm:$0xff] %vm277_vm0, %v6849_v0 }
  0x3c   : > { %324 = vst.msk [vmem:[#allocation2 + $0x170] sm:$0xff] %vm277_vm0, %v6849_v0  ;;  %325 = vst.msk [vmem:[#allocation2 + $0x178] sm:$0xff] %vm277_vm0, %v6849_v0 }
  0x3d   : > { %326 = vst.msk [vmem:[#allocation2 + $0x180] sm:$0xff] %vm277_vm0, %v6849_v0  ;;  %327 = vst.msk [vmem:[#allocation2 + $0x188] sm:$0xff] %vm277_vm0, %v6849_v0 }
  0x3e   : > { %328 = vst.msk [vmem:[#allocation2 + $0x190] sm:$0xff] %vm277_vm0, %v6849_v0  ;;  %329 = vst.msk [vmem:[#allocation2 + $0x198] sm:$0xff] %vm277_vm0, %v6849_v0 }
  0x3f   : > { %330 = vst.msk [vmem:[#allocation2 + $0x1a0] sm:$0xff] %vm277_vm0, %v6849_v0  ;;  %331 = vst.msk [vmem:[#allocation2 + $0x1a8] sm:$0xff] %vm277_vm0, %v6849_v0 }
  0x40   : > { %332 = vst.msk [vmem:[#allocation2 + $0x1b0] sm:$0xff] %vm277_vm0, %v6849_v0  ;;  %333 = vst.msk [vmem:[#allocation2 + $0x1b8] sm:$0xff] %vm277_vm0, %v6849_v0 }
  0x41   : > { %334 = vst.msk [vmem:[#allocation2 + $0x1c0] sm:$0xff] %vm277_vm0, %v6849_v0  ;;  %335 = vst.msk [vmem:[#allocation2 + $0x1c8] sm:$0xff] %vm277_vm0, %v6849_v0 }
  0x42   : > { %336 = vst.msk [vmem:[#allocation2 + $0x1d0] sm:$0xff] %vm277_vm0, %v6849_v0  ;;  %337 = vst.msk [vmem:[#allocation2 + $0x1d8] sm:$0xff] %vm277_vm0, %v6849_v0 }
  0x43   : > { %338 = vst.msk [vmem:[#allocation2 + $0x1e0] sm:$0xff] %vm277_vm0, %v6849_v0  ;;  %339 = vst.msk [vmem:[#allocation2 + $0x1e8] sm:$0xff] %vm277_vm0, %v6849_v0 }
  0x44   : > { %340 = vst.msk [vmem:[#allocation2 + $0x1f0] sm:$0xff] %vm277_vm0, %v6849_v0  ;;  %341 = vst.msk [vmem:[#allocation2 + $0x1f8] sm:$0xff] %vm277_vm0, %v6849_v0 }
  0x45   : > { %342 = vst.msk [vmem:[#allocation2 + $0x200] sm:$0xff] %vm277_vm0, %v6849_v0  ;;  %343 = vst.msk [vmem:[#allocation2 + $0x208] sm:$0xff] %vm277_vm0, %v6849_v0 }
  0x46   : > { %344 = vst.msk [vmem:[#allocation2 + $0x210] sm:$0xff] %vm277_vm0, %v6849_v0  ;;  %345 = vst.msk [vmem:[#allocation2 + $0x218] sm:$0xff] %vm277_vm0, %v6849_v0 }
  0x47   : > { %346 = vst.msk [vmem:[#allocation2 + $0x220] sm:$0xff] %vm277_vm0, %v6849_v0  ;;  %347 = vst.msk [vmem:[#allocation2 + $0x228] sm:$0xff] %vm277_vm0, %v6849_v0 }
  0x48   : > { %348 = vst.msk [vmem:[#allocation2 + $0x230] sm:$0xff] %vm277_vm0, %v6849_v0  ;;  %349 = vst.msk [vmem:[#allocation2 + $0x238] sm:$0xff] %vm277_vm0, %v6849_v0 }
  0x49   : > { %350 = vst.msk [vmem:[%s6972_s23] sm:$0xff] %vm277_vm0, %v6849_v0  ;;  %351 = vst.msk [vmem:[%s6972_s23 + $0x8] sm:$0xff] %vm277_vm0, %v6849_v0 }
  0x4a   : > { %352 = vst.msk [vmem:[%s6972_s23 + $0x10] sm:$0xff] %vm277_vm0, %v6849_v0  ;;  %353 = vst.msk [vmem:[%s6972_s23 + $0x18] sm:$0xff] %vm277_vm0, %v6849_v0 }
  0x4b   : > { %354 = vst.msk [vmem:[%s6972_s23 + $0x20] sm:$0xff] %vm277_vm0, %v6849_v0  ;;  %355 = vst.msk [vmem:[%s6972_s23 + $0x28] sm:$0xff] %vm277_vm0, %v6849_v0 }
  0x4c   : > { %356 = vst.msk [vmem:[%s6972_s23 + $0x30] sm:$0xff] %vm277_vm0, %v6849_v0  ;;  %357 = vst.msk [vmem:[%s6972_s23 + $0x38] sm:$0xff] %vm277_vm0, %v6849_v0 }
  0x4d   : > { %358 = vst.msk [vmem:[%s6972_s23 + $0x40] sm:$0xff] %vm277_vm0, %v6849_v0  ;;  %359 = vst.msk [vmem:[%s6972_s23 + $0x48] sm:$0xff] %vm277_vm0, %v6849_v0 }
  0x4e   : > { %360 = vst.msk [vmem:[%s6972_s23 + $0x50] sm:$0xff] %vm277_vm0, %v6849_v0  ;;  %361 = vst.msk [vmem:[%s6972_s23 + $0x58] sm:$0xff] %vm277_vm0, %v6849_v0 }
  0x4f   : > { %362 = vst.msk [vmem:[%s6972_s23 + $0x60] sm:$0xff] %vm277_vm0, %v6849_v0  ;;  %363 = vst.msk [vmem:[%s6972_s23 + $0x68] sm:$0xff] %vm277_vm0, %v6849_v0 }
  0x50   : > { %364 = vst.msk [vmem:[%s6972_s23 + $0x70] sm:$0xff] %vm277_vm0, %v6849_v0  ;;  %365 = vst.msk [vmem:[%s6972_s23 + $0x78] sm:$0xff] %vm277_vm0, %v6849_v0 }
  0x51   : > { %366 = vst.msk [vmem:[%s6972_s23 + $0x80] sm:$0xff] %vm277_vm0, %v6849_v0  ;;  %367 = vst.msk [vmem:[%s6972_s23 + $0x88] sm:$0xff] %vm277_vm0, %v6849_v0 }
  0x52   : > { %368 = vst.msk [vmem:[%s6972_s23 + $0x90] sm:$0xff] %vm277_vm0, %v6849_v0  ;;  %369 = vst.msk [vmem:[%s6972_s23 + $0x98] sm:$0xff] %vm277_vm0, %v6849_v0 }
  0x53   : > { %370 = vst.msk [vmem:[%s6972_s23 + $0xa0] sm:$0xff] %vm277_vm0, %v6849_v0  ;;  %371 = vst.msk [vmem:[%s6972_s23 + $0xa8] sm:$0xff] %vm277_vm0, %v6849_v0 }
  0x54   : > { %372 = vst.msk [vmem:[%s6972_s23 + $0xb0] sm:$0xff] %vm277_vm0, %v6849_v0  ;;  %373 = vst.msk [vmem:[%s6972_s23 + $0xb8] sm:$0xff] %vm277_vm0, %v6849_v0 }
  0x55   : > { %374 = vst.msk [vmem:[%s6972_s23 + $0xc0] sm:$0xff] %vm277_vm0, %v6849_v0  ;;  %375 = vst.msk [vmem:[%s6972_s23 + $0xc8] sm:$0xff] %vm277_vm0, %v6849_v0 }
  0x56   : > { %376 = vst.msk [vmem:[%s6972_s23 + $0xd0] sm:$0xff] %vm277_vm0, %v6849_v0  ;;  %377 = vst.msk [vmem:[%s6972_s23 + $0xd8] sm:$0xff] %vm277_vm0, %v6849_v0 }
  0x57   : > { %378 = vst.msk [vmem:[%s6972_s23 + $0xe0] sm:$0xff] %vm277_vm0, %v6849_v0  ;;  %379 = vst.msk [vmem:[%s6972_s23 + $0xe8] sm:$0xff] %vm277_vm0, %v6849_v0 }
  0x58   : > { %380 = vst.msk [vmem:[%s6972_s23 + $0xf0] sm:$0xff] %vm277_vm0, %v6849_v0  ;;  %381 = vst.msk [vmem:[%s6972_s23 + $0xf8] sm:$0xff] %vm277_vm0, %v6849_v0 }
  0x59 PF: > { %v6462_v1 = vld [vmem:[%s8943_s1 + $0x10] ss:$0 sps:$4 sm:$0x33]   ;;  %vm570_vm1 = vcmask 1041408   ;;  %v6463_v2 = vld [vmem:[%s8944_s2 + $0x8] sm:$0xff]   ;;  %v6465_v5 = vld [vmem:[%s8944_s2] sm:$0xff]  }
  0x5a   : > { %6384 = vmatprep.subr.msk.bf16.mxu0 %vm570_vm1, %v6462_v1  ;;  %v572_v3 = vsel %vm570_vm1, %v6462_v1, 0  ;;  %v6464_v4 = vld [vmem:[%s8943_s1 + $0x8] sm:$0xff]   ;;  %6060 = vmatprep.subr.bf16.mxu1 %v6463_v2  ;;  %vm863_vm2 = vcmask 261120   ;;  %v6466_v9 = vld [vmem:[%s8943_s1] sm:$0xff]   ;;  %v6467_v13 = vld [vmem:[%s8944_s2 + $0x18] sm:$0xff]   ;;  %vm521_vm3 = vcmask 293888  }
  0x5b   : > { %6023 = vmatpush3.bf16.msra.mxu0 %v572_v3  ;;  %6061 = vmatpush3.bf16.msra.mxu1 %v6463_v2  ;;  %v767_v6 = vld [vmem:[#allocation2 + $0x7] sm:$0xff]  ;;  %v768_v7 = vld [vmem:[#allocation2 + $0xf] sm:$0xff]  ;;  %v6472_v27 = vld [vmem:[%s6965_s8 + $0x18] sm:$0xff]   ;;  %s6850_s11 = smov 32   ;;  %s6851_s12 = smov 96  }
  0x5c   : > { %6024 = vmatprep.subr.bf16.mxu0 %v6464_v4  ;;  %6062 = vmatprep.subr.bf16.mxu1 %v6465_v5  ;;  %v799_v8 = vpack.c.bf16 %v768_v7, %v767_v6  ;;  %v769_v10 = vld [vmem:[#allocation2 + $0x27] sm:$0xff]  ;;  %v770_v11 = vld [vmem:[#allocation2 + $0x2f] sm:$0xff]  ;;  %v6476_v45 = vld [vmem:[%s6965_s8 + $0x38] sm:$0xff]   ;;  %s6852_s13 = smov 64   ;;  %s5840_s14 = sshll.u32 %s6835_s22, 12 }
  0x5d   : > { %v7231_v12 = vpack.c.bf16 %v770_v11, %v769_v10  ;;  %v6468_v14 = vld [vmem:[%s6965_s8] sm:$0xff]   ;;  %v6469_v15 = vld [vmem:[%s6965_s8 + $0x8] sm:$0xff]   ;;  %v6471_v22 = vld [vmem:[%s6965_s8 + $0x10] sm:$0xff]   ;;  %s5437_s17 = sshll.u32 %s6972_s23, 4  ;;  %s8788_s26 = scalar_lea.sflag [#allocation5], %s251_s10  ;;  %s8783_s17 = int_to_ptr.vmem [resolvable:$true] %s5437_s17 }
  0x5e   : > { %6064 = vmatprep.mubr.msk.bf16.mxu1 %vm863_vm2, %v799_v8  ;;  %6028 = vmatprep.mubr.msk.bf16.mxu0 %vm521_vm3, %v6468_v14  ;;  %v6470_v16 = vld [vmem:[%s8944_s2 + $0x28] sm:$0xff]   ;;  %v6473_v28 = vld [vmem:[%s6965_s8 + $0x20] sm:$0xff]   ;;  %v6477_v33 = vld [vmem:[%s8944_s2 + $0x10] sm:$0xff]   ;;  %s6755_s22 = scalar_lea.vmem %s8783_s17, 4096  ;;  %s6853_s27 = smov [#allocation4]  }
  0x5f   : > { %6025 = vmatpush3.bf16.msra.mxu0 %v6464_v4  ;;  %6063 = vmatpush3.bf16.msra.mxu1 %v6465_v5  ;;  %v771_v17 = vld [vmem:[#allocation2 + $0x47] sm:$0xff]  ;;  %v772_v18 = vld [vmem:[#allocation2 + $0x4f] sm:$0xff]  ;;  %v7294_v51 = vld [vmem:[%s8944_s2 + $0x38] sm:$0xff]   ;;  %p6756_p1 = scmp.ne.s32.totalorder %s8783_s17, %s6755_s22  ;;  %s6759_s7 = sshll.u32 %s6853_s27, 4  ;;  %s6760_s7 = int_to_ptr.vmem [resolvable:$false] %s6759_s7 }
  0x60   : > { %6026 = vmatprep.subr.bf16.mxu0 %v6466_v9  ;;  %6096 = vmatprep.subr.bf16.mxu1 %v6467_v13  ;;  %v7244_v19 = vpack.c.bf16 %v772_v18, %v771_v17  ;;  %v773_v20 = vld [vmem:[#allocation2 + $0x67] sm:$0xff]  ;;  %v774_v21 = vld [vmem:[#allocation2 + $0x6f] sm:$0xff]  ;;  %v6482_v63 = vld [vmem:[%s6965_s8 + $0x58] sm:$0xff]   ;;  %p6762_p5 = scmp.lt.s32.totalorder %s8783_s17, %s6760_s7 }
  0x61   : > { %v775_v23 = vld [vmem:[#allocation2 + $0x87] sm:$0xff]  ;;  %v776_v24 = vld [vmem:[#allocation2 + $0x8f] sm:$0xff]  ;;  %v7250_v25 = vpack.c.bf16 %v774_v21, %v773_v20  ;;  %v6486_v18 = vld [vmem:[%s6965_s8 + $0x78] sm:$0xff]   ;;  %p6757_p2 = pnand %p6756_p1, %p6935_p3 }
  0x62   : > { %6065 = vmatmul.mubr.msk.bf16.vlgmr.msra.gmra.mxu1 %vm863_vm2, %v7231_v12  ;;  %v7253_v26 = vpack.c.bf16 %v776_v24, %v775_v23  ;;  %v777_v29 = vld [vmem:[#allocation2 + $0xa7] sm:$0xff]  ;;  %v778_v30 = vld [vmem:[#allocation2 + $0xaf] sm:$0xff] }
  0x63   : > { %6027 = vmatpush3.bf16.msra.mxu0 %v6466_v9  ;;  %6097 = vmatpush3.bf16.msra.mxu1 %v6467_v13  ;;  %v779_v31 = vld [vmem:[#allocation2 + $0xc7] sm:$0xff]  ;;  %v780_v32 = vld [vmem:[#allocation2 + $0xcf] sm:$0xff]  ;;  %v7265_v34 = vpack.c.bf16 %v778_v30, %v777_v29  ;;  %p6758_p4 = pneg %p6757_p2 }
  0x64   : > { %6132 = vmatprep.subr.bf16.mxu0 %v6470_v16  ;;  %6068 = vmatprep.mubr.msk.bf16.mxu1 %vm863_vm2, %v7244_v19  ;;  %v7268_v35 = vpack.c.bf16 %v780_v32, %v779_v31  ;;  %v6480_v36 = vld [vmem:[%s8944_s2 + $0x20] sm:$0xff]   ;;  %v6474_v37 = vld [vmem:[%s6965_s8 + $0x28] sm:$0xff]   ;;  %v6475_v39 = vld [vmem:[%s6965_s8 + $0x30] sm:$0xff]  }
  0x65   : > { %6098 = vmatprep.subr.bf16.mxu1 %v6477_v33  ;;  %v781_v38 = vld [vmem:[#allocation2 + $0xe7] sm:$0xff]  ;;  %v782_v40 = vld [vmem:[#allocation2 + $0xef] sm:$0xff] }
  0x66   : > { %6029 = vmatmul.mubr.msk.bf16.vlgmr.msra.gmra.mxu0 %vm521_vm3, %v6469_v15  ;;  %v783_v41 = vld [vmem:[#allocation2 + $0x107] sm:$0xff]  ;;  %v784_v42 = vld [vmem:[#allocation2 + $0x10f] sm:$0xff]  ;;  %v7280_v43 = vpack.c.bf16 %v782_v40, %v781_v38 }
  0x67   : > { %6133 = vmatpush3.bf16.msra.mxu0 %v6470_v16  ;;  %6032 = vmatprep.mubr.msk.bf16.mxu0 %vm521_vm3, %v6471_v22  ;;  %v7283_v44 = vpack.c.bf16 %v784_v42, %v783_v41  ;;  %v785_v46 = vld [vmem:[#allocation2 + $0x127] sm:$0xff]  ;;  %v786_v48 = vld [vmem:[#allocation2 + $0x12f] sm:$0xff] }
  0x68   : > { %6099 = vmatpush3.bf16.msra.mxu1 %v6477_v33  ;;  %6134 = vmatprep.subr.bf16.mxu0 %v6480_v36  ;;  %v6478_v47 = vld [vmem:[%s6965_s8 + $0x40] sm:$0xff]   ;;  %v788_v50 = vld [vmem:[#allocation2 + $0x14f] sm:$0xff]  ;;  %v7297_v52 = vpack.c.bf16 %v786_v48, %v785_v46 }
  0x69   : > { %v787_v49 = vld [vmem:[#allocation2 + $0x147] sm:$0xff]  ;;  %6168 = vmatprep.subr.bf16.mxu1 %v7294_v51  ;;  %v6481_v56 = vld [vmem:[%s6965_s8 + $0x50] sm:$0xff]  }
  0x6a   : > { %6069 = vmatmul.mubr.msk.bf16.gmra.mxu1 %vm863_vm2, %v7250_v25  ;;  %v7301_v53 = vpack.c.bf16 %v788_v50, %v787_v49  ;;  %v7306_v54 = vld [vmem:[%s8944_s2 + $0x48] sm:$0xff]   ;;  %v6483_v1 = vld [vmem:[%s6965_s8 + $0x60] sm:$0xff]   ;;  %v6485_v8 = vld [vmem:[%s6965_s8 + $0x70] sm:$0xff]  }
  0x6b   : > { %6072 = vmatprep.mubr.msk.bf16.mxu1 %vm863_vm2, %v7253_v26  ;;  %6135 = vmatpush3.bf16.msra.mxu0 %v6480_v36  ;;  %v6479_v55 = vld [vmem:[%s6965_s8 + $0x48] sm:$0xff]   ;;  %v1138_v13 = vld [vmem:[#allocation2 + $0x10] sm:$0xff]  ;;  %v6490_v40 = vld [vmem:[%s8944_s2 + $0x40] sm:$0xff]  }
  0x6c   : > { %6204 = vmatprep.subr.bf16.mxu0 %v7306_v54  ;;  %v789_v57 = vld [vmem:[#allocation2 + $0x167] sm:$0xff]  ;;  %v790_v58 = vld [vmem:[#allocation2 + $0x16f] sm:$0xff] }
  0x6d   : > { %v791_v59 = vld [vmem:[#allocation2 + $0x187] sm:$0xff]  ;;  %v792_v60 = vld [vmem:[#allocation2 + $0x18f] sm:$0xff]  ;;  %v7316_v61 = vpack.c.bf16 %v790_v58, %v789_v57 }
  0x6e   : > { %6033 = vmatmul.mubr.msk.bf16.gmra.mxu0 %vm521_vm3, %v6472_v27  ;;  %v7319_v62 = vpack.c.bf16 %v792_v60, %v791_v59  ;;  %v793_v0 = vld [vmem:[#allocation2 + $0x1a7] sm:$0xff]  ;;  %v794_v2 = vld [vmem:[#allocation2 + $0x1af] sm:$0xff] }
  0x6f   : > { %6036 = vmatprep.mubr.msk.bf16.mxu0 %vm521_vm3, %v6473_v28  ;;  %v795_v3 = vld [vmem:[#allocation2 + $0x1c7] sm:$0xff]  ;;  %v796_v4 = vld [vmem:[#allocation2 + $0x1cf] sm:$0xff]  ;;  %v7328_v5 = vpack.c.bf16 %v794_v2, %v793_v0 }
  0x70   : > { %v7331_v6 = vpack.c.bf16 %v796_v4, %v795_v3  ;;  %v6484_v7 = vld [vmem:[%s6965_s8 + $0x68] sm:$0xff]   ;;  %v1508_v17 = vld [vmem:[#allocation2 + $0x11] sm:$0xff]  ;;  %s8780_s8 = scalar_lea.hbm %s8947_s5, %s5840_s14 }
  0x71   : > { %v797_v9 = vld [vmem:[#allocation2 + $0x1e7] sm:$0xff]  ;;  %v798_v10 = vld [vmem:[#allocation2 + $0x1ef] sm:$0xff] }
  0x72   : > { %6073 = vmatmul.mubr.msk.bf16.gmra.mxu1 %vm863_vm2, %v7265_v34  ;;  %v1137_v11 = vld [vmem:[#allocation2 + $0x8] sm:$0xff]  ;;  %v7340_v14 = vpack.c.bf16 %v798_v10, %v797_v9  ;;  %v1140_v21 = vld [vmem:[#allocation2 + $0x30] sm:$0xff] }
  0x73   : > { %6076 = vmatprep.mubr.msk.bf16.mxu1 %vm863_vm2, %v7268_v35  ;;  %v1507_v15 = vld [vmem:[#allocation2 + $0x9] sm:$0xff]  ;;  %v1169_v16 = vpack.c.bf16 %v1138_v13, %v1137_v11  ;;  %v1510_v29 = vld [vmem:[#allocation2 + $0x31] sm:$0xff] }
  0x74   : > { %v1139_v20 = vld [vmem:[#allocation2 + $0x28] sm:$0xff]  ;;  %v1539_v22 = vpack.c.bf16 %v1508_v17, %v1507_v15  ;;  %v1142_v24 = vld [vmem:[#allocation2 + $0x50] sm:$0xff] }
  0x75   : > { %v1141_v23 = vld [vmem:[#allocation2 + $0x48] sm:$0xff]  ;;  %v7348_v27 = vpack.c.bf16 %v1140_v21, %v1139_v20  ;;  %v1512_v32 = vld [vmem:[#allocation2 + $0x51] sm:$0xff] }
  0x76   : > { %6037 = vmatmul.mubr.msk.bf16.gmra.mxu0 %vm521_vm3, %v6474_v37  ;;  %v1509_v28 = vld [vmem:[#allocation2 + $0x29] sm:$0xff]  ;;  %v7351_v30 = vpack.c.bf16 %v1142_v24, %v1141_v23  ;;  %v1514_v48 = vld [vmem:[#allocation2 + $0x71] sm:$0xff] }
  0x77   : > { %6040 = vmatprep.mubr.msk.bf16.mxu0 %vm521_vm3, %v6475_v39  ;;  %v1511_v31 = vld [vmem:[#allocation2 + $0x49] sm:$0xff]  ;;  %v7356_v36 = vpack.c.bf16 %v1510_v29, %v1509_v28  ;;  %v1520_v4 = vld [vmem:[#allocation2 + $0xd1] sm:$0xff] }
  0x78   : > { %v6489_v33 = vld [vmem:[%s8944_s2 + $0x30] sm:$0xff]   ;;  %v7360_v37 = vpack.c.bf16 %v1512_v32, %v1511_v31  ;;  %v1143_v38 = vld [vmem:[#allocation2 + $0x68] sm:$0xff] }
  0x79   : > { %v1144_v39 = vld [vmem:[#allocation2 + $0x70] sm:$0xff]  ;;  %v1145_v41 = vld [vmem:[#allocation2 + $0x88] sm:$0xff] }
  0x7a   : > { %6077 = vmatmul.mubr.msk.bf16.gmra.mxu1 %vm863_vm2, %v7280_v43  ;;  %v1146_v42 = vld [vmem:[#allocation2 + $0x90] sm:$0xff]  ;;  %v7376_v46 = vpack.c.bf16 %v1144_v39, %v1143_v38  ;;  %v1147_v57 = vld [vmem:[#allocation2 + $0xa8] sm:$0xff] }
  0x7b   : > { %6080 = vmatprep.mubr.msk.bf16.mxu1 %vm863_vm2, %v7283_v44  ;;  %v7380_v49 = vpack.c.bf16 %v1146_v42, %v1145_v41  ;;  %v1515_v50 = vld [vmem:[#allocation2 + $0x89] sm:$0xff]  ;;  %v1522_v17 = vld [vmem:[#allocation2 + $0xf1] sm:$0xff] }
  0x7c   : > { %v1148_v58 = vld [vmem:[#allocation2 + $0xb0] sm:$0xff]  ;;  %v1149_v59 = vld [vmem:[#allocation2 + $0xc8] sm:$0xff] }
  0x7d   : > { %v1150_v60 = vld [vmem:[#allocation2 + $0xd0] sm:$0xff]  ;;  %v1151_v9 = vld [vmem:[#allocation2 + $0xe8] sm:$0xff] }
  0x7e   : > { %6041 = vmatmul.mubr.msk.bf16.gmra.mxu0 %vm521_vm3, %v6476_v45  ;;  %v7371_v45 = vld [vmem:[%s8944_s2 + $0x58] sm:$0xff]   ;;  %v1517_v0 = vld [vmem:[#allocation2 + $0xa9] sm:$0xff]  ;;  %v7403_v2 = vpack.c.bf16 %v1150_v60, %v1149_v59 }
  0x7f   : > { %6044 = vmatprep.mubr.msk.bf16.mxu0 %vm521_vm3, %v6478_v47  ;;  %v1513_v47 = vld [vmem:[#allocation2 + $0x69] sm:$0xff]  ;;  %v1524_v21 = vld [vmem:[#allocation2 + $0x111] sm:$0xff] }
  0x80   : > { %v1519_v3 = vld [vmem:[#allocation2 + $0xc9] sm:$0xff]  ;;  %v1526_v38 = vld [vmem:[#allocation2 + $0x131] sm:$0xff] }
  0x81   : > { %v1152_v10 = vld [vmem:[#allocation2 + $0xf0] sm:$0xff]  ;;  %v1153_v11 = vld [vmem:[#allocation2 + $0x108] sm:$0xff] }
  0x82   : > { %6081 = vmatmul.mubr.msk.bf16.gmra.mxu1 %vm863_vm2, %v7297_v52  ;;  %v1154_v13 = vld [vmem:[#allocation2 + $0x110] sm:$0xff]  ;;  %v7415_v15 = vpack.c.bf16 %v1152_v10, %v1151_v9  ;;  %v1155_v24 = vld [vmem:[#allocation2 + $0x128] sm:$0xff] }
  0x83   : > { %6084 = vmatprep.mubr.msk.bf16.mxu1 %vm863_vm2, %v7301_v53  ;;  %v1523_v20 = vld [vmem:[#allocation2 + $0x109] sm:$0xff]  ;;  %v1528_v41 = vld [vmem:[#allocation2 + $0x151] sm:$0xff] }
  0x84   : > { %v7425_v23 = vpack.c.bf16 %v1524_v21, %v1523_v20  ;;  %v1156_v28 = vld [vmem:[#allocation2 + $0x130] sm:$0xff]  ;;  %v1157_v29 = vld [vmem:[#allocation2 + $0x148] sm:$0xff] }
  0x85   : > { %v1158_v31 = vld [vmem:[#allocation2 + $0x150] sm:$0xff]  ;;  %v7431_v32 = vpack.c.bf16 %v1156_v28, %v1155_v24  ;;  %v1163_v10 = vld [vmem:[#allocation2 + $0x1a8] sm:$0xff] }
  0x86   : > { %6045 = vmatmul.mubr.msk.bf16.gmra.mxu0 %vm521_vm3, %v6479_v55  ;;  %v7385_v55 = vld [vmem:[%s8944_s2 + $0x68] sm:$0xff]   ;;  %v7435_v39 = vpack.c.bf16 %v1158_v31, %v1157_v29  ;;  %v1530_v60 = vld [vmem:[#allocation2 + $0x171] sm:$0xff] }
  0x87   : > { %6048 = vmatprep.mubr.msk.bf16.mxu0 %vm521_vm3, %v6481_v56  ;;  %v1529_v59 = vld [vmem:[#allocation2 + $0x169] sm:$0xff]  ;;  %v1534_v21 = vld [vmem:[#allocation2 + $0x1b1] sm:$0xff] }
  0x88   : > { %v1533_v20 = vld [vmem:[#allocation2 + $0x1a9] sm:$0xff]  ;;  %v1536_v29 = vld [vmem:[#allocation2 + $0x1d1] sm:$0xff] }
  0x89   : > { %v1535_v28 = vld [vmem:[#allocation2 + $0x1c9] sm:$0xff]  ;;  %v7465_v31 = vpack.c.bf16 %v1534_v21, %v1533_v20 }
  0x8a   : > { %6085 = vmatmul.mubr.msk.bf16.gmra.mxu1 %vm863_vm2, %v7316_v61 }
  0x8b   : > { %6088 = vmatprep.mubr.msk.bf16.mxu1 %vm863_vm2, %v7319_v62 }
  0x8e   : > { %6049 = vmatmul.mubr.msk.bf16.gmra.mxu0 %vm521_vm3, %v6482_v63  ;;  %v7399_v63 = vpack.c.bf16 %v1148_v58, %v1147_v57  ;;  %v1162_v57 = vld [vmem:[#allocation2 + $0x190] sm:$0xff] }
  0x8f   : > { %6052 = vmatprep.mubr.msk.bf16.mxu0 %vm521_vm3, %v6483_v1  ;;  %v1518_v1 = vld [vmem:[#allocation2 + $0xb1] sm:$0xff] }
  0x92   : > { %6089 = vmatmul.mubr.msk.bf16.gmra.mxu1 %vm863_vm2, %v7328_v5 }
  0x93   : > { %6092 = vmatprep.mubr.msk.bf16.mxu1 %vm863_vm2, %v7331_v6 }
  0x96   : > { %6053 = vmatmul.mubr.msk.bf16.gmra.mxu0 %vm521_vm3, %v6484_v7  ;;  %v7405_v7 = vpack.c.bf16 %v1518_v1, %v1517_v0  ;;  %v1531_v1 = vld [vmem:[#allocation2 + $0x189] sm:$0xff] }
  0x97   : > { %6056 = vmatprep.mubr.msk.bf16.mxu0 %vm521_vm3, %v6485_v8  ;;  %v7409_v8 = vpack.c.bf16 %v1520_v4, %v1519_v3  ;;  %v1532_v3 = vld [vmem:[#allocation2 + $0x191] sm:$0xff]  ;;  %v7453_v4 = vpack.c.bf16 %v1530_v60, %v1529_v59 }
  0x98   : > { %v7457_v9 = vpack.c.bf16 %v1532_v3, %v1531_v1 }
  0x9a   : > { %6093 = vmatmul.mubr.msk.bf16.gmra.mxu1 %vm863_vm2, %v7340_v14 }
  0x9b   : > { %6100 = vmatprep.mubr.msk.bf16.mxu1 %vm863_vm2, %v1169_v16  ;;  %v1521_v16 = vld [vmem:[#allocation2 + $0xe9] sm:$0xff] }
  0x9e   : > { %6057 = vmatmul.mubr.msk.bf16.gmra.mxu0 %vm521_vm3, %v6486_v18  ;;  %v7419_v18 = vpack.c.bf16 %v1154_v13, %v1153_v11  ;;  %v1164_v11 = vld [vmem:[#allocation2 + $0x1b0] sm:$0xff]  ;;  %v1165_v13 = vld [vmem:[#allocation2 + $0x1c8] sm:$0xff] }
  0x9f   : > { %6136 = vmatprep.mubr.msk.bf16.mxu0 %vm863_vm2, %v1539_v22  ;;  %v7421_v22 = vpack.c.bf16 %v1522_v17, %v1521_v16  ;;  %v1166_v16 = vld [vmem:[#allocation2 + $0x1d0] sm:$0xff]  ;;  %v1182_v17 = vpack.c.bf16 %v1164_v11, %v1163_v10 }
  0xa0   : > { %v1183_v24 = vpack.c.bf16 %v1166_v16, %v1165_v13 }
  0xa2   : > { %6101 = vmatmul.mubr.msk.bf16.vlgmr.msra.gmra.mxu1 %vm863_vm2, %v7348_v27 }
  0xa3   : > { %6169 = vmatpush3.bf16.msra.mxu1 %v7294_v51  ;;  %6104 = vmatprep.mubr.msk.bf16.mxu1 %vm863_vm2, %v7351_v30  ;;  %v1516_v51 = vld [vmem:[#allocation2 + $0x91] sm:$0xff] }
  0xa4   : > { %6170 = vmatprep.subr.bf16.mxu1 %v6489_v33  ;;  %v7392_v56 = vpack.c.bf16 %v1516_v51, %v1515_v50  ;;  %v1160_v50 = vld [vmem:[#allocation2 + $0x170] sm:$0xff]  ;;  %v1161_v51 = vld [vmem:[#allocation2 + $0x188] sm:$0xff] }
  0xa5   : > { %v7451_v0 = vpack.c.bf16 %v1162_v57, %v1161_v51  ;;  %v6493_v57 = vld [vmem:[%s8944_s2 + $0x50] sm:$0xff]  }
  0xa6   : > { %6137 = vmatmul.mubr.msk.bf16.vlgmr.msra.gmra.mxu0 %vm863_vm2, %v7356_v36 }
  0xa7   : > { %6205 = vmatpush3.bf16.msra.mxu0 %v7306_v54  ;;  %6140 = vmatprep.mubr.msk.bf16.mxu0 %vm863_vm2, %v7360_v37  ;;  %v7388_v54 = vpack.c.bf16 %v1514_v48, %v1513_v47  ;;  %v1159_v48 = vld [vmem:[#allocation2 + $0x168] sm:$0xff] }
  0xa8   : > { %6171 = vmatpush3.bf16.msra.mxu1 %v6489_v33  ;;  %6206 = vmatprep.subr.bf16.mxu0 %v6490_v40  ;;  %v1525_v33 = vld [vmem:[#allocation2 + $0x129] sm:$0xff]  ;;  %v7447_v58 = vpack.c.bf16 %v1160_v50, %v1159_v48  ;;  %v1538_v50 = vld [vmem:[#allocation2 + $0x1f1] sm:$0xff] }
  0xa9   : > { %6240 = vmatprep.subr.bf16.mxu1 %v7371_v45  ;;  %v7437_v42 = vpack.c.bf16 %v1526_v38, %v1525_v33  ;;  %v7468_v33 = vpack.c.bf16 %v1536_v29, %v1535_v28  ;;  %v1167_v38 = vld [vmem:[#allocation2 + $0x1e8] sm:$0xff] }
  0xaa   : > { %6105 = vmatmul.mubr.msk.bf16.gmra.mxu1 %vm863_vm2, %v7376_v46  ;;  %v1537_v48 = vld [vmem:[#allocation2 + $0x1e9] sm:$0xff] }
  0xab   : > { %6207 = vmatpush3.bf16.msra.mxu0 %v6490_v40  ;;  %6108 = vmatprep.mubr.msk.bf16.mxu1 %vm863_vm2, %v7380_v49  ;;  %v1527_v40 = vld [vmem:[#allocation2 + $0x149] sm:$0xff]  ;;  %v7475_v51 = vpack.c.bf16 %v1538_v50, %v1537_v48 }
  0xac   : > { %6276 = vmatprep.subr.bf16.mxu0 %v7385_v55  ;;  %v7441_v47 = vpack.c.bf16 %v1528_v41, %v1527_v40  ;;  %v1168_v40 = vld [vmem:[#allocation2 + $0x1f0] sm:$0xff] }
  0xad   : > { %v1184_v41 = vpack.c.bf16 %v1168_v40, %v1167_v38 }
  0xae   : > { %6141 = vmatmul.mubr.msk.bf16.gmra.mxu0 %vm863_vm2, %v7388_v54 }
  0xaf   : > { %6144 = vmatprep.mubr.msk.bf16.mxu0 %vm863_vm2, %v7392_v56 }
  0xb2   : > { %6109 = vmatmul.mubr.msk.bf16.gmra.mxu1 %vm863_vm2, %v7399_v63 }
  0xb3   : > { %6112 = vmatprep.mubr.msk.bf16.mxu1 %vm863_vm2, %v7403_v2 }
  0xb6   : > { %6145 = vmatmul.mubr.msk.bf16.gmra.mxu0 %vm863_vm2, %v7405_v7 }
  0xb7   : > { %6148 = vmatprep.mubr.msk.bf16.mxu0 %vm863_vm2, %v7409_v8 }
  0xba   : > { %6113 = vmatmul.mubr.msk.bf16.gmra.mxu1 %vm863_vm2, %v7415_v15 }
  0xbb   : > { %6116 = vmatprep.mubr.msk.bf16.mxu1 %vm863_vm2, %v7419_v18 }
  0xbe   : > { %6149 = vmatmul.mubr.msk.bf16.gmra.mxu0 %vm863_vm2, %v7421_v22 }
  0xbf   : > { %6152 = vmatprep.mubr.msk.bf16.mxu0 %vm863_vm2, %v7425_v23 }
  0xc2   : > { %6117 = vmatmul.mubr.msk.bf16.gmra.mxu1 %vm863_vm2, %v7431_v32 }
  0xc3   : > { %6120 = vmatprep.mubr.msk.bf16.mxu1 %vm863_vm2, %v7435_v39 }
  0xc6   : > { %6153 = vmatmul.mubr.msk.bf16.gmra.mxu0 %vm863_vm2, %v7437_v42 }
  0xc7   : > { %6156 = vmatprep.mubr.msk.bf16.mxu0 %vm863_vm2, %v7441_v47 }
  0xca   : > { %6121 = vmatmul.mubr.msk.bf16.gmra.mxu1 %vm863_vm2, %v7447_v58 }
  0xcb   : > { %6124 = vmatprep.mubr.msk.bf16.mxu1 %vm863_vm2, %v7451_v0 }
  0xce   : > { %6157 = vmatmul.mubr.msk.bf16.gmra.mxu0 %vm863_vm2, %v7453_v4 }
  0xcf   : > { %6160 = vmatprep.mubr.msk.bf16.mxu0 %vm863_vm2, %v7457_v9 }
  0xd2   : > { %6125 = vmatmul.mubr.msk.bf16.gmra.mxu1 %vm863_vm2, %v1182_v17 }
  0xd3   : > { %6128 = vmatprep.mubr.msk.bf16.mxu1 %vm863_vm2, %v1183_v24 }
  0xd6   : > { %6161 = vmatmul.mubr.msk.bf16.gmra.mxu0 %vm863_vm2, %v7465_v31 }
  0xd7   : > { %6164 = vmatprep.mubr.msk.bf16.mxu0 %vm863_vm2, %v7468_v33 }
  0xda   : > { %6129 = vmatmul.mubr.msk.bf16.gmra.mxu1 %vm863_vm2, %v1184_v41 }
  0xdb   : > { %6172 = vmatprep.mubr.msk.bf16.mxu1 %vm863_vm2, %v7231_v12  ;;  %v6494_v12 = vld [vmem:[%s8944_s2 + $0x60] sm:$0xff]  }
  0xde   : > { %6165 = vmatmul.mubr.msk.bf16.gmra.mxu0 %vm863_vm2, %v7475_v51 }
  0xdf   : > { %6208 = vmatprep.mubr.msk.bf16.mxu0 %vm863_vm2, %v7348_v27  ;;  %v6495_v27 = vld [vmem:[%s8944_s2 + $0x78] sm:$0xff]  }
  0xe2   : > { %6173 = vmatmul.mubr.msk.bf16.vlgmr.msra.gmra.mxu1 %vm863_vm2, %v7244_v19 }
  0xe3   : > { %6241 = vmatpush3.bf16.msra.mxu1 %v7371_v45  ;;  %6176 = vmatprep.mubr.msk.bf16.mxu1 %vm863_vm2, %v7250_v25  ;;  %v6496_v45 = vld [vmem:[%s8944_s2 + $0x88] sm:$0xff]  }
  0xe4   : > { %6242 = vmatprep.subr.bf16.mxu1 %v6493_v57 }
  0xe6   : > { %6209 = vmatmul.mubr.msk.bf16.vlgmr.msra.gmra.mxu0 %vm863_vm2, %v7351_v30 }
  0xe7   : > { %6277 = vmatpush3.bf16.msra.mxu0 %v7385_v55  ;;  %6212 = vmatprep.mubr.msk.bf16.mxu0 %vm863_vm2, %v7376_v46  ;;  %v1908_v46 = vld [vmem:[#allocation2 + $0x207] sm:$0xff] }
  0xe8   : > { %6243 = vmatpush3.bf16.msra.mxu1 %v6493_v57  ;;  %6278 = vmatprep.subr.bf16.mxu0 %v6494_v12 }
  0xe9   : > { %6312 = vmatprep.subr.bf16.mxu1 %v6495_v27 }
  0xea   : > { %6177 = vmatmul.mubr.msk.bf16.gmra.mxu1 %vm863_vm2, %v7253_v26 }
  0xeb   : > { %6279 = vmatpush3.bf16.msra.mxu0 %v6494_v12  ;;  %6180 = vmatprep.mubr.msk.bf16.mxu1 %vm863_vm2, %v7265_v34 }
  0xec   : > { %6348 = vmatprep.subr.bf16.mxu0 %v6496_v45 }
  0xee   : > { %6213 = vmatmul.mubr.msk.bf16.gmra.mxu0 %vm863_vm2, %v7380_v49  ;;  %v1909_v49 = vld [vmem:[#allocation2 + $0x20f] sm:$0xff] }
  0xef   : > { %6216 = vmatprep.mubr.msk.bf16.mxu0 %vm863_vm2, %v7399_v63  ;;  %v7550_v55 = vpack.c.bf16 %v1909_v49, %v1908_v46  ;;  %v2278_v63 = vld [vmem:[#allocation2 + $0x208] sm:$0xff] }
  0xf2   : > { %6181 = vmatmul.mubr.msk.bf16.gmra.mxu1 %vm863_vm2, %v7268_v35 }
  0xf3   : > { %6184 = vmatprep.mubr.msk.bf16.mxu1 %vm863_vm2, %v7280_v43 }
  0xf6   : > { %6217 = vmatmul.mubr.msk.bf16.gmra.mxu0 %vm863_vm2, %v7403_v2  ;;  %v2279_v2 = vld [vmem:[#allocation2 + $0x210] sm:$0xff] }
  0xf7   : > { %6220 = vmatprep.mubr.msk.bf16.mxu0 %vm863_vm2, %v7415_v15  ;;  %v7553_v15 = vpack.c.bf16 %v2279_v2, %v2278_v63 }
  0xfa   : > { %6185 = vmatmul.mubr.msk.bf16.gmra.mxu1 %vm863_vm2, %v7283_v44 }
  0xfb   : > { %6188 = vmatprep.mubr.msk.bf16.mxu1 %vm863_vm2, %v7297_v52 }
  0xfe   : > { %6221 = vmatmul.mubr.msk.bf16.gmra.mxu0 %vm863_vm2, %v7419_v18 }
  0xff   : > { %6224 = vmatprep.mubr.msk.bf16.mxu0 %vm863_vm2, %v7431_v32  ;;  %v7571_v32 = vld [vmem:[%s8945_s3] ss:$0 sm:$0xff] }
 0x102   : > { %6189 = vmatmul.mubr.msk.bf16.gmra.mxu1 %vm863_vm2, %v7301_v53 }
 0x103   : > { %6192 = vmatprep.mubr.msk.bf16.mxu1 %vm863_vm2, %v7316_v61 }
 0x106   : > { %6225 = vmatmul.mubr.msk.bf16.gmra.mxu0 %vm863_vm2, %v7435_v39 }
 0x107   : > { %6228 = vmatprep.mubr.msk.bf16.mxu0 %vm863_vm2, %v7447_v58 }
 0x10a   : > { %6193 = vmatmul.mubr.msk.bf16.gmra.mxu1 %vm863_vm2, %v7319_v62 }
 0x10b   : > { %6196 = vmatprep.mubr.msk.bf16.mxu1 %vm863_vm2, %v7328_v5 }
 0x10e   : > { %6229 = vmatmul.mubr.msk.bf16.gmra.mxu0 %vm863_vm2, %v7451_v0 }
 0x10f   : > { %6232 = vmatprep.mubr.msk.bf16.mxu0 %vm863_vm2, %v1182_v17 }
 0x112   : > { %6197 = vmatmul.mubr.msk.bf16.gmra.mxu1 %vm863_vm2, %v7331_v6 }
 0x113   : > { %6200 = vmatprep.mubr.msk.bf16.mxu1 %vm863_vm2, %v7340_v14  ;;  %v6497_v14 = vld [vmem:[%s8944_s2 + $0x70] sm:$0xff]  }
 0x116   : > { %6233 = vmatmul.mubr.msk.bf16.gmra.mxu0 %vm863_vm2, %v1183_v24 }
 0x117   : > { %6236 = vmatprep.mubr.msk.bf16.mxu0 %vm863_vm2, %v1184_v41 }
 0x11a   : > { %6201 = vmatmul.mubr.msk.bf16.gmra.mxu1 %vm863_vm2, %v7550_v55 }
 0x11b   : > { %6244 = vmatprep.mubr.msk.bf16.mxu1 %vm863_vm2, %v7356_v36 }
 0x11e   : > { %6237 = vmatmul.mubr.msk.bf16.gmra.mxu0 %vm863_vm2, %v7553_v15 }
 0x11f   : > { %6280 = vmatprep.mubr.msk.bf16.mxu0 %vm863_vm2, %v7244_v19  ;;  %v6498_v19 = vld [vmem:[%s8944_s2 + $0x80] sm:$0xff]  }
 0x122   : > { %v6066_v18 = vpop.f32.mrf.mxu1  ;;  %6245 = vmatmul.mubr.msk.bf16.vlgmr.msra.gmra.mxu1 %vm863_vm2, %v7360_v37 }
 0x123   : > { %6313 = vmatpush3.bf16.msra.mxu1 %v6495_v27  ;;  %6248 = vmatprep.mubr.msk.bf16.mxu1 %vm863_vm2, %v7388_v54 }
 0x124   : > { %v946_v36 = vpop.f32.mrf.mxu1  ;;  %6314 = vmatprep.subr.bf16.mxu1 %v6497_v14 }
 0x126   : > { %v6030_v39 = vpop.f32.mrf.mxu0  ;;  %6281 = vmatmul.mubr.msk.bf16.vlgmr.msra.gmra.mxu0 %vm863_vm2, %v7250_v25  ;;  %v6067_v58 = vpop.f32.mrf.mxu1 }
 0x127   : > { %v617_v37 = vadd.f32 %v6030_v39, %v7571_v32  ;;  %6349 = vmatpush3.bf16.msra.mxu0 %v6496_v45  ;;  %6284 = vmatprep.mubr.msk.bf16.mxu0 %vm863_vm2, %v7253_v26 }
 0x128   : > { %v608_v59 = vpop.f32.mrf.mxu0  ;;  %6315 = vmatpush3.bf16.msra.mxu1 %v6497_v14  ;;  %6350 = vmatprep.subr.bf16.mxu0 %v6498_v19  ;;  %v949_v60 = vpop.f32.mrf.mxu1 }
 0x129   : > { %v609_v54 = vadd.f32 %v7571_v32, %v608_v59  ;;  %v7584_v0 = vadd.f32 %v6066_v18, %v617_v37 }
 0x12a   : > { %v6031_v1 = vpop.f32.mrf.mxu0  ;;  %v6070_v10 = vpop.f32.mrf.mxu1  ;;  %6249 = vmatmul.mubr.msk.bf16.gmra.mxu1 %vm863_vm2, %v7392_v56 }
 0x12b   : > { %v620_v3 = vadd.f32 %v6031_v1, %v7571_v32  ;;  %6351 = vmatpush3.bf16.msra.mxu0 %v6498_v19  ;;  %v7589_v25 = vadd.f32 %v946_v36, %v609_v54  ;;  %6252 = vmatprep.mubr.msk.bf16.mxu1 %vm863_vm2, %v7405_v7 }
 0x12c   : > { %v611_v11 = vpop.f32.mrf.mxu0  ;;  %v962_v13 = vpop.f32.mrf.mxu1 }
 0x12d   : > { %v612_v26 = vadd.f32 %v7571_v32, %v611_v11  ;;  %v7594_v16 = vadd.f32 %v6067_v58, %v620_v3 }
 0x12e   : > { %v6034_v17 = vpop.f32.mrf.mxu0  ;;  %6285 = vmatmul.mubr.msk.bf16.gmra.mxu0 %vm863_vm2, %v7265_v34  ;;  %v6071_v21 = vpop.f32.mrf.mxu1 }
 0x12f   : > { %v633_v20 = vadd.f32 %v6034_v17, %v7571_v32  ;;  %6288 = vmatprep.mubr.msk.bf16.mxu0 %vm863_vm2, %v7268_v35  ;;  %v7601_v56 = vadd.f32 %v949_v60, %v612_v26 }
 0x130   : > { %v624_v24 = vpop.f32.mrf.mxu0  ;;  %v965_v28 = vpop.f32.mrf.mxu1 }
 0x131   : > { %v625_v7 = vadd.f32 %v7571_v32, %v624_v24  ;;  %v7604_v29 = vadd.f32 %v6070_v10, %v633_v20 }
 0x132   : > { %v6035_v38 = vpop.f32.mrf.mxu0  ;;  %v6074_v41 = vpop.f32.mrf.mxu1  ;;  %6253 = vmatmul.mubr.msk.bf16.gmra.mxu1 %vm863_vm2, %v7409_v8 }
 0x133   : > { %v636_v40 = vadd.f32 %v6035_v38, %v7571_v32  ;;  %v7609_v34 = vadd.f32 %v962_v13, %v625_v7  ;;  %6256 = vmatprep.mubr.msk.bf16.mxu1 %vm863_vm2, %v7421_v22 }
 0x134   : > { %v627_v48 = vpop.f32.mrf.mxu0  ;;  %v978_v50 = vpop.f32.mrf.mxu1 }
 0x135   : > { %v628_v35 = vadd.f32 %v7571_v32, %v627_v48  ;;  %v7614_v57 = vadd.f32 %v6071_v21, %v636_v40 }
 0x136   : > { %v6038_v12 = vpop.f32.mrf.mxu0  ;;  %6289 = vmatmul.mubr.msk.bf16.gmra.mxu0 %vm863_vm2, %v7280_v43  ;;  %v6075_v45 = vpop.f32.mrf.mxu1 }
 0x137   : > { %v649_v27 = vadd.f32 %v6038_v12, %v7571_v32  ;;  %6292 = vmatprep.mubr.msk.bf16.mxu0 %vm863_vm2, %v7283_v44  ;;  %v7621_v8 = vadd.f32 %v965_v28, %v628_v35 }
 0x138   : > { %v640_v46 = vpop.f32.mrf.mxu0  ;;  %v981_v49 = vpop.f32.mrf.mxu1 }
 0x139   : > { %v641_v22 = vadd.f32 %v7571_v32, %v640_v46  ;;  %v7624_v63 = vadd.f32 %v6074_v41, %v649_v27 }
 0x13a   : > { %v6039_v2 = vpop.f32.mrf.mxu0  ;;  %v6078_v18 = vpop.f32.mrf.mxu1  ;;  %6257 = vmatmul.mubr.msk.bf16.gmra.mxu1 %vm863_vm2, %v7425_v23 }
 0x13b   : > { %v652_v14 = vadd.f32 %v6039_v2, %v7571_v32  ;;  %v7629_v43 = vadd.f32 %v978_v50, %v641_v22  ;;  %6260 = vmatprep.mubr.msk.bf16.mxu1 %vm863_vm2, %v7437_v42  ;;  %v3016_v22 = vld [vmem:[#allocation2 + $0x1ef] sm:$0xff] }
 0x13c   : > { %v643_v19 = vpop.f32.mrf.mxu0  ;;  %v994_v36 = vpop.f32.mrf.mxu1 }
 0x13d   : > { %v644_v44 = vadd.f32 %v7571_v32, %v643_v19  ;;  %v7634_v39 = vadd.f32 %v6075_v45, %v652_v14 }
 0x13e   : > { %v6042_v37 = vpop.f32.mrf.mxu0  ;;  %6293 = vmatmul.mubr.msk.bf16.gmra.mxu0 %vm863_vm2, %v7297_v52  ;;  %v6079_v59 = vpop.f32.mrf.mxu1 }
 0x13f   : > { %v665_v58 = vadd.f32 %v6042_v37, %v7571_v32  ;;  %6296 = vmatprep.mubr.msk.bf16.mxu0 %vm863_vm2, %v7301_v53  ;;  %v7641_v23 = vadd.f32 %v981_v49, %v644_v44 }
 0x140   : > { %v656_v54 = vpop.f32.mrf.mxu0  ;;  %v997_v60 = vpop.f32.mrf.mxu1 }
 0x141   : > { %v657_v42 = vadd.f32 %v7571_v32, %v656_v54  ;;  %v7644_v1 = vadd.f32 %v6078_v18, %v665_v58  ;;  %v2649_v54 = vld [vmem:[#allocation2 + $0x211] sm:$0xff] }
 0x142   : > { %v6043_v3 = vpop.f32.mrf.mxu0  ;;  %v6082_v11 = vpop.f32.mrf.mxu1  ;;  %6261 = vmatmul.mubr.msk.bf16.gmra.mxu1 %vm863_vm2, %v7441_v47 }
 0x143   : > { %v668_v10 = vadd.f32 %v6043_v3, %v7571_v32  ;;  %v7649_v52 = vadd.f32 %v994_v36, %v657_v42  ;;  %6264 = vmatprep.mubr.msk.bf16.mxu1 %vm863_vm2, %v7453_v4  ;;  %v4355_v36 = vld [vmem:[%s6972_s23] sm:$0xff] }
 0x144   : > { %v659_v26 = vpop.f32.mrf.mxu0  ;;  %v1010_v13 = vpop.f32.mrf.mxu1  ;;  %4419 = vrot.lane.b32.xlu0 %v4355_v36, %s6850_s11 }
 0x145   : > { %v660_v53 = vadd.f32 %v7571_v32, %v659_v26  ;;  %v7654_v17 = vadd.f32 %v6079_v59, %v668_v10  ;;  %v2648_v59 = vld [vmem:[#allocation2 + $0x209] sm:$0xff] }
 0x146   : > { %v6046_v20 = vpop.f32.mrf.mxu0  ;;  %6297 = vmatmul.mubr.msk.bf16.gmra.mxu0 %vm863_vm2, %v7316_v61  ;;  %v6083_v24 = vpop.f32.mrf.mxu1 }
 0x147   : > { %v681_v21 = vadd.f32 %v6046_v20, %v7571_v32  ;;  %6300 = vmatprep.mubr.msk.bf16.mxu0 %vm863_vm2, %v7319_v62  ;;  %v7661_v47 = vadd.f32 %v997_v60, %v660_v53  ;;  %v3020_v20 = vld [vmem:[#allocation2 + $0x22f] sm:$0xff] }
 0x148   : > { %v672_v7 = vpop.f32.mrf.mxu0  ;;  %v1013_v28 = vpop.f32.mrf.mxu1 }
 0x149   : > { %v673_v4 = vadd.f32 %v7571_v32, %v672_v7  ;;  %v7664_v38 = vadd.f32 %v6082_v11, %v681_v21  ;;  %v4356_v11 = vld [vmem:[%s6972_s23 + $0x8] sm:$0xff] }
 0x14a   : > { %v6047_v40 = vpop.f32.mrf.mxu0  ;;  %v6086_v48 = vpop.f32.mrf.mxu1  ;;  %6265 = vmatmul.mubr.msk.bf16.gmra.mxu1 %vm863_vm2, %v7457_v9  ;;  %v3015_v9 = vld [vmem:[#allocation2 + $0x1e7] sm:$0xff]  ;;  %4421 = vrot.lane.b32.xlu0 %v4356_v11, %s6850_s11 }
 0x14b   : > { %v684_v41 = vadd.f32 %v6047_v40, %v7571_v32  ;;  %v7669_v61 = vadd.f32 %v1010_v13, %v673_v4  ;;  %6268 = vmatprep.mubr.msk.bf16.mxu1 %vm863_vm2, %v7465_v31  ;;  %v3034_v44 = vpack.c.bf16 %v3016_v22, %v3015_v9  ;;  %v7702_v13 = vpack.c.bf16 %v2649_v54, %v2648_v59  ;;  %v3729_v7 = vld [vmem:[#allocation2 + $0x49] sm:$0xff]  ;;  %v3730_v4 = vld [vmem:[#allocation2 + $0x51] sm:$0xff] }
 0x14c   : > { %v675_v35 = vpop.f32.mrf.mxu0  ;;  %v1026_v50 = vpop.f32.mrf.mxu1  ;;  %v3361_v22 = vld [vmem:[#allocation2 + $0x68] sm:$0xff] }
 0x14d   : > { %v676_v62 = vadd.f32 %v7571_v32, %v675_v35  ;;  %v7674_v12 = vadd.f32 %v6083_v24, %v684_v41 }
 0x14e   : > { %v6050_v27 = vpop.f32.mrf.mxu0  ;;  %6301 = vmatmul.mubr.msk.bf16.gmra.mxu0 %vm863_vm2, %v7328_v5  ;;  %v6087_v46 = vpop.f32.mrf.mxu1 }
 0x14f   : > { %v697_v45 = vadd.f32 %v6050_v27, %v7571_v32  ;;  %6304 = vmatprep.mubr.msk.bf16.mxu0 %vm863_vm2, %v7331_v6  ;;  %v7681_v49 = vadd.f32 %v1013_v28, %v676_v62  ;;  %v4358_v62 = vld [vmem:[%s6972_s23 + $0x18] sm:$0xff] }
 0x150   : > { %v688_v31 = vpop.f32.mrf.mxu0  ;;  %v1029_v14 = vpop.f32.mrf.mxu1 }
 0x151   : > { %v689_v2 = vadd.f32 %v7571_v32, %v688_v31  ;;  %v7684_v18 = vadd.f32 %v6086_v48, %v697_v45  ;;  %v3761_v45 = vpack.c.bf16 %v3730_v4, %v3729_v7  ;;  %v3362_v31 = vld [vmem:[#allocation2 + $0x70] sm:$0xff] }
 0x152   : > { %v6051_v19 = vpop.f32.mrf.mxu0  ;;  %v6090_v37 = vpop.f32.mrf.mxu1  ;;  %6269 = vmatmul.mubr.msk.bf16.gmra.mxu1 %vm863_vm2, %v7468_v33  ;;  %v4357_v33 = vld [vmem:[%s6972_s23 + $0x10] sm:$0xff] }
 0x153   : > { %v700_v5 = vadd.f32 %v6051_v19, %v7571_v32  ;;  %v7690_v6 = vadd.f32 %v1026_v50, %v689_v2  ;;  %6272 = vmatprep.mubr.msk.bf16.mxu1 %vm863_vm2, %v7475_v51  ;;  %v3019_v51 = vld [vmem:[#allocation2 + $0x227] sm:$0xff]  ;;  %4423 = vrot.lane.b32.xlu1 %v4357_v33, %s6850_s11 }
 0x154   : > { %v691_v58 = vpop.f32.mrf.mxu0  ;;  %v1042_v60 = vpop.f32.mrf.mxu1  ;;  %v3036_v35 = vpack.c.bf16 %v3020_v20, %v3019_v51  ;;  %v3363_v19 = vld [vmem:[#allocation2 + $0x88] sm:$0xff] }
 0x155   : > { %v692_v42 = vadd.f32 %v7571_v32, %v691_v58  ;;  %v7696_v3 = vadd.f32 %v6087_v46, %v700_v5  ;;  %v4361_v58 = vld [vmem:[%s6972_s23 + $0x30] sm:$0xff] }
 0x156   : > { %v6054_v10 = vpop.f32.mrf.mxu0  ;;  %6305 = vmatmul.mubr.msk.bf16.gmra.mxu0 %vm863_vm2, %v3034_v44  ;;  %v6091_v53 = vpop.f32.mrf.mxu1  ;;  %v3364_v44 = vld [vmem:[#allocation2 + $0x90] sm:$0xff] }
 0x157   : > { %v713_v26 = vadd.f32 %v6054_v10, %v7571_v32  ;;  %6308 = vmatprep.mubr.msk.bf16.mxu0 %vm863_vm2, %v7550_v55  ;;  %v7706_v21 = vadd.f32 %v1029_v14, %v692_v42  ;;  %v4359_v55 = vld [vmem:[%s6972_s23 + $0x20] sm:$0xff]  ;;  %4425 = vrot.lane.b32.xlu1 %v4358_v62, %s6850_s11  ;;  %v3731_v42 = vld [vmem:[#allocation2 + $0x69] sm:$0xff]  ;;  %v3393_v11 = vpack.c.bf16 %v3364_v44, %v3363_v19 }
 0x158   : > { %v704_v24 = vpop.f32.mrf.mxu0  ;;  %v1045_v40 = vpop.f32.mrf.mxu1  ;;  %4427 = vrot.lane.b32.xlu0 %v4359_v55, %s6850_s11  ;;  %v3368_v19 = vld [vmem:[#allocation2 + $0xd0] sm:$0xff] }
 0x159   : > { %v705_v28 = vadd.f32 %v7571_v32, %v704_v24  ;;  %v7711_v41 = vadd.f32 %v6090_v37, %v713_v26  ;;  %v4360_v37 = vld [vmem:[%s6972_s23 + $0x28] sm:$0xff] }
 0x15a   : > { %v6055_v48 = vpop.f32.mrf.mxu0  ;;  %v6094_v27 = vpop.f32.mrf.mxu1  ;;  %6273 = vmatmul.mubr.msk.bf16.gmra.mxu1 %vm863_vm2, %v7702_v13  ;;  %v3733_v26 = vld [vmem:[#allocation2 + $0x89] sm:$0xff] }
 0x15b   : > { %v716_v50 = vadd.f32 %v6055_v48, %v7571_v32  ;;  %v7718_v46 = vadd.f32 %v1042_v60, %v705_v28  ;;  %6316 = vmatprep.mubr.msk.bf16.mxu1 %vm863_vm2, %v7351_v30  ;;  %v3392_v30 = vpack.c.bf16 %v3362_v31, %v3361_v22  ;;  %v3732_v60 = vld [vmem:[#allocation2 + $0x71] sm:$0xff]  ;;  %4429 = vrot.lane.b32.xlu1 %v4360_v37, %s6850_s11  ;;  %v4363_v48 = vld [vmem:[%s6972_s23 + $0x40] sm:$0xff] }
 0x15c   : > { %v707_v9 = vpop.f32.mrf.mxu0  ;;  %v1058_v14 = vpop.f32.mrf.mxu1  ;;  %4431 = vrot.lane.b32.xlu0 %v4361_v58, %s6850_s11  ;;  %v3762_v4 = vpack.c.bf16 %v3732_v60, %v3731_v42  ;;  %v4362_v28 = vld [vmem:[%s6972_s23 + $0x38] sm:$0xff]  ;;  %v4365_v37 = vld [vmem:[%s6972_s23 + $0x50] sm:$0xff] }
 0x15d   : > { %v708_v2 = vadd.f32 %v7571_v32, %v707_v9  ;;  %v7725_v36 = vadd.f32 %v6091_v53, %v716_v50  ;;  %v3734_v53 = vld [vmem:[#allocation2 + $0x91] sm:$0xff] }
 0x15e   : > { %v6058_v5 = vpop.f32.mrf.mxu0  ;;  %6309 = vmatmul.mubr.msk.bf16.gmra.mxu0 %vm863_vm2, %v3036_v35  ;;  %v6095_v54 = vpop.f32.mrf.mxu1  ;;  %v3763_v62 = vpack.c.bf16 %v3734_v53, %v3733_v26  ;;  %v3366_v9 = vld [vmem:[#allocation2 + $0xb0] sm:$0xff] }
 0x15f   : > { %v729_v59 = vadd.f32 %v6058_v5, %v7571_v32  ;;  %6352 = vmatprep.mubr.msk.bf16.mxu0 %vm863_vm2, %v3761_v45  ;;  %v7732_v10 = vadd.f32 %v1045_v40, %v708_v2  ;;  %4433 = vrot.lane.b32.xlu1 %v4362_v28, %s6850_s11  ;;  %v3365_v45 = vld [vmem:[#allocation2 + $0xa8] sm:$0xff]  ;;  %v3736_v42 = vld [vmem:[#allocation2 + $0xb1] sm:$0xff] }
 0x160   : > { %v720_v33 = vpop.f32.mrf.mxu0  ;;  %v1061_v20 = vpop.f32.mrf.mxu1  ;;  %4435 = vrot.lane.b32.xlu0 %v4363_v48, %s6850_s11  ;;  %v3367_v2 = vld [vmem:[#allocation2 + $0xc8] sm:$0xff]  ;;  %v3738_v26 = vld [vmem:[#allocation2 + $0xd1] sm:$0xff] }
 0x161   : > { %v721_v51 = vadd.f32 %v7571_v32, %v720_v33  ;;  %v7737_v24 = vadd.f32 %v6094_v27, %v729_v59  ;;  %v3395_v33 = vpack.c.bf16 %v3368_v19, %v3367_v2  ;;  %v4366_v48 = vld [vmem:[%s6972_s23 + $0x58] sm:$0xff] }
 0x162   : > { %v6059_v7 = vpop.f32.mrf.mxu0  ;;  %v6102_v35 = vpop.f32.mrf.mxu1  ;;  %6317 = vmatmul.mubr.msk.bf16.vlgmr.msra.gmra.mxu1 %vm863_vm2, %v3392_v30  ;;  %v3394_v30 = vpack.c.bf16 %v3366_v9, %v3365_v45 }
 0x163   : > { %v732_v40 = vadd.f32 %v6059_v7, %v7571_v32  ;;  %v7743_v55 = vadd.f32 %v1058_v14, %v721_v51  ;;  %v1445_v50 = vadd.f32 %v6102_v35, %v7584_v0  ;;  %6320 = vmatprep.mubr.msk.bf16.mxu1 %vm863_vm2, %v3393_v11  ;;  %v4364_v0 = vld [vmem:[%s6972_s23 + $0x48] sm:$0xff] }
 0x164   : > { %v723_v27 = vpop.f32.mrf.mxu0  ;;  %v1316_v31 = vpop.f32.mrf.mxu1  ;;  %4437 = vrot.lane.b32.xlu1 %v4364_v0, %s6850_s11  ;;  %v3737_v11 = vld [vmem:[#allocation2 + $0xc9] sm:$0xff]  ;;  %4439 = vrot.lane.b32.xlu0 %v4365_v37, %s6850_s11 }
 0x165   : > { %v724_v22 = vadd.f32 %v7571_v32, %v723_v27  ;;  %v7750_v14 = vadd.f32 %v6095_v54, %v732_v40  ;;  %v1443_v44 = vadd.f32 %v1316_v31, %v7589_v25  ;;  %v3735_v32 = vld [vmem:[#allocation2 + $0xa9] sm:$0xff] }
 0x166   : > { %v6138_v5 = vpop.f32.mrf.mxu0  ;;  %6353 = vmatmul.mubr.msk.bf16.vlgmr.msra.gmra.mxu0 %vm863_vm2, %v3762_v4  ;;  %v6103_v58 = vpop.f32.mrf.mxu1  ;;  %v3764_v28 = vpack.c.bf16 %v3736_v42, %v3735_v32  ;;  %v3370_v27 = vld [vmem:[#allocation2 + $0xf0] sm:$0xff] }
 0x167   : > { %v7756_v59 = vadd.f32 %v6138_v5, %v1445_v50  ;;  %6356 = vmatprep.mubr.msk.bf16.mxu0 %vm863_vm2, %v3763_v62  ;;  %v7759_v60 = vadd.f32 %v1061_v20, %v724_v22  ;;  %v1446_v25 = vadd.f32 %v6103_v58, %v7594_v16  ;;  %v4367_v20 = vld [vmem:[%s6972_s23 + $0x60] sm:$0xff]  ;;  %v3765_v16 = vpack.c.bf16 %v3738_v26, %v3737_v11  ;;  %v3371_v22 = vld [vmem:[#allocation2 + $0x108] sm:$0xff]  ;;  %v3372_v31 = vld [vmem:[#allocation2 + $0x110] sm:$0xff] }
 0x168   : > { %v1686_v54 = vpop.f32.mrf.mxu0  ;;  %v1319_v53 = vpop.f32.mrf.mxu1  ;;  %4441 = vrot.lane.b32.xlu1 %v4366_v48, %s6850_s11  ;;  %4443 = vrot.lane.b32.xlu0 %v4367_v20, %s6850_s11  ;;  %v4369_v5 = vld [vmem:[%s6972_s23 + $0x70] sm:$0xff]  ;;  %v3397_v42 = vpack.c.bf16 %v3372_v31, %v3371_v22 }
 0x169   : > { %v7764_v51 = vadd.f32 %v1686_v54, %v1443_v44  ;;  %v1444_v7 = vadd.f32 %v1319_v53, %v7601_v56  ;;  %v3369_v56 = vld [vmem:[#allocation2 + $0xe8] sm:$0xff]  ;;  %v3742_v54 = vld [vmem:[#allocation2 + $0x111] sm:$0xff] }
 0x16a   : > { %v6139_v4 = vpop.f32.mrf.mxu0  ;;  %v6106_v40 = vpop.f32.mrf.mxu1  ;;  %6321 = vmatmul.mubr.msk.bf16.gmra.mxu1 %vm863_vm2, %v3394_v30  ;;  %v4368_v44 = vld [vmem:[%s6972_s23 + $0x68] sm:$0xff]  ;;  %v3396_v37 = vpack.c.bf16 %v3370_v27, %v3369_v56  ;;  %v3740_v30 = vld [vmem:[#allocation2 + $0xf1] sm:$0xff] }
 0x16b   : > { %v7769_v35 = vadd.f32 %v6139_v4, %v1446_v25  ;;  %v1449_v62 = vadd.f32 %v6106_v40, %v7604_v29  ;;  %6324 = vmatprep.mubr.msk.bf16.mxu1 %vm863_vm2, %v3395_v33  ;;  %v3739_v58 = vld [vmem:[#allocation2 + $0xe9] sm:$0xff]  ;;  %v4370_v4 = vld [vmem:[%s6972_s23 + $0x78] sm:$0xff] }
 0x16c   : > { %v1689_v50 = vpop.f32.mrf.mxu0  ;;  %v1332_v45 = vpop.f32.mrf.mxu1  ;;  %4445 = vrot.lane.b32.xlu1 %v4368_v44, %s6850_s11  ;;  %v3741_v25 = vld [vmem:[#allocation2 + $0x109] sm:$0xff]  ;;  %4447 = vrot.lane.b32.xlu0 %v4369_v5, %s6850_s11 }
 0x16d   : > { %v7776_v9 = vadd.f32 %v1689_v50, %v1444_v7  ;;  %v1447_v2 = vadd.f32 %v1332_v45, %v7609_v34  ;;  %v3766_v7 = vpack.c.bf16 %v3740_v30, %v3739_v58  ;;  %v3375_v27 = vld [vmem:[#allocation2 + $0x148] sm:$0xff]  ;;  %v3376_v45 = vld [vmem:[#allocation2 + $0x150] sm:$0xff] }
 0x16e   : > { %v6142_v19 = vpop.f32.mrf.mxu0  ;;  %6357 = vmatmul.mubr.msk.bf16.gmra.mxu0 %vm863_vm2, %v3764_v28  ;;  %v6107_v29 = vpop.f32.mrf.mxu1  ;;  %v4371_v28 = vld [vmem:[%s6972_s23 + $0x80] sm:$0xff]  ;;  %v3399_v30 = vpack.c.bf16 %v3376_v45, %v3375_v27 }
 0x16f   : > { %v7782_v0 = vadd.f32 %v6142_v19, %v1449_v62  ;;  %6360 = vmatprep.mubr.msk.bf16.mxu0 %vm863_vm2, %v3765_v16  ;;  %v1450_v32 = vadd.f32 %v6107_v29, %v7614_v57  ;;  %v3767_v57 = vpack.c.bf16 %v3742_v54, %v3741_v25  ;;  %v3374_v62 = vld [vmem:[#allocation2 + $0x130] sm:$0xff] }
 0x170   : > { %v1702_v34 = vpop.f32.mrf.mxu0  ;;  %v1335_v33 = vpop.f32.mrf.mxu1  ;;  %4449 = vrot.lane.b32.xlu1 %v4370_v4, %s6850_s11  ;;  %4451 = vrot.lane.b32.xlu0 %v4371_v28, %s6850_s11  ;;  %v4373_v19 = vld [vmem:[%s6972_s23 + $0x90] sm:$0xff] }
 0x171   : > { %v7788_v11 = vadd.f32 %v1702_v34, %v1447_v2  ;;  %v1448_v26 = vadd.f32 %v1335_v33, %v7621_v8  ;;  %v3373_v8 = vld [vmem:[#allocation2 + $0x128] sm:$0xff]  ;;  %v3746_v34 = vld [vmem:[#allocation2 + $0x151] sm:$0xff] }
 0x172   : > { %v6143_v53 = vpop.f32.mrf.mxu0  ;;  %v6110_v48 = vpop.f32.mrf.mxu1  ;;  %6325 = vmatmul.mubr.msk.bf16.gmra.mxu1 %vm863_vm2, %v3396_v37  ;;  %v4372_v2 = vld [vmem:[%s6972_s23 + $0x88] sm:$0xff]  ;;  %v3398_v5 = vpack.c.bf16 %v3374_v62, %v3373_v8  ;;  %v3744_v37 = vld [vmem:[#allocation2 + $0x131] sm:$0xff] }
 0x173   : > { %v7793_v20 = vadd.f32 %v6143_v53, %v1450_v32  ;;  %v1453_v40 = vadd.f32 %v6110_v48, %v7624_v63  ;;  %6328 = vmatprep.mubr.msk.bf16.mxu1 %vm863_vm2, %v3397_v42  ;;  %v3743_v29 = vld [vmem:[#allocation2 + $0x129] sm:$0xff]  ;;  %v4374_v53 = vld [vmem:[%s6972_s23 + $0x98] sm:$0xff] }
 0x174   : > { %v1705_v16 = vpop.f32.mrf.mxu0  ;;  %v1348_v50 = vpop.f32.mrf.mxu1  ;;  %4453 = vrot.lane.b32.xlu1 %v4372_v2, %s6850_s11  ;;  %v3745_v32 = vld [vmem:[#allocation2 + $0x149] sm:$0xff]  ;;  %4455 = vrot.lane.b32.xlu0 %v4373_v19, %s6850_s11 }
 0x175   : > { %v7800_v56 = vadd.f32 %v1705_v16, %v1448_v26  ;;  %v1451_v22 = vadd.f32 %v1348_v50, %v7629_v43  ;;  %v3768_v26 = vpack.c.bf16 %v3744_v37, %v3743_v29  ;;  %v3379_v62 = vld [vmem:[#allocation2 + $0x188] sm:$0xff]  ;;  %v3380_v50 = vld [vmem:[#allocation2 + $0x190] sm:$0xff] }
 0x176   : > { %v6146_v31 = vpop.f32.mrf.mxu0  ;;  %6361 = vmatmul.mubr.msk.bf16.gmra.mxu0 %vm863_vm2, %v3766_v7  ;;  %v6111_v63 = vpop.f32.mrf.mxu1  ;;  %v4375_v7 = vld [vmem:[%s6972_s23 + $0xa0] sm:$0xff]  ;;  %v3401_v37 = vpack.c.bf16 %v3380_v50, %v3379_v62 }
 0x177   : > { %v7806_v44 = vadd.f32 %v6146_v31, %v1453_v40  ;;  %6364 = vmatprep.mubr.msk.bf16.mxu0 %vm863_vm2, %v3767_v57  ;;  %v1454_v58 = vadd.f32 %v6111_v63, %v7634_v39  ;;  %v3769_v39 = vpack.c.bf16 %v3746_v34, %v3745_v32  ;;  %v3378_v40 = vld [vmem:[#allocation2 + $0x170] sm:$0xff] }
 0x178   : > { %v1718_v43 = vpop.f32.mrf.mxu0  ;;  %v1351_v42 = vpop.f32.mrf.mxu1  ;;  %4457 = vrot.lane.b32.xlu1 %v4374_v53, %s6850_s11  ;;  %4459 = vrot.lane.b32.xlu0 %v4375_v7, %s6850_s11  ;;  %v4377_v31 = vld [vmem:[%s6972_s23 + $0xb0] sm:$0xff] }
 0x179   : > { %v7812_v25 = vadd.f32 %v1718_v43, %v1451_v22  ;;  %v1452_v54 = vadd.f32 %v1351_v42, %v7641_v23  ;;  %v3377_v23 = vld [vmem:[#allocation2 + $0x168] sm:$0xff]  ;;  %v3750_v43 = vld [vmem:[#allocation2 + $0x191] sm:$0xff] }
 0x17a   : > { %v6147_v33 = vpop.f32.mrf.mxu0  ;;  %v6114_v4 = vpop.f32.mrf.mxu1  ;;  %6329 = vmatmul.mubr.msk.bf16.gmra.mxu1 %vm863_vm2, %v3398_v5  ;;  %v4376_v22 = vld [vmem:[%s6972_s23 + $0xa8] sm:$0xff]  ;;  %v3400_v19 = vpack.c.bf16 %v3378_v40, %v3377_v23  ;;  %v3748_v5 = vld [vmem:[#allocation2 + $0x171] sm:$0xff] }
 0x17b   : > { %v7817_v28 = vadd.f32 %v6147_v33, %v1454_v58  ;;  %v1457_v48 = vadd.f32 %v6114_v4, %v7644_v1  ;;  %6332 = vmatprep.mubr.msk.bf16.mxu1 %vm863_vm2, %v3399_v30  ;;  %v3747_v63 = vld [vmem:[#allocation2 + $0x169] sm:$0xff]  ;;  %v4378_v33 = vld [vmem:[%s6972_s23 + $0xb8] sm:$0xff] }
 0x17c   : > { %v1721_v57 = vpop.f32.mrf.mxu0  ;;  %v1364_v16 = vpop.f32.mrf.mxu1  ;;  %4461 = vrot.lane.b32.xlu1 %v4376_v22, %s6850_s11  ;;  %v3749_v58 = vld [vmem:[#allocation2 + $0x189] sm:$0xff]  ;;  %4463 = vrot.lane.b32.xlu0 %v4377_v31, %s6850_s11 }
 0x17d   : > { %v7824_v8 = vadd.f32 %v1721_v57, %v1452_v54  ;;  %v1455_v27 = vadd.f32 %v1364_v16, %v7649_v52  ;;  %v3770_v54 = vpack.c.bf16 %v3748_v5, %v3747_v63  ;;  %v3383_v40 = vld [vmem:[#allocation2 + $0x1c8] sm:$0xff]  ;;  %v3384_v16 = vld [vmem:[#allocation2 + $0x1d0] sm:$0xff] }
 0x17e   : > { %v6150_v45 = vpop.f32.mrf.mxu0  ;;  %6365 = vmatmul.mubr.msk.bf16.gmra.mxu0 %vm863_vm2, %v3768_v26  ;;  %v6115_v1 = vpop.f32.mrf.mxu1  ;;  %v4379_v26 = vld [vmem:[%s6972_s23 + $0xc0] sm:$0xff]  ;;  %v3403_v5 = vpack.c.bf16 %v3384_v16, %v3383_v40  ;;  %v4384_v40 = vld [vmem:[%s6972_s23 + $0xe8] sm:$0xff]  ;;  %v4385_v16 = vld [vmem:[%s6972_s23 + $0xf0] sm:$0xff] }
 0x17f   : > { %v7830_v2 = vadd.f32 %v6150_v45, %v1457_v48  ;;  %6368 = vmatprep.mubr.msk.bf16.mxu0 %vm863_vm2, %v3769_v39  ;;  %v1458_v29 = vadd.f32 %v6115_v1, %v7654_v17  ;;  %v3771_v17 = vpack.c.bf16 %v3750_v43, %v3749_v58  ;;  %v3382_v48 = vld [vmem:[#allocation2 + $0x1b0] sm:$0xff] }
 0x180   : > { %v1734_v52 = vpop.f32.mrf.mxu0  ;;  %v1367_v30 = vpop.f32.mrf.mxu1  ;;  %4465 = vrot.lane.b32.xlu1 %v4378_v33, %s6850_s11  ;;  %4467 = vrot.lane.b32.xlu0 %v4379_v26, %s6850_s11  ;;  %v4381_v45 = vld [vmem:[%s6972_s23 + $0xd0] sm:$0xff] }
 0x181   : > { %v7836_v32 = vadd.f32 %v1734_v52, %v1455_v27  ;;  %v1456_v34 = vadd.f32 %v1367_v30, %v7661_v47  ;;  %v3381_v47 = vld [vmem:[#allocation2 + $0x1a8] sm:$0xff]  ;;  %v3754_v52 = vld [vmem:[#allocation2 + $0x1d1] sm:$0xff] }
 0x182   : > { %v6151_v42 = vpop.f32.mrf.mxu0  ;;  %v6118_v53 = vpop.f32.mrf.mxu1  ;;  %6333 = vmatmul.mubr.msk.bf16.gmra.mxu1 %vm863_vm2, %v3400_v19  ;;  %v4380_v27 = vld [vmem:[%s6972_s23 + $0xc8] sm:$0xff]  ;;  %v3402_v31 = vpack.c.bf16 %v3382_v48, %v3381_v47  ;;  %v3752_v19 = vld [vmem:[#allocation2 + $0x1b1] sm:$0xff] }
 0x183   : > { %v7841_v7 = vadd.f32 %v6151_v42, %v1458_v29  ;;  %v1461_v4 = vadd.f32 %v6118_v53, %v7664_v38  ;;  %6336 = vmatprep.mubr.msk.bf16.mxu1 %vm863_vm2, %v3401_v37  ;;  %v3751_v1 = vld [vmem:[#allocation2 + $0x1a9] sm:$0xff]  ;;  %v4382_v42 = vld [vmem:[%s6972_s23 + $0xd8] sm:$0xff] }
 0x184   : > { %v1737_v39 = vpop.f32.mrf.mxu0  ;;  %v1380_v57 = vpop.f32.mrf.mxu1  ;;  %4469 = vrot.lane.b32.xlu1 %v4380_v27, %s6850_s11  ;;  %v3753_v29 = vld [vmem:[#allocation2 + $0x1c9] sm:$0xff]  ;;  %4471 = vrot.lane.b32.xlu0 %v4381_v45, %s6850_s11  ;;  %v3756_v45 = vld [vmem:[#allocation2 + $0x1f1] sm:$0xff] }
 0x185   : > { %v7848_v23 = vadd.f32 %v1737_v39, %v1456_v34  ;;  %v1459_v62 = vadd.f32 %v1380_v57, %v7669_v61  ;;  %v3772_v34 = vpack.c.bf16 %v3752_v19, %v3751_v1  ;;  %v3755_v27 = vld [vmem:[#allocation2 + $0x1e9] sm:$0xff] }
 0x186   : > { %v6154_v50 = vpop.f32.mrf.mxu0  ;;  %6369 = vmatmul.mubr.msk.bf16.gmra.mxu0 %vm863_vm2, %v3770_v54  ;;  %v6119_v38 = vpop.f32.mrf.mxu1  ;;  %v4383_v54 = vld [vmem:[%s6972_s23 + $0xe0] sm:$0xff] }
 0x187   : > { %v7854_v22 = vadd.f32 %v6154_v50, %v1461_v4  ;;  %6372 = vmatprep.mubr.msk.bf16.mxu0 %vm863_vm2, %v3771_v17  ;;  %v1462_v63 = vadd.f32 %v6119_v38, %v7674_v12  ;;  %v3773_v12 = vpack.c.bf16 %v3754_v52, %v3753_v29  ;;  %v3386_v4 = vld [vmem:[#allocation2 + $0x1f0] sm:$0xff] }
 0x188   : > { %v1750_v61 = vpop.f32.mrf.mxu0  ;;  %v1383_v37 = vpop.f32.mrf.mxu1  ;;  %4473 = vrot.lane.b32.xlu1 %v4382_v42, %s6850_s11  ;;  %4475 = vrot.lane.b32.xlu0 %v4383_v54, %s6850_s11 }
 0x189   : > { %v7860_v58 = vadd.f32 %v1750_v61, %v1459_v62  ;;  %v1460_v43 = vadd.f32 %v1383_v37, %v7681_v49  ;;  %v3385_v49 = vld [vmem:[#allocation2 + $0x1e8] sm:$0xff]  ;;  %v3774_v61 = vpack.c.bf16 %v3756_v45, %v3755_v27 }
 0x18a   : > { %v6155_v30 = vpop.f32.mrf.mxu0  ;;  %v6122_v33 = vpop.f32.mrf.mxu1  ;;  %6337 = vmatmul.mubr.msk.bf16.gmra.mxu1 %vm863_vm2, %v3402_v31  ;;  %v3404_v50 = vpack.c.bf16 %v3386_v4, %v3385_v49 }
 0x18b   : > { %v7865_v26 = vadd.f32 %v6155_v30, %v1462_v63  ;;  %v1465_v53 = vadd.f32 %v6122_v33, %v7684_v18  ;;  %6340 = vmatprep.mubr.msk.bf16.mxu1 %vm863_vm2, %v3403_v5  ;;  %v4386_v5 = vld [vmem:[%s6972_s23 + $0xf8] sm:$0xff]  ;;  %v3390_v30 = vld [vmem:[#allocation2 + $0x230] sm:$0xff] }
 0x18c   : > { %v1753_v17 = vpop.f32.mrf.mxu0  ;;  %v1396_v39 = vpop.f32.mrf.mxu1  ;;  %4477 = vrot.lane.b32.xlu1 %v4384_v40, %s6850_s11  ;;  %4479 = vrot.lane.b32.xlu0 %v4385_v16, %s6850_s11 }
 0x18d   : > { %v7872_v47 = vadd.f32 %v1753_v17, %v1460_v43  ;;  %v1463_v48 = vadd.f32 %v1396_v39, %v7690_v6  ;;  %v3389_v43 = vld [vmem:[#allocation2 + $0x228] sm:$0xff]  ;;  %v3760_v17 = vld [vmem:[#allocation2 + $0x231] sm:$0xff] }
 0x18e   : > { %v6158_v57 = vpop.f32.mrf.mxu0  ;;  %6373 = vmatmul.mubr.msk.bf16.gmra.mxu0 %vm863_vm2, %v3772_v34  ;;  %v6123_v62 = vpop.f32.mrf.mxu1 }
 0x18f   : > { %v7878_v18 = vadd.f32 %v6158_v57, %v1465_v53  ;;  %6376 = vmatprep.mubr.msk.bf16.mxu0 %vm863_vm2, %v3773_v12  ;;  %v1466_v38 = vadd.f32 %v6123_v62, %v7696_v3  ;;  %v3406_v53 = vpack.c.bf16 %v3390_v30, %v3389_v43 }
 0x190   : > { %v1766_v31 = vpop.f32.mrf.mxu0  ;;  %v1399_v6 = vpop.f32.mrf.mxu1  ;;  %4481 = vrot.lane.b32.xlu1 %v4386_v5, %s6850_s11 }
 0x191   : > { %v7884_v1 = vadd.f32 %v1766_v31, %v1463_v48  ;;  %v1464_v19 = vadd.f32 %v1399_v6, %v7706_v21 }
 0x192   : > { %v6159_v63 = vpop.f32.mrf.mxu0  ;;  %v6126_v29 = vpop.f32.mrf.mxu1  ;;  %6341 = vmatmul.mubr.msk.bf16.gmra.mxu1 %vm863_vm2, %v3404_v50 }
 0x193   : > { %v7888_v52 = vadd.f32 %v6159_v63, %v1466_v38  ;;  %v1469_v3 = vadd.f32 %v6126_v29, %v7711_v41  ;;  %6344 = vmatprep.mubr.msk.bf16.mxu1 %vm863_vm2, %v7553_v15  ;;  %v3759_v41 = vld [vmem:[#allocation2 + $0x229] sm:$0xff] }
 0x194   : > { %v1769_v37 = vpop.f32.mrf.mxu0  ;;  %v1412_v34 = vpop.f32.mrf.mxu1  ;;  %v3776_v57 = vpack.c.bf16 %v3760_v17, %v3759_v41 }
 0x195   : > { %v7895_v21 = vadd.f32 %v1769_v37, %v1464_v19  ;;  %v1467_v42 = vadd.f32 %v1412_v34, %v7718_v46 }
 0x196   : > { %v6162_v54 = vpop.f32.mrf.mxu0  ;;  %6377 = vmatmul.mubr.msk.bf16.gmra.mxu0 %vm863_vm2, %v3774_v61  ;;  %v6127_v33 = vpop.f32.mrf.mxu1 }
 0x197   : > { %v7899_v12 = vadd.f32 %v6162_v54, %v1469_v3  ;;  %6380 = vmatprep.mubr.msk.bf16.mxu0 %vm863_vm2, %v7702_v13  ;;  %v1470_v15 = vadd.f32 %v6127_v33, %v7725_v36 }
 0x198   : > { %v1782_v49 = vpop.f32.mrf.mxu0  ;;  %v1415_v4 = vpop.f32.mrf.mxu1 }
 0x199   : > { %v7904_v39 = vadd.f32 %v1782_v49, %v1467_v42  ;;  %v1468_v46 = vadd.f32 %v1415_v4, %v7732_v10 }
 0x19a   : > { %v6163_v48 = vpop.f32.mrf.mxu0  ;;  %v6130_v40 = vpop.f32.mrf.mxu1  ;;  %6345 = vmatmul.mubr.msk.bf16.gmra.mxu1 %vm863_vm2, %v3406_v53 }
 0x19b   : > { %v7907_v16 = vadd.f32 %v6163_v48, %v1470_v15  ;;  %v1473_v62 = vadd.f32 %v6130_v40, %v7737_v24 }
 0x19c   : > { %v1785_v13 = vpop.f32.mrf.mxu0  ;;  %v1428_v50 = vpop.f32.mrf.mxu1 }
 0x19d   : > { %v7911_v27 = vadd.f32 %v1785_v13, %v1468_v46  ;;  %v1471_v36 = vadd.f32 %v1428_v50, %v7743_v55 }
 0x19e   : > { %v6166_v45 = vpop.f32.mrf.mxu0  ;;  %6381 = vmatmul.mubr.msk.bf16.gmra.mxu0 %vm863_vm2, %v3776_v57  ;;  %v6131_v38 = vpop.f32.mrf.mxu1 }
 0x19f   : > { %v7915_v10 = vadd.f32 %v6166_v45, %v1473_v62  ;;  %v1474_v31 = vadd.f32 %v6131_v38, %v7750_v14 }
 0x1a0   : > { %v1798_v6 = vpop.f32.mrf.mxu0  ;;  %v1431_v19 = vpop.f32.mrf.mxu1 }
 0x1a1   : > { %v7918_v63 = vadd.f32 %v1798_v6, %v1471_v36  ;;  %v1472_v24 = vadd.f32 %v1431_v19, %v7759_v60 }
 0x1a2   : > { %v6167_v61 = vpop.f32.mrf.mxu0  ;;  %v6174_v29 = vpop.f32.mrf.mxu1 }
 0x1a3   : > { %v7921_v5 = vadd.f32 %v6167_v61, %v1474_v31  ;;  %v2186_v55 = vadd.f32 %v6174_v29, %v7756_v59 }
 0x1a4   : > { %v1801_v3 = vpop.f32.mrf.mxu0  ;;  %v2057_v43 = vpop.f32.mrf.mxu1 }
 0x1a5   : > { %v7924_v37 = vadd.f32 %v1801_v3, %v1472_v24  ;;  %v2184_v30 = vadd.f32 %v2057_v43, %v7764_v51 }
 0x1a6   : > { %v6210_v34 = vpop.f32.mrf.mxu0  ;;  %v6175_v14 = vpop.f32.mrf.mxu1 }
 0x1a7   : > { %v7927_v42 = vadd.f32 %v6210_v34, %v2186_v55  ;;  %v2187_v54 = vadd.f32 %v6175_v14, %v7769_v35 }
 0x1a8   : > { %v2427_v33 = vpop.f32.mrf.mxu0  ;;  %v2060_v60 = vpop.f32.mrf.mxu1 }
 0x1a9   : > { %v7930_v53 = vadd.f32 %v2427_v33, %v2184_v30  ;;  %v2185_v41 = vadd.f32 %v2060_v60, %v7776_v9 }
 0x1aa   : > { %v6211_v17 = vpop.f32.mrf.mxu0  ;;  %v6178_v59 = vpop.f32.mrf.mxu1 }
 0x1ab   : > { %v7933_v15 = vadd.f32 %v6211_v17, %v2187_v54  ;;  %v2190_v49 = vadd.f32 %v6178_v59, %v7782_v0 }
 0x1ac   : > { %v2430_v4 = vpop.f32.mrf.mxu0  ;;  %v2073_v51 = vpop.f32.mrf.mxu1 }
 0x1ad   : > { %v7936_v46 = vadd.f32 %v2430_v4, %v2185_v41  ;;  %v2188_v48 = vadd.f32 %v2073_v51, %v7788_v11 }
 0x1ae   : > { %v6214_v57 = vpop.f32.mrf.mxu0  ;;  %v6179_v35 = vpop.f32.mrf.mxu1 }
 0x1af   : > { %v7939_v40 = vadd.f32 %v6214_v57, %v2190_v49  ;;  %v2191_v62 = vadd.f32 %v6179_v35, %v7793_v20 }
 0x1b0   : > { %v2443_v13 = vpop.f32.mrf.mxu0  ;;  %v2076_v9 = vpop.f32.mrf.mxu1 }
 0x1b1   : > { %v7942_v50 = vadd.f32 %v2443_v13, %v2188_v48  ;;  %v2189_v36 = vadd.f32 %v2076_v9, %v7800_v56 }
 0x1b2   : > { %v6215_v45 = vpop.f32.mrf.mxu0  ;;  %v6182_v0 = vpop.f32.mrf.mxu1 }
 0x1b3   : > { %v7945_v38 = vadd.f32 %v6215_v45, %v2191_v62  ;;  %v2194_v31 = vadd.f32 %v6182_v0, %v7806_v44 }
 0x1b4   : > { %v2446_v6 = vpop.f32.mrf.mxu0  ;;  %v2089_v11 = vpop.f32.mrf.mxu1 }
 0x1b5   : > { %v7948_v19 = vadd.f32 %v2446_v6, %v2189_v36  ;;  %v2192_v24 = vadd.f32 %v2089_v11, %v7812_v25 }
 0x1b6   : > { %v6218_v61 = vpop.f32.mrf.mxu0  ;;  %v6183_v20 = vpop.f32.mrf.mxu1 }
 0x1b7   : > { %v7951_v29 = vadd.f32 %v6218_v61, %v2194_v31  ;;  %v2195_v55 = vadd.f32 %v6183_v20, %v7817_v28 }
 0x1b8   : > { %v2459_v3 = vpop.f32.mrf.mxu0  ;;  %v2092_v56 = vpop.f32.mrf.mxu1 }
 0x1b9   : > { %v7954_v43 = vadd.f32 %v2459_v3, %v2192_v24  ;;  %v2193_v30 = vadd.f32 %v2092_v56, %v7824_v8 }
 0x1ba   : > { %v6219_v34 = vpop.f32.mrf.mxu0  ;;  %v6186_v44 = vpop.f32.mrf.mxu1 }
 0x1bb   : > { %v7957_v14 = vadd.f32 %v6219_v34, %v2195_v55  ;;  %v2198_v54 = vadd.f32 %v6186_v44, %v7830_v2 }
 0x1bc   : > { %v2462_v33 = vpop.f32.mrf.mxu0  ;;  %v2105_v25 = vpop.f32.mrf.mxu1 }
 0x1bd   : > { %v7960_v60 = vadd.f32 %v2462_v33, %v2193_v30  ;;  %v2196_v41 = vadd.f32 %v2105_v25, %v7836_v32 }
 0x1be   : > { %v6222_v17 = vpop.f32.mrf.mxu0  ;;  %v6187_v28 = vpop.f32.mrf.mxu1 }
 0x1bf   : > { %v7963_v59 = vadd.f32 %v6222_v17, %v2198_v54  ;;  %v2199_v49 = vadd.f32 %v6187_v28, %v7841_v7 }
 0x1c0   : > { %v2475_v4 = vpop.f32.mrf.mxu0  ;;  %v2108_v8 = vpop.f32.mrf.mxu1 }
 0x1c1   : > { %v7966_v51 = vadd.f32 %v2475_v4, %v2196_v41  ;;  %v2197_v48 = vadd.f32 %v2108_v8, %v7848_v23 }
 0x1c2   : > { %v6223_v57 = vpop.f32.mrf.mxu0  ;;  %v6190_v2 = vpop.f32.mrf.mxu1 }
 0x1c3   : > { %v7969_v35 = vadd.f32 %v6223_v57, %v2199_v49  ;;  %v2202_v62 = vadd.f32 %v6190_v2, %v7854_v22 }
 0x1c4   : > { %v2478_v13 = vpop.f32.mrf.mxu0  ;;  %v2121_v32 = vpop.f32.mrf.mxu1 }
 0x1c5   : > { %v7972_v9 = vadd.f32 %v2478_v13, %v2197_v48  ;;  %v2200_v36 = vadd.f32 %v2121_v32, %v7860_v58 }
 0x1c6   : > { %v6226_v45 = vpop.f32.mrf.mxu0  ;;  %v6191_v7 = vpop.f32.mrf.mxu1 }
 0x1c7   : > { %v7975_v0 = vadd.f32 %v6226_v45, %v2202_v62  ;;  %v2203_v31 = vadd.f32 %v6191_v7, %v7865_v26 }
 0x1c8   : > { %v2491_v6 = vpop.f32.mrf.mxu0  ;;  %v2124_v23 = vpop.f32.mrf.mxu1 }
 0x1c9   : > { %v7978_v11 = vadd.f32 %v2491_v6, %v2200_v36  ;;  %v2201_v24 = vadd.f32 %v2124_v23, %v7872_v47 }
 0x1ca   : > { %v6227_v61 = vpop.f32.mrf.mxu0  ;;  %v6194_v22 = vpop.f32.mrf.mxu1 }
 0x1cb   : > { %v7981_v20 = vadd.f32 %v6227_v61, %v2203_v31  ;;  %v2206_v55 = vadd.f32 %v6194_v22, %v7878_v18 }
 0x1cc   : > { %v2494_v3 = vpop.f32.mrf.mxu0  ;;  %v2137_v58 = vpop.f32.mrf.mxu1 }
 0x1cd   : > { %v7984_v56 = vadd.f32 %v2494_v3, %v2201_v24  ;;  %v2204_v30 = vadd.f32 %v2137_v58, %v7884_v1 }
 0x1ce   : > { %v6230_v34 = vpop.f32.mrf.mxu0  ;;  %v6195_v26 = vpop.f32.mrf.mxu1 }
 0x1cf   : > { %v7987_v44 = vadd.f32 %v6230_v34, %v2206_v55  ;;  %v2207_v54 = vadd.f32 %v6195_v26, %v7888_v52 }
 0x1d0   : > { %v2507_v33 = vpop.f32.mrf.mxu0  ;;  %v2140_v47 = vpop.f32.mrf.mxu1 }
 0x1d1   : > { %v7990_v25 = vadd.f32 %v2507_v33, %v2204_v30  ;;  %v2205_v41 = vadd.f32 %v2140_v47, %v7895_v21 }
 0x1d2   : > { %v6231_v17 = vpop.f32.mrf.mxu0  ;;  %v6198_v18 = vpop.f32.mrf.mxu1 }
 0x1d3   : > { %v7993_v28 = vadd.f32 %v6231_v17, %v2207_v54  ;;  %v2210_v49 = vadd.f32 %v6198_v18, %v7899_v12 }
 0x1d4   : > { %v2510_v4 = vpop.f32.mrf.mxu0  ;;  %v2153_v1 = vpop.f32.mrf.mxu1 }
 0x1d5   : > { %v7996_v8 = vadd.f32 %v2510_v4, %v2205_v41  ;;  %v2208_v48 = vadd.f32 %v2153_v1, %v7904_v39 }
 0x1d6   : > { %v6234_v57 = vpop.f32.mrf.mxu0  ;;  %v6199_v52 = vpop.f32.mrf.mxu1 }
 0x1d7   : > { %v7999_v2 = vadd.f32 %v6234_v57, %v2210_v49  ;;  %v2211_v62 = vadd.f32 %v6199_v52, %v7907_v16 }
 0x1d8   : > { %v2523_v13 = vpop.f32.mrf.mxu0  ;;  %v2156_v21 = vpop.f32.mrf.mxu1 }
 0x1d9   : > { %v8002_v32 = vadd.f32 %v2523_v13, %v2208_v48  ;;  %v2209_v36 = vadd.f32 %v2156_v21, %v7911_v27 }
 0x1da   : > { %v6235_v45 = vpop.f32.mrf.mxu0  ;;  %v6202_v12 = vpop.f32.mrf.mxu1 }
 0x1db   : > { %v8005_v7 = vadd.f32 %v6235_v45, %v2211_v62  ;;  %v2214_v31 = vadd.f32 %v6202_v12, %v7915_v10 }
 0x1dc   : > { %v2526_v6 = vpop.f32.mrf.mxu0  ;;  %v2169_v39 = vpop.f32.mrf.mxu1 }
 0x1dd   : > { %v8008_v23 = vadd.f32 %v2526_v6, %v2209_v36  ;;  %v2212_v24 = vadd.f32 %v2169_v39, %v7918_v63 }
 0x1de   : > { %v6238_v61 = vpop.f32.mrf.mxu0  ;;  %v6203_v16 = vpop.f32.mrf.mxu1 }
 0x1df   : > { %v8011_v22 = vadd.f32 %v6238_v61, %v2214_v31  ;;  %v2215_v55 = vadd.f32 %v6203_v16, %v7921_v5 }
 0x1e0   : > { %v2539_v3 = vpop.f32.mrf.mxu0  ;;  %v2172_v27 = vpop.f32.mrf.mxu1 }
 0x1e1   : > { %v8014_v58 = vadd.f32 %v2539_v3, %v2212_v24  ;;  %v2213_v30 = vadd.f32 %v2172_v27, %v7924_v37 }
 0x1e2   : > { %v6239_v34 = vpop.f32.mrf.mxu0  ;;  %v8019_v26 = vpop.f32.mrf.mxu1 }
 0x1e3   : > { %v8017_v10 = vadd.f32 %v6239_v34, %v2215_v55 }
 0x1e4   : > { %v2542_v54 = vpop.f32.mrf.mxu0  ;;  %v8023_v63 = vpop.f32.mrf.mxu1 }
 0x1e5   : > { %v8021_v33 = vadd.f32 %v2542_v54, %v2213_v30 }
 0x1e6   : > { %v8025_v47 = vpop.f32.mrf.mxu0  ;;  %v8027_v41 = vpop.f32.mrf.mxu1 }
 0x1e8   : > { %v8029_v5 = vpop.f32.mrf.mxu0  ;;  %v8031_v17 = vpop.f32.mrf.mxu1 }
 0x1ea   : > { %v8033_v18 = vpop.f32.mrf.mxu0  ;;  %v8035_v37 = vpop.f32.mrf.mxu1 }
 0x1ec   : > { %v8037_v49 = vpop.f32.mrf.mxu0  ;;  %v8039_v4 = vpop.f32.mrf.mxu1 }
 0x1ee   : > { %v8041_v1 = vpop.f32.mrf.mxu0  ;;  %v8043_v48 = vpop.f32.mrf.mxu1 }
 0x1f0   : > { %v8045_v57 = vpop.f32.mrf.mxu0  ;;  %v8047_v52 = vpop.f32.mrf.mxu1 }
 0x1f2   : > { %v8049_v62 = vpop.f32.mrf.mxu0  ;;  %v8051_v13 = vpop.f32.mrf.mxu1 }
 0x1f4   : > { %v8053_v21 = vpop.f32.mrf.mxu0  ;;  %v2829_v36 = vpop.f32.mrf.mxu1 }
 0x1f5   : > { %v2932_v45 = vadd.f32 %v2829_v36, %v7954_v43 }
 0x1f6   : > { %v8056_v12 = vpop.f32.mrf.mxu0  ;;  %v6255_v31 = vpop.f32.mrf.mxu1 }
 0x1f7   : > { %8965 = vst [vmem:[#allocation11_spill] sm:$0xff] %v8056_v12  ;;  %v2935_v6 = vadd.f32 %v6255_v31, %v7957_v14 }
 0x1f8   : > { %v3200_v39 = vpop.f32.mrf.mxu0  ;;  %v2832_v24 = vpop.f32.mrf.mxu1 }
 0x1f9   : > { %v8059_v61 = vadd.f32 %v3200_v39, %v2932_v45  ;;  %v2933_v16 = vadd.f32 %v2832_v24, %v7960_v60 }
 0x1fa   : > { %v6291_v55 = vpop.f32.mrf.mxu0  ;;  %v6258_v3 = vpop.f32.mrf.mxu1 }
 0x1fb   : > { %v8062_v27 = vadd.f32 %v6291_v55, %v2935_v6  ;;  %v2938_v30 = vadd.f32 %v6258_v3, %v7963_v59 }
 0x1fc   : > { %v3203_v34 = vpop.f32.mrf.mxu0  ;;  %v2845_v54 = vpop.f32.mrf.mxu1 }
 0x1fd   : > { %v8065_v43 = vadd.f32 %v3203_v34, %v2933_v16  ;;  %v2936_v36 = vadd.f32 %v2845_v54, %v7966_v51 }
 0x1fe   : > { %v6294_v12 = vpop.f32.mrf.mxu0  ;;  %v6259_v14 = vpop.f32.mrf.mxu1 }
 0x1ff   : > { %v8068_v31 = vadd.f32 %v6294_v12, %v2938_v30  ;;  %v2939_v45 = vadd.f32 %v6259_v14, %v7969_v35 }
 0x200   : > { %v3216_v39 = vpop.f32.mrf.mxu0  ;;  %v2848_v60 = vpop.f32.mrf.mxu1 }
 0x201   : > { %v8071_v24 = vadd.f32 %v3216_v39, %v2936_v36  ;;  %v2937_v6 = vadd.f32 %v2848_v60, %v7972_v9 }
 0x202   : > { %v6295_v55 = vpop.f32.mrf.mxu0  ;;  %v6262_v59 = vpop.f32.mrf.mxu1 }
 0x203   : > { %v8074_v3 = vadd.f32 %v6295_v55, %v2939_v45  ;;  %v2942_v16 = vadd.f32 %v6262_v59, %v7975_v0 }
 0x204   : > { %v3219_v34 = vpop.f32.mrf.mxu0  ;;  %v2861_v51 = vpop.f32.mrf.mxu1 }
 0x205   : > { %v8077_v54 = vadd.f32 %v3219_v34, %v2937_v6  ;;  %v2940_v12 = vadd.f32 %v2861_v51, %v7978_v11 }
 0x206   : > { %v6298_v30 = vpop.f32.mrf.mxu0  ;;  %v6263_v35 = vpop.f32.mrf.mxu1 }
 0x207   : > { %v8080_v14 = vadd.f32 %v6298_v30, %v2942_v16  ;;  %v2943_v36 = vadd.f32 %v6263_v35, %v7981_v20 }
 0x208   : > { %v3232_v39 = vpop.f32.mrf.mxu0  ;;  %v2864_v9 = vpop.f32.mrf.mxu1 }
 0x209   : > { %v8083_v60 = vadd.f32 %v3232_v39, %v2940_v12  ;;  %v2941_v45 = vadd.f32 %v2864_v9, %v7984_v56 }
 0x20a   : > { %v6299_v55 = vpop.f32.mrf.mxu0  ;;  %v6266_v0 = vpop.f32.mrf.mxu1 }
 0x20b   : > { %v8086_v59 = vadd.f32 %v6299_v55, %v2943_v36  ;;  %v2946_v6 = vadd.f32 %v6266_v0, %v7987_v44 }
 0x20c   : > { %v3235_v34 = vpop.f32.mrf.mxu0  ;;  %v2877_v11 = vpop.f32.mrf.mxu1 }
 0x20d   : > { %v8089_v51 = vadd.f32 %v3235_v34, %v2941_v45  ;;  %v2944_v16 = vadd.f32 %v2877_v11, %v7990_v25 }
 0x20e   : > { %v6302_v30 = vpop.f32.mrf.mxu0  ;;  %v6267_v20 = vpop.f32.mrf.mxu1 }
 0x20f   : > { %v8092_v35 = vadd.f32 %v6302_v30, %v2946_v6  ;;  %v2947_v12 = vadd.f32 %v6267_v20, %v7993_v28 }
 0x210   : > { %v3248_v39 = vpop.f32.mrf.mxu0  ;;  %v2880_v56 = vpop.f32.mrf.mxu1 }
 0x211   : > { %v8095_v9 = vadd.f32 %v3248_v39, %v2944_v16  ;;  %v2945_v36 = vadd.f32 %v2880_v56, %v7996_v8 }
 0x212   : > { %v6303_v55 = vpop.f32.mrf.mxu0  ;;  %v6270_v44 = vpop.f32.mrf.mxu1 }
 0x213   : > { %v8098_v0 = vadd.f32 %v6303_v55, %v2947_v12  ;;  %v2950_v45 = vadd.f32 %v6270_v44, %v7999_v2 }
 0x214   : > { %v3251_v34 = vpop.f32.mrf.mxu0  ;;  %v2893_v25 = vpop.f32.mrf.mxu1 }
 0x215   : > { %v8101_v11 = vadd.f32 %v3251_v34, %v2945_v36  ;;  %v2948_v6 = vadd.f32 %v2893_v25, %v8002_v32 }
 0x216   : > { %v6306_v30 = vpop.f32.mrf.mxu0  ;;  %v6271_v28 = vpop.f32.mrf.mxu1 }
 0x217   : > { %v8104_v20 = vadd.f32 %v6306_v30, %v2950_v45  ;;  %v2951_v16 = vadd.f32 %v6271_v28, %v8005_v7 }
 0x218   : > { %v3264_v39 = vpop.f32.mrf.mxu0  ;;  %v2896_v8 = vpop.f32.mrf.mxu1 }
 0x219   : > { %v8107_v56 = vadd.f32 %v3264_v39, %v2948_v6  ;;  %v2949_v12 = vadd.f32 %v2896_v8, %v8008_v23  ;;  %v2926_v23 = vadd.f32 %v8019_v26, %v7927_v42 }
 0x21a   : > { %v6307_v55 = vpop.f32.mrf.mxu0  ;;  %v6274_v2 = vpop.f32.mrf.mxu1 }
 0x21b   : > { %v8110_v44 = vadd.f32 %v6307_v55, %v2951_v16  ;;  %v2954_v36 = vadd.f32 %v6274_v2, %v8011_v22 }
 0x21c   : > { %v3267_v34 = vpop.f32.mrf.mxu0  ;;  %v2909_v32 = vpop.f32.mrf.mxu1 }
 0x21d   : > { %v8113_v25 = vadd.f32 %v3267_v34, %v2949_v12  ;;  %v2952_v45 = vadd.f32 %v2909_v32, %v8014_v58  ;;  %v2924_v12 = vadd.f32 %v8023_v63, %v7930_v53  ;;  %v3297_v58 = vadd.f32 %v8025_v47, %v2926_v23 }
 0x21e   : > { %v6310_v30 = vpop.f32.mrf.mxu0  ;;  %v6275_v7 = vpop.f32.mrf.mxu1 }
 0x21f   : > { %v8116_v28 = vadd.f32 %v6310_v30, %v2954_v36  ;;  %v2955_v6 = vadd.f32 %v6275_v7, %v8017_v10  ;;  %v2927_v10 = vadd.f32 %v8027_v41, %v7933_v15  ;;  %v3295_v42 = vadd.f32 %v8029_v5, %v2924_v12 }
 0x220   : > { %v3280_v39 = vpop.f32.mrf.mxu0  ;;  %v2912_v16 = vpop.f32.mrf.mxu1  ;;  %v2925_v30 = vadd.f32 %v8031_v17, %v7936_v46  ;;  %v2928_v46 = vadd.f32 %v8039_v4, %v7942_v50  ;;  %v2929_v4 = vadd.f32 %v8047_v52, %v7948_v19  ;;  %v8966_v52 = vld [vmem:[#allocation11_spill] sm:$0xff] }
 0x221   : > { %v8121_v8 = vadd.f32 %v3280_v39, %v2952_v45  ;;  %v2953_v22 = vadd.f32 %v2912_v16, %v8021_v33  ;;  %v3298_v53 = vadd.f32 %v8033_v18, %v2927_v10 }
 0x222   : > { %v6311_v55 = vpop.f32.mrf.mxu0  ;;  %v6318_v36 = vpop.f32.mrf.mxu1  ;;  %v3296_v41 = vadd.f32 %v8037_v49, %v2925_v30  ;;  %v3299_v49 = vadd.f32 %v8045_v57, %v2928_v46 }
 0x223   : > { %v8127_v2 = vadd.f32 %v6311_v55, %v2955_v6  ;;  %v3667_v26 = vadd.f32 %v6318_v36, %v3297_v58  ;;  %v2930_v6 = vadd.f32 %v8035_v37, %v7939_v40  ;;  %v2931_v40 = vadd.f32 %v8043_v48, %v7945_v38 }
 0x224   : > { %v3283_v34 = vpop.f32.mrf.mxu0  ;;  %v3538_v45 = vpop.f32.mrf.mxu1  ;;  %v2934_v48 = vadd.f32 %v8051_v13, %v7951_v29 }
 0x225   : > { %v8132_v32 = vadd.f32 %v3283_v34, %v2953_v22  ;;  %v3665_v63 = vadd.f32 %v3538_v45, %v3295_v42  ;;  %v3301_v17 = vadd.f32 %v8041_v1, %v2930_v6  ;;  %v3302_v1 = vadd.f32 %v8049_v62, %v2931_v40 }
 0x226   : > { %v6354_v33 = vpop.f32.mrf.mxu0  ;;  %v6319_v47 = vpop.f32.mrf.mxu1  ;;  %v3300_v42 = vadd.f32 %v8053_v21, %v2929_v4  ;;  %v3305_v62 = vadd.f32 %v8966_v52, %v2934_v48 }
 0x227   : > { %v8137_v7 = vadd.f32 %v6354_v33, %v3667_v26  ;;  %v3668_v5 = vadd.f32 %v6319_v47, %v3298_v53 }
 0x228   : > { %v3908_v15 = vpop.f32.mrf.mxu0  ;;  %v3541_v39 = vpop.f32.mrf.mxu1 }
 0x229   : > { %6499 = vtanh.f32 %v8137_v7  ;;  %v8143_v23 = vadd.f32 %v3908_v15, %v3665_v63  ;;  %v3666_v18 = vadd.f32 %v3541_v39, %v3296_v41 }
 0x22a   : > { %v6355_v16 = vpop.f32.mrf.mxu0  ;;  %v6322_v22 = vpop.f32.mrf.mxu1 }
 0x22b   : > { %v8148_v55 = vadd.f32 %v6355_v16, %v3668_v5  ;;  %6501 = vtanh.f32 %v8143_v23  ;;  %v3671_v12 = vadd.f32 %v6322_v22, %v3301_v17 }
 0x22c   : > { %v3911_v37 = vpop.f32.mrf.mxu0  ;;  %v3554_v58 = vpop.f32.mrf.mxu1 }
 0x22d   : > { %v8154_v36 = vadd.f32 %v3911_v37, %v3666_v18  ;;  %6503 = vtanh.f32 %v8148_v55  ;;  %v3669_v34 = vadd.f32 %v3554_v58, %v3299_v49 }
 0x22e   : > { %v6358_v50 = vpop.f32.mrf.mxu0  ;;  %v6323_v10 = vpop.f32.mrf.mxu1 }
 0x22f   : > { %v8160_v38 = vadd.f32 %v6358_v50, %v3671_v12  ;;  %6505 = vtanh.f32 %v8154_v36  ;;  %v3672_v26 = vadd.f32 %v6323_v10, %v3302_v1 }
 0x230   : > { %v3924_v57 = vpop.f32.mrf.mxu0  ;;  %v3557_v45 = vpop.f32.mrf.mxu1 }
 0x231   : > { %v8166_v33 = vadd.f32 %v3924_v57, %v3669_v34  ;;  %6507 = vtanh.f32 %v8160_v38  ;;  %v3670_v30 = vadd.f32 %v3557_v45, %v3300_v42 }
 0x232   : > { %v6359_v19 = vpop.f32.mrf.mxu0  ;;  %v6326_v53 = vpop.f32.mrf.mxu1 }
 0x233   : > { %v8170_v63 = vadd.f32 %v6359_v19, %v3672_v26  ;;  %6509 = vtanh.f32 %v8166_v33  ;;  %v3675_v29 = vadd.f32 %v6326_v53, %v3305_v62 }
 0x234   : > { %v3927_v47 = vpop.f32.mrf.mxu0  ;;  %v3570_v13 = vpop.f32.mrf.mxu1 }
 0x235   : > { %v8173_v21 = vadd.f32 %v3927_v47, %v3670_v30  ;;  %6511 = vtanh.f32 %v8170_v63  ;;  %v3673_v17 = vadd.f32 %v3570_v13, %v8059_v61 }
 0x236   : > { %v6500_v6 = vpop.eup %6499  ;;  %v6362_v15 = vpop.f32.mrf.mxu0 }
 0x237   : > { %v6327_v41 = vpop.f32.mrf.mxu1  ;;  %v8176_v5 = vadd.f32 %v6362_v15, %v3675_v29  ;;  %4583 = vrot.lane.b32.xlu0 %v6500_v6, %s6850_s11  ;;  %6513 = vtanh.f32 %v8173_v21 }
 0x238   : > { %v3940_v39 = vpop.f32.mrf.mxu0  ;;  %v6502_v46 = vpop.eup %6501  ;;  %v3676_v50 = vadd.f32 %v6327_v41, %v8062_v27 }
 0x239   : > { %v3573_v16 = vpop.f32.mrf.mxu1  ;;  %6515 = vtanh.f32 %v8176_v5  ;;  %v8183_v37 = vadd.f32 %v3940_v39, %v3673_v17 }
 0x23a   : > { %v6363_v18 = vpop.f32.mrf.mxu0  ;;  %v6504_v22 = vpop.eup %6503  ;;  %v3674_v42 = vadd.f32 %v3573_v16, %v8065_v43 }
 0x23b   : > { %v6330_v40 = vpop.f32.mrf.mxu1  ;;  %4579 = vrot.lane.b32.xlu0 %v6502_v46, %s6850_s11  ;;  %4585 = vrot.lane.b32.xlu1 %v6504_v22, %s6850_s11  ;;  %6517 = vtanh.f32 %v8183_v37  ;;  %v8188_v61 = vadd.f32 %v6363_v18, %v3676_v50  ;;  %v8209_v16 = vpop.permute.xlu0 %4419 }
 0x23c   : > { %v3943_v49 = vpop.f32.mrf.mxu0  ;;  %v6506_v58 = vpop.eup %6505  ;;  %v3679_v62 = vadd.f32 %v6330_v40, %v8068_v31 }
 0x23d   : > { %v3586_v12 = vpop.f32.mrf.mxu1  ;;  %6519 = vtanh.f32 %v8188_v61  ;;  %v8194_v27 = vadd.f32 %v3943_v49, %v3674_v42 }
 0x23e   : > { %v6366_v4 = vpop.f32.mrf.mxu0  ;;  %v6508_v1 = vpop.eup %6507  ;;  %v3677_v15 = vadd.f32 %v3586_v12, %v8071_v24 }
 0x23f   : > { %v6331_v34 = vpop.f32.mrf.mxu1  ;;  %4581 = vrot.lane.b32.xlu1 %v6506_v58, %s6850_s11  ;;  %4591 = vrot.lane.b32.xlu0 %v6508_v1, %s6850_s11  ;;  %v8199_v13 = vadd.f32 %v6366_v4, %v3679_v62  ;;  %6521 = vtanh.f32 %v8194_v27  ;;  %v8216_v24 = vpop.permute.xlu1 %4423 }
 0x240   : > { %v3956_v10 = vpop.f32.mrf.mxu0  ;;  %v6510_v57 = vpop.eup %6509  ;;  %v3680_v39 = vadd.f32 %v6331_v34, %v8074_v3 }
 0x241   : > { %v3589_v48 = vpop.f32.mrf.mxu1  ;;  %6523 = vtanh.f32 %v8199_v13  ;;  %v8207_v31 = vadd.f32 %v3956_v10, %v3677_v15  ;;  %v8222_v50 = vpop.permute.xlu0 %4421 }
 0x242   : > { %v6367_v26 = vpop.f32.mrf.mxu0  ;;  %v6512_v45 = vpop.eup %6511  ;;  %v3678_v40 = vadd.f32 %v3589_v48, %v8077_v54 }
 0x243   : > { %v6334_v19 = vpop.f32.mrf.mxu1  ;;  %4593 = vrot.lane.b32.xlu1 %v6512_v45, %s6850_s11  ;;  %4587 = vrot.lane.b32.xlu0 %v6510_v57, %s6850_s11  ;;  %v8211_v18 = vadd.f32 %v6367_v26, %v3680_v39  ;;  %6525 = vtanh.f32 %v8207_v31 }
 0x244   : > { %v3959_v52 = vpop.f32.mrf.mxu0  ;;  %v6514_v53 = vpop.eup %6513  ;;  %v3683_v12 = vadd.f32 %v6334_v19, %v8080_v14 }
 0x245   : > { %v3602_v30 = vpop.f32.mrf.mxu1  ;;  %6527 = vtanh.f32 %v8211_v18  ;;  %v8220_v58 = vadd.f32 %v3959_v52, %v3678_v40  ;;  %v8230_v14 = vpop.permute.xlu1 %4425 }
 0x246   : > { %v6370_v47 = vpop.f32.mrf.mxu0  ;;  %v6516_v29 = vpop.eup %6515  ;;  %v3681_v10 = vadd.f32 %v3602_v30, %v8083_v60 }
 0x247   : > { %v6335_v43 = vpop.f32.mrf.mxu1  ;;  %4589 = vrot.lane.b32.xlu1 %v6514_v53, %s6850_s11  ;;  %4599 = vrot.lane.b32.xlu0 %v6516_v29, %s6850_s11  ;;  %v8225_v1 = vadd.f32 %v6370_v47, %v3683_v12  ;;  %6529 = vtanh.f32 %v8220_v58  ;;  %v8236_v26 = vpop.permute.xlu0 %4427 }
 0x248   : > { %v3972_v6 = vpop.f32.mrf.mxu0  ;;  %v6518_v17 = vpop.eup %6517  ;;  %v3684_v48 = vadd.f32 %v6335_v43, %v8086_v59 }
 0x249   : > { %v3605_v46 = vpop.f32.mrf.mxu1  ;;  %6531 = vtanh.f32 %v8225_v1  ;;  %v8234_v42 = vadd.f32 %v3972_v6, %v3681_v10  ;;  %v8247_v47 = vpop.permute.xlu1 %4429 }
 0x24a   : > { %v6371_v41 = vpop.f32.mrf.mxu0  ;;  %v6520_v49 = vpop.eup %6519  ;;  %v3682_v60 = vadd.f32 %v3605_v46, %v8089_v51 }
 0x24b   : > { %4595 = vrot.lane.b32.xlu0 %v6518_v17, %s6850_s11  ;;  %v6338_v3 = vpop.f32.mrf.mxu1  ;;  %4601 = vrot.lane.b32.xlu1 %v6520_v49, %s6850_s11  ;;  %v8238_v19 = vadd.f32 %v6371_v41, %v3684_v48  ;;  %6533 = vtanh.f32 %v8234_v42  ;;  %v8249_v43 = vpop.permute.xlu0 %4431 }
 0x24c   : > { %v3975_v22 = vpop.f32.mrf.mxu0  ;;  %v6522_v34 = vpop.eup %6521  ;;  %v3687_v30 = vadd.f32 %v6338_v3, %v8092_v35 }
 0x24d   : > { %v3618_v54 = vpop.f32.mrf.mxu1  ;;  %6535 = vtanh.f32 %v8238_v19  ;;  %v8245_v53 = vadd.f32 %v3975_v22, %v3682_v60  ;;  %v8260_v17 = vpop.permute.xlu1 %4433 }
 0x24e   : > { %v6374_v4 = vpop.f32.mrf.mxu0  ;;  %v6524_v45 = vpop.eup %6523  ;;  %v3685_v41 = vadd.f32 %v3618_v54, %v8095_v9 }
 0x24f   : > { %4597 = vrot.lane.b32.xlu1 %v6522_v34, %s6850_s11  ;;  %v6339_v52 = vpop.f32.mrf.mxu1  ;;  %4607 = vrot.lane.b32.xlu0 %v6524_v45, %s6850_s11  ;;  %v8252_v15 = vadd.f32 %v6374_v4, %v3687_v30  ;;  %6537 = vtanh.f32 %v8245_v53  ;;  %v8263_v3 = vpop.permute.xlu0 %4435 }
 0x250   : > { %v3988_v57 = vpop.f32.mrf.mxu0  ;;  %v6526_v62 = vpop.eup %6525  ;;  %v3688_v40 = vadd.f32 %v6339_v52, %v8098_v0 }
 0x251   : > { %v3621_v29 = vpop.f32.mrf.mxu1  ;;  %6539 = vtanh.f32 %v8252_v15  ;;  %v8258_v46 = vadd.f32 %v3988_v57, %v3685_v41  ;;  %v8271_v48 = vpop.permute.xlu1 %4437 }
 0x252   : > { %v6375_v59 = vpop.f32.mrf.mxu0  ;;  %v6528_v6 = vpop.eup %6527  ;;  %v3686_v54 = vadd.f32 %v3621_v29, %v8101_v11 }
 0x253   : > { %4603 = vrot.lane.b32.xlu0 %v6526_v62, %s6850_s11  ;;  %4609 = vrot.lane.b32.xlu1 %v6528_v6, %s6850_s11  ;;  %v6342_v35 = vpop.f32.mrf.mxu1  ;;  %v8266_v9 = vadd.f32 %v6375_v59, %v3688_v40  ;;  %6541 = vtanh.f32 %v8258_v46  ;;  %v8277_v52 = vpop.permute.xlu0 %4439 }
 0x254   : > { %v3991_v51 = vpop.f32.mrf.mxu0  ;;  %v6530_v39 = vpop.eup %6529  ;;  %v3691_v57 = vadd.f32 %v6342_v35, %v8104_v20 }
 0x255   : > { %v3634_v12 = vpop.f32.mrf.mxu1  ;;  %6543 = vtanh.f32 %v8266_v9  ;;  %v8275_v45 = vadd.f32 %v3991_v51, %v3686_v54  ;;  %v8285_v20 = vpop.permute.xlu1 %4441 }
 0x256   : > { %v6378_v22 = vpop.f32.mrf.mxu0  ;;  %v6532_v49 = vpop.eup %6531  ;;  %v3689_v30 = vadd.f32 %v3634_v12, %v8107_v56 }
 0x257   : > { %4605 = vrot.lane.b32.xlu1 %v6530_v39, %s6850_s11  ;;  %4615 = vrot.lane.b32.xlu0 %v6532_v49, %s6850_s11  ;;  %v6343_v10 = vpop.f32.mrf.mxu1  ;;  %v8281_v59 = vadd.f32 %v6378_v22, %v3691_v57  ;;  %6545 = vtanh.f32 %v8275_v45  ;;  %v8292_v35 = vpop.permute.xlu0 %4443 }
 0x258   : > { %v4004_v4 = vpop.f32.mrf.mxu0  ;;  %v6534_v34 = vpop.eup %6533  ;;  %v3692_v51 = vadd.f32 %v6343_v10, %v8110_v44 }
 0x259   : > { %v3637_v11 = vpop.f32.mrf.mxu1  ;;  %6547 = vtanh.f32 %v8281_v59  ;;  %v8290_v41 = vadd.f32 %v4004_v4, %v3689_v30  ;;  %v8299_v54 = vpop.permute.xlu1 %4445 }
 0x25a   : > { %v6536_v0 = vpop.eup %6535  ;;  %v6379_v60 = vpop.f32.mrf.mxu0  ;;  %v3690_v49 = vadd.f32 %v3637_v11, %v8113_v25 }
 0x25b   : > { %4611 = vrot.lane.b32.xlu0 %v6534_v34, %s6850_s11  ;;  %4617 = vrot.lane.b32.xlu1 %v6536_v0, %s6850_s11  ;;  %v6346_v39 = vpop.f32.mrf.mxu1  ;;  %v8295_v56 = vadd.f32 %v6379_v60, %v3692_v51  ;;  %6549 = vtanh.f32 %v8290_v41  ;;  %v8306_v34 = vpop.permute.xlu0 %4447 }
 0x25c   : > { %v6538_v62 = vpop.eup %6537  ;;  %v4007_v29 = vpop.f32.mrf.mxu0  ;;  %v3695_v44 = vadd.f32 %v6346_v39, %v8116_v28 }
 0x25d   : > { %v3650_v12 = vpop.f32.mrf.mxu1  ;;  %6551 = vtanh.f32 %v8295_v56  ;;  %v8304_v4 = vadd.f32 %v4007_v29, %v3690_v49  ;;  %v8313_v28 = vpop.permute.xlu1 %4449 }
 0x25e   : > { %v6540_v6 = vpop.eup %6539  ;;  %v6382_v22 = vpop.f32.mrf.mxu0  ;;  %v3693_v60 = vadd.f32 %v3650_v12, %v8121_v8 }
 0x25f   : > { %4613 = vrot.lane.b32.xlu1 %v6538_v62, %s6850_s11  ;;  %4623 = vrot.lane.b32.xlu0 %v6540_v6, %s6850_s11  ;;  %v8308_v57 = vadd.f32 %v6382_v22, %v3695_v44  ;;  %v6347_v25 = vpop.f32.mrf.mxu1  ;;  %6553 = vtanh.f32 %v8304_v4  ;;  %v8319_v6 = vpop.permute.xlu0 %4451 }
 0x260   : > { %v6542_v40 = vpop.eup %6541  ;;  %v4020_v0 = vpop.f32.mrf.mxu0  ;;  %v3696_v30 = vadd.f32 %v6347_v25, %v8127_v2 }
 0x261   : > { %6555 = vtanh.f32 %v8308_v57  ;;  %v8317_v29 = vadd.f32 %v4020_v0, %v3693_v60  ;;  %v3653_v39 = vpop.f32.mrf.mxu1  ;;  %v8327_v49 = vpop.permute.xlu1 %4453  ;;  %v5805_v0 = vmul.f32 -1.442695, %v8137_v7  ;;  %v5804_v7 = vmul.f32 -1.442695, %v8154_v36 }
 0x262   : > { %v6544_v10 = vpop.eup %6543  ;;  %v6383_v62 = vpop.f32.mrf.mxu0 }
 0x263   : > { %4619 = vrot.lane.b32.xlu0 %v6542_v40, %s6850_s11  ;;  %4625 = vrot.lane.b32.xlu1 %v6544_v10, %s6850_s11  ;;  %v8322_v22 = vadd.f32 %v6383_v62, %v3696_v30  ;;  %v3694_v40 = vadd.f32 %v3653_v39, %v8132_v32  ;;  %6557 = vtanh.f32 %v8317_v29  ;;  %v8332_v44 = vpop.permute.xlu0 %4455  ;;  %v5803_v62 = vmul.f32 -1.442695, %v8143_v23 }
 0x264   : > { %v6546_v11 = vpop.eup %6545  ;;  %v4023_v8 = vpop.f32.mrf.mxu0  ;;  %v5806_v30 = vmul.f32 -1.442695, %v8148_v55  ;;  %v5807_v23 = vmul.f32 -1.442695, %v8166_v33  ;;  %v5810_v55 = vmul.f32 -1.442695, %v8170_v63 }
 0x265   : > { %6559 = vtanh.f32 %v8322_v22  ;;  %v8330_v12 = vadd.f32 %v4023_v8, %v3694_v40  ;;  %v8338_v25 = vpop.permute.xlu1 %4457  ;;  %v5809_v8 = vmul.f32 -1.442695, %v8160_v38  ;;  %v5808_v38 = vmul.f32 -1.442695, %v8173_v21 }
 0x266   : > { %v6548_v51 = vpop.eup %6547 }
 0x267   : > { %4621 = vrot.lane.b32.xlu1 %v6546_v11, %s6850_s11  ;;  %4631 = vrot.lane.b32.xlu0 %v6548_v51, %s6850_s11  ;;  %6561 = vtanh.f32 %v8330_v12  ;;  %v8340_v60 = vpop.permute.xlu0 %4459 }
 0x268   : > { %v6550_v2 = vpop.eup %6549  ;;  %6563 = vpow2.f32 %v5805_v0 }
 0x269   : > { %6565 = vpow2.f32 %v5803_v62  ;;  %v8347_v39 = vpop.permute.xlu1 %4461 }
 0x26a   : > { %v6552_v10 = vpop.eup %6551  ;;  %6567 = vpow2.f32 %v5806_v30 }
 0x26b   : > { %4627 = vrot.lane.b32.xlu0 %v6550_v2, %s6850_s11  ;;  %4633 = vrot.lane.b32.xlu1 %v6552_v10, %s6850_s11  ;;  %v8350_v40 = vpop.permute.xlu0 %4463  ;;  %6569 = vpow2.f32 %v5804_v7  ;;  %v5811_v7 = vmul.f32 -1.442695, %v8183_v37  ;;  %v5812_v37 = vmul.f32 -1.442695, %v8194_v27 }
 0x26c   : > { %v6554_v32 = vpop.eup %6553  ;;  %6571 = vpow2.f32 %v5809_v8 }
 0x26d   : > { %v8356_v36 = vpop.permute.xlu1 %4465  ;;  %6573 = vpow2.f32 %v5807_v23 }
 0x26e   : > { %v6556_v11 = vpop.eup %6555  ;;  %6575 = vpow2.f32 %v5810_v55 }
 0x26f   : > { %4629 = vrot.lane.b32.xlu1 %v6554_v32, %s6850_s11  ;;  %4639 = vrot.lane.b32.xlu0 %v6556_v11, %s6850_s11  ;;  %v8358_v0 = vpop.permute.xlu0 %4467  ;;  %v5813_v11 = vmul.f32 -1.442695, %v8176_v5  ;;  %6577 = vpow2.f32 %v5808_v38  ;;  %v5814_v5 = vmul.f32 -1.442695, %v8188_v61 }
 0x270   : > { %v6558_v51 = vpop.eup %6557 }
 0x271   : > { %v8363_v33 = vpop.permute.xlu1 %4469  ;;  %6579 = vpow2.f32 %v5813_v11 }
 0x272   : > { %v6560_v2 = vpop.eup %6559  ;;  %8967 = vst [vmem:[#allocation11_spill] sm:$0xff] %v8363_v33 }
 0x273   : > { %4635 = vrot.lane.b32.xlu0 %v6558_v51, %s6850_s11  ;;  %4641 = vrot.lane.b32.xlu1 %v6560_v2, %s6850_s11  ;;  %v8365_v63 = vpop.permute.xlu0 %4471 }
 0x274   : > { %v6562_v10 = vpop.eup %6561 }
 0x275   : > { %v6564_v32 = vpop.eup %6563  ;;  %v8368_v55 = vpop.permute.xlu1 %4473 }
 0x276   : > { %v4229_v62 = vadd.f32 1.0, %v6564_v32  ;;  %v6566_v30 = vpop.eup %6565  ;;  %8968 = vst [vmem:[#allocation12_spill] sm:$0xff] %v8368_v55 }
 0x277   : > { %4637 = vrot.lane.b32.xlu1 %v6562_v10, %s6850_s11  ;;  %v6568_v51 = vpop.eup %6567  ;;  %v4227_v8 = vadd.f32 1.0, %v6566_v30  ;;  %v8371_v10 = vpop.permute.xlu0 %4475 }
 0x278   : > { %6581 = vrcp.f32 %v4229_v62  ;;  %v6570_v2 = vpop.eup %6569  ;;  %v4230_v23 = vadd.f32 1.0, %v6568_v51  ;;  %8969 = vst [vmem:[#allocation13_spill] sm:$0xff] %v8371_v10 }
 0x279   : > { %v6572_v21 = vpop.eup %6571  ;;  %6583 = vpow2.f32 %v5811_v7  ;;  %v4228_v38 = vadd.f32 1.0, %v6570_v2  ;;  %v8374_v30 = vpop.permute.xlu1 %4477 }
 0x27a   : > { %6585 = vrcp.f32 %v4227_v8  ;;  %v6574_v32 = vpop.eup %6573  ;;  %v4233_v11 = vadd.f32 1.0, %v6572_v21  ;;  %8970 = vst [vmem:[#allocation14_spill] sm:$0xff] %v8374_v30  ;;  %v5817_v8 = vmul.f32 -1.442695, %v8199_v13 }
 0x27b   : > { %6587 = vrcp.f32 %v4230_v23  ;;  %v6576_v33 = vpop.eup %6575  ;;  %v4231_v62 = vadd.f32 1.0, %v6574_v32  ;;  %v8376_v55 = vpop.permute.xlu0 %4479 }
 0x27c   : > { %6589 = vpow2.f32 %v5814_v5  ;;  %v6578_v51 = vpop.eup %6577  ;;  %v4234_v7 = vadd.f32 1.0, %v6576_v33  ;;  %8971 = vst [vmem:[#allocation15_spill] sm:$0xff] %v8376_v55  ;;  %v5815_v5 = vmul.f32 -1.442695, %v8207_v31 }
 0x27d   : > { %6591 = vrcp.f32 %v4228_v38  ;;  %v4232_v2 = vadd.f32 1.0, %v6578_v51  ;;  %v8382_v38 = vpop.permute.xlu1 %4481 }
 0x27e   : > { %6593 = vrcp.f32 %v4233_v11  ;;  %v6580_v61 = vpop.eup %6579  ;;  %8972 = vst [vmem:[#allocation16_spill] sm:$0xff] %v8382_v38  ;;  %v5818_v11 = vmul.f32 -1.442695, %v8211_v18 }
 0x27f   : > { %6595 = vpow2.f32 %v5812_v37  ;;  %v4237_v27 = vadd.f32 1.0, %v6580_v61  ;;  %v5816_v61 = vmul.f32 -1.442695, %v8220_v58 }
 0x280   : > { %6597 = vrcp.f32 %v4231_v62 }
 0x281   : > { %6599 = vrcp.f32 %v4234_v7 }
 0x282   : > { %6601 = vpow2.f32 %v5817_v8 }
 0x283   : > { %6603 = vrcp.f32 %v4232_v2 }
 0x284   : > { %6605 = vrcp.f32 %v4237_v27 }
 0x285   : > { %v8379_v23 = vpop.eup %6581  ;;  %6607 = vpow2.f32 %v5815_v5 }
 0x286   : > { %v6584_v32 = vpop.eup %6583  ;;  %6609 = vpow2.f32 %v5818_v11 }
 0x287   : > { %v8387_v13 = vpop.eup %6585  ;;  %v4235_v51 = vadd.f32 1.0, %v6584_v32 }
 0x288   : > { %v8389_v62 = vpop.eup %6587 }
 0x289   : > { %v6590_v2 = vpop.eup %6589  ;;  %6611 = vrcp.f32 %v4235_v51 }
 0x28a   : > { %v8395_v18 = vpop.eup %6591  ;;  %6613 = vpow2.f32 %v5816_v61  ;;  %v5822_v61 = vmul.f32 -1.442695, %v8238_v19  ;;  %v5820_v19 = vmul.f32 -1.442695, %v8245_v53  ;;  %v5823_v53 = vmul.f32 -1.442695, %v8258_v46 }
 0x28b   : > { %v8398_v27 = vpop.eup %6593  ;;  %v5824_v46 = vmul.f32 -1.442695, %v8275_v45 }
 0x28c   : > { %v6596_v32 = vpop.eup %6595 }
 0x2a9   : > { %v4584_v21 = vpop.permute.xlu0 %4583 }
 0x2aa   : > { %v4677_v33 = vmul.f32 %v8379_v23, %v4584_v21  ;;  %v5821_v21 = vmul.f32 -1.442695, %v8225_v1  ;;  %v4236_v1 = vadd.f32 1.0, %v6596_v32 }
 0x2ac   : > { %4743 = vrot.lane.b32.xlu0 %v4677_v33, %s6850_s11  ;;  %6615 = vpow2.f32 %v5821_v21 }
 0x2ad   : > { %v4580_v37 = vpop.permute.xlu0 %4579  ;;  %v4586_v7 = vpop.permute.xlu1 %4585 }
 0x2ae   : > { %v4675_v31 = vmul.f32 %v8387_v13, %v4580_v37  ;;  %v4678_v8 = vmul.f32 %v8389_v62, %v4586_v7  ;;  %v4238_v37 = vadd.f32 1.0, %v6590_v2  ;;  %v8403_v7 = vpop.eup %6597 }
 0x2af   : > { %v8408_v51 = vpop.eup %6599 }
 0x2b0   : > { %4739 = vrot.lane.b32.xlu0 %v4675_v31, %s6850_s11  ;;  %4745 = vrot.lane.b32.xlu1 %v4678_v8, %s6850_s11  ;;  %v5819_v31 = vmul.f32 -1.442695, %v8234_v42  ;;  %v6602_v2 = vpop.eup %6601  ;;  %6617 = vrcp.f32 %v4238_v37 }
 0x2b1   : > { %v4582_v5 = vpop.permute.xlu1 %4581  ;;  %v4592_v33 = vpop.permute.xlu0 %4591  ;;  %v4241_v21 = vadd.f32 1.0, %v6602_v2 }
 0x2b2   : > { %v4676_v58 = vmul.f32 %v8395_v18, %v4582_v5  ;;  %v4681_v11 = vmul.f32 %v8398_v27, %v4592_v33  ;;  %v8413_v38 = vpop.eup %6603  ;;  %6619 = vpow2.f32 %v5819_v31  ;;  %v5825_v31 = vmul.f32 -1.442695, %v8252_v15 }
 0x2b3   : > { %v8417_v42 = vpop.eup %6605  ;;  %6621 = vrcp.f32 %v4236_v1 }
 0x2b4   : > { %4741 = vrot.lane.b32.xlu1 %v4676_v58, %s6850_s11  ;;  %4751 = vrot.lane.b32.xlu0 %v4681_v11, %s6850_s11  ;;  %v6608_v37 = vpop.eup %6607  ;;  %6623 = vpow2.f32 %v5822_v61 }
 0x2b5   : > { %v4594_v8 = vpop.permute.xlu1 %4593  ;;  %v4588_v30 = vpop.permute.xlu0 %4587  ;;  %6625 = vrcp.f32 %v4241_v21  ;;  %v4239_v1 = vadd.f32 1.0, %v6608_v37  ;;  %v5826_v21 = vmul.f32 -1.442695, %v8266_v9  ;;  %v5829_v9 = vmul.f32 -1.442695, %v8281_v59 }
 0x2b6   : > { %v4682_v5 = vmul.f32 %v8408_v51, %v4594_v8  ;;  %v4679_v33 = vmul.f32 %v8403_v7, %v4588_v30  ;;  %v6610_v8 = vpop.eup %6609  ;;  %6627 = vpow2.f32 %v5820_v19 }
 0x2b7   : > { %v8425_v2 = vpop.eup %6611  ;;  %v4242_v61 = vadd.f32 1.0, %v6610_v8  ;;  %6629 = vpow2.f32 %v5825_v31 }
 0x2b8   : > { %4753 = vrot.lane.b32.xlu1 %v4682_v5, %s6850_s11  ;;  %4747 = vrot.lane.b32.xlu0 %v4679_v33, %s6850_s11  ;;  %v6614_v5 = vpop.eup %6613  ;;  %6631 = vrcp.f32 %v4239_v1 }
 0x2b9   : > { %v4590_v32 = vpop.permute.xlu1 %4589  ;;  %v4600_v58 = vpop.permute.xlu0 %4599  ;;  %v4240_v15 = vadd.f32 1.0, %v6614_v5  ;;  %6633 = vrcp.f32 %v4242_v61 }
 0x2ba   : > { %v4680_v11 = vmul.f32 %v8413_v38, %v4590_v32  ;;  %v4685_v30 = vmul.f32 %v8417_v42, %v4600_v58  ;;  %v6616_v58 = vpop.eup %6615  ;;  %6635 = vpow2.f32 %v5823_v53 }
 0x2bb   : > { %v4245_v8 = vadd.f32 1.0, %v6616_v58  ;;  %6637 = vrcp.f32 %v4240_v15 }
 0x2bc   : > { %4749 = vrot.lane.b32.xlu1 %v4680_v11, %s6850_s11  ;;  %4759 = vrot.lane.b32.xlu0 %v4685_v30, %s6850_s11  ;;  %6639 = vpow2.f32 %v5826_v21  ;;  %v5827_v21 = vmul.f32 -1.442695, %v8290_v41 }
 0x2bd   : > { %v4596_v33 = vpop.permute.xlu0 %4595  ;;  %v8430_v11 = vpop.eup %6617  ;;  %6641 = vrcp.f32 %v4245_v8  ;;  %v5830_v8 = vmul.f32 -1.442695, %v8295_v56 }
 0x2be   : > { %v4683_v32 = vmul.f32 %v8425_v2, %v4596_v33  ;;  %v4602_v37 = vpop.permute.xlu1 %4601  ;;  %6643 = vpow2.f32 %v5824_v46 }
 0x2bf   : > { %v4686_v19 = vmul.f32 %v8430_v11, %v4602_v37  ;;  %v6620_v30 = vpop.eup %6619 }
 0x2c0   : > { %4755 = vrot.lane.b32.xlu0 %v4683_v32, %s6850_s11  ;;  %v8434_v31 = vpop.eup %6621  ;;  %v4243_v33 = vadd.f32 1.0, %v6620_v30 }
 0x2c1   : > { %4761 = vrot.lane.b32.xlu1 %v4686_v19, %s6850_s11  ;;  %v6624_v1 = vpop.eup %6623  ;;  %v4608_v58 = vpop.permute.xlu0 %4607 }
 0x2c2   : > { %v4598_v5 = vpop.permute.xlu1 %4597  ;;  %v8440_v53 = vpop.eup %6625  ;;  %v4246_v32 = vadd.f32 1.0, %v6624_v1  ;;  %6645 = vrcp.f32 %v4243_v33 }
 0x2c3   : > { %v4684_v61 = vmul.f32 %v8434_v31, %v4598_v5  ;;  %v6628_v15 = vpop.eup %6627  ;;  %v4689_v45 = vmul.f32 %v8440_v53, %v4608_v58  ;;  %6647 = vpow2.f32 %v5829_v9 }
 0x2c4   : > { %v6630_v37 = vpop.eup %6629  ;;  %6649 = vrcp.f32 %v4246_v32  ;;  %v4244_v59 = vadd.f32 1.0, %v6628_v15  ;;  %v5828_v32 = vmul.f32 -1.442695, %v8304_v4 }
 0x2c5   : > { %4757 = vrot.lane.b32.xlu1 %v4684_v61, %s6850_s11  ;;  %4767 = vrot.lane.b32.xlu0 %v4689_v45, %s6850_s11  ;;  %v8446_v19 = vpop.eup %6631  ;;  %v4604_v30 = vpop.permute.xlu0 %4603  ;;  %v4249_v5 = vadd.f32 1.0, %v6630_v37  ;;  %6651 = vpow2.f32 %v5827_v21  ;;  %v5833_v45 = vmul.f32 -1.442695, %v8308_v57 }
 0x2c6   : > { %v4687_v46 = vmul.f32 %v8446_v19, %v4604_v30  ;;  %v8450_v1 = vpop.eup %6633  ;;  %v4610_v61 = vpop.permute.xlu1 %4609  ;;  %6653 = vrcp.f32 %v4244_v59 }
 0x2c7   : > { %v6636_v33 = vpop.eup %6635  ;;  %v4690_v9 = vmul.f32 %v8450_v1, %v4610_v61  ;;  %6655 = vpow2.f32 %v5830_v8 }
 0x2c8   : > { %v8454_v41 = vpop.eup %6637  ;;  %6657 = vrcp.f32 %v4249_v5  ;;  %v4247_v58 = vadd.f32 1.0, %v6636_v33  ;;  %v5831_v5 = vmul.f32 -1.442695, %v8317_v29 }
 0x2c9   : > { %4763 = vrot.lane.b32.xlu0 %v4687_v46, %s6850_s11  ;;  %4769 = vrot.lane.b32.xlu1 %v4690_v9, %s6850_s11  ;;  %v6640_v56 = vpop.eup %6639  ;;  %v4616_v30 = vpop.permute.xlu0 %4615  ;;  %6659 = vpow2.f32 %v5828_v32  ;;  %v5834_v32 = vmul.f32 -1.442695, %v8322_v22 }
 0x2ca   : > { %v4606_v15 = vpop.permute.xlu1 %4605  ;;  %v8460_v21 = vpop.eup %6641  ;;  %v4250_v59 = vadd.f32 1.0, %v6640_v56  ;;  %6661 = vrcp.f32 %v4247_v58 }
 0x2cb   : > { %v4688_v37 = vmul.f32 %v8454_v41, %v4606_v15  ;;  %v6644_v46 = vpop.eup %6643  ;;  %v4693_v8 = vmul.f32 %v8460_v21, %v4616_v30  ;;  %6663 = vpow2.f32 %v5833_v45  ;;  %v5832_v30 = vmul.f32 -1.442695, %v8330_v12 }
 0x2cc   : > { %v4248_v61 = vadd.f32 1.0, %v6644_v46  ;;  %6665 = vrcp.f32 %v4250_v59 }
 0x2cd   : > { %4765 = vrot.lane.b32.xlu1 %v4688_v37, %s6850_s11  ;;  %4775 = vrot.lane.b32.xlu0 %v4693_v8, %s6850_s11  ;;  %v4612_v33 = vpop.permute.xlu0 %4611  ;;  %6667 = vpow2.f32 %v5831_v5 }
 0x2ce   : > { %v4618_v56 = vpop.permute.xlu1 %4617  ;;  %6669 = vrcp.f32 %v4248_v61 }
 0x2cf   : > { %v8464_v4 = vpop.eup %6645  ;;  %6671 = vpow2.f32 %v5834_v32 }
 0x2d0   : > { %v6648_v57 = vpop.eup %6647  ;;  %v4691_v15 = vmul.f32 %v8464_v4, %v4612_v33 }
 0x2d1   : > { %v8468_v9 = vpop.eup %6649  ;;  %v4253_v37 = vadd.f32 1.0, %v6648_v57  ;;  %v4624_v5 = vpop.permute.xlu0 %4623 }
 0x2d2   : > { %v4694_v58 = vmul.f32 %v8468_v9, %v4618_v56  ;;  %4771 = vrot.lane.b32.xlu0 %v4691_v15, %s6850_s11  ;;  %v6652_v29 = vpop.eup %6651  ;;  %v4614_v46 = vpop.permute.xlu1 %4613 }
 0x2d3   : > { %v8475_v45 = vpop.eup %6653  ;;  %6673 = vrcp.f32 %v4253_v37  ;;  %v4251_v57 = vadd.f32 1.0, %v6652_v29 }
 0x2d4   : > { %4777 = vrot.lane.b32.xlu1 %v4694_v58, %s6850_s11  ;;  %v6656_v22 = vpop.eup %6655  ;;  %v4692_v59 = vmul.f32 %v8475_v45, %v4614_v46  ;;  %6675 = vpow2.f32 %v5832_v30 }
 0x2d5   : > { %v8479_v8 = vpop.eup %6657  ;;  %v4254_v61 = vadd.f32 1.0, %v6656_v22  ;;  %6677 = vrcp.f32 %v4251_v57  ;;  %v4620_v12 = vpop.permute.xlu0 %4619 }
 0x2d6   : > { %v4697_v33 = vmul.f32 %v8479_v8, %v4624_v5  ;;  %v6660_v56 = vpop.eup %6659  ;;  %v4626_v46 = vpop.permute.xlu1 %4625 }
 0x2d7   : > { %v8484_v32 = vpop.eup %6661  ;;  %6679 = vrcp.f32 %v4254_v61  ;;  %v4252_v37 = vadd.f32 1.0, %v6660_v56 }
 0x2d8   : > { %4773 = vrot.lane.b32.xlu1 %v4692_v59, %s6850_s11  ;;  %4783 = vrot.lane.b32.xlu0 %v4697_v33, %s6850_s11  ;;  %v6664_v15 = vpop.eup %6663  ;;  %v4695_v58 = vmul.f32 %v8484_v32, %v4620_v12 }
 0x2d9   : > { %v8487_v29 = vpop.eup %6665  ;;  %v4257_v59 = vadd.f32 1.0, %v6664_v15  ;;  %6681 = vrcp.f32 %v4252_v37  ;;  %v4632_v10 = vpop.permute.xlu0 %4631 }
 0x2da   : > { %v4698_v30 = vmul.f32 %v8487_v29, %v4626_v46  ;;  %v6668_v22 = vpop.eup %6667  ;;  %v4622_v33 = vpop.permute.xlu1 %4621 }
 0x2db   : > { %v8491_v5 = vpop.eup %6669  ;;  %6683 = vrcp.f32 %v4257_v59  ;;  %v4255_v12 = vadd.f32 1.0, %v6668_v22 }
 0x2dc   : > { %4779 = vrot.lane.b32.xlu0 %v4695_v58, %s6850_s11  ;;  %4785 = vrot.lane.b32.xlu1 %v4698_v30, %s6850_s11  ;;  %v6672_v57 = vpop.eup %6671  ;;  %v4696_v61 = vmul.f32 %v8491_v5, %v4622_v33 }
 0x2dd   : > { %v4258_v55 = vadd.f32 1.0, %v6672_v57  ;;  %6685 = vrcp.f32 %v4255_v12  ;;  %v4628_v46 = vpop.permute.xlu0 %4627 }
 0x2de   : > { %v4634_v33 = vpop.permute.xlu1 %4633 }
 0x2df   : > { %6687 = vrcp.f32 %v4258_v55 }
 0x2e0   : > { %v8495_v56 = vpop.eup %6673  ;;  %4781 = vrot.lane.b32.xlu1 %v4696_v61, %s6850_s11 }
 0x2e1   : > { %v4701_v15 = vmul.f32 %v8495_v56, %v4632_v10  ;;  %v6676_v58 = vpop.eup %6675  ;;  %v4640_v55 = vpop.permute.xlu0 %4639 }
 0x2e2   : > { %v8500_v37 = vpop.eup %6677  ;;  %v4256_v59 = vadd.f32 1.0, %v6676_v58  ;;  %v4630_v12 = vpop.permute.xlu1 %4629 }
 0x2e3   : > { %4791 = vrot.lane.b32.xlu0 %v4701_v15, %s6850_s11  ;;  %v4699_v30 = vmul.f32 %v8500_v37, %v4628_v46 }
 0x2e4   : > { %v8503_v22 = vpop.eup %6679  ;;  %6689 = vrcp.f32 %v4256_v59 }
 0x2e5   : > { %8973 = vst [vmem:[#allocation17_spill] sm:$0xff] %v8503_v22  ;;  %v4702_v57 = vmul.f32 %v8503_v22, %v4634_v33 }
 0x2e6   : > { %v8508_v10 = vpop.eup %6681 }
 0x2e7   : > { %4787 = vrot.lane.b32.xlu0 %v4699_v30, %s6850_s11  ;;  %4793 = vrot.lane.b32.xlu1 %v4702_v57, %s6850_s11  ;;  %v4700_v61 = vmul.f32 %v8508_v10, %v4630_v12  ;;  %v4636_v30 = vpop.permute.xlu0 %4635  ;;  %v4642_v57 = vpop.permute.xlu1 %4641 }
 0x2e8   : > { %v8511_v15 = vpop.eup %6683 }
 0x2e9   : > { %8974 = vst [vmem:[#allocation18_spill] sm:$0xff] %v8511_v15  ;;  %v4705_v58 = vmul.f32 %v8511_v15, %v4640_v55  ;;  %v4515_v15 = vmul.f32 %v8387_v13, %v8209_v16 }
 0x2ea   : > { %v8516_v46 = vpop.eup %6685 }
 0x2eb   : > { %4789 = vrot.lane.b32.xlu1 %v4700_v61, %s6850_s11  ;;  %4799 = vrot.lane.b32.xlu0 %v4705_v58, %s6850_s11  ;;  %8975 = vst [vmem:[#allocation19_spill] sm:$0xff] %v8516_v46  ;;  %v4703_v59 = vmul.f32 %v8516_v46, %v4636_v30  ;;  %v4638_v55 = vpop.permute.xlu1 %4637  ;;  %v4517_v58 = vmul.f32 %v8379_v23, %v8216_v24 }
 0x2ec   : > { %v8519_v33 = vpop.eup %6687  ;;  %v4516_v24 = vmul.f32 %v8395_v18, %v8222_v50 }
 0x2ed   : > { %8976 = vst [vmem:[#allocation20_spill] sm:$0xff] %v8519_v33  ;;  %v4706_v22 = vmul.f32 %v8519_v33, %v4642_v57 }
 0x2ef   : > { %4795 = vrot.lane.b32.xlu0 %v4703_v59, %s6850_s11  ;;  %4801 = vrot.lane.b32.xlu1 %v4706_v22, %s6850_s11  ;;  %v4518_v22 = vmul.f32 %v8389_v62, %v8230_v14 }
 0x2f1   : > { %v8524_v12 = vpop.eup %6689 }
 0x2f2   : > { %v4704_v61 = vmul.f32 %v8524_v12, %v4638_v55 }
 0x2f4   : > { %4797 = vrot.lane.b32.xlu1 %v4704_v61, %s6850_s11  ;;  %v4521_v61 = vmul.f32 %v8398_v27, %v8249_v43 }
 0x31e   : > { %v4744_v30 = vpop.permute.xlu0 %4743 }
 0x31f   : > { %v4837_v46 = vadd.f32 %v4744_v30, %v4517_v58 }
 0x321   : > { %5095 = vrot.lane.b32.xlu0 %v4837_v46, %s6851_s12  ;;  %6691 = vtanh.f32 %v4837_v46  ;;  %v4522_v46 = vmul.f32 %v8408_v51, %v8260_v17 }
 0x322   : > { %v4740_v59 = vpop.permute.xlu0 %4739  ;;  %v4746_v57 = vpop.permute.xlu1 %4745 }
 0x323   : > { %v4835_v33 = vadd.f32 %v4740_v59, %v4515_v15  ;;  %v4838_v55 = vadd.f32 %v4746_v57, %v4518_v22  ;;  %v4519_v15 = vmul.f32 %v8403_v7, %v8236_v26  ;;  %v4520_v59 = vmul.f32 %v8413_v38, %v8247_v47 }
 0x325   : > { %5091 = vrot.lane.b32.xlu0 %v4835_v33, %s6851_s12  ;;  %5097 = vrot.lane.b32.xlu1 %v4838_v55, %s6851_s12  ;;  %6693 = vtanh.f32 %v4835_v33 }
 0x326   : > { %v4742_v16 = vpop.permute.xlu1 %4741  ;;  %v4752_v58 = vpop.permute.xlu0 %4751  ;;  %6695 = vtanh.f32 %v4838_v55 }
 0x327   : > { %v4836_v14 = vadd.f32 %v4742_v16, %v4516_v24  ;;  %v4841_v30 = vadd.f32 %v4752_v58, %v4521_v61  ;;  %v4525_v16 = vmul.f32 %v8417_v42, %v8277_v52 }
 0x329   : > { %5093 = vrot.lane.b32.xlu1 %v4836_v14, %s6851_s12  ;;  %5103 = vrot.lane.b32.xlu0 %v4841_v30, %s6851_s12  ;;  %6697 = vtanh.f32 %v4836_v14 }
 0x32a   : > { %v4754_v50 = vpop.permute.xlu1 %4753  ;;  %v4748_v43 = vpop.permute.xlu0 %4747  ;;  %6699 = vtanh.f32 %v4841_v30  ;;  %v4526_v30 = vmul.f32 %v8430_v11, %v8285_v20 }
 0x32b   : > { %v4842_v22 = vadd.f32 %v4754_v50, %v4522_v46  ;;  %v4839_v33 = vadd.f32 %v4748_v43, %v4519_v15  ;;  %v4523_v46 = vmul.f32 %v8425_v2, %v8263_v3 }
 0x32d   : > { %5105 = vrot.lane.b32.xlu1 %v4842_v22, %s6851_s12  ;;  %5099 = vrot.lane.b32.xlu0 %v4839_v33, %s6851_s12  ;;  %6701 = vtanh.f32 %v4842_v22  ;;  %v4524_v22 = vmul.f32 %v8434_v31, %v8271_v48 }
 0x32e   : > { %v4750_v26 = vpop.permute.xlu1 %4749  ;;  %v6692_v55 = vpop.eup %6691  ;;  %6703 = vtanh.f32 %v4839_v33 }
 0x32f   : > { %v4840_v57 = vadd.f32 %v4750_v26, %v4520_v59  ;;  %v4760_v17 = vpop.permute.xlu0 %4759 }
 0x330   : > { %v4845_v47 = vadd.f32 %v4760_v17, %v4525_v16  ;;  %v4530_v16 = vmul.f32 %v8450_v1, %v8313_v28 }
 0x331   : > { %5101 = vrot.lane.b32.xlu1 %v4840_v57, %s6851_s12  ;;  %4935 = vrot.lane.b32.xlu0 %v6692_v55, %s6850_s11  ;;  %6705 = vtanh.f32 %v4840_v57  ;;  %v4529_v57 = vmul.f32 %v8440_v53, %v8306_v34 }
 0x332   : > { %v6694_v24 = vpop.eup %6693  ;;  %6707 = vtanh.f32 %v4845_v47 }
 0x333   : > { %v6696_v61 = vpop.eup %6695  ;;  %v4762_v14 = vpop.permute.xlu1 %4761 }
 0x334   : > { %v4756_v15 = vpop.permute.xlu0 %4755  ;;  %v4846_v52 = vadd.f32 %v4762_v14, %v4526_v30  ;;  %v4528_v14 = vmul.f32 %v8454_v41, %v8299_v54 }
 0x335   : > { %4937 = vrot.lane.b32.xlu1 %v6696_v61, %s6850_s11  ;;  %4931 = vrot.lane.b32.xlu0 %v6694_v24, %s6850_s11  ;;  %v4843_v50 = vadd.f32 %v4756_v15, %v4523_v46  ;;  %v4527_v61 = vmul.f32 %v8446_v19, %v8292_v35 }
 0x336   : > { %v6698_v58 = vpop.eup %6697 }
 0x337   : > { %v4758_v43 = vpop.permute.xlu1 %4757  ;;  %v6700_v3 = vpop.eup %6699  ;;  %6709 = vtanh.f32 %v4843_v50 }
 0x338   : > { %v4844_v33 = vadd.f32 %v4758_v43, %v4524_v22  ;;  %v4768_v20 = vpop.permute.xlu0 %4767  ;;  %6711 = vtanh.f32 %v4846_v52 }
 0x339   : > { %4933 = vrot.lane.b32.xlu1 %v6698_v58, %s6850_s11  ;;  %5111 = vrot.lane.b32.xlu0 %v4845_v47, %s6851_s12  ;;  %v4849_v55 = vadd.f32 %v4768_v20, %v4529_v57 }
 0x33a   : > { %v6702_v59 = vpop.eup %6701  ;;  %6713 = vtanh.f32 %v4844_v33 }
 0x33b   : > { %v6704_v26 = vpop.eup %6703  ;;  %v4770_v48 = vpop.permute.xlu1 %4769  ;;  %6715 = vtanh.f32 %v4849_v55 }
 0x33c   : > { %v4764_v24 = vpop.permute.xlu0 %4763  ;;  %v4850_v34 = vadd.f32 %v4770_v48, %v4530_v16 }
 0x33d   : > { %5113 = vrot.lane.b32.xlu1 %v4846_v52, %s6851_s12  ;;  %5107 = vrot.lane.b32.xlu0 %v4843_v50, %s6851_s12  ;;  %v4847_v47 = vadd.f32 %v4764_v24, %v4527_v61  ;;  %v4533_v52 = vmul.f32 %v8460_v21, %v8332_v44 }
 0x33e   : > { %v6706_v17 = vpop.eup %6705 }
 0x33f   : > { %v4766_v58 = vpop.permute.xlu1 %4765  ;;  %v6708_v35 = vpop.eup %6707  ;;  %6717 = vtanh.f32 %v4847_v47 }
 0x340   : > { %v4848_v15 = vadd.f32 %v4766_v58, %v4528_v14  ;;  %v4776_v28 = vpop.permute.xlu0 %4775  ;;  %6719 = vtanh.f32 %v4850_v34 }
 0x341   : > { %5109 = vrot.lane.b32.xlu1 %v4844_v33, %s6851_s12  ;;  %4943 = vrot.lane.b32.xlu0 %v6700_v3, %s6850_s11  ;;  %v4853_v50 = vadd.f32 %v4776_v28, %v4533_v52  ;;  %v4531_v33 = vmul.f32 %v8464_v4, %v8319_v6  ;;  %v4534_v3 = vmul.f32 %v8468_v9, %v8338_v25 }
 0x342   : > { %6721 = vtanh.f32 %v4848_v15 }
 0x343   : > { %6723 = vtanh.f32 %v4853_v50 }
 0x344   : > { %v6710_v46 = vpop.eup %6709  ;;  %v4772_v22 = vpop.permute.xlu0 %4771 }
 0x345   : > { %4945 = vrot.lane.b32.xlu1 %v6702_v59, %s6850_s11  ;;  %4939 = vrot.lane.b32.xlu0 %v6704_v26, %s6850_s11  ;;  %v6712_v30 = vpop.eup %6711  ;;  %v4851_v20 = vadd.f32 %v4772_v22, %v4531_v33  ;;  %v4532_v26 = vmul.f32 %v8475_v45, %v8327_v49  ;;  %v8977_v22 = vld [vmem:[#allocation12_spill] sm:$0xff]  ;;  %v8978_v33 = vld [vmem:[#allocation17_spill] sm:$0xff] }
 0x346   : > { %v4778_v54 = vpop.permute.xlu1 %4777 }
 0x347   : > { %v6714_v43 = vpop.eup %6713  ;;  %v4854_v44 = vadd.f32 %v4778_v54, %v4534_v3  ;;  %6725 = vtanh.f32 %v4851_v20  ;;  %v4542_v3 = vmul.f32 %v8978_v33, %v8977_v22 }
 0x348   : > { %v6716_v6 = vpop.eup %6715 }
 0x349   : > { %4941 = vrot.lane.b32.xlu1 %v6706_v17, %s6850_s11  ;;  %5119 = vrot.lane.b32.xlu0 %v4849_v55, %s6851_s12  ;;  %v4537_v17 = vmul.f32 %v8479_v8, %v8350_v40  ;;  %6727 = vtanh.f32 %v4854_v44 }
 0x34a   : > { %v4774_v59 = vpop.permute.xlu1 %4773  ;;  %v4784_v25 = vpop.permute.xlu0 %4783 }
 0x34b   : > { %v4852_v57 = vadd.f32 %v4774_v59, %v4532_v26  ;;  %v4857_v24 = vadd.f32 %v4784_v25, %v4537_v17  ;;  %v8979_v59 = vld [vmem:[#allocation11_spill] sm:$0xff]  ;;  %v8981_v17 = vld [vmem:[#allocation18_spill] sm:$0xff] }
 0x34c   : > { %v6718_v48 = vpop.eup %6717  ;;  %v4540_v26 = vmul.f32 %v8508_v10, %v8979_v59 }
 0x34d   : > { %5121 = vrot.lane.b32.xlu1 %v4850_v34, %s6851_s12  ;;  %5115 = vrot.lane.b32.xlu0 %v4847_v47, %s6851_s12  ;;  %v6720_v55 = vpop.eup %6719  ;;  %v4535_v34 = vmul.f32 %v8484_v32, %v8340_v60  ;;  %v4538_v47 = vmul.f32 %v8487_v29, %v8356_v36  ;;  %6729 = vtanh.f32 %v4852_v57 }
 0x34e   : > { %v4786_v49 = vpop.permute.xlu1 %4785  ;;  %v4780_v16 = vpop.permute.xlu0 %4779  ;;  %6731 = vtanh.f32 %v4857_v24 }
 0x34f   : > { %v6722_v61 = vpop.eup %6721  ;;  %v4858_v40 = vadd.f32 %v4786_v49, %v4538_v47  ;;  %v4855_v58 = vadd.f32 %v4780_v16, %v4535_v34  ;;  %v8982_v47 = vld [vmem:[#allocation13_spill] sm:$0xff] }
 0x350   : > { %v6724_v60 = vpop.eup %6723 }
 0x351   : > { %5117 = vrot.lane.b32.xlu1 %v4848_v15, %s6851_s12  ;;  %4951 = vrot.lane.b32.xlu0 %v6708_v35, %s6850_s11  ;;  %v4536_v15 = vmul.f32 %v8491_v5, %v8347_v39  ;;  %6733 = vtanh.f32 %v4855_v58 }
 0x352   : > { %v4782_v14 = vpop.permute.xlu1 %4781  ;;  %6735 = vtanh.f32 %v4858_v40 }
 0x353   : > { %v4856_v35 = vadd.f32 %v4782_v14, %v4536_v15  ;;  %v8984_v14 = vld [vmem:[#allocation16_spill] sm:$0xff] }
 0x354   : > { %v6726_v28 = vpop.eup %6725  ;;  %v8985_v15 = vld [vmem:[#allocation20_spill] sm:$0xff] }
 0x355   : > { %4953 = vrot.lane.b32.xlu1 %v6712_v30, %s6850_s11  ;;  %4947 = vrot.lane.b32.xlu0 %v6710_v46, %s6850_s11  ;;  %v4792_v36 = vpop.permute.xlu0 %4791  ;;  %v4541_v30 = vmul.f32 %v8495_v56, %v8365_v63  ;;  %6737 = vtanh.f32 %v4856_v35 }
 0x356   : > { %v6728_v46 = vpop.eup %6727 }
 0x357   : > { %v4861_v52 = vadd.f32 %v4792_v36, %v4541_v30 }
 0x359   : > { %4949 = vrot.lane.b32.xlu1 %v6714_v43, %s6850_s11  ;;  %5127 = vrot.lane.b32.xlu0 %v4853_v50, %s6851_s12  ;;  %v4794_v39 = vpop.permute.xlu1 %4793  ;;  %v4788_v50 = vpop.permute.xlu0 %4787  ;;  %v4539_v43 = vmul.f32 %v8500_v37, %v8358_v0  ;;  %6739 = vtanh.f32 %v4861_v52 }
 0x35a   : > { %v6730_v54 = vpop.eup %6729  ;;  %v4862_v63 = vadd.f32 %v4794_v39, %v4542_v3 }
 0x35b   : > { %v6732_v0 = vpop.eup %6731 }
 0x35d   : > { %5129 = vrot.lane.b32.xlu1 %v4854_v44, %s6851_s12  ;;  %5123 = vrot.lane.b32.xlu0 %v4851_v20, %s6851_s12  ;;  %v4859_v44 = vadd.f32 %v4788_v50, %v4539_v43  ;;  %v4790_v20 = vpop.permute.xlu1 %4789 }
 0x35e   : > { %v6734_v25 = vpop.eup %6733 }
 0x35f   : > { %6741 = vtanh.f32 %v4859_v44 }
 0x360   : > { %6743 = vtanh.f32 %v4862_v63 }
 0x361   : > { %5125 = vrot.lane.b32.xlu1 %v4852_v57, %s6851_s12  ;;  %4959 = vrot.lane.b32.xlu0 %v6716_v6, %s6850_s11  ;;  %v4860_v57 = vadd.f32 %v4790_v20, %v4540_v26  ;;  %v4800_v6 = vpop.permute.xlu0 %4799 }
 0x363   : > { %6745 = vtanh.f32 %v4860_v57 }
 0x365   : > { %4961 = vrot.lane.b32.xlu1 %v6720_v55, %s6850_s11  ;;  %4955 = vrot.lane.b32.xlu0 %v6718_v48, %s6850_s11  ;;  %v6736_v48 = vpop.eup %6735  ;;  %v8980_v55 = vld [vmem:[#allocation15_spill] sm:$0xff]  ;;  %v4796_v16 = vpop.permute.xlu0 %4795 }
 0x366   : > { %v4545_v49 = vmul.f32 %v8981_v17, %v8980_v55  ;;  %v6738_v34 = vpop.eup %6737 }
 0x369   : > { %4957 = vrot.lane.b32.xlu1 %v6722_v61, %s6850_s11  ;;  %5135 = vrot.lane.b32.xlu0 %v4857_v24, %s6851_s12  ;;  %v4802_v24 = vpop.permute.xlu1 %4801  ;;  %v4865_v61 = vadd.f32 %v4800_v6, %v4545_v49 }
 0x36b   : > { %6747 = vtanh.f32 %v4865_v61 }
 0x36d   : > { %5137 = vrot.lane.b32.xlu1 %v4858_v40, %s6851_s12  ;;  %5131 = vrot.lane.b32.xlu0 %v4855_v58, %s6851_s12  ;;  %v8983_v40 = vld [vmem:[#allocation19_spill] sm:$0xff] }
 0x36e   : > { %v4543_v58 = vmul.f32 %v8983_v40, %v8982_v47 }
 0x371   : > { %5133 = vrot.lane.b32.xlu1 %v4856_v35, %s6851_s12  ;;  %4967 = vrot.lane.b32.xlu0 %v6724_v60, %s6850_s11  ;;  %v4546_v35 = vmul.f32 %v8985_v15, %v8984_v14  ;;  %v4863_v60 = vadd.f32 %v4796_v16, %v4543_v58 }
 0x373   : > { %v4866_v36 = vadd.f32 %v4802_v24, %v4546_v35  ;;  %6749 = vtanh.f32 %v4863_v60 }
 0x375   : > { %4969 = vrot.lane.b32.xlu1 %v6728_v46, %s6850_s11  ;;  %4963 = vrot.lane.b32.xlu0 %v6726_v28, %s6850_s11  ;;  %v4798_v28 = vpop.permute.xlu1 %4797  ;;  %v8986_v46 = vld [vmem:[#allocation14_spill] sm:$0xff]  ;;  %6751 = vtanh.f32 %v4866_v36 }
 0x376   : > { %v4544_v30 = vmul.f32 %v8524_v12, %v8986_v46 }
 0x378   : > { %v4864_v39 = vadd.f32 %v4798_v28, %v4544_v30 }
 0x379   : > { %4965 = vrot.lane.b32.xlu1 %v6730_v54, %s6850_s11  ;;  %5143 = vrot.lane.b32.xlu0 %v4861_v52, %s6851_s12  ;;  %v6740_v52 = vpop.eup %6739 }
 0x37a   : > { %v6742_v50 = vpop.eup %6741  ;;  %6753 = vtanh.f32 %v4864_v39 }
 0x37b   : > { %v6744_v43 = vpop.eup %6743 }
 0x37c   : > { %v6746_v3 = vpop.eup %6745 }
 0x37d   : > { %5145 = vrot.lane.b32.xlu1 %v4862_v63, %s6851_s12  ;;  %5139 = vrot.lane.b32.xlu0 %v4859_v44, %s6851_s12  ;;  %v6748_v44 = vpop.eup %6747 }
 0x380   : > { %v6750_v20 = vpop.eup %6749 }
 0x381   : > { %5141 = vrot.lane.b32.xlu1 %v4860_v57, %s6851_s12  ;;  %4975 = vrot.lane.b32.xlu0 %v6732_v0, %s6850_s11 }
 0x382   : > { %v6752_v57 = vpop.eup %6751 }
 0x385   : > { %4977 = vrot.lane.b32.xlu1 %v6736_v48, %s6850_s11  ;;  %4971 = vrot.lane.b32.xlu0 %v6734_v25, %s6850_s11 }
 0x387   : > { %v6754_v25 = vpop.eup %6753 }
 0x389   : > { %4973 = vrot.lane.b32.xlu1 %v6738_v34, %s6850_s11  ;;  %5151 = vrot.lane.b32.xlu0 %v4865_v61, %s6851_s12 }
 0x38d   : > { %5153 = vrot.lane.b32.xlu1 %v4866_v36, %s6851_s12  ;;  %5147 = vrot.lane.b32.xlu0 %v4863_v60, %s6851_s12 }
 0x391   : > { %5149 = vrot.lane.b32.xlu1 %v4864_v39, %s6851_s12  ;;  %4983 = vrot.lane.b32.xlu0 %v6740_v52, %s6850_s11 }
 0x393   : > { %v5096_v54 = vpop.permute.xlu0 %5095 }
 0x394   : > { %5189 = vst.msk [vmem:[%s6972_s23 + $0x10] sm:$0xff] %vm863_vm2, %v5096_v54 }
 0x395   : > { %4985 = vrot.lane.b32.xlu1 %v6744_v43, %s6850_s11  ;;  %4979 = vrot.lane.b32.xlu0 %v6742_v50, %s6850_s11 }
 0x397   : > { %v5092_v22 = vpop.permute.xlu0 %5091  ;;  %v5098_v63 = vpop.permute.xlu1 %5097 }
 0x398   : > { %5187 = vst.msk [vmem:[%s6972_s23] sm:$0xff] %vm863_vm2, %v5092_v22  ;;  %5190 = vst.msk [vmem:[%s6972_s23 + $0x18] sm:$0xff] %vm863_vm2, %v5098_v63 }
 0x399   : > { %4981 = vrot.lane.b32.xlu1 %v6746_v3, %s6850_s11  ;;  %4991 = vrot.lane.b32.xlu0 %v6748_v44, %s6850_s11 }
 0x39b   : > { %v5094_v59 = vpop.permute.xlu1 %5093  ;;  %v5104_v26 = vpop.permute.xlu0 %5103 }
 0x39c   : > { %5188 = vst.msk [vmem:[%s6972_s23 + $0x8] sm:$0xff] %vm863_vm2, %v5094_v59  ;;  %5193 = vst.msk [vmem:[%s6972_s23 + $0x30] sm:$0xff] %vm863_vm2, %v5104_v26 }
 0x39d   : > { %4993 = vrot.lane.b32.xlu1 %v6752_v57, %s6850_s11  ;;  %4987 = vrot.lane.b32.xlu0 %v6750_v20, %s6850_s11 }
 0x39f   : > { %v5106_v0 = vpop.permute.xlu1 %5105  ;;  %v5100_v6 = vpop.permute.xlu0 %5099 }
 0x3a0   : > { %5194 = vst.msk [vmem:[%s6972_s23 + $0x38] sm:$0xff] %vm863_vm2, %v5106_v0  ;;  %5191 = vst.msk [vmem:[%s6972_s23 + $0x20] sm:$0xff] %vm863_vm2, %v5100_v6 }
 0x3a1   : > { %4989 = vrot.lane.b32.xlu1 %v6754_v25, %s6850_s11 }
 0x3a3   : > { %v5102_v48 = vpop.permute.xlu1 %5101  ;;  %v4936_v55 = vpop.permute.xlu0 %4935 }
 0x3a4   : > { %5192 = vst.msk [vmem:[%s6972_s23 + $0x28] sm:$0xff] %vm863_vm2, %v5102_v48  ;;  %v5029_v49 = vmul.f32 %v8379_v23, %v4936_v55 }
 0x3a6   : > { %5255 = vrot.lane.b32.xlu0 %v5029_v49, %s6852_s13 }
 0x3a7   : > { %v4938_v24 = vpop.permute.xlu1 %4937  ;;  %v4932_v61 = vpop.permute.xlu0 %4931 }
 0x3a8   : > { %v5030_v16 = vmul.f32 %v8389_v62, %v4938_v24  ;;  %v5027_v34 = vmul.f32 %v8387_v13, %v4932_v61 }
 0x3aa   : > { %5257 = vrot.lane.b32.xlu1 %v5030_v16, %s6852_s13  ;;  %5251 = vrot.lane.b32.xlu0 %v5027_v34, %s6852_s13 }
 0x3ab   : > { %v4934_v47 = vpop.permute.xlu1 %4933  ;;  %v5112_v58 = vpop.permute.xlu0 %5111 }
 0x3ac   : > { %v5028_v23 = vmul.f32 %v8395_v18, %v4934_v47  ;;  %5197 = vst.msk [vmem:[%s6972_s23 + $0x50] sm:$0xff] %vm863_vm2, %v5112_v58 }
 0x3ae   : > { %5253 = vrot.lane.b32.xlu1 %v5028_v23, %s6852_s13 }
 0x3af   : > { %v5114_v14 = vpop.permute.xlu1 %5113  ;;  %v5108_v35 = vpop.permute.xlu0 %5107 }
 0x3b0   : > { %5198 = vst.msk [vmem:[%s6972_s23 + $0x58] sm:$0xff] %vm863_vm2, %v5114_v14  ;;  %5195 = vst.msk [vmem:[%s6972_s23 + $0x40] sm:$0xff] %vm863_vm2, %v5108_v35 }
 0x3b3   : > { %v5110_v13 = vpop.permute.xlu1 %5109  ;;  %v4944_v62 = vpop.permute.xlu0 %4943 }
 0x3b4   : > { %5196 = vst.msk [vmem:[%s6972_s23 + $0x48] sm:$0xff] %vm863_vm2, %v5110_v13  ;;  %v5033_v60 = vmul.f32 %v8398_v27, %v4944_v62 }
 0x3b6   : > { %5263 = vrot.lane.b32.xlu0 %v5033_v60, %s6852_s13 }
 0x3b7   : > { %v4946_v18 = vpop.permute.xlu1 %4945  ;;  %v4940_v36 = vpop.permute.xlu0 %4939 }
 0x3b8   : > { %v5034_v28 = vmul.f32 %v8408_v51, %v4946_v18  ;;  %v5031_v46 = vmul.f32 %v8403_v7, %v4940_v36 }
 0x3ba   : > { %5265 = vrot.lane.b32.xlu1 %v5034_v28, %s6852_s13  ;;  %5259 = vrot.lane.b32.xlu0 %v5031_v46, %s6852_s13 }
 0x3bb   : > { %v4942_v30 = vpop.permute.xlu1 %4941  ;;  %v5120_v39 = vpop.permute.xlu0 %5119 }
 0x3bc   : > { %v5032_v52 = vmul.f32 %v8413_v38, %v4942_v30  ;;  %5201 = vst.msk [vmem:[%s6972_s23 + $0x70] sm:$0xff] %vm863_vm2, %v5120_v39 }
 0x3be   : > { %5261 = vrot.lane.b32.xlu1 %v5032_v52, %s6852_s13 }
 0x3bf   : > { %v5122_v27 = vpop.permute.xlu1 %5121  ;;  %v5116_v54 = vpop.permute.xlu0 %5115 }
 0x3c0   : > { %5202 = vst.msk [vmem:[%s6972_s23 + $0x78] sm:$0xff] %vm863_vm2, %v5122_v27  ;;  %5199 = vst.msk [vmem:[%s6972_s23 + $0x60] sm:$0xff] %vm863_vm2, %v5116_v54 }
 0x3c3   : > { %v5118_v7 = vpop.permute.xlu1 %5117  ;;  %v4952_v51 = vpop.permute.xlu0 %4951 }
 0x3c4   : > { %5200 = vst.msk [vmem:[%s6972_s23 + $0x68] sm:$0xff] %vm863_vm2, %v5118_v7  ;;  %v5037_v50 = vmul.f32 %v8417_v42, %v4952_v51 }
 0x3c6   : > { %5271 = vrot.lane.b32.xlu0 %v5037_v50, %s6852_s13 }
 0x3c7   : > { %v4954_v38 = vpop.permute.xlu1 %4953  ;;  %v4948_v43 = vpop.permute.xlu0 %4947 }
 0x3c8   : > { %v5038_v22 = vmul.f32 %v8430_v11, %v4954_v38  ;;  %v5035_v3 = vmul.f32 %v8425_v2, %v4948_v43 }
 0x3ca   : > { %5273 = vrot.lane.b32.xlu1 %v5038_v22, %s6852_s13  ;;  %5267 = vrot.lane.b32.xlu0 %v5035_v3, %s6852_s13 }
 0x3cb   : > { %v4950_v63 = vpop.permute.xlu1 %4949  ;;  %v5128_v44 = vpop.permute.xlu0 %5127 }
 0x3cc   : > { %v5036_v20 = vmul.f32 %v8434_v31, %v4950_v63  ;;  %5205 = vst.msk [vmem:[%s6972_s23 + $0x90] sm:$0xff] %vm863_vm2, %v5128_v44 }
 0x3ce   : > { %5269 = vrot.lane.b32.xlu1 %v5036_v20, %s6852_s13 }
 0x3cf   : > { %v5130_v42 = vpop.permute.xlu1 %5129  ;;  %v5124_v59 = vpop.permute.xlu0 %5123 }
 0x3d0   : > { %5206 = vst.msk [vmem:[%s6972_s23 + $0x98] sm:$0xff] %vm863_vm2, %v5130_v42  ;;  %5203 = vst.msk [vmem:[%s6972_s23 + $0x80] sm:$0xff] %vm863_vm2, %v5124_v59 }
 0x3d3   : > { %v5126_v2 = vpop.permute.xlu1 %5125  ;;  %v4960_v11 = vpop.permute.xlu0 %4959 }
 0x3d4   : > { %5204 = vst.msk [vmem:[%s6972_s23 + $0x88] sm:$0xff] %vm863_vm2, %v5126_v2  ;;  %v5041_v26 = vmul.f32 %v8440_v53, %v4960_v11 }
 0x3d6   : > { %5279 = vrot.lane.b32.xlu0 %v5041_v26, %s6852_s13 }
 0x3d7   : > { %v4962_v31 = vpop.permute.xlu1 %4961  ;;  %v4956_v57 = vpop.permute.xlu0 %4955 }
 0x3d8   : > { %v5042_v0 = vmul.f32 %v8450_v1, %v4962_v31  ;;  %v5039_v6 = vmul.f32 %v8446_v19, %v4956_v57 }
 0x3da   : > { %5281 = vrot.lane.b32.xlu1 %v5042_v0, %s6852_s13  ;;  %5275 = vrot.lane.b32.xlu0 %v5039_v6, %s6852_s13 }
 0x3db   : > { %v4958_v25 = vpop.permute.xlu1 %4957  ;;  %v5136_v48 = vpop.permute.xlu0 %5135 }
 0x3dc   : > { %v5040_v55 = vmul.f32 %v8454_v41, %v4958_v25  ;;  %5209 = vst.msk [vmem:[%s6972_s23 + $0xb0] sm:$0xff] %vm863_vm2, %v5136_v48 }
 0x3de   : > { %5277 = vrot.lane.b32.xlu1 %v5040_v55, %s6852_s13 }
 0x3df   : > { %v5138_v53 = vpop.permute.xlu1 %5137  ;;  %v5132_v49 = vpop.permute.xlu0 %5131 }
 0x3e0   : > { %5210 = vst.msk [vmem:[%s6972_s23 + $0xb8] sm:$0xff] %vm863_vm2, %v5138_v53  ;;  %5207 = vst.msk [vmem:[%s6972_s23 + $0xa0] sm:$0xff] %vm863_vm2, %v5132_v49 }
 0x3e3   : > { %v5134_v19 = vpop.permute.xlu1 %5133  ;;  %v4968_v1 = vpop.permute.xlu0 %4967 }
 0x3e4   : > { %5208 = vst.msk [vmem:[%s6972_s23 + $0xa8] sm:$0xff] %vm863_vm2, %v5134_v19  ;;  %v5045_v24 = vmul.f32 %v8460_v21, %v4968_v1 }
 0x3e6   : > { %5287 = vrot.lane.b32.xlu0 %v5045_v24, %s6852_s13 }
 0x3e7   : > { %v4970_v41 = vpop.permute.xlu1 %4969  ;;  %v4964_v61 = vpop.permute.xlu0 %4963 }
 0x3e8   : > { %v5046_v16 = vmul.f32 %v8468_v9, %v4970_v41  ;;  %v5043_v34 = vmul.f32 %v8464_v4, %v4964_v61 }
 0x3ea   : > { %5289 = vrot.lane.b32.xlu1 %v5046_v16, %s6852_s13  ;;  %5283 = vrot.lane.b32.xlu0 %v5043_v34, %s6852_s13 }
 0x3eb   : > { %v4966_v47 = vpop.permute.xlu1 %4965  ;;  %v5144_v58 = vpop.permute.xlu0 %5143 }
 0x3ec   : > { %v5044_v23 = vmul.f32 %v8475_v45, %v4966_v47  ;;  %5213 = vst.msk [vmem:[%s6972_s23 + $0xd0] sm:$0xff] %vm863_vm2, %v5144_v58 }
 0x3ee   : > { %5285 = vrot.lane.b32.xlu1 %v5044_v23, %s6852_s13 }
 0x3ef   : > { %v5146_v21 = vpop.permute.xlu1 %5145  ;;  %v5140_v14 = vpop.permute.xlu0 %5139 }
 0x3f0   : > { %5214 = vst.msk [vmem:[%s6972_s23 + $0xd8] sm:$0xff] %vm863_vm2, %v5146_v21  ;;  %5211 = vst.msk [vmem:[%s6972_s23 + $0xc0] sm:$0xff] %vm863_vm2, %v5140_v14 }
 0x3f3   : > { %v5142_v4 = vpop.permute.xlu1 %5141  ;;  %v4976_v9 = vpop.permute.xlu0 %4975 }
 0x3f4   : > { %5212 = vst.msk [vmem:[%s6972_s23 + $0xc8] sm:$0xff] %vm863_vm2, %v5142_v4  ;;  %v5049_v35 = vmul.f32 %v8479_v8, %v4976_v9 }
 0x3f6   : > { %5295 = vrot.lane.b32.xlu0 %v5049_v35, %s6852_s13 }
 0x3f7   : > { %v4978_v45 = vpop.permute.xlu1 %4977  ;;  %v4972_v13 = vpop.permute.xlu0 %4971 }
 0x3f8   : > { %v5050_v62 = vmul.f32 %v8487_v29, %v4978_v45  ;;  %v5047_v60 = vmul.f32 %v8484_v32, %v4972_v13 }
 0x3fa   : > { %5297 = vrot.lane.b32.xlu1 %v5050_v62, %s6852_s13  ;;  %5291 = vrot.lane.b32.xlu0 %v5047_v60, %s6852_s13 }
 0x3fb   : > { %v4974_v18 = vpop.permute.xlu1 %4973  ;;  %v5152_v36 = vpop.permute.xlu0 %5151 }
 0x3fc   : > { %v5048_v28 = vmul.f32 %v8491_v5, %v4974_v18  ;;  %5217 = vst.msk [vmem:[%s6972_s23 + $0xf0] sm:$0xff] %vm863_vm2, %v5152_v36 }
 0x3fe   : > { %5293 = vrot.lane.b32.xlu1 %v5048_v28, %s6852_s13 }
 0x3ff   : > { %v5154_v8 = vpop.permute.xlu1 %5153  ;;  %v5148_v46 = vpop.permute.xlu0 %5147 }
 0x400   : > { %5218 = vst.msk [vmem:[%s6972_s23 + $0xf8] sm:$0xff] %vm863_vm2, %v5154_v8  ;;  %5215 = vst.msk [vmem:[%s6972_s23 + $0xe0] sm:$0xff] %vm863_vm2, %v5148_v46 }
 0x403   : > { %v5150_v32 = vpop.permute.xlu1 %5149  ;;  %v4984_v29 = vpop.permute.xlu0 %4983 }
 0x404   : > { %5216 = vst.msk [vmem:[%s6972_s23 + $0xe8] sm:$0xff] %vm863_vm2, %v5150_v32  ;;  %v5053_v30 = vmul.f32 %v8495_v56, %v4984_v29  ;;  %s6761_s23 = scalar_lea.vmem %s6760_s7, 8192 }
 0x405   : > { %p6763_p6 = scmp.lt.s32.totalorder %s6761_s23, %s6755_s22 }
 0x406   : > { %5303 = vrot.lane.b32.xlu0 %v5053_v30, %s6852_s13 }
 0x407   : > { %v4986_v5 = vpop.permute.xlu1 %4985  ;;  %v4980_v39 = vpop.permute.xlu0 %4979  ;;  %p6764_p7 = por %p6763_p6, %p6762_p5 }
 0x408   : > { %v5054_v52 = vmul.f32 %v8978_v33, %v4986_v5  ;;  %v5051_v27 = vmul.f32 %v8500_v37, %v4980_v39 }
 0x409   : > { %p6765_p8 = pnand %p6764_p7, %p6758_p4 }
 0x40a   : > { %5305 = vrot.lane.b32.xlu1 %v5054_v52, %s6852_s13  ;;  %5299 = vrot.lane.b32.xlu0 %v5051_v27, %s6852_s13 }
 0x40b   : > { %v4982_v54 = vpop.permute.xlu1 %4981  ;;  %v4992_v7 = vpop.permute.xlu0 %4991 }
 0x40c   : > { %v5052_v51 = vmul.f32 %v8508_v10, %v4982_v54 }
 0x40e   : > { %5301 = vrot.lane.b32.xlu1 %v5052_v51, %s6852_s13 }
 0x40f   : > { %v4994_v56 = vpop.permute.xlu1 %4993  ;;  %v4988_v37 = vpop.permute.xlu0 %4987 }
 0x410   : > { %v5055_v33 = vmul.f32 %v8983_v40, %v4988_v37 }
 0x411   : > { %6768 = shalt.err (!%p6765_p8)
}
 0x412   : > { %s6769_s10 = scalar_lea.hbm %s8780_s8, 4096  ;;  %s6773_s29 = scalar_lea.hbm %s8947_s5, 8192 }
 0x413   : > { %p6770_p10 = scmp.ne.s32.totalorder %s8780_s8, %s6769_s10  ;;  %p6774_p13 = scmp.lt.s32.totalorder %s8780_s8, %s8947_s5 }
 0x414   : > { %p6775_p0 = scmp.lt.s32.totalorder %s6773_s29, %s6769_s10 }
 0x415   : > { %p6771_p11 = pnand %p6770_p10, %p6935_p3 }
 0x416   : > { %p6776_p1 = por %p6775_p0, %p6774_p13 }
 0x417   : > { %p6772_p12 = pneg %p6771_p11 }
 0x419   : > { %p6777_p2 = pnand %p6776_p1, %p6772_p12 }
 0x41b   : > { %6780 = shalt.err (!%p6777_p2)
}
 0x41c   : > { %s6854_s14 = smov 128   ;;  %s6855_s15 = smov 8   ;;  %5307 = vrot.lane.b32.xlu0 %v5055_v33, %s6852_s13  ;;  %v4990_v10 = vpop.permute.xlu1 %4989  ;;  %v5057_v40 = vmul.f32 %v8981_v17, %v4992_v7  ;;  %v5058_v38 = vmul.f32 %v8985_v15, %v4994_v56  ;;  %v5256_v43 = vpop.permute.xlu0 %5255 }
 0x41d   : > { %6385 = dma.vmem_to_hbm [thread:$0]  (%p6935_p3), %s8783_s17, 4096, %s8780_s8, %s8788_s26, %s6854_s14, %s6854_s14, %s6855_s15   ;;  %v5056_v50 = vmul.f32 %v8524_v12, %v4990_v10  ;;  %5381 = vst.msk [vmem:[#allocation2 + $0x48] sm:$0xff] %vm863_vm2, %v5256_v43 }
 0x41e   : > { %5349 = vst.msk [vmem:[%s6970_s24 + $0x10] sm:$0xff] %vm863_vm2, %v5256_v43 }
 0x41f   : > { %5309 = vrot.lane.b32.xlu1 %v5056_v50, %s6852_s13 }
 0x420   : > { %5311 = vrot.lane.b32.xlu0 %v5057_v40, %s6852_s13  ;;  %v5258_v22 = vpop.permute.xlu1 %5257  ;;  %v5252_v17 = vpop.permute.xlu0 %5251 }
 0x421   : > { %5350 = vst.msk [vmem:[%s6970_s24 + $0x18] sm:$0xff] %vm863_vm2, %v5258_v22  ;;  %5382 = vst.msk [vmem:[#allocation2 + $0x50] sm:$0xff] %vm863_vm2, %v5258_v22 }
 0x422   : > { %5347 = vst.msk [vmem:[%s6970_s24] sm:$0xff] %vm863_vm2, %v5252_v17  ;;  %5379 = vst.msk [vmem:[#allocation2 + $0x28] sm:$0xff] %vm863_vm2, %v5252_v17 }
 0x423   : > { %5313 = vrot.lane.b32.xlu1 %v5058_v38, %s6852_s13 }
 0x424   : > { %v5254_v12 = vpop.permute.xlu1 %5253 }
 0x425   : > { %5348 = vst.msk [vmem:[%s6970_s24 + $0x8] sm:$0xff] %vm863_vm2, %v5254_v12  ;;  %5380 = vst.msk [vmem:[#allocation2 + $0x30] sm:$0xff] %vm863_vm2, %v5254_v12 }
 0x428   : > { %v5264_v15 = vpop.permute.xlu0 %5263 }
 0x429   : > { %5353 = vst.msk [vmem:[%s6970_s24 + $0x30] sm:$0xff] %vm863_vm2, %v5264_v15  ;;  %5385 = vst.msk [vmem:[#allocation2 + $0x88] sm:$0xff] %vm863_vm2, %v5264_v15 }
 0x42c   : > { %v5266_v3 = vpop.permute.xlu1 %5265  ;;  %v5260_v63 = vpop.permute.xlu0 %5259 }
 0x42d   : > { %5354 = vst.msk [vmem:[%s6970_s24 + $0x38] sm:$0xff] %vm863_vm2, %v5266_v3  ;;  %5386 = vst.msk [vmem:[#allocation2 + $0x90] sm:$0xff] %vm863_vm2, %v5266_v3 }
 0x42e   : > { %5351 = vst.msk [vmem:[%s6970_s24 + $0x20] sm:$0xff] %vm863_vm2, %v5260_v63  ;;  %5383 = vst.msk [vmem:[#allocation2 + $0x68] sm:$0xff] %vm863_vm2, %v5260_v63 }
 0x430   : > { %v5262_v44 = vpop.permute.xlu1 %5261 }
 0x431   : > { %5352 = vst.msk [vmem:[%s6970_s24 + $0x28] sm:$0xff] %vm863_vm2, %v5262_v44  ;;  %5384 = vst.msk [vmem:[#allocation2 + $0x70] sm:$0xff] %vm863_vm2, %v5262_v44 }
 0x438   : > { %v5272_v20 = vpop.permute.xlu0 %5271 }
 0x439   : > { %5357 = vst.msk [vmem:[%s6970_s24 + $0x50] sm:$0xff] %vm863_vm2, %v5272_v20  ;;  %5389 = vst.msk [vmem:[#allocation2 + $0xc8] sm:$0xff] %vm863_vm2, %v5272_v20 }
 0x43c   : > { %v5274_v42 = vpop.permute.xlu1 %5273  ;;  %v5268_v59 = vpop.permute.xlu0 %5267 }
 0x43d   : > { %5358 = vst.msk [vmem:[%s6970_s24 + $0x58] sm:$0xff] %vm863_vm2, %v5274_v42  ;;  %5390 = vst.msk [vmem:[#allocation2 + $0xd0] sm:$0xff] %vm863_vm2, %v5274_v42 }
 0x43e   : > { %5355 = vst.msk [vmem:[%s6970_s24 + $0x40] sm:$0xff] %vm863_vm2, %v5268_v59  ;;  %5387 = vst.msk [vmem:[#allocation2 + $0xa8] sm:$0xff] %vm863_vm2, %v5268_v59 }
 0x440   : > { %v5270_v2 = vpop.permute.xlu1 %5269 }
 0x441   : > { %5356 = vst.msk [vmem:[%s6970_s24 + $0x48] sm:$0xff] %vm863_vm2, %v5270_v2  ;;  %5388 = vst.msk [vmem:[#allocation2 + $0xb0] sm:$0xff] %vm863_vm2, %v5270_v2 }
 0x448   : > { %v5280_v11 = vpop.permute.xlu0 %5279 }
 0x449   : > { %5361 = vst.msk [vmem:[%s6970_s24 + $0x70] sm:$0xff] %vm863_vm2, %v5280_v11  ;;  %5393 = vst.msk [vmem:[#allocation2 + $0x108] sm:$0xff] %vm863_vm2, %v5280_v11 }
 0x44c   : > { %v5282_v26 = vpop.permute.xlu1 %5281  ;;  %v5276_v31 = vpop.permute.xlu0 %5275 }
 0x44d   : > { %5362 = vst.msk [vmem:[%s6970_s24 + $0x78] sm:$0xff] %vm863_vm2, %v5282_v26  ;;  %5394 = vst.msk [vmem:[#allocation2 + $0x110] sm:$0xff] %vm863_vm2, %v5282_v26 }
 0x44e   : > { %5359 = vst.msk [vmem:[%s6970_s24 + $0x60] sm:$0xff] %vm863_vm2, %v5276_v31  ;;  %5391 = vst.msk [vmem:[#allocation2 + $0xe8] sm:$0xff] %vm863_vm2, %v5276_v31 }
 0x450   : > { %v5278_v57 = vpop.permute.xlu1 %5277 }
 0x451   : > { %5360 = vst.msk [vmem:[%s6970_s24 + $0x68] sm:$0xff] %vm863_vm2, %v5278_v57  ;;  %5392 = vst.msk [vmem:[#allocation2 + $0xf0] sm:$0xff] %vm863_vm2, %v5278_v57 }
 0x458   : > { %v5288_v0 = vpop.permute.xlu0 %5287 }
 0x459   : > { %5365 = vst.msk [vmem:[%s6970_s24 + $0x90] sm:$0xff] %vm863_vm2, %v5288_v0  ;;  %5397 = vst.msk [vmem:[#allocation2 + $0x148] sm:$0xff] %vm863_vm2, %v5288_v0 }
 0x45c   : > { %v5290_v6 = vpop.permute.xlu1 %5289  ;;  %v5284_v25 = vpop.permute.xlu0 %5283 }
 0x45d   : > { %5366 = vst.msk [vmem:[%s6970_s24 + $0x98] sm:$0xff] %vm863_vm2, %v5290_v6  ;;  %5398 = vst.msk [vmem:[#allocation2 + $0x150] sm:$0xff] %vm863_vm2, %v5290_v6 }
 0x45e   : > { %5363 = vst.msk [vmem:[%s6970_s24 + $0x80] sm:$0xff] %vm863_vm2, %v5284_v25  ;;  %5395 = vst.msk [vmem:[#allocation2 + $0x128] sm:$0xff] %vm863_vm2, %v5284_v25 }
 0x460   : > { %v5286_v48 = vpop.permute.xlu1 %5285 }
 0x461   : > { %5364 = vst.msk [vmem:[%s6970_s24 + $0x88] sm:$0xff] %vm863_vm2, %v5286_v48  ;;  %5396 = vst.msk [vmem:[#allocation2 + $0x130] sm:$0xff] %vm863_vm2, %v5286_v48 }
 0x468   : > { %v5296_v55 = vpop.permute.xlu0 %5295 }
 0x469   : > { %5369 = vst.msk [vmem:[%s6970_s24 + $0xb0] sm:$0xff] %vm863_vm2, %v5296_v55  ;;  %5401 = vst.msk [vmem:[#allocation2 + $0x188] sm:$0xff] %vm863_vm2, %v5296_v55 }
 0x46c   : > { %v5298_v53 = vpop.permute.xlu1 %5297  ;;  %v5292_v49 = vpop.permute.xlu0 %5291 }
 0x46d   : > { %5370 = vst.msk [vmem:[%s6970_s24 + $0xb8] sm:$0xff] %vm863_vm2, %v5298_v53  ;;  %5402 = vst.msk [vmem:[#allocation2 + $0x190] sm:$0xff] %vm863_vm2, %v5298_v53 }
 0x46e   : > { %5367 = vst.msk [vmem:[%s6970_s24 + $0xa0] sm:$0xff] %vm863_vm2, %v5292_v49  ;;  %5399 = vst.msk [vmem:[#allocation2 + $0x168] sm:$0xff] %vm863_vm2, %v5292_v49 }
 0x470   : > { %v5294_v19 = vpop.permute.xlu1 %5293 }
 0x471   : > { %5368 = vst.msk [vmem:[%s6970_s24 + $0xa8] sm:$0xff] %vm863_vm2, %v5294_v19  ;;  %5400 = vst.msk [vmem:[#allocation2 + $0x170] sm:$0xff] %vm863_vm2, %v5294_v19 }
 0x478   : > { %v5304_v1 = vpop.permute.xlu0 %5303 }
 0x479   : > { %5373 = vst.msk [vmem:[%s6970_s24 + $0xd0] sm:$0xff] %vm863_vm2, %v5304_v1  ;;  %5405 = vst.msk [vmem:[#allocation2 + $0x1c8] sm:$0xff] %vm863_vm2, %v5304_v1 }
 0x47c   : > { %v5306_v24 = vpop.permute.xlu1 %5305  ;;  %v5300_v41 = vpop.permute.xlu0 %5299 }
 0x47d   : > { %5374 = vst.msk [vmem:[%s6970_s24 + $0xd8] sm:$0xff] %vm863_vm2, %v5306_v24  ;;  %5406 = vst.msk [vmem:[#allocation2 + $0x1d0] sm:$0xff] %vm863_vm2, %v5306_v24 }
 0x47e   : > { %5371 = vst.msk [vmem:[%s6970_s24 + $0xc0] sm:$0xff] %vm863_vm2, %v5300_v41  ;;  %5403 = vst.msk [vmem:[#allocation2 + $0x1a8] sm:$0xff] %vm863_vm2, %v5300_v41 }
 0x480   : > { %v5302_v61 = vpop.permute.xlu1 %5301 }
 0x481   : > { %5372 = vst.msk [vmem:[%s6970_s24 + $0xc8] sm:$0xff] %vm863_vm2, %v5302_v61  ;;  %5404 = vst.msk [vmem:[#allocation2 + $0x1b0] sm:$0xff] %vm863_vm2, %v5302_v61 }
 0x48e   : > { %v5308_v16 = vpop.permute.xlu0 %5307 }
 0x48f   : > { %5375 = vst.msk [vmem:[%s6970_s24 + $0xe0] sm:$0xff] %vm863_vm2, %v5308_v16  ;;  %5407 = vst.msk [vmem:[#allocation2 + $0x1e8] sm:$0xff] %vm863_vm2, %v5308_v16 }
 0x491   : > { %v5310_v34 = vpop.permute.xlu1 %5309 }
 0x492   : > { %v5312_v47 = vpop.permute.xlu0 %5311  ;;  %5376 = vst.msk [vmem:[%s6970_s24 + $0xe8] sm:$0xff] %vm863_vm2, %v5310_v34  ;;  %5408 = vst.msk [vmem:[#allocation2 + $0x1f0] sm:$0xff] %vm863_vm2, %v5310_v34 }
 0x493   : > { %5377 = vst.msk [vmem:[%s6970_s24 + $0xf0] sm:$0xff] %vm863_vm2, %v5312_v47  ;;  %5409 = vst.msk [vmem:[#allocation2 + $0x208] sm:$0xff] %vm863_vm2, %v5312_v47 }
 0x495   : > { %v5314_v58 = vpop.permute.xlu1 %5313 }
 0x496   : > { %5378 = vst.msk [vmem:[%s6970_s24 + $0xf8] sm:$0xff] %vm863_vm2, %v5314_v58  ;;  %5410 = vst.msk [vmem:[#allocation2 + $0x210] sm:$0xff] %vm863_vm2, %v5314_v58 }
 0x497 PF: > { %p6391_p3 = scmp.ge.s32.totalorder %s6847_s25, 2  ;;  %s5464_s30 = sand.u32 1, %s6819_s18  }
 0x498   : > { %s5465_s13 = scalar_lea.sflag [#allocation5], %s5464_s30 }
 0x499   : > { %p6388_p4 = pnand %p6391_p3, %p6945_p9 }
 0x49b   : > { %p6389_p5 = pneg %p6388_p4 }
 0x49d   : > { %6814 = dma.done.wait (%p6389_p5), %s5465_s13, 4096  }
 0x49e   : > { %6816 = vsyncadd (%p6389_p5), %s5465_s13, 4294963200  ;;  %s19_s25 = sadd.s32 1, %s6847_s25   ;;  %s8987_s21 = sld [smem:[#allocation7_spill]] }
 0x49f   : > { %p16_p6 = scmp.ge.s32.totalorder %s19_s25, 18   ;;  %s8988_s22 = sld [smem:[#allocation8_spill]] }
 0x4a0   : > { %s8989_s23 = sld [smem:[#allocation9_spill]]  ;;  %s8991_s18 = smov %s6823_s19 }
 0x4a1   : > { %s8990_s24 = sld [smem:[#allocation10_spill]]  ;;  %s8992_s19 = smov %s6827_s20 }
 0x4a2   : > { %s8993_s20 = smov %s6953_s9  ;;  %18 = sbr.rel (!%p16_p6) target bundleno = 5 (0x5), region = 97 }
 0x4a7   :  { %5470 = vsyncpa [#allocation5], 1 }
 0x4a8   :  { %5472 = vsyncpa [#allocation5 + $0x1], 1 }

// kernel: convlstm_forward.3
= control target key start
LH: loop header
LB: loop body
LE: loop exit
PB: predicated region body
PF: predicated region fallthrough
CT: control target
= control target key end

     0   :  { %11 = vsyncpa [#allocation5], 0  ;;  %s9945_s0 = inlined_call_operand.vmem [shape: bf16[2,8,256,288], index: 0, kind: input, shape index: {}]   ;;  %s9946_s1 = inlined_call_operand.vmem [shape: bf16[288,128], index: 1, kind: input, shape index: {}]   ;;  %s9947_s2 = inlined_call_operand.vmem [shape: bf16[9,32,128], index: 2, kind: input, shape index: {}]   ;;  %s9948_s3 = inlined_call_operand.vmem [shape: f32[1,128], index: 3, kind: input, shape index: {}]   ;;  %s9949_s4 = inlined_call_operand.vmem [shape: f32[2,8,256,32], index: 4, kind: output, shape index: {0}]   ;;  %s9950_s5 = inlined_call_operand.hbm [shape: f32[2,256,32], index: 5, kind: output, shape index: {1}]  }
   0x1   :  { %13 = vsyncpa [#allocation5 + $0x1], 0  ;;  %s7580_s18 = smov 0   ;;  %s7582_s19 = smov 0  }
   0x2   :  { %s7584_s20 = smov 0   ;;  %s7586_s21 = smov 0  }
   0x3   :  { %s7588_s22 = smov 0   ;;  %s7590_s23 = smov 0  }
   0x4   :  { %s7592_s24 = smov 0   ;;  %s7594_s25 = smov 0  }
   0x5 LB: > { %9964 = sst [smem:[#allocation7_spill]] %s7521_s20  ;;  %s6032_s26 = sadd.s32 4294967295, %s7541_s25   ;;  %s7541_s25 = sphi %s7594_s25, %s19_s25   ;;  %s7537_s24 = sphi %s7592_s24, %s10014_s24   ;;  %s7533_s23 = sphi %s7590_s23, %s10013_s23   ;;  %s7529_s22 = sphi %s7588_s22, %s10012_s22   ;;  %s7525_s21 = sphi %s7586_s21, %s10011_s21   ;;  %s7521_s20 = sphi %s7584_s20, %s10010_s20   ;;  %s7517_s19 = sphi %s7582_s19, %s10016_s19   ;;  %s7513_s18 = sphi %s7580_s18, %s10015_s18  }
   0x6   : > { %9965 = sst [smem:[#allocation8_spill]] %s7533_s23  ;;  %s6033_s27 = sadd.s32 4294967294, %s7541_s25  }
   0x7   : > { %9966 = sst [smem:[#allocation9_spill]] %s7537_s24  ;;  %s28_s28 = sadd.s32 1, %s7533_s23 }
   0x8   : > { %p29_p0 = scmp.ge.s32.totalorder %s28_s28, 8  ;;  %s31_s29 = sadd.s32 1, %s7537_s24 }
   0x9   : > { %p167_p1 = scmp.ne.s32.totalorder %s7521_s20, %s7517_s19  ;;  %p168_p2 = scmp.eq.s32.totalorder %s6032_s26, 15 }
   0xa   : > { %s10018_s28 = smov (%p29_p0, %s28_s28), 0  ;;  %s10020_s29 = smov (!%p29_p0, %s31_s29), %s7537_s24 }
   0xb   : > { %9967 = sst [smem:[#allocation10_spill]] %s10018_s28  ;;  %p7629_p3 = por %p168_p2, %p167_p1 }
   0xc   : > { %p173_p4 = scmp.ne.s32.totalorder %s7517_s19, %s7513_s18  ;;  %p33_p5 = scmp.ge.s32.totalorder %s10020_s29, 2 }
   0xd   : > { %p174_p6 = scmp.eq.s32.totalorder %s6033_s27, 15  ;;  %p6036_p7 = scmp.ge.s32.totalorder %s7541_s25, 1 }
   0xe   : > { %p213_p8 = scmp.lt.s32.totalorder %s7541_s25, 17  ;;  %s10022_s29 = smov (%p33_p5, %s10020_s29), 0 }
   0xf   : > { %9969 = sst [smem:[#allocation11_spill]] %s10022_s29  ;;  %p7639_p9 = por %p174_p6, %p173_p4 }
  0x10   : > { %p214_p10 = pnand %p6036_p7, %p213_p8  ;;  %s154_s7 = ssub.s32 %s7537_s24, %s10022_s29 }
  0x11   : > { %s157_s8 = sadd.s32 1, %s7521_s20  ;;  %p155_p11 = scmp.eq.s32.totalorder %s154_s7, 0 }
  0x12   : > { %217 = sbr.rel (%p214_p10) target bundleno = 1254 (0x4e6), region = 36 }
  0x13   : > { %s7647_s9 = scalar_select %p155_p11, %s7521_s20, %s157_s8  }
  0x15   : > { %9971 = sst [smem:[#allocation12_spill]] %s7647_s9 }
  0x17   : > { %s9954_s10 = sand.u32 1, %s7517_s19   ;;  %p254_p12 = scmp.lt.s32.totalorder %s7529_s22, 1 }
  0x18   : > { %s6037_s11 = sshll.u32 %s9954_s10, 8  ;;  %p256_p13 = scmp.lt.s32.totalorder %s7525_s21, 7 }
  0x19   : > { %s255_s12 = scalar_select %p254_p12, %s7529_s22, 1 }
  0x1a   : > { %s257_s13 = scalar_select %p256_p13, %s7525_s21, 7 }
  0x1b   : > { %s7015_s14 = smul.u32 768, %s255_s12  ;;  %s6040_s15 = sshll.u32 %s255_s12, 8 }
  0x1c   : > { %s7014_s16 = smul.u32 96, %s257_s13  ;;  %s6039_s17 = sshll.u32 %s257_s13, 5 }
  0x1d   : > { %s269_s26 = sadd.s32 %s6040_s15, %s6039_s17  ;;  %s7666_s20 = scalar_lea.vmem [#allocation4], %s6037_s11 }
  0x1e   : > { %s260_s27 = sadd.s32 %s7015_s14, %s7014_s16  ;;  %s6041_s7 = sshll.u32 %s269_s26, 3 }
  0x1f   : > { %s6038_s8 = sshll.u32 %s260_s27, 2  ;;  %s7659_s24 = scalar_lea.vmem %s9949_s4, %s6041_s7 }
  0x20   : > { %s7664_s10 = scalar_lea.vmem %s9945_s0, %s6038_s8  ;;  %p6042_p0 = scmp.ne.s32.totalorder %s7525_s21, 0 }
  0x22   : > { %276 = sbr.rel (%p6042_p0) target bundleno = 92 (0x5c), region = 40 }
  0x27   : > { %vm277_vm0 = vcmask 261120   ;;  %v7543_v0 = vmov 0.0  }
  0x28   : > { %278 = vst.msk [vmem:[#allocation2] sm:$0xff] %vm277_vm0, %v7543_v0  ;;  %279 = vst.msk [vmem:[#allocation2 + $0x8] sm:$0xff] %vm277_vm0, %v7543_v0 }
  0x29   : > { %280 = vst.msk [vmem:[#allocation2 + $0x10] sm:$0xff] %vm277_vm0, %v7543_v0  ;;  %281 = vst.msk [vmem:[#allocation2 + $0x18] sm:$0xff] %vm277_vm0, %v7543_v0 }
  0x2a   : > { %282 = vst.msk [vmem:[#allocation2 + $0x20] sm:$0xff] %vm277_vm0, %v7543_v0  ;;  %283 = vst.msk [vmem:[#allocation2 + $0x28] sm:$0xff] %vm277_vm0, %v7543_v0 }
  0x2b   : > { %284 = vst.msk [vmem:[#allocation2 + $0x30] sm:$0xff] %vm277_vm0, %v7543_v0  ;;  %285 = vst.msk [vmem:[#allocation2 + $0x38] sm:$0xff] %vm277_vm0, %v7543_v0 }
  0x2c   : > { %286 = vst.msk [vmem:[#allocation2 + $0x40] sm:$0xff] %vm277_vm0, %v7543_v0  ;;  %287 = vst.msk [vmem:[#allocation2 + $0x48] sm:$0xff] %vm277_vm0, %v7543_v0 }
  0x2d   : > { %288 = vst.msk [vmem:[#allocation2 + $0x50] sm:$0xff] %vm277_vm0, %v7543_v0  ;;  %289 = vst.msk [vmem:[#allocation2 + $0x58] sm:$0xff] %vm277_vm0, %v7543_v0 }
  0x2e   : > { %290 = vst.msk [vmem:[#allocation2 + $0x60] sm:$0xff] %vm277_vm0, %v7543_v0  ;;  %291 = vst.msk [vmem:[#allocation2 + $0x68] sm:$0xff] %vm277_vm0, %v7543_v0 }
  0x2f   : > { %292 = vst.msk [vmem:[#allocation2 + $0x70] sm:$0xff] %vm277_vm0, %v7543_v0  ;;  %293 = vst.msk [vmem:[#allocation2 + $0x78] sm:$0xff] %vm277_vm0, %v7543_v0 }
  0x30   : > { %294 = vst.msk [vmem:[#allocation2 + $0x80] sm:$0xff] %vm277_vm0, %v7543_v0  ;;  %295 = vst.msk [vmem:[#allocation2 + $0x88] sm:$0xff] %vm277_vm0, %v7543_v0 }
  0x31   : > { %296 = vst.msk [vmem:[#allocation2 + $0x90] sm:$0xff] %vm277_vm0, %v7543_v0  ;;  %297 = vst.msk [vmem:[#allocation2 + $0x98] sm:$0xff] %vm277_vm0, %v7543_v0 }
  0x32   : > { %298 = vst.msk [vmem:[#allocation2 + $0xa0] sm:$0xff] %vm277_vm0, %v7543_v0  ;;  %299 = vst.msk [vmem:[#allocation2 + $0xa8] sm:$0xff] %vm277_vm0, %v7543_v0 }
  0x33   : > { %300 = vst.msk [vmem:[#allocation2 + $0xb0] sm:$0xff] %vm277_vm0, %v7543_v0  ;;  %301 = vst.msk [vmem:[#allocation2 + $0xb8] sm:$0xff] %vm277_vm0, %v7543_v0 }
  0x34   : > { %302 = vst.msk [vmem:[#allocation2 + $0xc0] sm:$0xff] %vm277_vm0, %v7543_v0  ;;  %303 = vst.msk [vmem:[#allocation2 + $0xc8] sm:$0xff] %vm277_vm0, %v7543_v0 }
  0x35   : > { %304 = vst.msk [vmem:[#allocation2 + $0xd0] sm:$0xff] %vm277_vm0, %v7543_v0  ;;  %305 = vst.msk [vmem:[#allocation2 + $0xd8] sm:$0xff] %vm277_vm0, %v7543_v0 }
  0x36   : > { %306 = vst.msk [vmem:[#allocation2 + $0xe0] sm:$0xff] %vm277_vm0, %v7543_v0  ;;  %307 = vst.msk [vmem:[#allocation2 + $0xe8] sm:$0xff] %vm277_vm0, %v7543_v0 }
  0x37   : > { %308 = vst.msk [vmem:[#allocation2 + $0xf0] sm:$0xff] %vm277_vm0, %v7543_v0  ;;  %309 = vst.msk [vmem:[#allocation2 + $0xf8] sm:$0xff] %vm277_vm0, %v7543_v0 }
  0x38   : > { %310 = vst.msk [vmem:[#allocation2 + $0x100] sm:$0xff] %vm277_vm0, %v7543_v0  ;;  %311 = vst.msk [vmem:[#allocation2 + $0x108] sm:$0xff] %vm277_vm0, %v7543_v0 }
  0x39   : > { %312 = vst.msk [vmem:[#allocation2 + $0x110] sm:$0xff] %vm277_vm0, %v7543_v0  ;;  %313 = vst.msk [vmem:[#allocation2 + $0x118] sm:$0xff] %vm277_vm0, %v7543_v0 }
  0x3a   : > { %314 = vst.msk [vmem:[#allocation2 + $0x120] sm:$0xff] %vm277_vm0, %v7543_v0  ;;  %315 = vst.msk [vmem:[#allocation2 + $0x128] sm:$0xff] %vm277_vm0, %v7543_v0 }
  0x3b   : > { %316 = vst.msk [vmem:[#allocation2 + $0x130] sm:$0xff] %vm277_vm0, %v7543_v0  ;;  %317 = vst.msk [vmem:[#allocation2 + $0x138] sm:$0xff] %vm277_vm0, %v7543_v0 }
  0x3c   : > { %318 = vst.msk [vmem:[#allocation2 + $0x140] sm:$0xff] %vm277_vm0, %v7543_v0  ;;  %319 = vst.msk [vmem:[#allocation2 + $0x148] sm:$0xff] %vm277_vm0, %v7543_v0 }
  0x3d   : > { %320 = vst.msk [vmem:[#allocation2 + $0x150] sm:$0xff] %vm277_vm0, %v7543_v0  ;;  %321 = vst.msk [vmem:[#allocation2 + $0x158] sm:$0xff] %vm277_vm0, %v7543_v0 }
  0x3e   : > { %322 = vst.msk [vmem:[#allocation2 + $0x160] sm:$0xff] %vm277_vm0, %v7543_v0  ;;  %323 = vst.msk [vmem:[#allocation2 + $0x168] sm:$0xff] %vm277_vm0, %v7543_v0 }
  0x3f   : > { %324 = vst.msk [vmem:[#allocation2 + $0x170] sm:$0xff] %vm277_vm0, %v7543_v0  ;;  %325 = vst.msk [vmem:[#allocation2 + $0x178] sm:$0xff] %vm277_vm0, %v7543_v0 }
  0x40   : > { %326 = vst.msk [vmem:[#allocation2 + $0x180] sm:$0xff] %vm277_vm0, %v7543_v0  ;;  %327 = vst.msk [vmem:[#allocation2 + $0x188] sm:$0xff] %vm277_vm0, %v7543_v0 }
  0x41   : > { %328 = vst.msk [vmem:[#allocation2 + $0x190] sm:$0xff] %vm277_vm0, %v7543_v0  ;;  %329 = vst.msk [vmem:[#allocation2 + $0x198] sm:$0xff] %vm277_vm0, %v7543_v0 }
  0x42   : > { %330 = vst.msk [vmem:[#allocation2 + $0x1a0] sm:$0xff] %vm277_vm0, %v7543_v0  ;;  %331 = vst.msk [vmem:[#allocation2 + $0x1a8] sm:$0xff] %vm277_vm0, %v7543_v0 }
  0x43   : > { %332 = vst.msk [vmem:[#allocation2 + $0x1b0] sm:$0xff] %vm277_vm0, %v7543_v0  ;;  %333 = vst.msk [vmem:[#allocation2 + $0x1b8] sm:$0xff] %vm277_vm0, %v7543_v0 }
  0x44   : > { %334 = vst.msk [vmem:[#allocation2 + $0x1c0] sm:$0xff] %vm277_vm0, %v7543_v0  ;;  %335 = vst.msk [vmem:[#allocation2 + $0x1c8] sm:$0xff] %vm277_vm0, %v7543_v0 }
  0x45   : > { %336 = vst.msk [vmem:[#allocation2 + $0x1d0] sm:$0xff] %vm277_vm0, %v7543_v0  ;;  %337 = vst.msk [vmem:[#allocation2 + $0x1d8] sm:$0xff] %vm277_vm0, %v7543_v0 }
  0x46   : > { %338 = vst.msk [vmem:[#allocation2 + $0x1e0] sm:$0xff] %vm277_vm0, %v7543_v0  ;;  %339 = vst.msk [vmem:[#allocation2 + $0x1e8] sm:$0xff] %vm277_vm0, %v7543_v0 }
  0x47   : > { %340 = vst.msk [vmem:[#allocation2 + $0x1f0] sm:$0xff] %vm277_vm0, %v7543_v0  ;;  %341 = vst.msk [vmem:[#allocation2 + $0x1f8] sm:$0xff] %vm277_vm0, %v7543_v0 }
  0x48   : > { %342 = vst.msk [vmem:[#allocation2 + $0x200] sm:$0xff] %vm277_vm0, %v7543_v0  ;;  %343 = vst.msk [vmem:[#allocation2 + $0x208] sm:$0xff] %vm277_vm0, %v7543_v0 }
  0x49   : > { %344 = vst.msk [vmem:[#allocation2 + $0x210] sm:$0xff] %vm277_vm0, %v7543_v0  ;;  %345 = vst.msk [vmem:[#allocation2 + $0x218] sm:$0xff] %vm277_vm0, %v7543_v0 }
  0x4a   : > { %346 = vst.msk [vmem:[#allocation2 + $0x220] sm:$0xff] %vm277_vm0, %v7543_v0  ;;  %347 = vst.msk [vmem:[#allocation2 + $0x228] sm:$0xff] %vm277_vm0, %v7543_v0 }
  0x4b   : > { %348 = vst.msk [vmem:[#allocation2 + $0x230] sm:$0xff] %vm277_vm0, %v7543_v0  ;;  %349 = vst.msk [vmem:[#allocation2 + $0x238] sm:$0xff] %vm277_vm0, %v7543_v0 }
  0x4c   : > { %350 = vst.msk [vmem:[%s7666_s20] sm:$0xff] %vm277_vm0, %v7543_v0  ;;  %351 = vst.msk [vmem:[%s7666_s20 + $0x8] sm:$0xff] %vm277_vm0, %v7543_v0 }
  0x4d   : > { %352 = vst.msk [vmem:[%s7666_s20 + $0x10] sm:$0xff] %vm277_vm0, %v7543_v0  ;;  %353 = vst.msk [vmem:[%s7666_s20 + $0x18] sm:$0xff] %vm277_vm0, %v7543_v0 }
  0x4e   : > { %354 = vst.msk [vmem:[%s7666_s20 + $0x20] sm:$0xff] %vm277_vm0, %v7543_v0  ;;  %355 = vst.msk [vmem:[%s7666_s20 + $0x28] sm:$0xff] %vm277_vm0, %v7543_v0 }
  0x4f   : > { %356 = vst.msk [vmem:[%s7666_s20 + $0x30] sm:$0xff] %vm277_vm0, %v7543_v0  ;;  %357 = vst.msk [vmem:[%s7666_s20 + $0x38] sm:$0xff] %vm277_vm0, %v7543_v0 }
  0x50   : > { %358 = vst.msk [vmem:[%s7666_s20 + $0x40] sm:$0xff] %vm277_vm0, %v7543_v0  ;;  %359 = vst.msk [vmem:[%s7666_s20 + $0x48] sm:$0xff] %vm277_vm0, %v7543_v0 }
  0x51   : > { %360 = vst.msk [vmem:[%s7666_s20 + $0x50] sm:$0xff] %vm277_vm0, %v7543_v0  ;;  %361 = vst.msk [vmem:[%s7666_s20 + $0x58] sm:$0xff] %vm277_vm0, %v7543_v0 }
  0x52   : > { %362 = vst.msk [vmem:[%s7666_s20 + $0x60] sm:$0xff] %vm277_vm0, %v7543_v0  ;;  %363 = vst.msk [vmem:[%s7666_s20 + $0x68] sm:$0xff] %vm277_vm0, %v7543_v0 }
  0x53   : > { %364 = vst.msk [vmem:[%s7666_s20 + $0x70] sm:$0xff] %vm277_vm0, %v7543_v0  ;;  %365 = vst.msk [vmem:[%s7666_s20 + $0x78] sm:$0xff] %vm277_vm0, %v7543_v0 }
  0x54   : > { %366 = vst.msk [vmem:[%s7666_s20 + $0x80] sm:$0xff] %vm277_vm0, %v7543_v0  ;;  %367 = vst.msk [vmem:[%s7666_s20 + $0x88] sm:$0xff] %vm277_vm0, %v7543_v0 }
  0x55   : > { %368 = vst.msk [vmem:[%s7666_s20 + $0x90] sm:$0xff] %vm277_vm0, %v7543_v0  ;;  %369 = vst.msk [vmem:[%s7666_s20 + $0x98] sm:$0xff] %vm277_vm0, %v7543_v0 }
  0x56   : > { %370 = vst.msk [vmem:[%s7666_s20 + $0xa0] sm:$0xff] %vm277_vm0, %v7543_v0  ;;  %371 = vst.msk [vmem:[%s7666_s20 + $0xa8] sm:$0xff] %vm277_vm0, %v7543_v0 }
  0x57   : > { %372 = vst.msk [vmem:[%s7666_s20 + $0xb0] sm:$0xff] %vm277_vm0, %v7543_v0  ;;  %373 = vst.msk [vmem:[%s7666_s20 + $0xb8] sm:$0xff] %vm277_vm0, %v7543_v0 }
  0x58   : > { %374 = vst.msk [vmem:[%s7666_s20 + $0xc0] sm:$0xff] %vm277_vm0, %v7543_v0  ;;  %375 = vst.msk [vmem:[%s7666_s20 + $0xc8] sm:$0xff] %vm277_vm0, %v7543_v0 }
  0x59   : > { %376 = vst.msk [vmem:[%s7666_s20 + $0xd0] sm:$0xff] %vm277_vm0, %v7543_v0  ;;  %377 = vst.msk [vmem:[%s7666_s20 + $0xd8] sm:$0xff] %vm277_vm0, %v7543_v0 }
  0x5a   : > { %378 = vst.msk [vmem:[%s7666_s20 + $0xe0] sm:$0xff] %vm277_vm0, %v7543_v0  ;;  %379 = vst.msk [vmem:[%s7666_s20 + $0xe8] sm:$0xff] %vm277_vm0, %v7543_v0 }
  0x5b   : > { %380 = vst.msk [vmem:[%s7666_s20 + $0xf0] sm:$0xff] %vm277_vm0, %v7543_v0  ;;  %381 = vst.msk [vmem:[%s7666_s20 + $0xf8] sm:$0xff] %vm277_vm0, %v7543_v0 }
  0x5c PF: > { %v7093_v1 = vld [vmem:[%s9946_s1 + $0x78] sm:$0xff]   ;;  %v7094_v2 = vld [vmem:[%s9946_s1 + $0x88] sm:$0xff]   ;;  %v7096_v4 = vld [vmem:[%s9946_s1 + $0x70] sm:$0xff]   ;;  %vm837_vm1 = vcmask 261120   ;;  %s7544_s14 = smov 32   ;;  %s7545_s15 = smov 96  }
  0x5d   : > { %6358 = vmatprep.subr.bf16.mxu0 %v7093_v1  ;;  %v7095_v3 = vld [vmem:[%s9946_s1 + $0x38] sm:$0xff]   ;;  %6650 = vmatprep.subr.bf16.mxu1 %v7094_v2  ;;  %v7097_v5 = vld [vmem:[%s9946_s1 + $0x80] sm:$0xff]   ;;  %v7098_v6 = vld [vmem:[%s9946_s1 + $0x30] sm:$0xff]   ;;  %s7546_s16 = smov 64   ;;  %s6357_s17 = sshll.u32 %s7529_s22, 12 }
  0x5e   : > { %6359 = vmatpush3.bf16.msra.mxu0 %v7095_v3  ;;  %6651 = vmatpush3.bf16.msra.mxu1 %v7094_v2  ;;  %v7099_v7 = vld [vmem:[%s7664_s10 + $0x8] ss:$12 sps:$4 sm:$0xff]   ;;  %v7101_v9 = vld [vmem:[%s7664_s10 + $0x20] ss:$12 sps:$4 sm:$0xff]   ;;  %v7106_v14 = vld [vmem:[%s7664_s10 + $0x38] ss:$12 sps:$4 sm:$0xff]   ;;  %s9783_s7 = scalar_lea.hbm %s9950_s5, %s6357_s17 }
  0x5f   : > { %6360 = vmatprep.subr.bf16.mxu0 %v7096_v4  ;;  %6652 = vmatprep.subr.bf16.mxu1 %v7097_v5  ;;  %v7100_v8 = vld [vmem:[%s9946_s1 + $0x68] sm:$0xff]   ;;  %v7103_v11 = vld [vmem:[%s9946_s1 + $0x60] sm:$0xff]   ;;  %v7107_v15 = vld [vmem:[%s9946_s1 + $0x58] sm:$0xff]   ;;  %s5909_s8 = sshll.u32 %s7666_s20, 4  ;;  %s10008_s21 = sand.u32 1, %s7517_s19   ;;  %s9786_s8 = int_to_ptr.vmem [resolvable:$true] %s5909_s8 }
  0x60   : > { %6654 = vmatprep.mubr.msk.bf16.mxu1 %vm837_vm1, %v7099_v7  ;;  %v7102_v10 = vld [vmem:[%s9946_s1 + $0x28] sm:$0xff]   ;;  %v7104_v12 = vld [vmem:[%s9946_s1 + $0x20] sm:$0xff]   ;;  %v7108_v16 = vld [vmem:[%s7664_s10 + $0x50] ss:$12 sps:$4 sm:$0xff]   ;;  %s9791_s23 = scalar_lea.sflag [#allocation5], %s10008_s21  ;;  %s7449_s22 = scalar_lea.vmem %s9786_s8, 4096 }
  0x61   : > { %v7105_v13 = vld [vmem:[%s9947_s2 + $0x8] sm:$0xff]   ;;  %v7109_v17 = vld [vmem:[%s9946_s1 + $0x18] sm:$0xff]   ;;  %v7110_v18 = vld [vmem:[%s9946_s1 + $0x50] sm:$0xff]   ;;  %p7450_p1 = scmp.ne.s32.totalorder %s9786_s8, %s7449_s22  ;;  %s7547_s28 = smov [#allocation4]  }
  0x62   : > { %6361 = vmatpush3.bf16.msra.mxu0 %v7098_v6  ;;  %6653 = vmatpush3.bf16.msra.mxu1 %v7097_v5  ;;  %v7112_v19 = vld [vmem:[%s7664_s10 + $0x68] ss:$12 sps:$4 sm:$0xff]   ;;  %v7114_v22 = vld [vmem:[%s7664_s10 + $0x80] ss:$12 sps:$4 sm:$0xff]   ;;  %v7120_v25 = vld [vmem:[%s7664_s10 + $0x4] ss:$12 sps:$4 sm:$0xff]  }
  0x63   : > { %6362 = vmatprep.subr.bf16.mxu0 %v7100_v8  ;;  %6686 = vmatprep.subr.bf16.mxu1 %v7105_v13  ;;  %v7111_v20 = vld [vmem:[%s9946_s1 + $0x10] sm:$0xff]   ;;  %v7113_v21 = vld [vmem:[%s9946_s1 + $0x48] sm:$0xff]   ;;  %v7116_v24 = vld [vmem:[%s9946_s1 + $0x40] sm:$0xff]   ;;  %p7451_p2 = pnand %p7450_p1, %p7629_p3  ;;  %s7453_s29 = sshll.u32 %s7547_s28, 4  ;;  %s7454_s29 = int_to_ptr.vmem [resolvable:$false] %s7453_s29 }
  0x64   : > { %v7115_v23 = vld [vmem:[%s9946_s1 + $0x8] sm:$0xff]   ;;  %v7121_v26 = vld [vmem:[%s7664_s10 + $0x98] ss:$12 sps:$4 sm:$0xff]   ;;  %918 = vmatprep.mubr.bf16.mxu0 %v7120_v25  ;;  %v7122_v30 = vld [vmem:[%s7664_s10 + $0xb0] ss:$12 sps:$4 sm:$0xff]   ;;  %p7456_p5 = scmp.lt.s32.totalorder %s9786_s8, %s7454_s29 }
  0x65   : > { %6655 = vmatmul.mubr.msk.bf16.vlgmr.msra.gmra.mxu1 %vm837_vm1, %v7101_v9  ;;  %v7117_v27 = vld [vmem:[%s9946_s1] sm:$0xff]   ;;  %v7984_v28 = vld [vmem:[%s9947_s2 + $0x28] sm:$0xff]   ;;  %v7133_v38 = vld [vmem:[%s7664_s10 + $0x30] ss:$12 sps:$4 sm:$0xff]   ;;  %p7452_p4 = pneg %p7451_p2 }
  0x66   : > { %6363 = vmatpush3.bf16.msra.mxu0 %v7102_v10  ;;  %6658 = vmatprep.mubr.msk.bf16.mxu1 %vm837_vm1, %v7106_v14  ;;  %v7118_v29 = vld [vmem:[%s7664_s10] ss:$12 sps:$4 sm:$0xff]   ;;  %v7124_v31 = vld [vmem:[%s7664_s10 + $0x1c] ss:$12 sps:$4 sm:$0xff]   ;;  %v7127_v34 = vld [vmem:[%s7664_s10 + $0x18] ss:$12 sps:$4 sm:$0xff]  }
  0x67   : > { %6364 = vmatprep.subr.bf16.mxu0 %v7103_v11  ;;  %6687 = vmatpush3.bf16.msra.mxu1 %v7105_v13  ;;  %v7126_v32 = vld [vmem:[%s7664_s10 + $0xc8] ss:$12 sps:$4 sm:$0xff]   ;;  %v7129_v33 = vld [vmem:[%s9947_s2] sm:$0xff]   ;;  %v7134_v39 = vld [vmem:[%s7664_s10 + $0x110] ss:$12 sps:$4 sm:$0xff]  }
  0x68   : > { %6688 = vmatprep.subr.bf16.mxu1 %v7129_v33  ;;  %v7128_v35 = vld [vmem:[%s7664_s10 + $0xe0] ss:$12 sps:$4 sm:$0xff]   ;;  %v7132_v37 = vld [vmem:[%s7664_s10 + $0xf8] ss:$12 sps:$4 sm:$0xff]   ;;  %v7137_v42 = vld [vmem:[%s7664_s10 + $0x128] ss:$12 sps:$4 sm:$0xff]  }
  0x69   : > { %v7130_v36 = vld [vmem:[%s7664_s10 + $0x34] ss:$12 sps:$4 sm:$0xff]   ;;  %v7148_v40 = vld [vmem:[%s9947_s2 + $0x18] sm:$0xff]   ;;  %v7140_v45 = vld [vmem:[%s7664_s10 + $0x64] ss:$12 sps:$4 sm:$0xff]  }
  0x6a   : > { %6365 = vmatpush3.bf16.msra.mxu0 %v7104_v12  ;;  %v7135_v41 = vld [vmem:[%s7664_s10 + $0x4c] ss:$12 sps:$4 sm:$0xff]   ;;  %v7138_v43 = vld [vmem:[%s7664_s10 + $0x48] ss:$12 sps:$4 sm:$0xff]   ;;  %v8019_v47 = vld [vmem:[%s9947_s2 + $0x20] sm:$0xff]  }
  0x6b   : > { %6366 = vmatprep.subr.bf16.mxu0 %v7107_v15  ;;  %6689 = vmatpush3.bf16.msra.mxu1 %v7129_v33  ;;  %v7139_v44 = vld [vmem:[%s7664_s10 + $0x140] ss:$12 sps:$4 sm:$0xff]   ;;  %v7142_v46 = vld [vmem:[%s7664_s10 + $0x158] ss:$12 sps:$4 sm:$0xff]   ;;  %v7144_v51 = vld [vmem:[%s7664_s10 + $0x170] ss:$12 sps:$4 sm:$0xff]  }
  0x6c   : > { %6722 = vmatprep.subr.bf16.mxu1 %v7148_v40  ;;  %v1240_v48 = vld [vmem:[#allocation2 + $0x7] sm:$0xff]  ;;  %v1241_v49 = vld [vmem:[#allocation2 + $0xf] sm:$0xff] }
  0x6d   : > { %6659 = vmatmul.mubr.msk.bf16.gmra.mxu1 %vm837_vm1, %v7108_v16  ;;  %v7143_v50 = vld [vmem:[%s7664_s10 + $0x60] ss:$12 sps:$4 sm:$0xff]   ;;  %v7145_v52 = vld [vmem:[%s7664_s10 + $0x7c] ss:$12 sps:$4 sm:$0xff]   ;;  %v1272_v53 = vpack.c.bf16 %v1241_v49, %v1240_v48  ;;  %v7147_v58 = vld [vmem:[%s7664_s10 + $0x78] ss:$12 sps:$4 sm:$0xff]  }
  0x6e   : > { %6367 = vmatpush3.bf16.msra.mxu0 %v7109_v17  ;;  %6662 = vmatprep.mubr.msk.bf16.mxu1 %vm837_vm1, %v7112_v19  ;;  %v1242_v54 = vld [vmem:[#allocation2 + $0x27] sm:$0xff]  ;;  %v1243_v55 = vld [vmem:[#allocation2 + $0x2f] sm:$0xff] }
  0x6f   : > { %6368 = vmatprep.subr.bf16.mxu0 %v7110_v18  ;;  %v1244_v56 = vld [vmem:[#allocation2 + $0x47] sm:$0xff]  ;;  %v1245_v57 = vld [vmem:[#allocation2 + $0x4f] sm:$0xff]  ;;  %v8031_v59 = vpack.c.bf16 %v1243_v55, %v1242_v54 }
  0x70   : > { %v7149_v60 = vld [vmem:[%s7664_s10 + $0x94] ss:$12 sps:$4 sm:$0xff]   ;;  %v8034_v61 = vpack.c.bf16 %v1245_v57, %v1244_v56  ;;  %v1246_v63 = vld [vmem:[#allocation2 + $0x67] sm:$0xff]  ;;  %v7151_v3 = vld [vmem:[%s7664_s10 + $0x90] ss:$12 sps:$4 sm:$0xff]  }
  0x71   : > { %v7162_v62 = vld [vmem:[%s9947_s2 + $0x10] sm:$0xff]   ;;  %v1248_v1 = vld [vmem:[#allocation2 + $0x87] sm:$0xff] }
  0x72   : > { %6369 = vmatpush3.bf16.msra.mxu0 %v7111_v20  ;;  %v1247_v0 = vld [vmem:[#allocation2 + $0x6f] sm:$0xff]  ;;  %v1250_v8 = vld [vmem:[#allocation2 + $0xa7] sm:$0xff] }
  0x73   : > { %6370 = vmatprep.subr.bf16.mxu0 %v7113_v21  ;;  %v1249_v2 = vld [vmem:[#allocation2 + $0x8f] sm:$0xff]  ;;  %v8044_v4 = vpack.c.bf16 %v1247_v0, %v1246_v63  ;;  %v1252_v10 = vld [vmem:[#allocation2 + $0xc7] sm:$0xff] }
  0x74   : > { %v8049_v5 = vld [vmem:[%s9947_s2 + $0x48] sm:$0xff]   ;;  %v8052_v7 = vpack.c.bf16 %v1249_v2, %v1248_v1  ;;  %v7155_v14 = vld [vmem:[%s7664_s10 + $0xc4] ss:$12 sps:$4 sm:$0xff]   ;;  %v7175_v2 = vld [vmem:[%s7664_s10 + $0x154] ss:$12 sps:$4 sm:$0xff]  }
  0x75   : > { %6663 = vmatmul.mubr.msk.bf16.gmra.mxu1 %vm837_vm1, %v7114_v22  ;;  %v7152_v6 = vld [vmem:[%s7664_s10 + $0xac] ss:$12 sps:$4 sm:$0xff]   ;;  %v7154_v12 = vld [vmem:[%s7664_s10 + $0xa8] ss:$12 sps:$4 sm:$0xff]   ;;  %v7169_v48 = vld [vmem:[%s7664_s10 + $0x124] ss:$12 sps:$4 sm:$0xff]  }
  0x76   : > { %6371 = vmatpush3.bf16.msra.mxu0 %v7115_v23  ;;  %6666 = vmatprep.mubr.msk.bf16.mxu1 %vm837_vm1, %v7121_v26  ;;  %v1251_v9 = vld [vmem:[#allocation2 + $0xaf] sm:$0xff]  ;;  %v1254_v16 = vld [vmem:[#allocation2 + $0xe7] sm:$0xff] }
  0x77   : > { %6372 = vmatprep.subr.bf16.mxu0 %v7116_v24  ;;  %v1253_v11 = vld [vmem:[#allocation2 + $0xcf] sm:$0xff]  ;;  %v8061_v13 = vpack.c.bf16 %v1251_v9, %v1250_v8  ;;  %v1256_v18 = vld [vmem:[#allocation2 + $0x107] sm:$0xff] }
  0x78   : > { %v8064_v15 = vpack.c.bf16 %v1253_v11, %v1252_v10  ;;  %v1255_v17 = vld [vmem:[#allocation2 + $0xef] sm:$0xff]  ;;  %v7159_v22 = vld [vmem:[%s7664_s10 + $0xdc] ss:$12 sps:$4 sm:$0xff]   ;;  %v7174_v0 = vld [vmem:[%s7664_s10 + $0x138] ss:$12 sps:$4 sm:$0xff]  }
  0x79   : > { %v1257_v19 = vld [vmem:[#allocation2 + $0x10f] sm:$0xff]  ;;  %v8071_v21 = vpack.c.bf16 %v1255_v17, %v1254_v16  ;;  %v1258_v24 = vld [vmem:[#allocation2 + $0x127] sm:$0xff]  ;;  %v8132_v11 = vld [vmem:[%s9947_s2 + $0x38] sm:$0xff]  }
  0x7a   : > { %6373 = vmatpush3.bf16.msra.mxu0 %v7117_v27  ;;  %v7157_v20 = vld [vmem:[%s7664_s10 + $0xc0] ss:$12 sps:$4 sm:$0xff]   ;;  %v8074_v23 = vpack.c.bf16 %v1257_v19, %v1256_v18  ;;  %v7172_v56 = vld [vmem:[%s7664_s10 + $0x13c] ss:$12 sps:$4 sm:$0xff]   ;;  %v1614_v63 = vld [vmem:[#allocation2 + $0x50] sm:$0xff] }
  0x7b   : > { %6758 = vmatprep.subr.bf16.mxu0 %v7984_v28  ;;  %v1259_v25 = vld [vmem:[#allocation2 + $0x12f] sm:$0xff]  ;;  %v1260_v26 = vld [vmem:[#allocation2 + $0x147] sm:$0xff] }
  0x7c   : > { %v1261_v27 = vld [vmem:[#allocation2 + $0x14f] sm:$0xff]  ;;  %v1262_v33 = vld [vmem:[#allocation2 + $0x167] sm:$0xff] }
  0x7d   : > { %919 = vmatmul.mubr.bf16.vlgmr.msra.gmra.mxu0 %v7118_v29  ;;  %6667 = vmatmul.mubr.msk.bf16.gmra.mxu1 %vm837_vm1, %v7122_v30  ;;  %v7161_v29 = vld [vmem:[%s7664_s10 + $0xd8] ss:$12 sps:$4 sm:$0xff]   ;;  %v8081_v30 = vpack.c.bf16 %v1259_v25, %v1258_v24  ;;  %v7171_v54 = vld [vmem:[%s7664_s10 + $0x120] ss:$12 sps:$4 sm:$0xff]   ;;  %v1616_v8 = vld [vmem:[#allocation2 + $0x70] sm:$0xff] }
  0x7e   : > { %6759 = vmatpush3.bf16.msra.mxu0 %v7984_v28  ;;  %926 = vmatprep.mubr.bf16.mxu0 %v7124_v31  ;;  %v7163_v31 = vld [vmem:[%s7664_s10 + $0xf4] ss:$12 sps:$4 sm:$0xff]   ;;  %v1617_v9 = vld [vmem:[#allocation2 + $0x88] sm:$0xff] }
  0x7f   : > { %6670 = vmatprep.mubr.msk.bf16.mxu1 %vm837_vm1, %v7126_v32  ;;  %6760 = vmatprep.subr.bf16.mxu0 %v8019_v47  ;;  %v8084_v32 = vpack.c.bf16 %v1261_v27, %v1260_v26  ;;  %v1618_v10 = vld [vmem:[#allocation2 + $0x90] sm:$0xff]  ;;  %v7178_v16 = vld [vmem:[%s7664_s10 + $0x16c] ss:$12 sps:$4 sm:$0xff]  }
  0x80   : > { %v8138_v17 = vpack.c.bf16 %v1618_v10, %v1617_v9  ;;  %v1620_v18 = vld [vmem:[#allocation2 + $0xb0] sm:$0xff]  ;;  %v1621_v19 = vld [vmem:[#allocation2 + $0xc8] sm:$0xff] }
  0x81   : > { %v1980_v24 = vld [vmem:[#allocation2 + $0x11] sm:$0xff]  ;;  %v1633_v9 = vld [vmem:[#allocation2 + $0x188] sm:$0xff] }
  0x82   : > { %6761 = vmatpush3.bf16.msra.mxu0 %v8019_v47  ;;  %v7180_v25 = vld [vmem:[%s7664_s10 + $0x168] ss:$12 sps:$4 sm:$0xff]  }
  0x83   : > { %6830 = vmatprep.subr.bf16.mxu0 %v8049_v5  ;;  %v1634_v10 = vld [vmem:[#allocation2 + $0x190] sm:$0xff] }
  0x85   : > { %927 = vmatmul.mubr.bf16.gmra.mxu0 %v7127_v34  ;;  %6671 = vmatmul.mubr.msk.bf16.gmra.mxu1 %vm837_vm1, %v7128_v35  ;;  %v1263_v34 = vld [vmem:[#allocation2 + $0x16f] sm:$0xff]  ;;  %v1264_v35 = vld [vmem:[#allocation2 + $0x187] sm:$0xff] }
  0x86   : > { %934 = vmatprep.mubr.bf16.mxu0 %v7130_v36  ;;  %6674 = vmatprep.mubr.msk.bf16.mxu1 %vm837_vm1, %v7132_v37  ;;  %v1265_v36 = vld [vmem:[#allocation2 + $0x18f] sm:$0xff] }
  0x87   : > { %v7165_v37 = vld [vmem:[%s7664_s10 + $0xf0] ss:$12 sps:$4 sm:$0xff]  }
  0x8d   : > { %935 = vmatmul.mubr.bf16.gmra.mxu0 %v7133_v38  ;;  %6675 = vmatmul.mubr.msk.bf16.gmra.mxu1 %vm837_vm1, %v7134_v39  ;;  %v8091_v38 = vpack.c.bf16 %v1263_v34, %v1262_v33  ;;  %v7166_v39 = vld [vmem:[%s7664_s10 + $0x10c] ss:$12 sps:$4 sm:$0xff]  }
  0x8e   : > { %942 = vmatprep.mubr.bf16.mxu0 %v7135_v41  ;;  %6678 = vmatprep.mubr.msk.bf16.mxu1 %vm837_vm1, %v7137_v42  ;;  %v1266_v41 = vld [vmem:[#allocation2 + $0x1a7] sm:$0xff]  ;;  %v1267_v42 = vld [vmem:[#allocation2 + $0x1af] sm:$0xff] }
  0x8f   : > { %v1981_v33 = vld [vmem:[#allocation2 + $0x29] sm:$0xff]  ;;  %v1982_v34 = vld [vmem:[#allocation2 + $0x31] sm:$0xff] }
  0x95   : > { %943 = vmatmul.mubr.bf16.gmra.mxu0 %v7138_v43  ;;  %6679 = vmatmul.mubr.msk.bf16.gmra.mxu1 %vm837_vm1, %v7139_v44  ;;  %v1268_v43 = vld [vmem:[#allocation2 + $0x1c7] sm:$0xff]  ;;  %v1269_v44 = vld [vmem:[#allocation2 + $0x1cf] sm:$0xff] }
  0x96   : > { %950 = vmatprep.mubr.bf16.mxu0 %v7140_v45  ;;  %6682 = vmatprep.mubr.msk.bf16.mxu1 %vm837_vm1, %v7142_v46  ;;  %v7168_v45 = vld [vmem:[%s7664_s10 + $0x108] ss:$12 sps:$4 sm:$0xff]   ;;  %v8101_v46 = vpack.c.bf16 %v1267_v42, %v1266_v41  ;;  %v8104_v49 = vpack.c.bf16 %v1269_v44, %v1268_v43  ;;  %v8158_v42 = vpack.c.bf16 %v1982_v34, %v1981_v33 }
  0x97   : > { %v1995_v33 = vld [vmem:[#allocation2 + $0x109] sm:$0xff]  ;;  %v1996_v34 = vld [vmem:[#allocation2 + $0x111] sm:$0xff] }
  0x9d   : > { %951 = vmatmul.mubr.bf16.gmra.mxu0 %v7143_v50  ;;  %6683 = vmatmul.mubr.msk.bf16.gmra.mxu1 %vm837_vm1, %v7144_v51  ;;  %v1270_v50 = vld [vmem:[#allocation2 + $0x1e7] sm:$0xff]  ;;  %v1271_v51 = vld [vmem:[#allocation2 + $0x1ef] sm:$0xff] }
  0x9e   : > { %958 = vmatprep.mubr.bf16.mxu0 %v7145_v52  ;;  %6690 = vmatprep.mubr.msk.bf16.mxu1 %vm837_vm1, %v1272_v53  ;;  %v1609_v52 = vld [vmem:[#allocation2 + $0x8] sm:$0xff]  ;;  %v1610_v53 = vld [vmem:[#allocation2 + $0x10] sm:$0xff]  ;;  %v8111_v55 = vpack.c.bf16 %v1271_v51, %v1270_v50 }
  0x9f   : > { %v1641_v57 = vpack.c.bf16 %v1610_v53, %v1609_v52  ;;  %v1628_v50 = vld [vmem:[#allocation2 + $0x130] sm:$0xff]  ;;  %v1629_v53 = vld [vmem:[#allocation2 + $0x148] sm:$0xff] }
  0xa0   : > { %v1985_v51 = vld [vmem:[#allocation2 + $0x69] sm:$0xff]  ;;  %v1986_v52 = vld [vmem:[#allocation2 + $0x71] sm:$0xff] }
  0xa5   : > { %959 = vmatmul.mubr.bf16.gmra.mxu0 %v7147_v58  ;;  %6691 = vmatmul.mubr.msk.bf16.vlgmr.msra.gmra.mxu1 %vm837_vm1, %v8031_v59  ;;  %v1611_v58 = vld [vmem:[#allocation2 + $0x28] sm:$0xff] }
  0xa6   : > { %966 = vmatprep.mubr.bf16.mxu0 %v7149_v60  ;;  %6694 = vmatprep.mubr.msk.bf16.mxu1 %vm837_vm1, %v8034_v61  ;;  %v1612_v60 = vld [vmem:[#allocation2 + $0x30] sm:$0xff] }
  0xa7   : > { %6723 = vmatpush3.bf16.msra.mxu1 %v7148_v40  ;;  %v8094_v40 = vpack.c.bf16 %v1265_v36, %v1264_v35  ;;  %v8118_v1 = vpack.c.bf16 %v1612_v60, %v1611_v58  ;;  %v1625_v35 = vld [vmem:[#allocation2 + $0x108] sm:$0xff]  ;;  %v1626_v36 = vld [vmem:[#allocation2 + $0x110] sm:$0xff] }
  0xa8   : > { %6724 = vmatprep.subr.bf16.mxu1 %v7162_v62  ;;  %v8160_v43 = vpack.c.bf16 %v1626_v36, %v1625_v35  ;;  %v8179_v58 = vld [vmem:[%s9947_s2 + $0x68] sm:$0xff]  }
  0xab   : > { %6725 = vmatpush3.bf16.msra.mxu1 %v7162_v62  ;;  %v1613_v62 = vld [vmem:[#allocation2 + $0x48] sm:$0xff] }
  0xac   : > { %7010 = vmatprep.subr.bf16.mxu1 %v7984_v28 }
  0xad   : > { %967 = vmatmul.mubr.bf16.gmra.mxu0 %v7151_v3  ;;  %6695 = vmatmul.mubr.msk.bf16.gmra.mxu1 %vm837_vm1, %v8044_v4  ;;  %v8121_v3 = vpack.c.bf16 %v1614_v63, %v1613_v62 }
  0xae   : > { %974 = vmatprep.mubr.bf16.mxu0 %v7152_v6  ;;  %6698 = vmatprep.mubr.msk.bf16.mxu1 %vm837_vm1, %v8052_v7  ;;  %v1615_v6 = vld [vmem:[#allocation2 + $0x68] sm:$0xff] }
  0xb5   : > { %975 = vmatmul.mubr.bf16.gmra.mxu0 %v7154_v12  ;;  %6699 = vmatmul.mubr.msk.bf16.gmra.mxu1 %vm837_vm1, %v8061_v13  ;;  %v7177_v12 = vld [vmem:[%s7664_s10 + $0x150] ss:$12 sps:$4 sm:$0xff]  }
  0xb6   : > { %982 = vmatprep.mubr.bf16.mxu0 %v7155_v14  ;;  %6702 = vmatprep.mubr.msk.bf16.mxu1 %vm837_vm1, %v8064_v15  ;;  %v8135_v14 = vpack.c.bf16 %v1616_v8, %v1615_v6  ;;  %v1989_v6 = vld [vmem:[#allocation2 + $0xa9] sm:$0xff]  ;;  %v1990_v8 = vld [vmem:[#allocation2 + $0xb1] sm:$0xff] }
  0xbd   : > { %983 = vmatmul.mubr.bf16.gmra.mxu0 %v7157_v20  ;;  %6703 = vmatmul.mubr.msk.bf16.gmra.mxu1 %vm837_vm1, %v8071_v21  ;;  %v1622_v20 = vld [vmem:[#allocation2 + $0xd0] sm:$0xff] }
  0xbe   : > { %990 = vmatprep.mubr.bf16.mxu0 %v7159_v22  ;;  %6706 = vmatprep.mubr.msk.bf16.mxu1 %vm837_vm1, %v8074_v23  ;;  %v1979_v22 = vld [vmem:[#allocation2 + $0x9] sm:$0xff] }
  0xbf   : > { %v2011_v27 = vpack.c.bf16 %v1980_v24, %v1979_v22  ;;  %v1635_v22 = vld [vmem:[#allocation2 + $0x1a8] sm:$0xff]  ;;  %v1636_v24 = vld [vmem:[#allocation2 + $0x1b0] sm:$0xff] }
  0xc0   : > { %v8214_v35 = vpack.c.bf16 %v1636_v24, %v1635_v22  ;;  %v2004_v22 = vld [vmem:[#allocation2 + $0x191] sm:$0xff] }
  0xc5   : > { %991 = vmatmul.mubr.bf16.gmra.mxu0 %v7161_v29  ;;  %6707 = vmatmul.mubr.msk.bf16.gmra.mxu1 %vm837_vm1, %v8081_v30  ;;  %v1623_v29 = vld [vmem:[#allocation2 + $0xe8] sm:$0xff] }
  0xc6   : > { %998 = vmatprep.mubr.bf16.mxu0 %v7163_v31  ;;  %6710 = vmatprep.mubr.msk.bf16.mxu1 %vm837_vm1, %v8084_v32  ;;  %v1624_v31 = vld [vmem:[#allocation2 + $0xf0] sm:$0xff] }
  0xc7   : > { %v8156_v41 = vpack.c.bf16 %v1624_v31, %v1623_v29  ;;  %v1637_v29 = vld [vmem:[#allocation2 + $0x1c8] sm:$0xff]  ;;  %v1638_v31 = vld [vmem:[#allocation2 + $0x1d0] sm:$0xff] }
  0xcd   : > { %999 = vmatmul.mubr.bf16.gmra.mxu0 %v7165_v37  ;;  %6711 = vmatmul.mubr.msk.bf16.gmra.mxu1 %vm837_vm1, %v8091_v38  ;;  %v1983_v37 = vld [vmem:[#allocation2 + $0x49] sm:$0xff] }
  0xce   : > { %1006 = vmatprep.mubr.bf16.mxu0 %v7166_v39  ;;  %6714 = vmatprep.mubr.msk.bf16.mxu1 %vm837_vm1, %v8094_v40  ;;  %v1984_v39 = vld [vmem:[#allocation2 + $0x51] sm:$0xff] }
  0xcf   : > { %v8162_v44 = vpack.c.bf16 %v1984_v39, %v1983_v37  ;;  %v8218_v37 = vpack.c.bf16 %v1638_v31, %v1637_v29  ;;  %v8220_v39 = vpack.c.bf16 %v1996_v34, %v1995_v33  ;;  %v7184_v29 = vld [vmem:[%s9947_s2 + $0x30] sm:$0xff]  }
  0xd0   : > { %v2005_v33 = vld [vmem:[#allocation2 + $0x1a9] sm:$0xff]  ;;  %v2006_v34 = vld [vmem:[#allocation2 + $0x1b1] sm:$0xff] }
  0xd5   : > { %1007 = vmatmul.mubr.bf16.gmra.mxu0 %v7168_v45  ;;  %6715 = vmatmul.mubr.msk.bf16.gmra.mxu1 %vm837_vm1, %v8101_v46  ;;  %v7182_v45 = vld [vmem:[%s9947_s2 + $0x40] sm:$0xff]  }
  0xd6   : > { %1014 = vmatprep.mubr.bf16.mxu0 %v7169_v48  ;;  %6718 = vmatprep.mubr.msk.bf16.mxu1 %vm837_vm1, %v8104_v49  ;;  %v1627_v48 = vld [vmem:[#allocation2 + $0x128] sm:$0xff] }
  0xd7   : > { %v8181_v60 = vpack.c.bf16 %v1628_v50, %v1627_v48  ;;  %v1640_v48 = vld [vmem:[#allocation2 + $0x1f0] sm:$0xff] }
  0xd8   : > { %v1997_v50 = vld [vmem:[#allocation2 + $0x129] sm:$0xff] }
  0xdd   : > { %1015 = vmatmul.mubr.bf16.gmra.mxu0 %v7171_v54  ;;  %6719 = vmatmul.mubr.msk.bf16.gmra.mxu1 %vm837_vm1, %v8111_v55  ;;  %v1630_v54 = vld [vmem:[#allocation2 + $0x150] sm:$0xff] }
  0xde   : > { %1022 = vmatprep.mubr.bf16.mxu0 %v7172_v56  ;;  %6726 = vmatprep.mubr.msk.bf16.mxu1 %vm837_vm1, %v1641_v57  ;;  %v1987_v56 = vld [vmem:[#allocation2 + $0x89] sm:$0xff]  ;;  %v1988_v57 = vld [vmem:[#allocation2 + $0x91] sm:$0xff]  ;;  %v8185_v62 = vpack.c.bf16 %v1630_v54, %v1629_v53 }
  0xdf   : > { %v8187_v63 = vpack.c.bf16 %v1988_v57, %v1987_v56  ;;  %v2000_v53 = vld [vmem:[#allocation2 + $0x151] sm:$0xff]  ;;  %v2007_v54 = vld [vmem:[#allocation2 + $0x1c9] sm:$0xff] }
  0xe0   : > { %v2008_v56 = vld [vmem:[#allocation2 + $0x1d1] sm:$0xff] }
  0xe5   : > { %1023 = vmatmul.mubr.bf16.gmra.mxu0 %v7174_v0  ;;  %6727 = vmatmul.mubr.msk.bf16.vlgmr.msra.gmra.mxu1 %vm837_vm1, %v8118_v1  ;;  %v1631_v0 = vld [vmem:[#allocation2 + $0x168] sm:$0xff] }
  0xe6   : > { %1030 = vmatprep.mubr.bf16.mxu0 %v7175_v2  ;;  %6730 = vmatprep.mubr.msk.bf16.mxu1 %vm837_vm1, %v8121_v3  ;;  %v1632_v2 = vld [vmem:[#allocation2 + $0x170] sm:$0xff] }
  0xe7   : > { %7012 = vmatpush3.bf16.msra.mxu1 %v7984_v28  ;;  %v1619_v28 = vld [vmem:[#allocation2 + $0xa8] sm:$0xff] }
  0xe8   : > { %7011 = vmatprep.subr.bf16.mxu1 %v8019_v47  ;;  %v8147_v26 = vpack.c.bf16 %v1620_v18, %v1619_v28  ;;  %v8198_v28 = vpack.c.bf16 %v1632_v2, %v1631_v0  ;;  %v8200_v18 = vpack.c.bf16 %v1990_v8, %v1989_v6  ;;  %v8236_v6 = vpack.c.bf16 %v2008_v56, %v2007_v54  ;;  %v2001_v8 = vld [vmem:[#allocation2 + $0x169] sm:$0xff]  ;;  %v8291_v54 = vld [vmem:[%s9947_s2 + $0x78] sm:$0xff]  }
  0xeb   : > { %7013 = vmatpush3.bf16.msra.mxu1 %v8019_v47  ;;  %v8149_v47 = vpack.c.bf16 %v1622_v20, %v1621_v19  ;;  %v8202_v19 = vpack.c.bf16 %v1634_v10, %v1633_v9  ;;  %v2002_v9 = vld [vmem:[#allocation2 + $0x171] sm:$0xff]  ;;  %v2009_v10 = vld [vmem:[#allocation2 + $0x1e9] sm:$0xff] }
  0xec   : > { %6794 = vmatprep.subr.bf16.mxu1 %v8132_v11  ;;  %v8246_v24 = vpack.c.bf16 %v2002_v9, %v2001_v8  ;;  %v8317_v9 = vld [vmem:[%s9947_s2 + $0x88] sm:$0xff]  }
  0xed   : > { %1031 = vmatmul.mubr.bf16.gmra.mxu0 %v7177_v12  ;;  %6731 = vmatmul.mubr.msk.bf16.gmra.mxu1 %vm837_vm1, %v8135_v14  ;;  %v1991_v12 = vld [vmem:[#allocation2 + $0xc9] sm:$0xff] }
  0xee   : > { %1038 = vmatprep.mubr.bf16.mxu0 %v7178_v16  ;;  %6734 = vmatprep.mubr.msk.bf16.mxu1 %vm837_vm1, %v8138_v17  ;;  %v1992_v16 = vld [vmem:[#allocation2 + $0xd1] sm:$0xff] }
  0xef   : > { %v8204_v20 = vpack.c.bf16 %v1992_v16, %v1991_v12  ;;  %v2010_v12 = vld [vmem:[#allocation2 + $0x1f1] sm:$0xff]  ;;  %v2003_v16 = vld [vmem:[#allocation2 + $0x189] sm:$0xff] }
  0xf5   : > { %1039 = vmatmul.mubr.bf16.gmra.mxu0 %v7180_v25  ;;  %6735 = vmatmul.mubr.msk.bf16.gmra.mxu1 %vm837_vm1, %v8147_v26  ;;  %v1993_v25 = vld [vmem:[#allocation2 + $0xe9] sm:$0xff] }
  0xf6   : > { %6738 = vmatprep.mubr.msk.bf16.mxu1 %vm837_vm1, %v8149_v47  ;;  %6762 = vmatprep.mubr.msk.bf16.mxu0 %vm837_vm1, %v2011_v27  ;;  %v1994_v27 = vld [vmem:[#allocation2 + $0xf1] sm:$0xff] }
  0xf7   : > { %v8216_v36 = vpack.c.bf16 %v1994_v27, %v1993_v25  ;;  %v8248_v25 = vpack.c.bf16 %v2010_v12, %v2009_v10  ;;  %v8250_v27 = vpack.c.bf16 %v2004_v22, %v2003_v16 }
  0xfd   : > { %6739 = vmatmul.mubr.msk.bf16.gmra.mxu1 %vm837_vm1, %v8156_v41  ;;  %6763 = vmatmul.mubr.msk.bf16.vlgmr.msra.gmra.mxu0 %vm837_vm1, %v8158_v42 }
  0xfe   : > { %6831 = vmatpush3.bf16.msra.mxu0 %v8049_v5  ;;  %6742 = vmatprep.mubr.msk.bf16.mxu1 %vm837_vm1, %v8160_v43  ;;  %v8183_v5 = vpack.c.bf16 %v1986_v52, %v1985_v51  ;;  %v1998_v51 = vld [vmem:[#allocation2 + $0x131] sm:$0xff]  ;;  %v1999_v52 = vld [vmem:[#allocation2 + $0x149] sm:$0xff] }
  0xff   : > { %6766 = vmatprep.mubr.msk.bf16.mxu0 %vm837_vm1, %v8162_v44  ;;  %6832 = vmatprep.subr.bf16.mxu0 %v7182_v45  ;;  %v8232_v0 = vpack.c.bf16 %v1998_v51, %v1997_v50  ;;  %v8234_v2 = vpack.c.bf16 %v2000_v53, %v1999_v52  ;;  %v8271_v51 = vpack.c.bf16 %v2006_v34, %v2005_v33  ;;  %v7187_v52 = vld [vmem:[%s9947_s2 + $0x50] sm:$0xff]  }
 0x102   : > { %6833 = vmatpush3.bf16.msra.mxu0 %v7182_v45  ;;  %v1639_v45 = vld [vmem:[#allocation2 + $0x1e8] sm:$0xff] }
 0x103   : > { %6902 = vmatprep.subr.bf16.mxu0 %v8179_v58  ;;  %v8230_v57 = vpack.c.bf16 %v1640_v48, %v1639_v45  ;;  %v7185_v48 = vld [vmem:[%s9947_s2 + $0x58] sm:$0xff]  }
 0x105   : > { %6743 = vmatmul.mubr.msk.bf16.gmra.mxu1 %vm837_vm1, %v8181_v60  ;;  %6767 = vmatmul.mubr.msk.bf16.gmra.mxu0 %vm837_vm1, %v8183_v5 }
 0x106   : > { %6746 = vmatprep.mubr.msk.bf16.mxu1 %vm837_vm1, %v8185_v62  ;;  %6770 = vmatprep.mubr.msk.bf16.mxu0 %vm837_vm1, %v8187_v63 }
 0x10d   : > { %6747 = vmatmul.mubr.msk.bf16.gmra.mxu1 %vm837_vm1, %v8198_v28  ;;  %6771 = vmatmul.mubr.msk.bf16.gmra.mxu0 %vm837_vm1, %v8200_v18 }
 0x10e   : > { %6750 = vmatprep.mubr.msk.bf16.mxu1 %vm837_vm1, %v8202_v19  ;;  %6774 = vmatprep.mubr.msk.bf16.mxu0 %vm837_vm1, %v8204_v20 }
 0x115   : > { %6751 = vmatmul.mubr.msk.bf16.gmra.mxu1 %vm837_vm1, %v8214_v35  ;;  %6775 = vmatmul.mubr.msk.bf16.gmra.mxu0 %vm837_vm1, %v8216_v36 }
 0x116   : > { %6754 = vmatprep.mubr.msk.bf16.mxu1 %vm837_vm1, %v8218_v37  ;;  %6778 = vmatprep.mubr.msk.bf16.mxu0 %vm837_vm1, %v8220_v39 }
 0x11d   : > { %6755 = vmatmul.mubr.msk.bf16.gmra.mxu1 %vm837_vm1, %v8230_v57  ;;  %6779 = vmatmul.mubr.msk.bf16.gmra.mxu0 %vm837_vm1, %v8232_v0 }
 0x11e   : > { %6782 = vmatprep.mubr.msk.bf16.mxu0 %vm837_vm1, %v8234_v2  ;;  %6790 = vmatprep.mubr.msk.bf16.mxu1 %vm837_vm1, %v8236_v6 }
 0x125   : > { %v8255_v31 = vpop.f32.mrf.mxu1  ;;  %6783 = vmatmul.mubr.msk.bf16.gmra.mxu0 %vm837_vm1, %v8246_v24  ;;  %6791 = vmatmul.mubr.msk.bf16.vlgmr.msra.gmra.mxu1 %vm837_vm1, %v8248_v25 }
 0x126   : > { %6795 = vmatpush3.bf16.msra.mxu1 %v8132_v11  ;;  %6786 = vmatprep.mubr.msk.bf16.mxu0 %vm837_vm1, %v8250_v27 }
 0x127   : > { %v1081_v45 = vpop.f32.mrf.mxu1  ;;  %6796 = vmatprep.subr.bf16.mxu1 %v7184_v29  ;;  %6798 = vmatprep.mubr.msk.bf16.mxu1 %vm837_vm1, %v8031_v59 }
 0x129   : > { %v8269_v50 = vpop.f32.mrf.mxu1 }
 0x12a   : > { %6797 = vmatpush3.bf16.msra.mxu1 %v7184_v29 }
 0x12b   : > { %v1084_v11 = vpop.f32.mrf.mxu1  ;;  %6866 = vmatprep.subr.bf16.mxu1 %v7185_v48 }
 0x12d   : > { %v8276_v53 = vpop.f32.mrf.mxu1  ;;  %6787 = vmatmul.mubr.msk.bf16.gmra.mxu0 %vm837_vm1, %v8271_v51  ;;  %6799 = vmatmul.mubr.msk.bf16.vlgmr.msra.gmra.mxu1 %vm837_vm1, %v8034_v61  ;;  %v7188_v61 = vld [vmem:[%s9947_s2 + $0x60] sm:$0xff]  }
 0x12e   : > { %6802 = vmatprep.mubr.msk.bf16.mxu1 %vm837_vm1, %v8044_v4  ;;  %6834 = vmatprep.mubr.msk.bf16.mxu0 %vm837_vm1, %v8118_v1 }
 0x12f   : > { %v8286_v59 = vpop.f32.mrf.mxu1  ;;  %6867 = vmatpush3.bf16.msra.mxu1 %v7185_v48 }
 0x130   : > { %6868 = vmatprep.subr.bf16.mxu1 %v7187_v52 }
 0x131   : > { %v8293_v56 = vpop.f32.mrf.mxu1 }
 0x133   : > { %v8295_v8 = vpop.f32.mrf.mxu1  ;;  %6869 = vmatpush3.bf16.msra.mxu1 %v7187_v52 }
 0x134   : > { %6938 = vmatprep.subr.bf16.mxu1 %v8291_v54 }
 0x135   : > { %v8301_v4 = vpop.f32.mrf.mxu1  ;;  %6803 = vmatmul.mubr.msk.bf16.gmra.mxu1 %vm837_vm1, %v8052_v7  ;;  %6835 = vmatmul.mubr.msk.bf16.vlgmr.msra.gmra.mxu0 %vm837_vm1, %v8121_v3 }
 0x136   : > { %6903 = vmatpush3.bf16.msra.mxu0 %v8179_v58  ;;  %6806 = vmatprep.mubr.msk.bf16.mxu1 %vm837_vm1, %v8061_v13 }
 0x137   : > { %v8310_v1 = vpop.f32.mrf.mxu1  ;;  %6838 = vmatprep.mubr.msk.bf16.mxu0 %vm837_vm1, %v8135_v14  ;;  %6904 = vmatprep.subr.bf16.mxu0 %v7188_v61  ;;  %v8337_v14 = vld [vmem:[%s9948_s3] ss:$0 sm:$0xff] }
 0x139   : > { %v8319_v7 = vpop.f32.mrf.mxu1 }
 0x13a   : > { %6905 = vmatpush3.bf16.msra.mxu0 %v7188_v61 }
 0x13b   : > { %v8321_v3 = vpop.f32.mrf.mxu1  ;;  %6974 = vmatprep.subr.bf16.mxu0 %v8317_v9 }
 0x13d   : > { %v6374_v58 = vpop.f32.mrf.mxu0  ;;  %v8324_v13 = vpop.f32.mrf.mxu1  ;;  %6807 = vmatmul.mubr.msk.bf16.gmra.mxu1 %vm837_vm1, %v8064_v15  ;;  %6839 = vmatmul.mubr.msk.bf16.gmra.mxu0 %vm837_vm1, %v8138_v17 }
 0x13e   : > { %6810 = vmatprep.mubr.msk.bf16.mxu1 %vm837_vm1, %v8071_v21  ;;  %6842 = vmatprep.mubr.msk.bf16.mxu0 %vm837_vm1, %v8147_v26 }
 0x13f   : > { %v6375_v10 = vpop.f32.mrf.mxu0  ;;  %v8339_v12 = vpop.f32.mrf.mxu1 }
 0x140   : > { %v6376_v16 = vadd.f32 %v6375_v10, %v6374_v58 }
 0x141   : > { %v6377_v22 = vpop.f32.mrf.mxu0  ;;  %v8341_v15 = vpop.f32.mrf.mxu1 }
 0x142   : > { %v921_v17 = vadd.f32 %v6376_v16, %v8337_v14 }
 0x143   : > { %v6378_v29 = vpop.f32.mrf.mxu0  ;;  %v8344_v33 = vpop.f32.mrf.mxu1 }
 0x144   : > { %v6379_v21 = vadd.f32 %v6378_v29, %v6377_v22  ;;  %v8346_v34 = vadd.f32 %v1081_v45, %v921_v17 }
 0x145   : > { %v6380_v26 = vpop.f32.mrf.mxu0  ;;  %v8348_v48 = vpop.f32.mrf.mxu1  ;;  %6811 = vmatmul.mubr.msk.bf16.gmra.mxu1 %vm837_vm1, %v8074_v23  ;;  %6843 = vmatmul.mubr.msk.bf16.gmra.mxu0 %vm837_vm1, %v8149_v47 }
 0x146   : > { %v924_v52 = vadd.f32 %v6379_v21, %v8337_v14  ;;  %6814 = vmatprep.mubr.msk.bf16.mxu1 %vm837_vm1, %v8081_v30  ;;  %6846 = vmatprep.mubr.msk.bf16.mxu0 %vm837_vm1, %v8156_v41 }
 0x147   : > { %v6381_v61 = vpop.f32.mrf.mxu0  ;;  %v8359_v45 = vpop.f32.mrf.mxu1 }
 0x148   : > { %v6382_v58 = vadd.f32 %v6381_v61, %v6380_v26  ;;  %v8361_v10 = vadd.f32 %v1084_v11, %v924_v52 }
 0x149   : > { %v6383_v16 = vpop.f32.mrf.mxu0  ;;  %v8363_v22 = vpop.f32.mrf.mxu1 }
 0x14a   : > { %v929_v23 = vadd.f32 %v6382_v58, %v8337_v14 }
 0x14b   : > { %v6384_v47 = vpop.f32.mrf.mxu0  ;;  %v8366_v17 = vpop.f32.mrf.mxu1 }
 0x14c   : > { %v6385_v29 = vadd.f32 %v6384_v47, %v6383_v16  ;;  %v8369_v30 = vadd.f32 %v8255_v31, %v929_v23 }
 0x14d   : > { %v6386_v21 = vpop.f32.mrf.mxu0  ;;  %v8371_v41 = vpop.f32.mrf.mxu1  ;;  %6815 = vmatmul.mubr.msk.bf16.gmra.mxu1 %vm837_vm1, %v8084_v32  ;;  %6847 = vmatmul.mubr.msk.bf16.gmra.mxu0 %vm837_vm1, %v8160_v43 }
 0x14e   : > { %v932_v11 = vadd.f32 %v6385_v29, %v8337_v14  ;;  %6818 = vmatprep.mubr.msk.bf16.mxu1 %vm837_vm1, %v8091_v38  ;;  %6850 = vmatprep.mubr.msk.bf16.mxu0 %vm837_vm1, %v8181_v60 }
 0x14f   : > { %v6387_v26 = vpop.f32.mrf.mxu0  ;;  %v8382_v31 = vpop.f32.mrf.mxu1 }
 0x150   : > { %v6388_v52 = vadd.f32 %v6387_v26, %v6386_v21  ;;  %v8385_v61 = vadd.f32 %v8269_v50, %v932_v11 }
 0x151   : > { %v6389_v58 = vpop.f32.mrf.mxu0  ;;  %v8387_v32 = vpop.f32.mrf.mxu1 }
 0x152   : > { %v937_v43 = vadd.f32 %v6388_v52, %v8337_v14 }
 0x153   : > { %v6390_v16 = vpop.f32.mrf.mxu0  ;;  %v8390_v23 = vpop.f32.mrf.mxu1 }
 0x154   : > { %v6391_v47 = vadd.f32 %v6390_v16, %v6389_v58  ;;  %v8393_v38 = vadd.f32 %v8286_v59, %v937_v43 }
 0x155   : > { %v6392_v60 = vpop.f32.mrf.mxu0  ;;  %v8395_v29 = vpop.f32.mrf.mxu1  ;;  %6819 = vmatmul.mubr.msk.bf16.gmra.mxu1 %vm837_vm1, %v8094_v40  ;;  %6851 = vmatmul.mubr.msk.bf16.gmra.mxu0 %vm837_vm1, %v8185_v62 }
 0x156   : > { %9972 = vst [vmem:[#allocation13_spill] sm:$0xff] %v8395_v29  ;;  %v940_v50 = vadd.f32 %v6391_v47, %v8337_v14  ;;  %6822 = vmatprep.mubr.msk.bf16.mxu1 %vm837_vm1, %v8101_v46  ;;  %6854 = vmatprep.mubr.msk.bf16.mxu0 %vm837_vm1, %v8198_v28 }
 0x157   : > { %v6393_v21 = vpop.f32.mrf.mxu0  ;;  %v8406_v59 = vpop.f32.mrf.mxu1 }
 0x158   : > { %v6394_v11 = vadd.f32 %v6393_v21, %v6392_v60  ;;  %v8409_v26 = vadd.f32 %v8295_v8, %v940_v50  ;;  %v2380_v60 = vld [vmem:[#allocation2 + $0x207] sm:$0xff]  ;;  %v2381_v50 = vld [vmem:[#allocation2 + $0x20f] sm:$0xff] }
 0x159   : > { %v6395_v52 = vpop.f32.mrf.mxu0  ;;  %v8411_v40 = vpop.f32.mrf.mxu1 }
 0x15a   : > { %9973 = vst [vmem:[#allocation14_spill] sm:$0xff] %v8411_v40  ;;  %v945_v62 = vadd.f32 %v6394_v11, %v8337_v14 }
 0x15b   : > { %v6396_v58 = vpop.f32.mrf.mxu0  ;;  %v8414_v43 = vpop.f32.mrf.mxu1 }
 0x15c   : > { %v6397_v16 = vadd.f32 %v6396_v58, %v6395_v52  ;;  %v1106_v46 = vadd.f32 %v8276_v53, %v945_v62 }
 0x15d   : > { %v6398_v47 = vpop.f32.mrf.mxu0  ;;  %v8417_v28 = vpop.f32.mrf.mxu1  ;;  %6823 = vmatmul.mubr.msk.bf16.gmra.mxu1 %vm837_vm1, %v8104_v49  ;;  %6855 = vmatmul.mubr.msk.bf16.gmra.mxu0 %vm837_vm1, %v8202_v19  ;;  %v8433_v19 = vpack.c.bf16 %v2381_v50, %v2380_v60 }
 0x15e   : > { %9974 = vst [vmem:[#allocation15_spill] sm:$0xff] %v8417_v28  ;;  %v948_v8 = vadd.f32 %v6397_v16, %v8337_v14  ;;  %6826 = vmatprep.mubr.msk.bf16.mxu1 %vm837_vm1, %v8111_v55  ;;  %6858 = vmatprep.mubr.msk.bf16.mxu0 %vm837_vm1, %v8214_v35 }
 0x15f   : > { %v6399_v53 = vpop.f32.mrf.mxu0  ;;  %v8428_v21 = vpop.f32.mrf.mxu1 }
 0x160   : > { %9975 = vst [vmem:[#allocation16_spill] sm:$0xff] %v8428_v21  ;;  %v6400_v11 = vadd.f32 %v6399_v53, %v6398_v47  ;;  %v1109_v52 = vadd.f32 %v8293_v56, %v948_v8  ;;  %v2751_v8 = vld [vmem:[#allocation2 + $0x210] sm:$0xff]  ;;  %v3461_v53 = vld [vmem:[#allocation2 + $0x47] sm:$0xff] }
 0x161   : > { %v6401_v49 = vpop.f32.mrf.mxu0  ;;  %v8431_v62 = vpop.f32.mrf.mxu1 }
 0x162   : > { %9976 = vst [vmem:[#allocation17_spill] sm:$0xff] %v8431_v62  ;;  %v953_v58 = vadd.f32 %v6400_v11, %v8337_v14  ;;  %v3462_v11 = vld [vmem:[#allocation2 + $0x4f] sm:$0xff] }
 0x163   : > { %v6402_v16 = vpop.f32.mrf.mxu0  ;;  %v8436_v55 = vpop.f32.mrf.mxu1 }
 0x164   : > { %9977 = vst [vmem:[#allocation18_spill] sm:$0xff] %v8436_v55  ;;  %v6403_v28 = vadd.f32 %v6402_v16, %v6401_v49  ;;  %v8439_v35 = vadd.f32 %v8310_v1, %v953_v58  ;;  %v2750_v1 = vld [vmem:[#allocation2 + $0x208] sm:$0xff]  ;;  %v3493_v16 = vpack.c.bf16 %v3462_v11, %v3461_v53 }
 0x165   : > { %v6404_v40 = vpop.f32.mrf.mxu0  ;;  %v6692_v29 = vpop.f32.mrf.mxu1  ;;  %6827 = vmatmul.mubr.msk.bf16.gmra.mxu1 %vm837_vm1, %v8433_v19  ;;  %6859 = vmatmul.mubr.msk.bf16.gmra.mxu0 %vm837_vm1, %v8218_v37  ;;  %v2767_v58 = vpack.c.bf16 %v2751_v8, %v2750_v1 }
 0x166   : > { %v956_v56 = vadd.f32 %v6403_v28, %v8337_v14  ;;  %v8447_v47 = vadd.f32 %v6692_v29, %v8369_v30  ;;  %6862 = vmatprep.mubr.msk.bf16.mxu0 %vm837_vm1, %v8230_v57  ;;  %6870 = vmatprep.mubr.msk.bf16.mxu1 %vm837_vm1, %v8158_v42 }
 0x167   : > { %v6405_v60 = vpop.f32.mrf.mxu0  ;;  %v1418_v50 = vpop.f32.mrf.mxu1 }
 0x168   : > { %v6406_v49 = vadd.f32 %v6405_v60, %v6404_v40  ;;  %v8454_v37 = vadd.f32 %v1418_v50, %v8346_v34  ;;  %v8457_v28 = vadd.f32 %v8321_v3, %v956_v56  ;;  %v7191_v3 = vld [vmem:[%s9947_s2 + $0x70] sm:$0xff]  }
 0x169   : > { %v6407_v30 = vpop.f32.mrf.mxu0  ;;  %v6693_v29 = vpop.f32.mrf.mxu1 }
 0x16a   : > { %v961_v57 = vadd.f32 %v6406_v49, %v8337_v14  ;;  %v8461_v42 = vadd.f32 %v6693_v29, %v8385_v61 }
 0x16b   : > { %v6408_v62 = vpop.f32.mrf.mxu0  ;;  %v1421_v55 = vpop.f32.mrf.mxu1 }
 0x16c   : > { %v6409_v21 = vadd.f32 %v6408_v62, %v6407_v30  ;;  %v8464_v40 = vadd.f32 %v1421_v55, %v8361_v10  ;;  %v1122_v34 = vadd.f32 %v8301_v4, %v961_v57  ;;  %v3463_v4 = vld [vmem:[#allocation2 + $0x67] sm:$0xff]  ;;  %v3464_v10 = vld [vmem:[#allocation2 + $0x6f] sm:$0xff] }
 0x16d   : > { %v6410_v56 = vpop.f32.mrf.mxu0  ;;  %v6696_v1 = vpop.f32.mrf.mxu1  ;;  %6863 = vmatmul.mubr.msk.bf16.gmra.mxu0 %vm837_vm1, %v2767_v58  ;;  %6871 = vmatmul.mubr.msk.bf16.vlgmr.msra.gmra.mxu1 %vm837_vm1, %v8162_v44 }
 0x16e   : > { %v964_v61 = vadd.f32 %v6409_v21, %v8337_v14  ;;  %v8474_v8 = vadd.f32 %v6696_v1, %v1106_v46  ;;  %6874 = vmatprep.mubr.msk.bf16.mxu1 %vm837_vm1, %v8183_v5  ;;  %6906 = vmatprep.mubr.msk.bf16.mxu0 %vm837_vm1, %v3493_v16  ;;  %v3465_v21 = vld [vmem:[#allocation2 + $0x87] sm:$0xff]  ;;  %v3466_v46 = vld [vmem:[#allocation2 + $0x8f] sm:$0xff]  ;;  %v3494_v5 = vpack.c.bf16 %v3464_v10, %v3463_v4 }
 0x16f   : > { %v6411_v62 = vpop.f32.mrf.mxu0  ;;  %v1434_v55 = vpop.f32.mrf.mxu1  ;;  %6939 = vmatpush3.bf16.msra.mxu1 %v8291_v54  ;;  %v3495_v57 = vpack.c.bf16 %v3466_v46, %v3465_v21  ;;  %v7192_v54 = vld [vmem:[%s9947_s2 + $0x80] sm:$0xff]  }
 0x170   : > { %v6412_v60 = vadd.f32 %v6411_v62, %v6410_v56  ;;  %v8481_v50 = vadd.f32 %v1434_v55, %v8393_v38  ;;  %v1125_v44 = vadd.f32 %v8319_v7, %v964_v61  ;;  %6940 = vmatprep.subr.bf16.mxu1 %v7191_v3  ;;  %v3468_v61 = vld [vmem:[#allocation2 + $0xaf] sm:$0xff]  ;;  %v3469_v10 = vld [vmem:[#allocation2 + $0xc7] sm:$0xff] }
 0x171   : > { %v6413_v53 = vpop.f32.mrf.mxu0  ;;  %v6697_v11 = vpop.f32.mrf.mxu1  ;;  %v3470_v62 = vld [vmem:[#allocation2 + $0xcf] sm:$0xff] }
 0x172   : > { %v969_v49 = vadd.f32 %v6412_v60, %v8337_v14  ;;  %v8485_v30 = vadd.f32 %v6697_v11, %v1109_v52 }
 0x173   : > { %v6414_v29 = vpop.f32.mrf.mxu0  ;;  %v1437_v58 = vpop.f32.mrf.mxu1  ;;  %6941 = vmatpush3.bf16.msra.mxu1 %v7191_v3 }
 0x174   : > { %v6415_v38 = vadd.f32 %v6414_v29, %v6413_v53  ;;  %v8491_v7 = vadd.f32 %v1437_v58, %v8409_v26  ;;  %v1130_v16 = vadd.f32 %v8339_v12, %v969_v49  ;;  %v3467_v26 = vld [vmem:[#allocation2 + $0xa7] sm:$0xff]  ;;  %v3497_v53 = vpack.c.bf16 %v3470_v62, %v3469_v10 }
 0x175   : > { %v6416_v56 = vpop.f32.mrf.mxu0  ;;  %v6700_v1 = vpop.f32.mrf.mxu1  ;;  %6875 = vmatmul.mubr.msk.bf16.gmra.mxu1 %vm837_vm1, %v8187_v63  ;;  %6907 = vmatmul.mubr.msk.bf16.vlgmr.msra.gmra.mxu0 %vm837_vm1, %v3494_v5  ;;  %v3496_v21 = vpack.c.bf16 %v3468_v61, %v3467_v26 }
 0x176   : > { %v972_v52 = vadd.f32 %v6415_v38, %v8337_v14  ;;  %v8498_v3 = vadd.f32 %v6700_v1, %v1122_v34  ;;  %6975 = vmatpush3.bf16.msra.mxu0 %v8317_v9  ;;  %6878 = vmatprep.mubr.msk.bf16.mxu1 %vm837_vm1, %v8200_v18  ;;  %v3474_v1 = vld [vmem:[#allocation2 + $0x10f] sm:$0xff] }
 0x177   : > { %v6417_v4 = vpop.f32.mrf.mxu0  ;;  %v1450_v12 = vpop.f32.mrf.mxu1  ;;  %6910 = vmatprep.mubr.msk.bf16.mxu0 %vm837_vm1, %v3495_v57  ;;  %6976 = vmatprep.subr.bf16.mxu0 %v7192_v54 }
 0x178   : > { %v6418_v63 = vadd.f32 %v6417_v4, %v6416_v56  ;;  %v8505_v55 = vadd.f32 %v1450_v12, %v8439_v35  ;;  %v1133_v34 = vadd.f32 %v8344_v33, %v972_v52  ;;  %v3473_v56 = vld [vmem:[#allocation2 + $0x107] sm:$0xff] }
 0x179   : > { %v6419_v60 = vpop.f32.mrf.mxu0  ;;  %v6701_v9 = vpop.f32.mrf.mxu1 }
 0x17a   : > { %v977_v18 = vadd.f32 %v6418_v63, %v8337_v14  ;;  %v8509_v46 = vadd.f32 %v6701_v9, %v1125_v44  ;;  %6977 = vmatpush3.bf16.msra.mxu0 %v7192_v54  ;;  %v3472_v54 = vld [vmem:[#allocation2 + $0xef] sm:$0xff] }
 0x17b   : > { %v6420_v11 = vpop.f32.mrf.mxu0  ;;  %v1453_v5 = vpop.f32.mrf.mxu1 }
 0x17c   : > { %v6421_v49 = vadd.f32 %v6420_v11, %v6419_v60  ;;  %v8512_v29 = vadd.f32 %v1453_v5, %v8457_v28  ;;  %v1138_v35 = vadd.f32 %v8324_v13, %v977_v18  ;;  %v3471_v28 = vld [vmem:[#allocation2 + $0xe7] sm:$0xff]  ;;  %v3476_v5 = vld [vmem:[#allocation2 + $0x12f] sm:$0xff] }
 0x17d   : > { %v6422_v58 = vpop.f32.mrf.mxu0  ;;  %v6704_v57 = vpop.f32.mrf.mxu1  ;;  %6879 = vmatmul.mubr.msk.bf16.gmra.mxu1 %vm837_vm1, %v8204_v20  ;;  %6911 = vmatmul.mubr.msk.bf16.gmra.mxu0 %vm837_vm1, %v3496_v21  ;;  %v3498_v12 = vpack.c.bf16 %v3472_v54, %v3471_v28  ;;  %v3475_v11 = vld [vmem:[#allocation2 + $0x127] sm:$0xff] }
 0x17e   : > { %v980_v33 = vadd.f32 %v6421_v49, %v8337_v14  ;;  %v8519_v44 = vadd.f32 %v6704_v57, %v1138_v35  ;;  %6882 = vmatprep.mubr.msk.bf16.mxu1 %vm837_vm1, %v8216_v36  ;;  %6914 = vmatprep.mubr.msk.bf16.mxu0 %vm837_vm1, %v3497_v53  ;;  %v3499_v36 = vpack.c.bf16 %v3474_v1, %v3473_v56  ;;  %v3477_v35 = vld [vmem:[#allocation2 + $0x147] sm:$0xff] }
 0x17f   : > { %v6423_v38 = vpop.f32.mrf.mxu0  ;;  %v1466_v13 = vpop.f32.mrf.mxu1  ;;  %v3500_v54 = vpack.c.bf16 %v3476_v5, %v3475_v11 }
 0x180   : > { %v6424_v52 = vadd.f32 %v6423_v38, %v6422_v58  ;;  %v8524_v26 = vadd.f32 %v1466_v13, %v1130_v16  ;;  %v1141_v20 = vadd.f32 %v8341_v15, %v980_v33 }
 0x181   : > { %v6425_v61 = vpop.f32.mrf.mxu0  ;;  %v6705_v4 = vpop.f32.mrf.mxu1 }
 0x182   : > { %v985_v10 = vadd.f32 %v6424_v52, %v8337_v14  ;;  %v8528_v62 = vadd.f32 %v6705_v4, %v1141_v20 }
 0x183   : > { %v6426_v63 = vpop.f32.mrf.mxu0  ;;  %v1469_v60 = vpop.f32.mrf.mxu1 }
 0x184   : > { %v6427_v9 = vadd.f32 %v6426_v63, %v6425_v61  ;;  %v8530_v21 = vadd.f32 %v1469_v60, %v1133_v34  ;;  %v1146_v18 = vadd.f32 %v8359_v45, %v985_v10  ;;  %v3478_v45 = vld [vmem:[#allocation2 + $0x14f] sm:$0xff]  ;;  %v3481_v60 = vld [vmem:[#allocation2 + $0x187] sm:$0xff] }
 0x185   : > { %v6428_v53 = vpop.f32.mrf.mxu0  ;;  %v6708_v16 = vpop.f32.mrf.mxu1  ;;  %6883 = vmatmul.mubr.msk.bf16.gmra.mxu1 %vm837_vm1, %v8220_v39  ;;  %6915 = vmatmul.mubr.msk.bf16.gmra.mxu0 %vm837_vm1, %v3498_v12  ;;  %v3501_v13 = vpack.c.bf16 %v3478_v45, %v3477_v35  ;;  %v3479_v12 = vld [vmem:[#allocation2 + $0x167] sm:$0xff]  ;;  %v3480_v10 = vld [vmem:[#allocation2 + $0x16f] sm:$0xff] }
 0x186   : > { %v988_v15 = vadd.f32 %v6427_v9, %v8337_v14  ;;  %6886 = vmatprep.mubr.msk.bf16.mxu1 %vm837_vm1, %v8232_v0  ;;  %6918 = vmatprep.mubr.msk.bf16.mxu0 %vm837_vm1, %v3499_v36  ;;  %v3482_v9 = vld [vmem:[#allocation2 + $0x18f] sm:$0xff]  ;;  %v3502_v11 = vpack.c.bf16 %v3480_v10, %v3479_v12 }
 0x187   : > { %v6429_v34 = vpop.f32.mrf.mxu0  ;;  %v1482_v49 = vpop.f32.mrf.mxu1 }
 0x188   : > { %v6430_v58 = vadd.f32 %v6429_v34, %v6428_v53  ;;  %v8540_v57 = vadd.f32 %v1482_v49, %v1146_v18  ;;  %v1149_v39 = vadd.f32 %v8366_v17, %v988_v15  ;;  %v3503_v34 = vpack.c.bf16 %v3482_v9, %v3481_v60 }
 0x189   : > { %v6431_v33 = vpop.f32.mrf.mxu0  ;;  %v6709_v28 = vpop.f32.mrf.mxu1 }
 0x18a   : > { %v993_v38 = vadd.f32 %v6430_v58, %v8337_v14 }
 0x18b   : > { %v6432_v0 = vpop.f32.mrf.mxu0  ;;  %v1485_v56 = vpop.f32.mrf.mxu1 }
 0x18c   : > { %v6433_v1 = vadd.f32 %v6432_v0, %v6431_v33  ;;  %v8544_v52 = vadd.f32 %v1485_v56, %v1149_v39  ;;  %v1154_v20 = vadd.f32 %v8348_v48, %v993_v38  ;;  %v3486_v0 = vld [vmem:[#allocation2 + $0x1cf] sm:$0xff] }
 0x18d   : > { %v6434_v61 = vpop.f32.mrf.mxu0  ;;  %v6712_v4 = vpop.f32.mrf.mxu1  ;;  %6887 = vmatmul.mubr.msk.bf16.gmra.mxu1 %vm837_vm1, %v8234_v2  ;;  %6919 = vmatmul.mubr.msk.bf16.gmra.mxu0 %vm837_vm1, %v3500_v54 }
 0x18e   : > { %v996_v17 = vadd.f32 %v6433_v1, %v8337_v14  ;;  %6890 = vmatprep.mubr.msk.bf16.mxu1 %vm837_vm1, %v8246_v24  ;;  %6922 = vmatprep.mubr.msk.bf16.mxu0 %vm837_vm1, %v3501_v13  ;;  %v8554_v36 = vadd.f32 %v6708_v16, %v1154_v20  ;;  %v3485_v13 = vld [vmem:[#allocation2 + $0x1c7] sm:$0xff] }
 0x18f   : > { %v6435_v63 = vpop.f32.mrf.mxu0  ;;  %v1498_v48 = vpop.f32.mrf.mxu1  ;;  %v3505_v12 = vpack.c.bf16 %v3486_v0, %v3485_v13 }
 0x190   : > { %v6436_v18 = vadd.f32 %v6435_v63, %v6434_v61  ;;  %v1157_v2 = vadd.f32 %v8363_v22, %v996_v17 }
 0x191   : > { %v6437_v53 = vpop.f32.mrf.mxu0  ;;  %v6713_v15 = vpop.f32.mrf.mxu1 }
 0x192   : > { %v1001_v5 = vadd.f32 %v6436_v18, %v8337_v14  ;;  %v8558_v24 = vadd.f32 %v6709_v28, %v1157_v2  ;;  %v3483_v28 = vld [vmem:[#allocation2 + $0x1a7] sm:$0xff] }
 0x193   : > { %v6438_v49 = vpop.f32.mrf.mxu0  ;;  %v1501_v35 = vpop.f32.mrf.mxu1 }
 0x194   : > { %v1162_v16 = vadd.f32 %v8382_v31, %v1001_v5  ;;  %v6439_v45 = vadd.f32 %v6438_v49, %v6437_v53  ;;  %v3484_v31 = vld [vmem:[#allocation2 + $0x1af] sm:$0xff] }
 0x195   : > { %v6440_v58 = vpop.f32.mrf.mxu0  ;;  %v8561_v39 = vpop.f32.mrf.mxu1  ;;  %6891 = vmatmul.mubr.msk.bf16.gmra.mxu1 %vm837_vm1, %v8250_v27  ;;  %6923 = vmatmul.mubr.msk.bf16.gmra.mxu0 %vm837_vm1, %v3502_v11  ;;  %v3504_v61 = vpack.c.bf16 %v3484_v31, %v3483_v28  ;;  %v3121_v53 = vld [vmem:[#allocation2 + $0x211] sm:$0xff]  ;;  %v3487_v11 = vld [vmem:[#allocation2 + $0x1e7] sm:$0xff] }
 0x196   : > { %v8566_v22 = vadd.f32 %v1498_v48, %v1162_v16  ;;  %v1004_v33 = vadd.f32 %v6439_v45, %v8337_v14  ;;  %6894 = vmatprep.mubr.msk.bf16.mxu1 %vm837_vm1, %v8271_v51  ;;  %6926 = vmatprep.mubr.msk.bf16.mxu0 %vm837_vm1, %v3503_v34 }
 0x197   : > { %v6441_v54 = vpop.f32.mrf.mxu0  ;;  %v8572_v38 = vpop.f32.mrf.mxu1 }
 0x198   : > { %v1165_v27 = vadd.f32 %v8390_v23, %v1004_v33  ;;  %v6442_v56 = vadd.f32 %v6441_v54, %v6440_v58  ;;  %v3120_v23 = vld [vmem:[#allocation2 + $0x209] sm:$0xff]  ;;  %v4827_v58 = vld [vmem:[%s7666_s20] sm:$0xff] }
 0x199   : > { %v6443_v1 = vpop.f32.mrf.mxu0  ;;  %v8575_v20 = vpop.f32.mrf.mxu1  ;;  %v8600_v28 = vpack.c.bf16 %v3121_v53, %v3120_v23  ;;  %4891 = vrot.lane.b32.xlu0 %v4827_v58, %s7544_s14  ;;  %v3835_v23 = vld [vmem:[#allocation2 + $0x88] sm:$0xff] }
 0x19a   : > { %v8577_v17 = vadd.f32 %v1501_v35, %v1165_v27  ;;  %v1009_v51 = vadd.f32 %v6442_v56, %v8337_v14  ;;  %v3832_v35 = vld [vmem:[#allocation2 + $0x50] sm:$0xff] }
 0x19b   : > { %v6444_v10 = vpop.f32.mrf.mxu0  ;;  %v8580_v63 = vpop.f32.mrf.mxu1 }
 0x19c   : > { %v6445_v48 = vadd.f32 %v6444_v10, %v6443_v1  ;;  %v1170_v60 = vadd.f32 %v8371_v41, %v1009_v51  ;;  %v3488_v41 = vld [vmem:[#allocation2 + $0x1ef] sm:$0xff]  ;;  %v3491_v10 = vld [vmem:[#allocation2 + $0x227] sm:$0xff] }
 0x19d   : > { %v6446_v9 = vpop.f32.mrf.mxu0  ;;  %v8583_v18 = vpop.f32.mrf.mxu1  ;;  %6895 = vmatmul.mubr.msk.bf16.gmra.mxu1 %vm837_vm1, %v8236_v6  ;;  %6927 = vmatmul.mubr.msk.bf16.gmra.mxu0 %vm837_vm1, %v3504_v61  ;;  %v3831_v6 = vld [vmem:[#allocation2 + $0x48] sm:$0xff]  ;;  %v3506_v31 = vpack.c.bf16 %v3488_v41, %v3487_v11  ;;  %v4829_v1 = vld [vmem:[%s7666_s20 + $0x10] sm:$0xff] }
 0x19e   : > { %v1012_v2 = vadd.f32 %v6445_v48, %v8337_v14  ;;  %6898 = vmatprep.mubr.msk.bf16.mxu1 %vm837_vm1, %v8248_v25  ;;  %6930 = vmatprep.mubr.msk.bf16.mxu0 %vm837_vm1, %v3505_v12  ;;  %v8592_v5 = vadd.f32 %v6712_v4, %v1170_v60  ;;  %v3863_v54 = vpack.c.bf16 %v3832_v35, %v3831_v6  ;;  %v4828_v61 = vld [vmem:[%s7666_s20 + $0x8] sm:$0xff]  ;;  %v4202_v6 = vld [vmem:[#allocation2 + $0x51] sm:$0xff] }
 0x19f   : > { %v6447_v34 = vpop.f32.mrf.mxu0  ;;  %v8594_v49 = vpop.f32.mrf.mxu1  ;;  %v3492_v48 = vld [vmem:[#allocation2 + $0x22f] sm:$0xff]  ;;  %4895 = vrot.lane.b32.xlu1 %v4829_v1, %s7544_s14  ;;  %4893 = vrot.lane.b32.xlu0 %v4828_v61, %s7544_s14 }
 0x1a0   : > { %v6448_v16 = vadd.f32 %v6447_v34, %v6446_v9  ;;  %v1173_v45 = vadd.f32 %v8387_v32, %v1012_v2  ;;  %v3833_v60 = vld [vmem:[#allocation2 + $0x68] sm:$0xff]  ;;  %v3836_v2 = vld [vmem:[#allocation2 + $0x90] sm:$0xff] }
 0x1a1   : > { %v6449_v33 = vpop.f32.mrf.mxu0  ;;  %v8598_v25 = vpop.f32.mrf.mxu1  ;;  %v4201_v34 = vld [vmem:[#allocation2 + $0x49] sm:$0xff] }
 0x1a2   : > { %v1017_v4 = vadd.f32 %v6448_v16, %v8337_v14  ;;  %v8604_v13 = vadd.f32 %v6713_v15, %v1173_v45  ;;  %v4830_v16 = vld [vmem:[%s7666_s20 + $0x18] sm:$0xff]  ;;  %v4831_v45 = vld [vmem:[%s7666_s20 + $0x20] sm:$0xff] }
 0x1a3   : > { %v6450_v0 = vpop.f32.mrf.mxu0  ;;  %v8606_v27 = vpop.f32.mrf.mxu1  ;;  %4897 = vrot.lane.b32.xlu1 %v4830_v16, %s7544_s14  ;;  %4899 = vrot.lane.b32.xlu0 %v4831_v45, %s7544_s14  ;;  %v4206_v16 = vld [vmem:[#allocation2 + $0x91] sm:$0xff] }
 0x1a4   : > { %v6451_v32 = vadd.f32 %v6450_v0, %v6449_v33  ;;  %v1178_v56 = vadd.f32 %v8406_v59, %v1017_v4  ;;  %v3834_v59 = vld [vmem:[#allocation2 + $0x70] sm:$0xff]  ;;  %v3508_v33 = vpack.c.bf16 %v3492_v48, %v3491_v10  ;;  %v3865_v4 = vpack.c.bf16 %v3836_v2, %v3835_v23  ;;  %v4832_v10 = vld [vmem:[%s7666_s20 + $0x28] sm:$0xff] }
 0x1a5   : > { %v6452_v51 = vpop.f32.mrf.mxu0  ;;  %v6728_v12 = vpop.f32.mrf.mxu1  ;;  %6899 = vmatmul.mubr.msk.bf16.gmra.mxu1 %vm837_vm1, %v8600_v28  ;;  %6931 = vmatmul.mubr.msk.bf16.gmra.mxu0 %vm837_vm1, %v3506_v31  ;;  %v3864_v31 = vpack.c.bf16 %v3834_v59, %v3833_v60  ;;  %v4833_v48 = vld [vmem:[%s7666_s20 + $0x30] sm:$0xff] }
 0x1a6   : > { %v1020_v15 = vadd.f32 %v6451_v32, %v8337_v14  ;;  %v8616_v9 = vadd.f32 %v6728_v12, %v8447_v47  ;;  %6934 = vmatprep.mubr.msk.bf16.mxu0 %vm837_vm1, %v8433_v19  ;;  %6942 = vmatprep.mubr.msk.bf16.mxu1 %vm837_vm1, %v3863_v54  ;;  %v8622_v53 = vadd.f32 %v8572_v38, %v1178_v56  ;;  %v4203_v59 = vld [vmem:[#allocation2 + $0x69] sm:$0xff] }
 0x1a7   : > { %v6453_v11 = vpop.f32.mrf.mxu0  ;;  %v1788_v41 = vpop.f32.mrf.mxu1  ;;  %v4233_v32 = vpack.c.bf16 %v4202_v6, %v4201_v34  ;;  %4901 = vrot.lane.b32.xlu1 %v4832_v10, %s7544_s14  ;;  %4903 = vrot.lane.b32.xlu0 %v4833_v48, %s7544_s14 }
 0x1a8   : > { %v6454_v47 = vadd.f32 %v6453_v11, %v6452_v51  ;;  %v8627_v19 = vadd.f32 %v1788_v41, %v8454_v37  ;;  %v1181_v35 = vadd.f32 %v8414_v43, %v1020_v15  ;;  %v9978_v51 = vld [vmem:[#allocation13_spill] sm:$0xff]  ;;  %v3838_v15 = vld [vmem:[#allocation2 + $0xb0] sm:$0xff]  ;;  %v3839_v11 = vld [vmem:[#allocation2 + $0xc8] sm:$0xff] }
 0x1a9   : > { %v6455_v58 = vpop.f32.mrf.mxu0  ;;  %v6729_v38 = vpop.f32.mrf.mxu1  ;;  %v3840_v41 = vld [vmem:[#allocation2 + $0xd0] sm:$0xff] }
 0x1aa   : > { %v1025_v54 = vadd.f32 %v6454_v47, %v8337_v14  ;;  %v8634_v0 = vadd.f32 %v6729_v38, %v8461_v42  ;;  %v8637_v37 = vadd.f32 %v8580_v63, %v1181_v35  ;;  %v3837_v63 = vld [vmem:[#allocation2 + $0xa8] sm:$0xff] }
 0x1ab   : > { %v6456_v56 = vpop.f32.mrf.mxu0  ;;  %v1791_v43 = vpop.f32.mrf.mxu1  ;;  %v4205_v35 = vld [vmem:[#allocation2 + $0x89] sm:$0xff] }
 0x1ac   : > { %v6457_v1 = vadd.f32 %v6456_v56, %v6455_v58  ;;  %v8642_v61 = vadd.f32 %v1791_v43, %v8464_v40  ;;  %v1186_v12 = vadd.f32 %v9978_v51, %v1025_v54  ;;  %v4204_v40 = vld [vmem:[#allocation2 + $0x71] sm:$0xff]  ;;  %v9979_v58 = vld [vmem:[#allocation14_spill] sm:$0xff]  ;;  %v3866_v54 = vpack.c.bf16 %v3838_v15, %v3837_v63 }
 0x1ad   : > { %v6458_v42 = vpop.f32.mrf.mxu0  ;;  %v6732_v60 = vpop.f32.mrf.mxu1  ;;  %6935 = vmatmul.mubr.msk.bf16.gmra.mxu0 %vm837_vm1, %v3508_v33  ;;  %6943 = vmatmul.mubr.msk.bf16.vlgmr.msra.gmra.mxu1 %vm837_vm1, %v3864_v31  ;;  %v4834_v33 = vld [vmem:[%s7666_s20 + $0x38] sm:$0xff]  ;;  %v4835_v31 = vld [vmem:[%s7666_s20 + $0x40] sm:$0xff]  ;;  %v3867_v56 = vpack.c.bf16 %v3840_v41, %v3839_v11  ;;  %v4235_v51 = vpack.c.bf16 %v4206_v16, %v4205_v35  ;;  %v4836_v15 = vld [vmem:[%s7666_s20 + $0x48] sm:$0xff] }
 0x1ae   : > { %v1028_v23 = vadd.f32 %v6457_v1, %v8337_v14  ;;  %v8651_v2 = vadd.f32 %v6732_v60, %v8474_v8  ;;  %6946 = vmatprep.mubr.msk.bf16.mxu1 %vm837_vm1, %v3865_v4  ;;  %6978 = vmatprep.mubr.msk.bf16.mxu0 %vm837_vm1, %v4233_v32  ;;  %v8656_v34 = vadd.f32 %v8561_v39, %v1186_v12  ;;  %v9980_v60 = vld [vmem:[#allocation16_spill] sm:$0xff]  ;;  %v4207_v11 = vld [vmem:[#allocation2 + $0xa9] sm:$0xff] }
 0x1af   : > { %v6459_v6 = vpop.f32.mrf.mxu0  ;;  %v1804_v47 = vpop.f32.mrf.mxu1  ;;  %v4234_v32 = vpack.c.bf16 %v4204_v40, %v4203_v59  ;;  %4905 = vrot.lane.b32.xlu1 %v4834_v33, %s7544_s14  ;;  %4907 = vrot.lane.b32.xlu0 %v4835_v31, %s7544_s14  ;;  %v4837_v59 = vld [vmem:[%s7666_s20 + $0x50] sm:$0xff] }
 0x1b0   : > { %v6460_v8 = vadd.f32 %v6459_v6, %v6458_v42  ;;  %v8661_v45 = vadd.f32 %v1804_v47, %v8481_v50  ;;  %v1189_v38 = vadd.f32 %v9979_v58, %v1028_v23  ;;  %v3842_v40 = vld [vmem:[#allocation2 + $0xf0] sm:$0xff]  ;;  %v3843_v47 = vld [vmem:[#allocation2 + $0x108] sm:$0xff] }
 0x1b1   : > { %v6461_v4 = vpop.f32.mrf.mxu0  ;;  %v6733_v39 = vpop.f32.mrf.mxu1  ;;  %v3844_v35 = vld [vmem:[#allocation2 + $0x110] sm:$0xff] }
 0x1b2   : > { %v1033_v43 = vadd.f32 %v6460_v8, %v8337_v14  ;;  %v8668_v1 = vadd.f32 %v6733_v39, %v8485_v30  ;;  %v8671_v50 = vadd.f32 %v8575_v20, %v1189_v38  ;;  %v3841_v20 = vld [vmem:[#allocation2 + $0xe8] sm:$0xff]  ;;  %v4210_v33 = vld [vmem:[#allocation2 + $0xd1] sm:$0xff] }
 0x1b3   : > { %v6462_v12 = vpop.f32.mrf.mxu0  ;;  %v1807_v10 = vpop.f32.mrf.mxu1  ;;  %v4209_v38 = vld [vmem:[#allocation2 + $0xc9] sm:$0xff]  ;;  %4909 = vrot.lane.b32.xlu1 %v4836_v15, %s7544_s14  ;;  %4911 = vrot.lane.b32.xlu0 %v4837_v59, %s7544_s14 }
 0x1b4   : > { %v6463_v48 = vadd.f32 %v6462_v12, %v6461_v4  ;;  %v8676_v42 = vadd.f32 %v1807_v10, %v8491_v7  ;;  %v1194_v63 = vadd.f32 %v9980_v60, %v1033_v43  ;;  %v4208_v7 = vld [vmem:[#allocation2 + $0xb1] sm:$0xff]  ;;  %v9981_v4 = vld [vmem:[#allocation18_spill] sm:$0xff]  ;;  %v3868_v43 = vpack.c.bf16 %v3842_v40, %v3841_v20 }
 0x1b5   : > { %v6464_v30 = vpop.f32.mrf.mxu0  ;;  %v6736_v23 = vpop.f32.mrf.mxu1  ;;  %6947 = vmatmul.mubr.msk.bf16.gmra.mxu1 %vm837_vm1, %v3866_v54  ;;  %6979 = vmatmul.mubr.msk.bf16.vlgmr.msra.gmra.mxu0 %vm837_vm1, %v4234_v32  ;;  %v4838_v54 = vld [vmem:[%s7666_s20 + $0x58] sm:$0xff]  ;;  %v4839_v32 = vld [vmem:[%s7666_s20 + $0x60] sm:$0xff]  ;;  %v3869_v12 = vpack.c.bf16 %v3844_v35, %v3843_v47  ;;  %v4237_v60 = vpack.c.bf16 %v4210_v33, %v4209_v38  ;;  %v4840_v40 = vld [vmem:[%s7666_s20 + $0x68] sm:$0xff] }
 0x1b6   : > { %v1036_v41 = vadd.f32 %v6463_v48, %v8337_v14  ;;  %v8685_v6 = vadd.f32 %v6736_v23, %v8498_v3  ;;  %6950 = vmatprep.mubr.msk.bf16.mxu1 %vm837_vm1, %v3867_v56  ;;  %6982 = vmatprep.mubr.msk.bf16.mxu0 %vm837_vm1, %v4235_v51  ;;  %v8690_v16 = vadd.f32 %v8594_v49, %v1194_v63  ;;  %v9982_v23 = vld [vmem:[#allocation15_spill] sm:$0xff]  ;;  %v3847_v38 = vld [vmem:[#allocation2 + $0x148] sm:$0xff] }
 0x1b7   : > { %v6465_v8 = vpop.f32.mrf.mxu0  ;;  %v1820_v58 = vpop.f32.mrf.mxu1  ;;  %v4236_v51 = vpack.c.bf16 %v4208_v7, %v4207_v11  ;;  %4913 = vrot.lane.b32.xlu1 %v4838_v54, %s7544_s14  ;;  %4915 = vrot.lane.b32.xlu0 %v4839_v32, %s7544_s14  ;;  %v4841_v11 = vld [vmem:[%s7666_s20 + $0x70] sm:$0xff]  ;;  %v9983_v32 = vld [vmem:[#allocation17_spill] sm:$0xff] }
 0x1b8   : > { %v6466_v3 = vadd.f32 %v6465_v8, %v6464_v30  ;;  %v8695_v31 = vadd.f32 %v1820_v58, %v8505_v55  ;;  %v1197_v39 = vadd.f32 %v9981_v4, %v1036_v41  ;;  %v3846_v7 = vld [vmem:[#allocation2 + $0x130] sm:$0xff] }
 0x1b9   : > { %v6467_v56 = vpop.f32.mrf.mxu0  ;;  %v6737_v49 = vpop.f32.mrf.mxu1  ;;  %v4211_v47 = vld [vmem:[#allocation2 + $0xe9] sm:$0xff]  ;;  %v4212_v58 = vld [vmem:[#allocation2 + $0xf1] sm:$0xff] }
 0x1ba   : > { %v1041_v10 = vadd.f32 %v6466_v3, %v8337_v14  ;;  %v8702_v48 = vadd.f32 %v6737_v49, %v8509_v46  ;;  %v8705_v55 = vadd.f32 %v8606_v27, %v1197_v39  ;;  %v3845_v27 = vld [vmem:[#allocation2 + $0x128] sm:$0xff]  ;;  %v3848_v33 = vld [vmem:[#allocation2 + $0x150] sm:$0xff]  ;;  %v4842_v49 = vld [vmem:[%s7666_s20 + $0x78] sm:$0xff] }
 0x1bb   : > { %v6468_v63 = vpop.f32.mrf.mxu0  ;;  %v1823_v15 = vpop.f32.mrf.mxu1  ;;  %v4213_v39 = vld [vmem:[#allocation2 + $0x109] sm:$0xff]  ;;  %v4214_v54 = vld [vmem:[#allocation2 + $0x111] sm:$0xff]  ;;  %4917 = vrot.lane.b32.xlu1 %v4840_v40, %s7544_s14  ;;  %4919 = vrot.lane.b32.xlu0 %v4841_v11, %s7544_s14 }
 0x1bc   : > { %v6469_v59 = vadd.f32 %v6468_v63, %v6467_v56  ;;  %v8710_v30 = vadd.f32 %v1823_v15, %v8512_v29  ;;  %v1202_v20 = vadd.f32 %v9982_v23, %v1041_v10  ;;  %v4238_v10 = vpack.c.bf16 %v4212_v58, %v4211_v47  ;;  %v4845_v11 = vld [vmem:[%s7666_s20 + $0x90] sm:$0xff]  ;;  %v3851_v47 = vld [vmem:[#allocation2 + $0x188] sm:$0xff] }
 0x1bd   : > { %v6740_v46 = vpop.f32.mrf.mxu1  ;;  %v6764_v41 = vpop.f32.mrf.mxu0  ;;  %6951 = vmatmul.mubr.msk.bf16.gmra.mxu1 %vm837_vm1, %v3868_v43  ;;  %6983 = vmatmul.mubr.msk.bf16.gmra.mxu0 %vm837_vm1, %v4236_v51  ;;  %v4843_v43 = vld [vmem:[%s7666_s20 + $0x80] sm:$0xff]  ;;  %v4239_v15 = vpack.c.bf16 %v4214_v54, %v4213_v39 }
 0x1be   : > { %v1044_v35 = vadd.f32 %v6469_v59, %v8337_v14  ;;  %v8719_v8 = vadd.f32 %v6740_v46, %v8519_v44  ;;  %v8722_v29 = vadd.f32 %v6764_v41, %v8616_v9  ;;  %6954 = vmatprep.mubr.msk.bf16.mxu1 %vm837_vm1, %v3869_v12  ;;  %6986 = vmatprep.mubr.msk.bf16.mxu0 %vm837_vm1, %v4237_v60  ;;  %v3850_v41 = vld [vmem:[#allocation2 + $0x170] sm:$0xff]  ;;  %v4847_v39 = vld [vmem:[%s7666_s20 + $0xa0] sm:$0xff] }
 0x1bf   : > { %v1836_v3 = vpop.f32.mrf.mxu1  ;;  %v2158_v4 = vpop.f32.mrf.mxu0  ;;  %v8727_v14 = vadd.f32 %v8583_v18, %v1202_v20  ;;  %v3870_v18 = vpack.c.bf16 %v3846_v7, %v3845_v27  ;;  %v3871_v60 = vpack.c.bf16 %v3848_v33, %v3847_v38  ;;  %4921 = vrot.lane.b32.xlu1 %v4842_v49, %s7544_s14  ;;  %4923 = vrot.lane.b32.xlu0 %v4843_v43, %s7544_s14  ;;  %v4216_v7 = vld [vmem:[#allocation2 + $0x131] sm:$0xff]  ;;  %v4217_v33 = vld [vmem:[#allocation2 + $0x149] sm:$0xff] }
 0x1c0   : > { %v8732_v44 = vadd.f32 %v1836_v3, %v8524_v26  ;;  %v8735_v9 = vadd.f32 %v2158_v4, %v8627_v19  ;;  %v1205_v56 = vadd.f32 %v9983_v32, %v1044_v35  ;;  %v3852_v38 = vld [vmem:[#allocation2 + $0x190] sm:$0xff]  ;;  %v4846_v4 = vld [vmem:[%s7666_s20 + $0x98] sm:$0xff] }
 0x1c1   : > { %v6741_v51 = vpop.f32.mrf.mxu1  ;;  %v6765_v12 = vpop.f32.mrf.mxu0  ;;  %v4218_v3 = vld [vmem:[#allocation2 + $0x151] sm:$0xff] }
 0x1c2   : > { %v8741_v63 = vadd.f32 %v6741_v51, %v8528_v62  ;;  %v8744_v26 = vadd.f32 %v6765_v12, %v8634_v0  ;;  %v8747_v19 = vadd.f32 %v8598_v25, %v1205_v56  ;;  %v4844_v62 = vld [vmem:[%s7666_s20 + $0x88] sm:$0xff]  ;;  %v3873_v12 = vpack.c.bf16 %v3852_v38, %v3851_v47  ;;  %v4222_v47 = vld [vmem:[#allocation2 + $0x191] sm:$0xff] }
 0x1c3   : > { %v1839_v59 = vpop.f32.mrf.mxu1  ;;  %v2161_v23 = vpop.f32.mrf.mxu0  ;;  %v3849_v25 = vld [vmem:[#allocation2 + $0x168] sm:$0xff]  ;;  %4925 = vrot.lane.b32.xlu1 %v4844_v62, %s7544_s14  ;;  %4927 = vrot.lane.b32.xlu0 %v4845_v11, %s7544_s14  ;;  %v3854_v62 = vld [vmem:[#allocation2 + $0x1b0] sm:$0xff] }
 0x1c4   : > { %v8752_v20 = vadd.f32 %v1839_v59, %v8530_v21  ;;  %v8755_v40 = vadd.f32 %v2161_v23, %v8642_v61  ;;  %v4215_v61 = vld [vmem:[#allocation2 + $0x129] sm:$0xff]  ;;  %v3872_v56 = vpack.c.bf16 %v3850_v41, %v3849_v25 }
 0x1c5   : > { %v6744_v0 = vpop.f32.mrf.mxu1  ;;  %v6768_v46 = vpop.f32.mrf.mxu0  ;;  %6955 = vmatmul.mubr.msk.bf16.gmra.mxu1 %vm837_vm1, %v3870_v18  ;;  %6987 = vmatmul.mubr.msk.bf16.gmra.mxu0 %vm837_vm1, %v4238_v10  ;;  %v4240_v49 = vpack.c.bf16 %v4216_v7, %v4215_v61  ;;  %v3856_v61 = vld [vmem:[#allocation2 + $0x1d0] sm:$0xff] }
 0x1c6   : > { %v8762_v27 = vadd.f32 %v6744_v0, %v8554_v36  ;;  %v8765_v21 = vadd.f32 %v6768_v46, %v8651_v2  ;;  %6958 = vmatprep.mubr.msk.bf16.mxu1 %vm837_vm1, %v3871_v60  ;;  %6990 = vmatprep.mubr.msk.bf16.mxu0 %vm837_vm1, %v4239_v15  ;;  %v4848_v15 = vld [vmem:[%s7666_s20 + $0xa8] sm:$0xff]  ;;  %v4220_v0 = vld [vmem:[#allocation2 + $0x171] sm:$0xff] }
 0x1c7   : > { %v1852_v35 = vpop.f32.mrf.mxu1  ;;  %v2174_v58 = vpop.f32.mrf.mxu0  ;;  %4929 = vrot.lane.b32.xlu1 %v4846_v4, %s7544_s14  ;;  %4931 = vrot.lane.b32.xlu0 %v4847_v39, %s7544_s14  ;;  %v3855_v46 = vld [vmem:[#allocation2 + $0x1c8] sm:$0xff] }
 0x1c8   : > { %v8772_v36 = vadd.f32 %v1852_v35, %v8540_v57  ;;  %v8775_v2 = vadd.f32 %v2174_v58, %v8661_v45  ;;  %v4241_v57 = vpack.c.bf16 %v4218_v3, %v4217_v33  ;;  %v4221_v7 = vld [vmem:[#allocation2 + $0x189] sm:$0xff]  ;;  %v4850_v35 = vld [vmem:[%s7666_s20 + $0xb8] sm:$0xff]  ;;  %v4851_v58 = vld [vmem:[%s7666_s20 + $0xc0] sm:$0xff] }
 0x1c9   : > { %v6745_v54 = vpop.f32.mrf.mxu1  ;;  %v6769_v32 = vpop.f32.mrf.mxu0 }
 0x1ca   : > { %v8780_v43 = vadd.f32 %v6745_v54, %v8558_v24  ;;  %v8783_v51 = vadd.f32 %v6769_v32, %v8668_v1  ;;  %v4849_v24 = vld [vmem:[%s7666_s20 + $0xb0] sm:$0xff]  ;;  %v3853_v1 = vld [vmem:[#allocation2 + $0x1a8] sm:$0xff]  ;;  %v3875_v32 = vpack.c.bf16 %v3856_v61, %v3855_v46 }
 0x1cb   : > { %v1855_v18 = vpop.f32.mrf.mxu1  ;;  %v2177_v10 = vpop.f32.mrf.mxu0  ;;  %4933 = vrot.lane.b32.xlu1 %v4848_v15, %s7544_s14  ;;  %4935 = vrot.lane.b32.xlu0 %v4849_v24, %s7544_s14  ;;  %v3874_v3 = vpack.c.bf16 %v3854_v62, %v3853_v1  ;;  %v3858_v15 = vld [vmem:[#allocation2 + $0x1f0] sm:$0xff] }
 0x1cc   : > { %v8788_v45 = vadd.f32 %v1855_v18, %v8544_v52  ;;  %v8791_v60 = vadd.f32 %v2177_v10, %v8676_v42  ;;  %v4219_v42 = vld [vmem:[#allocation2 + $0x169] sm:$0xff]  ;;  %v4226_v46 = vld [vmem:[#allocation2 + $0x1d1] sm:$0xff] }
 0x1cd   : > { %v6748_v59 = vpop.f32.mrf.mxu1  ;;  %v6772_v23 = vpop.f32.mrf.mxu0  ;;  %6959 = vmatmul.mubr.msk.bf16.gmra.mxu1 %vm837_vm1, %v3872_v56  ;;  %6991 = vmatmul.mubr.msk.bf16.gmra.mxu0 %vm837_vm1, %v4240_v49  ;;  %v4242_v4 = vpack.c.bf16 %v4220_v0, %v4219_v42  ;;  %v3860_v42 = vld [vmem:[#allocation2 + $0x210] sm:$0xff] }
 0x1ce   : > { %v8798_v11 = vadd.f32 %v6748_v59, %v8592_v5  ;;  %v8801_v52 = vadd.f32 %v6772_v23, %v8685_v6  ;;  %6962 = vmatprep.mubr.msk.bf16.mxu1 %vm837_vm1, %v3873_v12  ;;  %6994 = vmatprep.mubr.msk.bf16.mxu0 %vm837_vm1, %v4241_v57  ;;  %v4852_v57 = vld [vmem:[%s7666_s20 + $0xc8] sm:$0xff]  ;;  %v4224_v59 = vld [vmem:[#allocation2 + $0x1b1] sm:$0xff] }
 0x1cf   : > { %v1868_v25 = vpop.f32.mrf.mxu1  ;;  %v2190_v41 = vpop.f32.mrf.mxu0  ;;  %4937 = vrot.lane.b32.xlu1 %v4850_v35, %s7544_s14  ;;  %4939 = vrot.lane.b32.xlu0 %v4851_v58, %s7544_s14  ;;  %v3859_v23 = vld [vmem:[#allocation2 + $0x208] sm:$0xff] }
 0x1d0   : > { %v8808_v5 = vadd.f32 %v1868_v25, %v8566_v22  ;;  %v8811_v6 = vadd.f32 %v2190_v41, %v8695_v31  ;;  %v4243_v22 = vpack.c.bf16 %v4222_v47, %v4221_v7  ;;  %v4225_v0 = vld [vmem:[#allocation2 + $0x1c9] sm:$0xff]  ;;  %v4854_v25 = vld [vmem:[%s7666_s20 + $0xd8] sm:$0xff]  ;;  %v4855_v41 = vld [vmem:[%s7666_s20 + $0xe0] sm:$0xff] }
 0x1d1   : > { %v6749_v38 = vpop.f32.mrf.mxu1  ;;  %v6773_v33 = vpop.f32.mrf.mxu0 }
 0x1d2   : > { %v8816_v39 = vadd.f32 %v6749_v38, %v8604_v13  ;;  %v8819_v54 = vadd.f32 %v6773_v33, %v8702_v48  ;;  %v4853_v13 = vld [vmem:[%s7666_s20 + $0xd0] sm:$0xff]  ;;  %v3857_v48 = vld [vmem:[#allocation2 + $0x1e8] sm:$0xff]  ;;  %v3877_v33 = vpack.c.bf16 %v3860_v42, %v3859_v23 }
 0x1d3   : > { %v1871_v56 = vpop.f32.mrf.mxu1  ;;  %v2193_v49 = vpop.f32.mrf.mxu0  ;;  %4941 = vrot.lane.b32.xlu1 %v4852_v57, %s7544_s14  ;;  %4943 = vrot.lane.b32.xlu0 %v4853_v13, %s7544_s14  ;;  %v3876_v47 = vpack.c.bf16 %v3858_v15, %v3857_v48 }
 0x1d4   : > { %v8824_v31 = vadd.f32 %v1871_v56, %v8577_v17  ;;  %v8827_v12 = vadd.f32 %v2193_v49, %v8710_v30  ;;  %v4223_v30 = vld [vmem:[#allocation2 + $0x1a9] sm:$0xff] }
 0x1d5   : > { %v6752_v18 = vpop.f32.mrf.mxu1  ;;  %v6776_v10 = vpop.f32.mrf.mxu0  ;;  %6963 = vmatmul.mubr.msk.bf16.gmra.mxu1 %vm837_vm1, %v3874_v3  ;;  %6995 = vmatmul.mubr.msk.bf16.gmra.mxu0 %vm837_vm1, %v4242_v4  ;;  %v4244_v35 = vpack.c.bf16 %v4224_v59, %v4223_v30 }
 0x1d6   : > { %v8834_v24 = vadd.f32 %v6752_v18, %v8656_v34  ;;  %v8837_v17 = vadd.f32 %v6776_v10, %v8719_v8  ;;  %6966 = vmatprep.mubr.msk.bf16.mxu1 %vm837_vm1, %v3875_v32  ;;  %6998 = vmatprep.mubr.msk.bf16.mxu0 %vm837_vm1, %v4243_v22  ;;  %v4856_v22 = vld [vmem:[%s7666_s20 + $0xe8] sm:$0xff]  ;;  %v4228_v18 = vld [vmem:[#allocation2 + $0x1f1] sm:$0xff] }
 0x1d7   : > { %v1884_v1 = vpop.f32.mrf.mxu1  ;;  %v2206_v62 = vpop.f32.mrf.mxu0  ;;  %4945 = vrot.lane.b32.xlu1 %v4854_v25, %s7544_s14  ;;  %4947 = vrot.lane.b32.xlu0 %v4855_v41, %s7544_s14 }
 0x1d8   : > { %v8844_v34 = vadd.f32 %v1884_v1, %v8622_v53  ;;  %v8847_v8 = vadd.f32 %v2206_v62, %v8732_v44  ;;  %v4245_v53 = vpack.c.bf16 %v4226_v46, %v4225_v0 }
 0x1d9   : > { %v6753_v61 = vpop.f32.mrf.mxu1  ;;  %v6777_v7 = vpop.f32.mrf.mxu0 }
 0x1da   : > { %v8852_v58 = vadd.f32 %v6753_v61, %v8671_v50  ;;  %v8855_v38 = vadd.f32 %v6777_v7, %v8741_v63  ;;  %v4857_v50 = vld [vmem:[%s7666_s20 + $0xf0] sm:$0xff]  ;;  %v3861_v63 = vld [vmem:[#allocation2 + $0x228] sm:$0xff] }
 0x1db   : > { %v1887_v3 = vpop.f32.mrf.mxu1  ;;  %v2209_v4 = vpop.f32.mrf.mxu0  ;;  %4949 = vrot.lane.b32.xlu1 %v4856_v22, %s7544_s14  ;;  %4951 = vrot.lane.b32.xlu0 %v4857_v50, %s7544_s14  ;;  %v4231_v61 = vld [vmem:[#allocation2 + $0x229] sm:$0xff]  ;;  %v4232_v7 = vld [vmem:[#allocation2 + $0x231] sm:$0xff] }
 0x1dc   : > { %v8860_v44 = vadd.f32 %v1887_v3, %v8637_v37  ;;  %v8863_v32 = vadd.f32 %v2209_v4, %v8752_v20  ;;  %v3862_v37 = vld [vmem:[#allocation2 + $0x230] sm:$0xff]  ;;  %v4248_v3 = vpack.c.bf16 %v4232_v7, %v4231_v61 }
 0x1dd   : > { %v6756_v56 = vpop.f32.mrf.mxu1  ;;  %v6780_v49 = vpop.f32.mrf.mxu0  ;;  %6967 = vmatmul.mubr.msk.bf16.gmra.mxu1 %vm837_vm1, %v3876_v47  ;;  %6999 = vmatmul.mubr.msk.bf16.gmra.mxu0 %vm837_vm1, %v4244_v35  ;;  %v4227_v20 = vld [vmem:[#allocation2 + $0x1e9] sm:$0xff]  ;;  %v3878_v23 = vpack.c.bf16 %v3862_v37, %v3861_v63 }
 0x1de   : > { %v1945_v57 = vadd.f32 %v6756_v56, %v8727_v14  ;;  %v8871_v13 = vadd.f32 %v6780_v49, %v8762_v27  ;;  %6970 = vmatprep.mubr.msk.bf16.mxu1 %vm837_vm1, %v3877_v33  ;;  %7002 = vmatprep.mubr.msk.bf16.mxu0 %vm837_vm1, %v4245_v53  ;;  %v4858_v27 = vld [vmem:[%s7666_s20 + $0xf8] sm:$0xff]  ;;  %v4246_v1 = vpack.c.bf16 %v4228_v18, %v4227_v20 }
 0x1df   : > { %v1900_v10 = vpop.f32.mrf.mxu1  ;;  %v2222_v48 = vpop.f32.mrf.mxu0  ;;  %4953 = vrot.lane.b32.xlu1 %v4858_v27, %s7544_s14 }
 0x1e0   : > { %v1943_v15 = vadd.f32 %v1900_v10, %v8690_v16  ;;  %v8879_v14 = vadd.f32 %v2222_v48, %v8772_v36 }
 0x1e1   : > { %v6757_v30 = vpop.f32.mrf.mxu1  ;;  %v6781_v59 = vpop.f32.mrf.mxu0 }
 0x1e2   : > { %v1946_v62 = vadd.f32 %v6757_v30, %v8747_v19  ;;  %v8884_v42 = vadd.f32 %v6781_v59, %v8780_v43 }
 0x1e3   : > { %v1903_v0 = vpop.f32.mrf.mxu1  ;;  %v2225_v46 = vpop.f32.mrf.mxu0 }
 0x1e4   : > { %v1944_v25 = vadd.f32 %v1903_v0, %v8705_v55  ;;  %v8889_v16 = vadd.f32 %v2225_v46, %v8788_v45 }
 0x1e5   : > { %v6784_v36 = vpop.f32.mrf.mxu0  ;;  %v6792_v41 = vpop.f32.mrf.mxu1  ;;  %6971 = vmatmul.mubr.msk.bf16.gmra.mxu1 %vm837_vm1, %v3878_v23  ;;  %7003 = vmatmul.mubr.msk.bf16.gmra.mxu0 %vm837_vm1, %v4246_v1 }
 0x1e6   : > { %v8894_v19 = vadd.f32 %v6784_v36, %v8798_v11  ;;  %v8896_v43 = vadd.f32 %v6792_v41, %v1945_v57  ;;  %7006 = vmatprep.mubr.msk.bf16.mxu0 %vm837_vm1, %v8600_v28 }
 0x1e7   : > { %v2238_v55 = vpop.f32.mrf.mxu0  ;;  %v2270_v47 = vpop.f32.mrf.mxu1 }
 0x1e8   : > { %v8901_v45 = vadd.f32 %v2238_v55, %v8808_v5  ;;  %v8903_v35 = vadd.f32 %v2270_v47, %v1943_v15 }
 0x1e9   : > { %v6785_v33 = vpop.f32.mrf.mxu0  ;;  %v6793_v53 = vpop.f32.mrf.mxu1 }
 0x1ea   : > { %v8906_v11 = vadd.f32 %v6785_v33, %v8816_v39  ;;  %v8908_v4 = vadd.f32 %v6793_v53, %v1946_v62 }
 0x1eb   : > { %v2241_v22 = vpop.f32.mrf.mxu0  ;;  %v2273_v50 = vpop.f32.mrf.mxu1 }
 0x1ec   : > { %v8911_v28 = vadd.f32 %v2241_v22, %v8824_v31  ;;  %v8913_v56 = vadd.f32 %v2273_v50, %v1944_v25 }
 0x1ed   : > { %v6788_v49 = vpop.f32.mrf.mxu0  ;;  %v6800_v5 = vpop.f32.mrf.mxu1  ;;  %7007 = vmatmul.mubr.msk.bf16.gmra.mxu0 %vm837_vm1, %v4248_v3 }
 0x1ee   : > { %v8917_v63 = vadd.f32 %v6788_v49, %v8834_v24  ;;  %v2658_v57 = vadd.f32 %v6800_v5, %v8722_v29 }
 0x1ef   : > { %v2254_v39 = vpop.f32.mrf.mxu0  ;;  %v2529_v37 = vpop.f32.mrf.mxu1 }
 0x1f0   : > { %v8921_v20 = vadd.f32 %v2254_v39, %v8844_v34  ;;  %v2656_v18 = vadd.f32 %v2529_v37, %v8735_v9 }
 0x1f1   : > { %v6789_v31 = vpop.f32.mrf.mxu0  ;;  %v6801_v10 = vpop.f32.mrf.mxu1 }
 0x1f2   : > { %v8925_v48 = vadd.f32 %v6789_v31, %v8852_v58  ;;  %v2659_v15 = vadd.f32 %v6801_v10, %v8744_v26 }
 0x1f3   : > { %v2257_v27 = vpop.f32.mrf.mxu0  ;;  %v2532_v30 = vpop.f32.mrf.mxu1 }
 0x1f4   : > { %v8929_v24 = vadd.f32 %v2257_v27, %v8860_v44  ;;  %v2657_v29 = vadd.f32 %v2532_v30, %v8755_v40 }
 0x1f5   : > { %v6804_v59 = vpop.f32.mrf.mxu1  ;;  %v6836_v23 = vpop.f32.mrf.mxu0 }
 0x1f6   : > { %v2662_v34 = vadd.f32 %v6804_v59, %v8765_v21  ;;  %v8933_v1 = vadd.f32 %v6836_v23, %v2658_v57 }
 0x1f7   : > { %v2545_v9 = vpop.f32.mrf.mxu1  ;;  %v2899_v62 = vpop.f32.mrf.mxu0 }
 0x1f8   : > { %v2660_v58 = vadd.f32 %v2545_v9, %v8775_v2  ;;  %v8936_v0 = vadd.f32 %v2899_v62, %v2656_v18 }
 0x1f9   : > { %v6805_v26 = vpop.f32.mrf.mxu1  ;;  %v6837_v46 = vpop.f32.mrf.mxu0 }
 0x1fa   : > { %v2663_v25 = vadd.f32 %v6805_v26, %v8783_v51  ;;  %v8939_v44 = vadd.f32 %v6837_v46, %v2659_v15 }
 0x1fb   : > { %v2548_v36 = vpop.f32.mrf.mxu1  ;;  %v2902_v40 = vpop.f32.mrf.mxu0 }
 0x1fc   : > { %v2661_v41 = vadd.f32 %v2548_v36, %v8791_v60  ;;  %v8942_v61 = vadd.f32 %v2902_v40, %v2657_v29 }
 0x1fd   : > { %v6808_v21 = vpop.f32.mrf.mxu1  ;;  %v6840_v7 = vpop.f32.mrf.mxu0 }
 0x1fe   : > { %v2666_v55 = vadd.f32 %v6808_v21, %v8801_v52  ;;  %v8945_v47 = vadd.f32 %v6840_v7, %v2662_v34 }
 0x1ff   : > { %v2561_v2 = vpop.f32.mrf.mxu1  ;;  %v2915_v33 = vpop.f32.mrf.mxu0 }
 0x200   : > { %v2664_v53 = vadd.f32 %v2561_v2, %v8811_v6  ;;  %v8948_v3 = vadd.f32 %v2915_v33, %v2660_v58 }
 0x201   : > { %v6809_v51 = vpop.f32.mrf.mxu1  ;;  %v6841_v22 = vpop.f32.mrf.mxu0 }
 0x202   : > { %v2667_v50 = vadd.f32 %v6809_v51, %v8819_v54  ;;  %v8951_v49 = vadd.f32 %v6841_v22, %v2663_v25 }
 0x203   : > { %v2564_v60 = vpop.f32.mrf.mxu1  ;;  %v2918_v5 = vpop.f32.mrf.mxu0 }
 0x204   : > { %v2665_v57 = vadd.f32 %v2564_v60, %v8827_v12  ;;  %v8954_v39 = vadd.f32 %v2918_v5, %v2661_v41 }
 0x205   : > { %v6812_v52 = vpop.f32.mrf.mxu1  ;;  %v6844_v37 = vpop.f32.mrf.mxu0 }
 0x206   : > { %v2670_v18 = vadd.f32 %v6812_v52, %v8837_v17  ;;  %v8957_v31 = vadd.f32 %v6844_v37, %v2666_v55 }
 0x207   : > { %v2577_v6 = vpop.f32.mrf.mxu1  ;;  %v2931_v10 = vpop.f32.mrf.mxu0 }
 0x208   : > { %v2668_v15 = vadd.f32 %v2577_v6, %v8847_v8  ;;  %v8960_v27 = vadd.f32 %v2931_v10, %v2664_v53 }
 0x209   : > { %v6813_v54 = vpop.f32.mrf.mxu1  ;;  %v6845_v30 = vpop.f32.mrf.mxu0 }
 0x20a   : > { %v2671_v29 = vadd.f32 %v6813_v54, %v8855_v38  ;;  %v8963_v59 = vadd.f32 %v6845_v30, %v2667_v50 }
 0x20b   : > { %v2580_v12 = vpop.f32.mrf.mxu1  ;;  %v2934_v23 = vpop.f32.mrf.mxu0 }
 0x20c   : > { %v2669_v34 = vadd.f32 %v2580_v12, %v8863_v32  ;;  %v8966_v9 = vadd.f32 %v2934_v23, %v2665_v57 }
 0x20d   : > { %v6816_v17 = vpop.f32.mrf.mxu1  ;;  %v6848_v62 = vpop.f32.mrf.mxu0 }
 0x20e   : > { %v2674_v58 = vadd.f32 %v6816_v17, %v8871_v13  ;;  %v8969_v26 = vadd.f32 %v6848_v62, %v2670_v18 }
 0x20f   : > { %v2593_v8 = vpop.f32.mrf.mxu1  ;;  %v2947_v46 = vpop.f32.mrf.mxu0 }
 0x210   : > { %v2672_v25 = vadd.f32 %v2593_v8, %v8879_v14  ;;  %v8972_v36 = vadd.f32 %v2947_v46, %v2668_v15 }
 0x211   : > { %v6817_v38 = vpop.f32.mrf.mxu1  ;;  %v6849_v40 = vpop.f32.mrf.mxu0 }
 0x212   : > { %v2675_v41 = vadd.f32 %v6817_v38, %v8884_v42  ;;  %v8975_v21 = vadd.f32 %v6849_v40, %v2671_v29 }
 0x213   : > { %v2596_v32 = vpop.f32.mrf.mxu1  ;;  %v2950_v7 = vpop.f32.mrf.mxu0 }
 0x214   : > { %v2673_v55 = vadd.f32 %v2596_v32, %v8889_v16  ;;  %v8978_v2 = vadd.f32 %v2950_v7, %v2669_v34 }
 0x215   : > { %v6820_v13 = vpop.f32.mrf.mxu1  ;;  %v6852_v33 = vpop.f32.mrf.mxu0 }
 0x216   : > { %v2678_v53 = vadd.f32 %v6820_v13, %v8894_v19  ;;  %v8981_v51 = vadd.f32 %v6852_v33, %v2674_v58 }
 0x217   : > { %v2609_v14 = vpop.f32.mrf.mxu1  ;;  %v2963_v22 = vpop.f32.mrf.mxu0 }
 0x218   : > { %v2676_v50 = vadd.f32 %v2609_v14, %v8901_v45  ;;  %v8984_v60 = vadd.f32 %v2963_v22, %v2672_v25 }
 0x219   : > { %v6821_v42 = vpop.f32.mrf.mxu1  ;;  %v6853_v5 = vpop.f32.mrf.mxu0 }
 0x21a   : > { %v2679_v57 = vadd.f32 %v6821_v42, %v8906_v11  ;;  %v8987_v52 = vadd.f32 %v6853_v5, %v2675_v41 }
 0x21b   : > { %v2612_v16 = vpop.f32.mrf.mxu1  ;;  %v2966_v37 = vpop.f32.mrf.mxu0 }
 0x21c   : > { %v2677_v18 = vadd.f32 %v2612_v16, %v8911_v28  ;;  %v8990_v6 = vadd.f32 %v2966_v37, %v2673_v55 }
 0x21d   : > { %v6824_v19 = vpop.f32.mrf.mxu1  ;;  %v6856_v10 = vpop.f32.mrf.mxu0 }
 0x21e   : > { %v2682_v15 = vadd.f32 %v6824_v19, %v8917_v63  ;;  %v8993_v54 = vadd.f32 %v6856_v10, %v2678_v53 }
 0x21f   : > { %v2625_v45 = vpop.f32.mrf.mxu1  ;;  %v2979_v30 = vpop.f32.mrf.mxu0 }
 0x220   : > { %v2680_v29 = vadd.f32 %v2625_v45, %v8921_v20  ;;  %v8996_v12 = vadd.f32 %v2979_v30, %v2676_v50 }
 0x221   : > { %v6825_v11 = vpop.f32.mrf.mxu1  ;;  %v6857_v23 = vpop.f32.mrf.mxu0 }
 0x222   : > { %v2683_v34 = vadd.f32 %v6825_v11, %v8925_v48  ;;  %v8999_v17 = vadd.f32 %v6857_v23, %v2679_v57 }
 0x223   : > { %v2628_v28 = vpop.f32.mrf.mxu1  ;;  %v2982_v62 = vpop.f32.mrf.mxu0 }
 0x224   : > { %v2681_v58 = vadd.f32 %v2628_v28, %v8929_v24  ;;  %v9002_v8 = vadd.f32 %v2982_v62, %v2677_v18 }
 0x225   : > { %v6828_v63 = vpop.f32.mrf.mxu1  ;;  %v6860_v46 = vpop.f32.mrf.mxu0 }
 0x226   : > { %v2686_v25 = vadd.f32 %v6828_v63, %v8896_v43  ;;  %v9005_v38 = vadd.f32 %v6860_v46, %v2682_v15 }
 0x227   : > { %v2641_v20 = vpop.f32.mrf.mxu1  ;;  %v2995_v40 = vpop.f32.mrf.mxu0 }
 0x228   : > { %v2684_v41 = vadd.f32 %v2641_v20, %v8903_v35  ;;  %v9008_v32 = vadd.f32 %v2995_v40, %v2680_v29 }
 0x229   : > { %v6829_v48 = vpop.f32.mrf.mxu1  ;;  %v6861_v7 = vpop.f32.mrf.mxu0 }
 0x22a   : > { %v2687_v55 = vadd.f32 %v6829_v48, %v8908_v4  ;;  %v9011_v13 = vadd.f32 %v6861_v7, %v2683_v34 }
 0x22b   : > { %v2644_v24 = vpop.f32.mrf.mxu1  ;;  %v2998_v33 = vpop.f32.mrf.mxu0 }
 0x22c   : > { %v2685_v53 = vadd.f32 %v2644_v24, %v8913_v56  ;;  %v9014_v14 = vadd.f32 %v2998_v33, %v2681_v58 }
 0x22d   : > { %v6864_v43 = vpop.f32.mrf.mxu0  ;;  %v9016_v22 = vpop.f32.mrf.mxu1 }
 0x22e   : > { %v9018_v50 = vadd.f32 %v6864_v43, %v2686_v25 }
 0x22f   : > { %v3011_v35 = vpop.f32.mrf.mxu0  ;;  %v9020_v42 = vpop.f32.mrf.mxu1 }
 0x230   : > { %v9022_v5 = vadd.f32 %v3011_v35, %v2684_v41 }
 0x231   : > { %v6865_v57 = vpop.f32.mrf.mxu0  ;;  %v9024_v4 = vpop.f32.mrf.mxu1 }
 0x232   : > { %v9026_v16 = vadd.f32 %v6865_v57, %v2687_v55 }
 0x233   : > { %v3014_v37 = vpop.f32.mrf.mxu0  ;;  %v9028_v18 = vpop.f32.mrf.mxu1 }
 0x234   : > { %v9030_v56 = vadd.f32 %v3014_v37, %v2685_v53 }
 0x235   : > { %v9032_v19 = vpop.f32.mrf.mxu1  ;;  %v9034_v10 = vpop.f32.mrf.mxu0 }
 0x237   : > { %v9036_v15 = vpop.f32.mrf.mxu1  ;;  %v9038_v45 = vpop.f32.mrf.mxu0 }
 0x239   : > { %v9040_v30 = vpop.f32.mrf.mxu1  ;;  %v9042_v29 = vpop.f32.mrf.mxu0 }
 0x23b   : > { %v9044_v11 = vpop.f32.mrf.mxu1  ;;  %v9046_v23 = vpop.f32.mrf.mxu0 }
 0x23d   : > { %v9048_v34 = vpop.f32.mrf.mxu1  ;;  %v9050_v28 = vpop.f32.mrf.mxu0 }
 0x23f   : > { %v3301_v62 = vpop.f32.mrf.mxu1  ;;  %v9052_v58 = vpop.f32.mrf.mxu0 }
 0x240   : > { %v3404_v63 = vadd.f32 %v3301_v62, %v8960_v27 }
 0x241   : > { %v6881_v46 = vpop.f32.mrf.mxu1  ;;  %v9055_v25 = vpop.f32.mrf.mxu0 }
 0x242   : > { %v3407_v20 = vadd.f32 %v6881_v46, %v8963_v59 }
 0x243   : > { %v3304_v40 = vpop.f32.mrf.mxu1  ;;  %v9058_v41 = vpop.f32.mrf.mxu0 }
 0x244   : > { %9984 = vst [vmem:[#allocation13_spill] sm:$0xff] %v9058_v41  ;;  %v3405_v48 = vadd.f32 %v3304_v40, %v8966_v9 }
 0x245   : > { %v6884_v7 = vpop.f32.mrf.mxu1  ;;  %v9061_v55 = vpop.f32.mrf.mxu0 }
 0x246   : > { %9985 = vst [vmem:[#allocation14_spill] sm:$0xff] %v9061_v55  ;;  %v3410_v24 = vadd.f32 %v6884_v7, %v8969_v26 }
 0x247   : > { %v3317_v33 = vpop.f32.mrf.mxu1  ;;  %v3672_v53 = vpop.f32.mrf.mxu0 }
 0x248   : > { %v3408_v43 = vadd.f32 %v3317_v33, %v8972_v36  ;;  %v9065_v27 = vadd.f32 %v3672_v53, %v3404_v63 }
 0x249   : > { %v6885_v35 = vpop.f32.mrf.mxu1  ;;  %v6917_v57 = vpop.f32.mrf.mxu0 }
 0x24a   : > { %v3411_v59 = vadd.f32 %v6885_v35, %v8975_v21  ;;  %v9068_v37 = vadd.f32 %v6917_v57, %v3407_v20 }
 0x24b   : > { %v3320_v62 = vpop.f32.mrf.mxu1  ;;  %v3675_v46 = vpop.f32.mrf.mxu0 }
 0x24c   : > { %v3409_v9 = vadd.f32 %v3320_v62, %v8978_v2  ;;  %v9071_v40 = vadd.f32 %v3675_v46, %v3405_v48 }
 0x24d   : > { %v6888_v55 = vpop.f32.mrf.mxu1  ;;  %v6920_v26 = vpop.f32.mrf.mxu0 }
 0x24e   : > { %v3414_v7 = vadd.f32 %v6888_v55, %v8981_v51  ;;  %v9074_v41 = vadd.f32 %v6920_v26, %v3410_v24 }
 0x24f   : > { %v3333_v36 = vpop.f32.mrf.mxu1  ;;  %v3688_v63 = vpop.f32.mrf.mxu0 }
 0x250   : > { %v3412_v33 = vadd.f32 %v3333_v36, %v8984_v60  ;;  %v9077_v53 = vadd.f32 %v3688_v63, %v3408_v43 }
 0x251   : > { %v6889_v21 = vpop.f32.mrf.mxu1  ;;  %v6921_v20 = vpop.f32.mrf.mxu0 }
 0x252   : > { %v3415_v35 = vadd.f32 %v6889_v21, %v8987_v52  ;;  %v9080_v57 = vadd.f32 %v6921_v20, %v3411_v59 }
 0x253   : > { %v3336_v2 = vpop.f32.mrf.mxu1  ;;  %v3691_v48 = vpop.f32.mrf.mxu0 }
 0x254   : > { %v3413_v62 = vadd.f32 %v3336_v2, %v8990_v6  ;;  %v9083_v46 = vadd.f32 %v3691_v48, %v3409_v9 }
 0x255   : > { %v6892_v51 = vpop.f32.mrf.mxu1  ;;  %v6924_v55 = vpop.f32.mrf.mxu0 }
 0x256   : > { %v3418_v24 = vadd.f32 %v6892_v51, %v8993_v54  ;;  %v9086_v26 = vadd.f32 %v6924_v55, %v3414_v7 }
 0x257   : > { %v3349_v60 = vpop.f32.mrf.mxu1  ;;  %v3704_v43 = vpop.f32.mrf.mxu0 }
 0x258   : > { %v3416_v36 = vadd.f32 %v3349_v60, %v8996_v12  ;;  %v9089_v63 = vadd.f32 %v3704_v43, %v3412_v33 }
 0x259   : > { %v6893_v52 = vpop.f32.mrf.mxu1  ;;  %v6925_v59 = vpop.f32.mrf.mxu0 }
 0x25a   : > { %v3419_v21 = vadd.f32 %v6893_v52, %v8999_v17  ;;  %v9092_v20 = vadd.f32 %v6925_v59, %v3415_v35 }
 0x25b   : > { %v3352_v6 = vpop.f32.mrf.mxu1  ;;  %v3707_v9 = vpop.f32.mrf.mxu0 }
 0x25c   : > { %v3417_v2 = vadd.f32 %v3352_v6, %v9002_v8  ;;  %v9095_v48 = vadd.f32 %v3707_v9, %v3413_v62 }
 0x25d   : > { %v6896_v54 = vpop.f32.mrf.mxu1  ;;  %v6928_v7 = vpop.f32.mrf.mxu0 }
 0x25e   : > { %v3422_v51 = vadd.f32 %v6896_v54, %v9005_v38  ;;  %v9098_v55 = vadd.f32 %v6928_v7, %v3418_v24 }
 0x25f   : > { %v3365_v12 = vpop.f32.mrf.mxu1  ;;  %v3720_v33 = vpop.f32.mrf.mxu0 }
 0x260   : > { %v3420_v60 = vadd.f32 %v3365_v12, %v9008_v32  ;;  %v9101_v43 = vadd.f32 %v3720_v33, %v3416_v36 }
 0x261   : > { %v6897_v17 = vpop.f32.mrf.mxu1  ;;  %v6929_v35 = vpop.f32.mrf.mxu0 }
 0x262   : > { %v3423_v52 = vadd.f32 %v6897_v17, %v9011_v13  ;;  %v9104_v59 = vadd.f32 %v6929_v35, %v3419_v21 }
 0x263   : > { %v3368_v8 = vpop.f32.mrf.mxu1  ;;  %v3723_v62 = vpop.f32.mrf.mxu0 }
 0x264   : > { %v3421_v6 = vadd.f32 %v3368_v8, %v9014_v14  ;;  %v9107_v9 = vadd.f32 %v3723_v62, %v3417_v2 }
 0x265   : > { %v6900_v38 = vpop.f32.mrf.mxu1  ;;  %v6932_v24 = vpop.f32.mrf.mxu0 }
 0x266   : > { %v3426_v54 = vadd.f32 %v6900_v38, %v9018_v50  ;;  %v9110_v7 = vadd.f32 %v6932_v24, %v3422_v51 }
 0x267   : > { %v3381_v32 = vpop.f32.mrf.mxu1  ;;  %v3736_v36 = vpop.f32.mrf.mxu0 }
 0x268   : > { %v3424_v12 = vadd.f32 %v3381_v32, %v9022_v5  ;;  %v9113_v33 = vadd.f32 %v3736_v36, %v3420_v60  ;;  %v3398_v60 = vadd.f32 %v9016_v22, %v8933_v1  ;;  %v3396_v36 = vadd.f32 %v9020_v42, %v8936_v0 }
 0x269   : > { %v6901_v13 = vpop.f32.mrf.mxu1  ;;  %v6933_v21 = vpop.f32.mrf.mxu0 }
 0x26a   : > { %v3427_v17 = vadd.f32 %v6901_v13, %v9026_v16  ;;  %v9116_v35 = vadd.f32 %v6933_v21, %v3423_v52 }
 0x26b   : > { %v3384_v14 = vpop.f32.mrf.mxu1  ;;  %v3739_v2 = vpop.f32.mrf.mxu0 }
 0x26c   : > { %v3425_v8 = vadd.f32 %v3384_v14, %v9030_v56  ;;  %v9119_v62 = vadd.f32 %v3739_v2, %v3421_v6  ;;  %v3769_v56 = vadd.f32 %v9034_v10, %v3398_v60  ;;  %v3767_v14 = vadd.f32 %v9038_v45, %v3396_v36 }
 0x26d   : > { %v6936_v50 = vpop.f32.mrf.mxu0  ;;  %v6944_v51 = vpop.f32.mrf.mxu1 }
 0x26e   : > { %v9121_v38 = vadd.f32 %v6936_v50, %v3426_v54  ;;  %v3399_v54 = vadd.f32 %v9024_v4, %v8939_v44  ;;  %v4139_v2 = vadd.f32 %v6944_v51, %v3769_v56  ;;  %v3397_v50 = vadd.f32 %v9028_v18, %v8942_v61 }
 0x26f   : > { %v3752_v24 = vpop.f32.mrf.mxu0  ;;  %v4010_v5 = vpop.f32.mrf.mxu1  ;;  %v3400_v61 = vadd.f32 %v9036_v15, %v8948_v3 }
 0x270   : > { %v9125_v32 = vadd.f32 %v3752_v24, %v3424_v12  ;;  %v3770_v0 = vadd.f32 %v9042_v29, %v3399_v54  ;;  %v4137_v42 = vadd.f32 %v4010_v5, %v3767_v14  ;;  %v3768_v4 = vadd.f32 %v9046_v23, %v3397_v50  ;;  %v9986_v54 = vld [vmem:[#allocation13_spill] sm:$0xff] }
 0x271   : > { %v6937_v16 = vpop.f32.mrf.mxu0  ;;  %v6945_v52 = vpop.f32.mrf.mxu1 }
 0x272   : > { %v9130_v6 = vadd.f32 %v6937_v16, %v3427_v17  ;;  %v3402_v17 = vadd.f32 %v9032_v19, %v8945_v47  ;;  %v4140_v45 = vadd.f32 %v6945_v52, %v3770_v0  ;;  %v3403_v47 = vadd.f32 %v9040_v30, %v8951_v49 }
 0x273   : > { %v3755_v13 = vpop.f32.mrf.mxu0  ;;  %v4013_v21 = vpop.f32.mrf.mxu1  ;;  %v3771_v16 = vadd.f32 %v9052_v58, %v3400_v61  ;;  %v3406_v30 = vadd.f32 %v9048_v34, %v8957_v31 }
 0x274   : > { %v9135_v1 = vadd.f32 %v3755_v13, %v3425_v8  ;;  %v3773_v18 = vadd.f32 %v9050_v28, %v3402_v17  ;;  %v4138_v29 = vadd.f32 %v4013_v21, %v3768_v4  ;;  %v3401_v28 = vadd.f32 %v9044_v11, %v8954_v39 }
 0x275   : > { %v6948_v22 = vpop.f32.mrf.mxu1  ;;  %v6980_v12 = vpop.f32.mrf.mxu0  ;;  %v3774_v56 = vadd.f32 %v9055_v25, %v3403_v47  ;;  %v9987_v25 = vld [vmem:[#allocation14_spill] sm:$0xff] }
 0x276   : > { %v9140_v10 = vadd.f32 %v6980_v12, %v4139_v2  ;;  %v4143_v52 = vadd.f32 %v6948_v22, %v3773_v18  ;;  %v3772_v14 = vadd.f32 %v9986_v54, %v3401_v28  ;;  %v3777_v12 = vadd.f32 %v9987_v25, %v3406_v30 }
 0x277   : > { %v4026_v24 = vpop.f32.mrf.mxu1  ;;  %v4380_v44 = vpop.f32.mrf.mxu0 }
 0x278   : > { %7193 = vtanh.f32 %v9140_v10  ;;  %v9146_v8 = vadd.f32 %v4380_v44, %v4137_v42  ;;  %v4141_v13 = vadd.f32 %v4026_v24, %v3771_v16 }
 0x279   : > { %v6949_v51 = vpop.f32.mrf.mxu1  ;;  %v6981_v60 = vpop.f32.mrf.mxu0 }
 0x27a   : > { %v9151_v5 = vadd.f32 %v6981_v60, %v4140_v45  ;;  %7195 = vtanh.f32 %v9146_v8  ;;  %v4144_v2 = vadd.f32 %v6949_v51, %v3774_v56 }
 0x27b   : > { %v4029_v19 = vpop.f32.mrf.mxu1  ;;  %v4383_v23 = vpop.f32.mrf.mxu0 }
 0x27c   : > { %v9157_v36 = vadd.f32 %v4383_v23, %v4138_v29  ;;  %7197 = vtanh.f32 %v9151_v5  ;;  %v4142_v50 = vadd.f32 %v4029_v19, %v3772_v14 }
 0x27d   : > { %v6952_v3 = vpop.f32.mrf.mxu1  ;;  %v6984_v15 = vpop.f32.mrf.mxu0 }
 0x27e   : > { %v9163_v49 = vadd.f32 %v6984_v15, %v4143_v52  ;;  %7199 = vtanh.f32 %v9157_v36  ;;  %v4147_v34 = vadd.f32 %v6952_v3, %v3777_v12 }
 0x27f   : > { %v4042_v58 = vpop.f32.mrf.mxu1  ;;  %v4396_v21 = vpop.f32.mrf.mxu0 }
 0x280   : > { %v9169_v22 = vadd.f32 %v4396_v21, %v4141_v13  ;;  %7201 = vtanh.f32 %v9163_v49  ;;  %v4145_v18 = vadd.f32 %v4042_v58, %v9065_v27 }
 0x281   : > { %v6953_v39 = vpop.f32.mrf.mxu1  ;;  %v6985_v11 = vpop.f32.mrf.mxu0 }
 0x282   : > { %v9173_v0 = vadd.f32 %v6985_v11, %v4144_v2  ;;  %7203 = vtanh.f32 %v9169_v22  ;;  %v4148_v15 = vadd.f32 %v6953_v39, %v9068_v37 }
 0x283   : > { %v4045_v42 = vpop.f32.mrf.mxu1  ;;  %v4399_v31 = vpop.f32.mrf.mxu0 }
 0x284   : > { %v9176_v17 = vadd.f32 %v4399_v31, %v4142_v50  ;;  %7205 = vtanh.f32 %v9173_v0  ;;  %v4146_v21 = vadd.f32 %v4045_v42, %v9071_v40 }
 0x285   : > { %v7194_v24 = vpop.eup %7193  ;;  %v6956_v44 = vpop.f32.mrf.mxu1 }
 0x286   : > { %v6988_v4 = vpop.f32.mrf.mxu0  ;;  %5055 = vrot.lane.b32.xlu0 %v7194_v24, %s7544_s14  ;;  %7207 = vtanh.f32 %v9176_v17  ;;  %v4151_v11 = vadd.f32 %v6956_v44, %v9074_v41  ;;  %v9212_v44 = vpop.permute.xlu0 %4891 }
 0x287   : > { %v9179_v45 = vadd.f32 %v6988_v4, %v4147_v34  ;;  %v4058_v51 = vpop.f32.mrf.mxu1  ;;  %v7196_v61 = vpop.eup %7195 }
 0x288   : > { %v4412_v60 = vpop.f32.mrf.mxu0  ;;  %v4149_v34 = vadd.f32 %v4058_v51, %v9077_v53  ;;  %v9219_v51 = vpop.permute.xlu1 %4895 }
 0x289   : > { %7209 = vtanh.f32 %v9179_v45  ;;  %v6957_v29 = vpop.f32.mrf.mxu1  ;;  %v7198_v19 = vpop.eup %7197  ;;  %v9186_v23 = vadd.f32 %v4412_v60, %v4145_v18 }
 0x28a   : > { %v6989_v47 = vpop.f32.mrf.mxu0  ;;  %5051 = vrot.lane.b32.xlu0 %v7196_v61, %s7544_s14  ;;  %5057 = vrot.lane.b32.xlu1 %v7198_v19, %s7544_s14  ;;  %v4152_v4 = vadd.f32 %v6957_v29, %v9080_v57 }
 0x28b   : > { %v4061_v16 = vpop.f32.mrf.mxu1  ;;  %v7200_v3 = vpop.eup %7199  ;;  %7211 = vtanh.f32 %v9186_v23  ;;  %v9191_v27 = vadd.f32 %v6989_v47, %v4148_v15 }
 0x28c   : > { %v4415_v52 = vpop.f32.mrf.mxu0  ;;  %v4150_v19 = vadd.f32 %v4061_v16, %v9083_v46 }
 0x28d   : > { %v7202_v56 = vpop.eup %7201  ;;  %v6960_v13 = vpop.f32.mrf.mxu1  ;;  %7213 = vtanh.f32 %v9191_v27  ;;  %v9197_v37 = vadd.f32 %v4415_v52, %v4146_v21 }
 0x28e   : > { %v6992_v28 = vpop.f32.mrf.mxu0  ;;  %5053 = vrot.lane.b32.xlu1 %v7200_v3, %s7544_s14  ;;  %5063 = vrot.lane.b32.xlu0 %v7202_v56, %s7544_s14  ;;  %v4155_v29 = vadd.f32 %v6960_v13, %v9086_v26  ;;  %v9225_v3 = vpop.permute.xlu0 %4893 }
 0x28f   : > { %v7204_v58 = vpop.eup %7203  ;;  %v4074_v2 = vpop.f32.mrf.mxu1  ;;  %v9202_v31 = vadd.f32 %v6992_v28, %v4151_v11  ;;  %7215 = vtanh.f32 %v9197_v37 }
 0x290   : > { %v4428_v30 = vpop.f32.mrf.mxu0  ;;  %v4153_v56 = vadd.f32 %v4074_v2, %v9089_v63  ;;  %v9233_v26 = vpop.permute.xlu1 %4897 }
 0x291   : > { %v7206_v14 = vpop.eup %7205  ;;  %v6961_v40 = vpop.f32.mrf.mxu1  ;;  %7217 = vtanh.f32 %v9202_v31  ;;  %v9210_v41 = vadd.f32 %v4428_v30, %v4149_v34 }
 0x292   : > { %v6993_v54 = vpop.f32.mrf.mxu0  ;;  %5065 = vrot.lane.b32.xlu1 %v7206_v14, %s7544_s14  ;;  %5059 = vrot.lane.b32.xlu0 %v7204_v58, %s7544_s14  ;;  %v4156_v30 = vadd.f32 %v6961_v40, %v9092_v20  ;;  %v9239_v21 = vpop.permute.xlu0 %4899 }
 0x293   : > { %v7208_v25 = vpop.eup %7207  ;;  %v4077_v60 = vpop.f32.mrf.mxu1  ;;  %v9214_v18 = vadd.f32 %v6993_v54, %v4152_v4  ;;  %7219 = vtanh.f32 %v9210_v41 }
 0x294   : > { %v4431_v39 = vpop.f32.mrf.mxu0  ;;  %v4154_v63 = vadd.f32 %v4077_v60, %v9095_v48 }
 0x295   : > { %v6964_v53 = vpop.f32.mrf.mxu1  ;;  %7221 = vtanh.f32 %v9214_v18  ;;  %v9223_v52 = vadd.f32 %v4431_v39, %v4150_v19 }
 0x296   : > { %v6996_v12 = vpop.f32.mrf.mxu0  ;;  %v7210_v50 = vpop.eup %7209  ;;  %5061 = vrot.lane.b32.xlu1 %v7208_v25, %s7544_s14  ;;  %v4159_v11 = vadd.f32 %v6964_v53, %v9098_v55 }
 0x297   : > { %5071 = vrot.lane.b32.xlu0 %v7210_v50, %s7544_s14  ;;  %v9228_v28 = vadd.f32 %v6996_v12, %v4155_v29  ;;  %v4090_v46 = vpop.f32.mrf.mxu1  ;;  %7223 = vtanh.f32 %v9223_v52  ;;  %v9250_v50 = vpop.permute.xlu1 %4901 }
 0x298   : > { %v4444_v42 = vpop.f32.mrf.mxu0  ;;  %v7212_v61 = vpop.eup %7211 }
 0x299   : > { %7225 = vtanh.f32 %v9228_v28  ;;  %v9237_v58 = vadd.f32 %v4444_v42, %v4153_v56  ;;  %v6965_v14 = vpop.f32.mrf.mxu1  ;;  %v9252_v40 = vpop.permute.xlu0 %4903 }
 0x29a   : > { %v6997_v24 = vpop.f32.mrf.mxu0  ;;  %v7214_v57 = vpop.eup %7213  ;;  %v4160_v19 = vadd.f32 %v6965_v14, %v9104_v59 }
 0x29b   : > { %5067 = vrot.lane.b32.xlu0 %v7212_v61, %s7544_s14  ;;  %5073 = vrot.lane.b32.xlu1 %v7214_v57, %s7544_s14  ;;  %v9241_v39 = vadd.f32 %v6997_v24, %v4156_v30  ;;  %7227 = vtanh.f32 %v9237_v58  ;;  %v4093_v25 = vpop.f32.mrf.mxu1  ;;  %v4157_v24 = vadd.f32 %v4090_v46, %v9101_v43  ;;  %v9263_v61 = vpop.permute.xlu1 %4905 }
 0x29c   : > { %v4447_v47 = vpop.f32.mrf.mxu0  ;;  %v7216_v16 = vpop.eup %7215  ;;  %v4158_v46 = vadd.f32 %v4093_v25, %v9107_v9 }
 0x29d   : > { %7229 = vtanh.f32 %v9241_v39  ;;  %v9248_v12 = vadd.f32 %v4447_v47, %v4154_v63  ;;  %v6968_v55 = vpop.f32.mrf.mxu1  ;;  %v9266_v53 = vpop.permute.xlu0 %4907 }
 0x29e   : > { %v7000_v15 = vpop.f32.mrf.mxu0  ;;  %v7218_v54 = vpop.eup %7217 }
 0x29f   : > { %5069 = vrot.lane.b32.xlu1 %v7216_v16, %s7544_s14  ;;  %5079 = vrot.lane.b32.xlu0 %v7218_v54, %s7544_s14  ;;  %v9255_v34 = vadd.f32 %v7000_v15, %v4159_v11  ;;  %7231 = vtanh.f32 %v9248_v12  ;;  %v4106_v29 = vpop.f32.mrf.mxu1  ;;  %v9274_v30 = vpop.permute.xlu1 %4909 }
 0x2a0   : > { %v4460_v13 = vpop.f32.mrf.mxu0  ;;  %v7220_v2 = vpop.eup %7219  ;;  %v4161_v11 = vadd.f32 %v4106_v29, %v9113_v33 }
 0x2a1   : > { %7233 = vtanh.f32 %v9255_v34  ;;  %v9261_v60 = vadd.f32 %v4460_v13, %v4157_v24  ;;  %v6969_v56 = vpop.f32.mrf.mxu1  ;;  %v4163_v13 = vadd.f32 %v6968_v55, %v9110_v7  ;;  %v9280_v14 = vpop.permute.xlu0 %4911 }
 0x2a2   : > { %v7001_v20 = vpop.f32.mrf.mxu0  ;;  %v7222_v42 = vpop.eup %7221 }
 0x2a3   : > { %5075 = vrot.lane.b32.xlu0 %v7220_v2, %s7544_s14  ;;  %5081 = vrot.lane.b32.xlu1 %v7222_v42, %s7544_s14  ;;  %v9269_v43 = vadd.f32 %v7001_v20, %v4160_v19  ;;  %7235 = vtanh.f32 %v9261_v60  ;;  %v4109_v9 = vpop.f32.mrf.mxu1  ;;  %v9288_v7 = vpop.permute.xlu1 %4913 }
 0x2a4   : > { %v4463_v48 = vpop.f32.mrf.mxu0  ;;  %v7224_v4 = vpop.eup %7223 }
 0x2a5   : > { %7237 = vtanh.f32 %v9269_v43  ;;  %v9278_v54 = vadd.f32 %v4463_v48, %v4158_v46  ;;  %v4164_v48 = vadd.f32 %v6969_v56, %v9116_v35  ;;  %v9295_v55 = vpop.permute.xlu0 %4915 }
 0x2a6   : > { %v7004_v47 = vpop.f32.mrf.mxu0  ;;  %v7226_v57 = vpop.eup %7225 }
 0x2a7   : > { %5077 = vrot.lane.b32.xlu1 %v7224_v4, %s7544_s14  ;;  %5087 = vrot.lane.b32.xlu0 %v7226_v57, %s7544_s14  ;;  %v9284_v20 = vadd.f32 %v7004_v47, %v4163_v13  ;;  %7239 = vtanh.f32 %v9278_v54  ;;  %v6972_v4 = vpop.f32.mrf.mxu1  ;;  %v4162_v57 = vadd.f32 %v4109_v9, %v9119_v62  ;;  %v9302_v46 = vpop.permute.xlu1 %4917 }
 0x2a8   : > { %v4476_v15 = vpop.f32.mrf.mxu0  ;;  %v7228_v16 = vpop.eup %7227  ;;  %v4167_v35 = vadd.f32 %v6972_v4, %v9121_v38 }
 0x2a9   : > { %7241 = vtanh.f32 %v9284_v20  ;;  %v9293_v24 = vadd.f32 %v4476_v15, %v4161_v11  ;;  %v4122_v29 = vpop.f32.mrf.mxu1 }
 0x2aa   : > { %v7230_v59 = vpop.eup %7229  ;;  %v7005_v63 = vpop.f32.mrf.mxu0 }
 0x2ab   : > { %5083 = vrot.lane.b32.xlu0 %v7228_v16, %s7544_s14  ;;  %5089 = vrot.lane.b32.xlu1 %v7230_v59, %s7544_s14  ;;  %v9298_v33 = vadd.f32 %v7005_v63, %v4164_v48  ;;  %7243 = vtanh.f32 %v9293_v24  ;;  %v9309_v16 = vpop.permute.xlu0 %4919  ;;  %v6973_v62 = vpop.f32.mrf.mxu1  ;;  %v4165_v63 = vadd.f32 %v4122_v29, %v9125_v32 }
 0x2ac   : > { %v7232_v2 = vpop.eup %7231  ;;  %v4479_v25 = vpop.f32.mrf.mxu0  ;;  %v4168_v11 = vadd.f32 %v6973_v62, %v9130_v6 }
 0x2ad   : > { %7245 = vtanh.f32 %v9298_v33  ;;  %v9307_v15 = vadd.f32 %v4479_v25, %v4162_v57  ;;  %v9316_v38 = vpop.permute.xlu1 %4921  ;;  %v4125_v4 = vpop.f32.mrf.mxu1 }
 0x2ae   : > { %v7234_v42 = vpop.eup %7233  ;;  %v7008_v47 = vpop.f32.mrf.mxu0 }
 0x2af   : > { %5085 = vrot.lane.b32.xlu1 %v7232_v2, %s7544_s14  ;;  %5095 = vrot.lane.b32.xlu0 %v7234_v42, %s7544_s14  ;;  %v9311_v13 = vadd.f32 %v7008_v47, %v4167_v35  ;;  %7247 = vtanh.f32 %v9307_v15  ;;  %v9322_v42 = vpop.permute.xlu0 %4923 }
 0x2b0   : > { %v7236_v19 = vpop.eup %7235  ;;  %v4492_v59 = vpop.f32.mrf.mxu0 }
 0x2b1   : > { %7249 = vtanh.f32 %v9311_v13  ;;  %v9320_v25 = vadd.f32 %v4492_v59, %v4165_v63  ;;  %v9330_v57 = vpop.permute.xlu1 %4925  ;;  %v6322_v59 = vmul.f32 -1.442695, %v9140_v10  ;;  %v6321_v10 = vmul.f32 -1.442695, %v9157_v36 }
 0x2b2   : > { %v7238_v56 = vpop.eup %7237  ;;  %v7009_v2 = vpop.f32.mrf.mxu0 }
 0x2b3   : > { %5091 = vrot.lane.b32.xlu0 %v7236_v19, %s7544_s14  ;;  %5097 = vrot.lane.b32.xlu1 %v7238_v56, %s7544_s14  ;;  %v9325_v47 = vadd.f32 %v7009_v2, %v4168_v11  ;;  %v4166_v19 = vadd.f32 %v4125_v4, %v9135_v1  ;;  %7251 = vtanh.f32 %v9320_v25  ;;  %v9335_v35 = vpop.permute.xlu0 %4927  ;;  %v6320_v2 = vmul.f32 -1.442695, %v9146_v8 }
 0x2b4   : > { %v7240_v9 = vpop.eup %7239  ;;  %v4495_v32 = vpop.f32.mrf.mxu0  ;;  %v6323_v11 = vmul.f32 -1.442695, %v9151_v5  ;;  %v6324_v8 = vmul.f32 -1.442695, %v9169_v22  ;;  %v6327_v5 = vmul.f32 -1.442695, %v9173_v0 }
 0x2b5   : > { %7253 = vtanh.f32 %v9325_v47  ;;  %v9333_v29 = vadd.f32 %v4495_v32, %v4166_v19  ;;  %v9341_v62 = vpop.permute.xlu1 %4929  ;;  %v6326_v32 = vmul.f32 -1.442695, %v9163_v49  ;;  %v6325_v49 = vmul.f32 -1.442695, %v9176_v17 }
 0x2b6   : > { %v7242_v48 = vpop.eup %7241 }
 0x2b7   : > { %5093 = vrot.lane.b32.xlu1 %v7240_v9, %s7544_s14  ;;  %5103 = vrot.lane.b32.xlu0 %v7242_v48, %s7544_s14  ;;  %7255 = vtanh.f32 %v9333_v29  ;;  %v9343_v63 = vpop.permute.xlu0 %4931 }
 0x2b8   : > { %v7244_v6 = vpop.eup %7243  ;;  %7257 = vpow2.f32 %v6322_v59 }
 0x2b9   : > { %7259 = vpow2.f32 %v6320_v2  ;;  %v9350_v4 = vpop.permute.xlu1 %4933 }
 0x2ba   : > { %v7246_v56 = vpop.eup %7245  ;;  %7261 = vpow2.f32 %v6323_v11 }
 0x2bb   : > { %5099 = vrot.lane.b32.xlu0 %v7244_v6, %s7544_s14  ;;  %5105 = vrot.lane.b32.xlu1 %v7246_v56, %s7544_s14  ;;  %v9353_v19 = vpop.permute.xlu0 %4935  ;;  %7263 = vpow2.f32 %v6321_v10  ;;  %v6328_v10 = vmul.f32 -1.442695, %v9186_v23  ;;  %v6329_v23 = vmul.f32 -1.442695, %v9197_v37 }
 0x2bc   : > { %v7248_v1 = vpop.eup %7247  ;;  %7265 = vpow2.f32 %v6326_v32 }
 0x2bd   : > { %v9359_v36 = vpop.permute.xlu1 %4937  ;;  %7267 = vpow2.f32 %v6324_v8 }
 0x2be   : > { %v7250_v9 = vpop.eup %7249  ;;  %7269 = vpow2.f32 %v6327_v5 }
 0x2bf   : > { %5101 = vrot.lane.b32.xlu1 %v7248_v1, %s7544_s14  ;;  %5111 = vrot.lane.b32.xlu0 %v7250_v9, %s7544_s14  ;;  %v9361_v59 = vpop.permute.xlu0 %4939  ;;  %v6330_v9 = vmul.f32 -1.442695, %v9179_v45  ;;  %7271 = vpow2.f32 %v6325_v49  ;;  %v6331_v45 = vmul.f32 -1.442695, %v9191_v27 }
 0x2c0   : > { %v7252_v48 = vpop.eup %7251 }
 0x2c1   : > { %v9366_v22 = vpop.permute.xlu1 %4941  ;;  %7273 = vpow2.f32 %v6330_v9 }
 0x2c2   : > { %v7254_v6 = vpop.eup %7253  ;;  %9988 = vst [vmem:[#allocation16_spill] sm:$0xff] %v9366_v22 }
 0x2c3   : > { %5107 = vrot.lane.b32.xlu0 %v7252_v48, %s7544_s14  ;;  %5113 = vrot.lane.b32.xlu1 %v7254_v6, %s7544_s14  ;;  %v9368_v0 = vpop.permute.xlu0 %4943 }
 0x2c4   : > { %v7256_v56 = vpop.eup %7255 }
 0x2c5   : > { %v7258_v1 = vpop.eup %7257  ;;  %v9371_v5 = vpop.permute.xlu1 %4945 }
 0x2c6   : > { %v4701_v2 = vadd.f32 1.0, %v7258_v1  ;;  %v7260_v11 = vpop.eup %7259  ;;  %9989 = vst [vmem:[#allocation18_spill] sm:$0xff] %v9371_v5 }
 0x2c7   : > { %5109 = vrot.lane.b32.xlu1 %v7256_v56, %s7544_s14  ;;  %v7262_v48 = vpop.eup %7261  ;;  %v4699_v32 = vadd.f32 1.0, %v7260_v11  ;;  %v9374_v56 = vpop.permute.xlu0 %4947 }
 0x2c8   : > { %7275 = vrcp.f32 %v4701_v2  ;;  %v7264_v6 = vpop.eup %7263  ;;  %v4702_v8 = vadd.f32 1.0, %v7262_v48  ;;  %9990 = vst [vmem:[#allocation15_spill] sm:$0xff] %v9374_v56 }
 0x2c9   : > { %v7266_v17 = vpop.eup %7265  ;;  %7277 = vpow2.f32 %v6328_v10  ;;  %v4700_v49 = vadd.f32 1.0, %v7264_v6  ;;  %v9377_v11 = vpop.permute.xlu1 %4949 }
 0x2ca   : > { %7279 = vrcp.f32 %v4699_v32  ;;  %v7268_v1 = vpop.eup %7267  ;;  %v4705_v9 = vadd.f32 1.0, %v7266_v17  ;;  %9991 = vst [vmem:[#allocation17_spill] sm:$0xff] %v9377_v11  ;;  %v6334_v32 = vmul.f32 -1.442695, %v9202_v31 }
 0x2cb   : > { %7281 = vrcp.f32 %v4702_v8  ;;  %v7270_v22 = vpop.eup %7269  ;;  %v4703_v2 = vadd.f32 1.0, %v7268_v1  ;;  %v9379_v5 = vpop.permute.xlu0 %4951 }
 0x2cc   : > { %7283 = vpow2.f32 %v6331_v45  ;;  %v7272_v48 = vpop.eup %7271  ;;  %v4706_v10 = vadd.f32 1.0, %v7270_v22  ;;  %9992 = vst [vmem:[#allocation13_spill] sm:$0xff] %v9379_v5  ;;  %v6332_v45 = vmul.f32 -1.442695, %v9210_v41 }
 0x2cd   : > { %7285 = vrcp.f32 %v4700_v49  ;;  %v4704_v6 = vadd.f32 1.0, %v7272_v48  ;;  %v9385_v49 = vpop.permute.xlu1 %4953 }
 0x2ce   : > { %7287 = vrcp.f32 %v4705_v9  ;;  %v7274_v27 = vpop.eup %7273  ;;  %9993 = vst [vmem:[#allocation14_spill] sm:$0xff] %v9385_v49  ;;  %v6335_v9 = vmul.f32 -1.442695, %v9214_v18 }
 0x2cf   : > { %7289 = vpow2.f32 %v6329_v23  ;;  %v4709_v37 = vadd.f32 1.0, %v7274_v27  ;;  %v6333_v27 = vmul.f32 -1.442695, %v9223_v52 }
 0x2d0   : > { %7291 = vrcp.f32 %v4703_v2 }
 0x2d1   : > { %7293 = vrcp.f32 %v4706_v10 }
 0x2d2   : > { %7295 = vpow2.f32 %v6334_v32 }
 0x2d3   : > { %7297 = vrcp.f32 %v4704_v6 }
 0x2d4   : > { %7299 = vrcp.f32 %v4709_v37 }
 0x2d5   : > { %v9382_v8 = vpop.eup %7275  ;;  %7301 = vpow2.f32 %v6332_v45 }
 0x2d6   : > { %v7278_v1 = vpop.eup %7277  ;;  %7303 = vpow2.f32 %v6335_v9 }
 0x2d7   : > { %v9390_v31 = vpop.eup %7279  ;;  %v4707_v48 = vadd.f32 1.0, %v7278_v1 }
 0x2d8   : > { %v9392_v2 = vpop.eup %7281 }
 0x2d9   : > { %v7284_v6 = vpop.eup %7283  ;;  %7305 = vrcp.f32 %v4707_v48 }
 0x2da   : > { %v9398_v18 = vpop.eup %7285  ;;  %7307 = vpow2.f32 %v6333_v27  ;;  %v6339_v27 = vmul.f32 -1.442695, %v9241_v39  ;;  %v6337_v39 = vmul.f32 -1.442695, %v9248_v12  ;;  %v6340_v12 = vmul.f32 -1.442695, %v9261_v60 }
 0x2db   : > { %v9401_v37 = vpop.eup %7287  ;;  %v6341_v60 = vmul.f32 -1.442695, %v9278_v54 }
 0x2dc   : > { %v7290_v1 = vpop.eup %7289 }
 0x2f8   : > { %v5056_v17 = vpop.permute.xlu0 %5055 }
 0x2f9   : > { %v5149_v22 = vmul.f32 %v9382_v8, %v5056_v17  ;;  %v6338_v17 = vmul.f32 -1.442695, %v9228_v28  ;;  %v4708_v28 = vadd.f32 1.0, %v7290_v1 }
 0x2fb   : > { %5215 = vrot.lane.b32.xlu0 %v5149_v22, %s7544_s14  ;;  %7309 = vpow2.f32 %v6338_v17 }
 0x2fc   : > { %v5052_v23 = vpop.permute.xlu0 %5051  ;;  %v5058_v10 = vpop.permute.xlu1 %5057 }
 0x2fd   : > { %v5147_v41 = vmul.f32 %v9390_v31, %v5052_v23  ;;  %v5150_v32 = vmul.f32 %v9392_v2, %v5058_v10  ;;  %v4710_v23 = vadd.f32 1.0, %v7284_v6  ;;  %v9406_v10 = vpop.eup %7291 }
 0x2fe   : > { %v9411_v48 = vpop.eup %7293 }
 0x2ff   : > { %5211 = vrot.lane.b32.xlu0 %v5147_v41, %s7544_s14  ;;  %5217 = vrot.lane.b32.xlu1 %v5150_v32, %s7544_s14  ;;  %v6336_v41 = vmul.f32 -1.442695, %v9237_v58  ;;  %v7296_v6 = vpop.eup %7295  ;;  %7311 = vrcp.f32 %v4710_v23 }
 0x300   : > { %v5054_v45 = vpop.permute.xlu1 %5053  ;;  %v5064_v22 = vpop.permute.xlu0 %5063  ;;  %v4713_v17 = vadd.f32 1.0, %v7296_v6 }
 0x301   : > { %v5148_v52 = vmul.f32 %v9398_v18, %v5054_v45  ;;  %v5153_v9 = vmul.f32 %v9401_v37, %v5064_v22  ;;  %v9416_v49 = vpop.eup %7297  ;;  %7313 = vpow2.f32 %v6336_v41  ;;  %v6342_v41 = vmul.f32 -1.442695, %v9255_v34 }
 0x302   : > { %v9420_v58 = vpop.eup %7299  ;;  %7315 = vrcp.f32 %v4708_v28 }
 0x303   : > { %5213 = vrot.lane.b32.xlu1 %v5148_v52, %s7544_s14  ;;  %5223 = vrot.lane.b32.xlu0 %v5153_v9, %s7544_s14  ;;  %v7302_v23 = vpop.eup %7301  ;;  %7317 = vpow2.f32 %v6339_v27 }
 0x304   : > { %v5066_v32 = vpop.permute.xlu1 %5065  ;;  %v5060_v11 = vpop.permute.xlu0 %5059  ;;  %7319 = vrcp.f32 %v4713_v17  ;;  %v4711_v28 = vadd.f32 1.0, %v7302_v23  ;;  %v6343_v17 = vmul.f32 -1.442695, %v9269_v43  ;;  %v6346_v43 = vmul.f32 -1.442695, %v9284_v20 }
 0x305   : > { %v5154_v45 = vmul.f32 %v9411_v48, %v5066_v32  ;;  %v5151_v22 = vmul.f32 %v9406_v10, %v5060_v11  ;;  %v7304_v32 = vpop.eup %7303  ;;  %7321 = vpow2.f32 %v6337_v39 }
 0x306   : > { %v9428_v6 = vpop.eup %7305  ;;  %v4714_v27 = vadd.f32 1.0, %v7304_v32  ;;  %7323 = vpow2.f32 %v6342_v41 }
 0x307   : > { %5225 = vrot.lane.b32.xlu1 %v5154_v45, %s7544_s14  ;;  %5219 = vrot.lane.b32.xlu0 %v5151_v22, %s7544_s14  ;;  %v7308_v45 = vpop.eup %7307  ;;  %7325 = vrcp.f32 %v4711_v28 }
 0x308   : > { %v5062_v1 = vpop.permute.xlu1 %5061  ;;  %v4712_v34 = vadd.f32 1.0, %v7308_v45  ;;  %7327 = vrcp.f32 %v4714_v27 }
 0x309   : > { %v5072_v52 = vpop.permute.xlu0 %5071  ;;  %v5152_v9 = vmul.f32 %v9416_v49, %v5062_v1  ;;  %7329 = vpow2.f32 %v6340_v12 }
 0x30a   : > { %v5157_v11 = vmul.f32 %v9420_v58, %v5072_v52  ;;  %v7310_v52 = vpop.eup %7309  ;;  %7331 = vrcp.f32 %v4712_v34 }
 0x30b   : > { %5221 = vrot.lane.b32.xlu1 %v5152_v9, %s7544_s14  ;;  %v4717_v32 = vadd.f32 1.0, %v7310_v52  ;;  %7333 = vpow2.f32 %v6343_v17  ;;  %v6344_v17 = vmul.f32 -1.442695, %v9293_v24 }
 0x30c   : > { %5231 = vrot.lane.b32.xlu0 %v5157_v11, %s7544_s14  ;;  %v9433_v9 = vpop.eup %7311 }
 0x30d   : > { %v5068_v22 = vpop.permute.xlu0 %5067  ;;  %v5074_v23 = vpop.permute.xlu1 %5073  ;;  %7335 = vrcp.f32 %v4717_v32  ;;  %v6347_v32 = vmul.f32 -1.442695, %v9298_v33 }
 0x30e   : > { %v5155_v1 = vmul.f32 %v9428_v6, %v5068_v22  ;;  %v5158_v39 = vmul.f32 %v9433_v9, %v5074_v23  ;;  %v7314_v11 = vpop.eup %7313  ;;  %7337 = vpow2.f32 %v6341_v60 }
 0x30f   : > { %v9437_v41 = vpop.eup %7315  ;;  %v4715_v22 = vadd.f32 1.0, %v7314_v11 }
 0x310   : > { %5227 = vrot.lane.b32.xlu0 %v5155_v1, %s7544_s14  ;;  %5233 = vrot.lane.b32.xlu1 %v5158_v39, %s7544_s14  ;;  %v7318_v28 = vpop.eup %7317 }
 0x311   : > { %v5070_v45 = vpop.permute.xlu1 %5069  ;;  %v9443_v12 = vpop.eup %7319  ;;  %v4718_v1 = vadd.f32 1.0, %v7318_v28  ;;  %7339 = vrcp.f32 %v4715_v22 }
 0x312   : > { %v5156_v27 = vmul.f32 %v9437_v41, %v5070_v45  ;;  %v5080_v52 = vpop.permute.xlu0 %5079  ;;  %v7322_v34 = vpop.eup %7321  ;;  %7341 = vpow2.f32 %v6346_v43 }
 0x313   : > { %v5161_v54 = vmul.f32 %v9443_v12, %v5080_v52  ;;  %v7324_v23 = vpop.eup %7323  ;;  %7343 = vrcp.f32 %v4718_v1  ;;  %v4716_v20 = vadd.f32 1.0, %v7322_v34  ;;  %v6345_v1 = vmul.f32 -1.442695, %v9307_v15 }
 0x314   : > { %5229 = vrot.lane.b32.xlu1 %v5156_v27, %s7544_s14  ;;  %v9449_v39 = vpop.eup %7325  ;;  %v4721_v45 = vadd.f32 1.0, %v7324_v23  ;;  %7345 = vpow2.f32 %v6344_v17 }
 0x315   : > { %5239 = vrot.lane.b32.xlu0 %v5161_v54, %s7544_s14  ;;  %v9453_v28 = vpop.eup %7327  ;;  %v5082_v27 = vpop.permute.xlu1 %5081  ;;  %7347 = vrcp.f32 %v4716_v20  ;;  %v6350_v54 = vmul.f32 -1.442695, %v9311_v13 }
 0x316   : > { %v5076_v11 = vpop.permute.xlu0 %5075  ;;  %v7330_v22 = vpop.eup %7329  ;;  %v5162_v43 = vmul.f32 %v9453_v28, %v5082_v27  ;;  %7349 = vpow2.f32 %v6347_v32 }
 0x317   : > { %v5159_v60 = vmul.f32 %v9449_v39, %v5076_v11  ;;  %v9457_v24 = vpop.eup %7331  ;;  %7351 = vrcp.f32 %v4721_v45  ;;  %v4719_v52 = vadd.f32 1.0, %v7330_v22  ;;  %v6348_v45 = vmul.f32 -1.442695, %v9320_v25 }
 0x318   : > { %5241 = vrot.lane.b32.xlu1 %v5162_v43, %s7544_s14  ;;  %v7334_v33 = vpop.eup %7333  ;;  %7353 = vpow2.f32 %v6345_v1  ;;  %v6351_v1 = vmul.f32 -1.442695, %v9325_v47 }
 0x319   : > { %5235 = vrot.lane.b32.xlu0 %v5159_v60, %s7544_s14  ;;  %v5078_v34 = vpop.permute.xlu1 %5077  ;;  %v4722_v20 = vadd.f32 1.0, %v7334_v33  ;;  %7355 = vrcp.f32 %v4719_v52 }
 0x31a   : > { %v5160_v23 = vmul.f32 %v9457_v24, %v5078_v34  ;;  %v9463_v17 = vpop.eup %7335  ;;  %v5088_v11 = vpop.permute.xlu0 %5087  ;;  %7357 = vpow2.f32 %v6350_v54 }
 0x31b   : > { %v7338_v60 = vpop.eup %7337  ;;  %v5165_v32 = vmul.f32 %v9463_v17, %v5088_v11  ;;  %7359 = vrcp.f32 %v4722_v20  ;;  %v6349_v11 = vmul.f32 -1.442695, %v9333_v29 }
 0x31c   : > { %5237 = vrot.lane.b32.xlu1 %v5160_v23, %s7544_s14  ;;  %v4720_v27 = vadd.f32 1.0, %v7338_v60  ;;  %7361 = vpow2.f32 %v6348_v45 }
 0x31d   : > { %5247 = vrot.lane.b32.xlu0 %v5165_v32, %s7544_s14  ;;  %v5090_v33 = vpop.permute.xlu1 %5089 }
 0x31e   : > { %v9467_v15 = vpop.eup %7339  ;;  %v5084_v22 = vpop.permute.xlu0 %5083  ;;  %7363 = vrcp.f32 %v4720_v27 }
 0x31f   : > { %v7342_v13 = vpop.eup %7341  ;;  %v5163_v34 = vmul.f32 %v9467_v15, %v5084_v22  ;;  %7365 = vpow2.f32 %v6351_v1 }
 0x320   : > { %v9471_v43 = vpop.eup %7343  ;;  %v4725_v23 = vadd.f32 1.0, %v7342_v13 }
 0x321   : > { %v5166_v52 = vmul.f32 %v9471_v43, %v5090_v33  ;;  %5243 = vrot.lane.b32.xlu0 %v5163_v34, %s7544_s14  ;;  %v7346_v25 = vpop.eup %7345  ;;  %v5086_v60 = vpop.permute.xlu1 %5085 }
 0x322   : > { %v9478_v54 = vpop.eup %7347  ;;  %7367 = vrcp.f32 %v4725_v23  ;;  %v4723_v13 = vadd.f32 1.0, %v7346_v25  ;;  %v5096_v45 = vpop.permute.xlu0 %5095 }
 0x323   : > { %5249 = vrot.lane.b32.xlu1 %v5166_v52, %s7544_s14  ;;  %v7350_v47 = vpop.eup %7349  ;;  %v5164_v20 = vmul.f32 %v9478_v54, %v5086_v60  ;;  %7369 = vpow2.f32 %v6349_v11 }
 0x324   : > { %v9482_v32 = vpop.eup %7351  ;;  %v4726_v27 = vadd.f32 1.0, %v7350_v47  ;;  %7371 = vrcp.f32 %v4723_v13 }
 0x325   : > { %v5169_v22 = vmul.f32 %v9482_v32, %v5096_v45  ;;  %v7354_v33 = vpop.eup %7353  ;;  %v5098_v60 = vpop.permute.xlu1 %5097 }
 0x326   : > { %v9487_v1 = vpop.eup %7355  ;;  %v5092_v29 = vpop.permute.xlu0 %5091  ;;  %7373 = vrcp.f32 %v4726_v27  ;;  %v4724_v23 = vadd.f32 1.0, %v7354_v33 }
 0x327   : > { %5245 = vrot.lane.b32.xlu1 %v5164_v20, %s7544_s14  ;;  %5255 = vrot.lane.b32.xlu0 %v5169_v22, %s7544_s14  ;;  %v7358_v34 = vpop.eup %7357  ;;  %v5167_v52 = vmul.f32 %v9487_v1, %v5092_v29 }
 0x328   : > { %v9490_v25 = vpop.eup %7359  ;;  %v4729_v20 = vadd.f32 1.0, %v7358_v34  ;;  %7375 = vrcp.f32 %v4724_v23 }
 0x329   : > { %v5170_v11 = vmul.f32 %v9490_v25, %v5098_v60  ;;  %v7362_v47 = vpop.eup %7361  ;;  %v5094_v22 = vpop.permute.xlu1 %5093 }
 0x32a   : > { %7377 = vrcp.f32 %v4729_v20  ;;  %v4727_v29 = vadd.f32 1.0, %v7362_v47  ;;  %v5104_v56 = vpop.permute.xlu0 %5103 }
 0x32b   : > { %5251 = vrot.lane.b32.xlu0 %v5167_v52, %s7544_s14  ;;  %v9494_v45 = vpop.eup %7363  ;;  %5257 = vrot.lane.b32.xlu1 %v5170_v11, %s7544_s14 }
 0x32c   : > { %v7366_v13 = vpop.eup %7365  ;;  %v5168_v27 = vmul.f32 %v9494_v45, %v5094_v22  ;;  %7379 = vrcp.f32 %v4727_v29 }
 0x32d   : > { %v4730_v5 = vadd.f32 1.0, %v7366_v13  ;;  %v5106_v22 = vpop.permute.xlu1 %5105 }
 0x32e   : > { %v5100_v60 = vpop.permute.xlu0 %5099 }
 0x32f   : > { %v9498_v33 = vpop.eup %7367  ;;  %5253 = vrot.lane.b32.xlu1 %v5168_v27, %s7544_s14  ;;  %7381 = vrcp.f32 %v4730_v5 }
 0x330   : > { %v5173_v34 = vmul.f32 %v9498_v33, %v5104_v56  ;;  %v7370_v52 = vpop.eup %7369 }
 0x331   : > { %v9503_v23 = vpop.eup %7371  ;;  %v4728_v20 = vadd.f32 1.0, %v7370_v52  ;;  %v5102_v29 = vpop.permute.xlu1 %5101 }
 0x332   : > { %5263 = vrot.lane.b32.xlu0 %v5173_v34, %s7544_s14  ;;  %v5171_v11 = vmul.f32 %v9503_v23, %v5100_v60  ;;  %v5112_v5 = vpop.permute.xlu0 %5111 }
 0x333   : > { %v9506_v47 = vpop.eup %7373  ;;  %7383 = vrcp.f32 %v4728_v20 }
 0x334   : > { %9994 = vst [vmem:[#allocation19_spill] sm:$0xff] %v9506_v47  ;;  %v5174_v13 = vmul.f32 %v9506_v47, %v5106_v22 }
 0x335   : > { %v9511_v56 = vpop.eup %7375 }
 0x336   : > { %5259 = vrot.lane.b32.xlu0 %v5171_v11, %s7544_s14  ;;  %5265 = vrot.lane.b32.xlu1 %v5174_v13, %s7544_s14  ;;  %v5172_v27 = vmul.f32 %v9511_v56, %v5102_v29  ;;  %v5108_v11 = vpop.permute.xlu0 %5107  ;;  %v5114_v13 = vpop.permute.xlu1 %5113 }
 0x337   : > { %v9514_v34 = vpop.eup %7377 }
 0x338   : > { %9995 = vst [vmem:[#allocation20_spill] sm:$0xff] %v9514_v34  ;;  %v5177_v52 = vmul.f32 %v9514_v34, %v5112_v5  ;;  %v4987_v34 = vmul.f32 %v9390_v31, %v9212_v44 }
 0x339   : > { %v9519_v60 = vpop.eup %7379 }
 0x33a   : > { %5261 = vrot.lane.b32.xlu1 %v5172_v27, %s7544_s14  ;;  %5271 = vrot.lane.b32.xlu0 %v5177_v52, %s7544_s14  ;;  %9996 = vst [vmem:[#allocation21_spill] sm:$0xff] %v9519_v60  ;;  %v5175_v20 = vmul.f32 %v9519_v60, %v5108_v11  ;;  %v5110_v5 = vpop.permute.xlu1 %5109  ;;  %v4989_v52 = vmul.f32 %v9382_v8, %v9219_v51 }
 0x33b   : > { %v4988_v51 = vmul.f32 %v9398_v18, %v9225_v3 }
 0x33c   : > { %v9522_v22 = vpop.eup %7381 }
 0x33d   : > { %9997 = vst [vmem:[#allocation22_spill] sm:$0xff] %v9522_v22  ;;  %v5178_v47 = vmul.f32 %v9522_v22, %v5114_v13 }
 0x33e   : > { %5267 = vrot.lane.b32.xlu0 %v5175_v20, %s7544_s14 }
 0x33f   : > { %5273 = vrot.lane.b32.xlu1 %v5178_v47, %s7544_s14  ;;  %v4990_v47 = vmul.f32 %v9392_v2, %v9233_v26 }
 0x340   : > { %v9527_v29 = vpop.eup %7383 }
 0x341   : > { %v5176_v27 = vmul.f32 %v9527_v29, %v5110_v5 }
 0x343   : > { %5269 = vrot.lane.b32.xlu1 %v5176_v27, %s7544_s14  ;;  %v4993_v27 = vmul.f32 %v9401_v37, %v9252_v40 }
 0x36d   : > { %v5216_v11 = vpop.permute.xlu0 %5215 }
 0x36e   : > { %v5309_v60 = vadd.f32 %v5216_v11, %v4989_v52 }
 0x370   : > { %5567 = vrot.lane.b32.xlu0 %v5309_v60, %s7545_s15  ;;  %7385 = vtanh.f32 %v5309_v60  ;;  %v4994_v60 = vmul.f32 %v9411_v48, %v9263_v61 }
 0x371   : > { %v5212_v20 = vpop.permute.xlu0 %5211  ;;  %v5218_v13 = vpop.permute.xlu1 %5217 }
 0x372   : > { %v5307_v22 = vadd.f32 %v5212_v20, %v4987_v34  ;;  %v5310_v5 = vadd.f32 %v5218_v13, %v4990_v47  ;;  %v4991_v34 = vmul.f32 %v9406_v10, %v9239_v21  ;;  %v4992_v20 = vmul.f32 %v9416_v49, %v9250_v50 }
 0x374   : > { %5563 = vrot.lane.b32.xlu0 %v5307_v22, %s7545_s15  ;;  %5569 = vrot.lane.b32.xlu1 %v5310_v5, %s7545_s15  ;;  %7387 = vtanh.f32 %v5307_v22 }
 0x375   : > { %v5214_v44 = vpop.permute.xlu1 %5213  ;;  %v5224_v52 = vpop.permute.xlu0 %5223  ;;  %7389 = vtanh.f32 %v5310_v5 }
 0x376   : > { %v5308_v26 = vadd.f32 %v5214_v44, %v4988_v51  ;;  %v5313_v11 = vadd.f32 %v5224_v52, %v4993_v27  ;;  %v4997_v44 = vmul.f32 %v9420_v58, %v9280_v14 }
 0x378   : > { %5565 = vrot.lane.b32.xlu1 %v5308_v26, %s7545_s15  ;;  %5575 = vrot.lane.b32.xlu0 %v5313_v11, %s7545_s15  ;;  %7391 = vtanh.f32 %v5308_v26 }
 0x379   : > { %v5226_v3 = vpop.permute.xlu1 %5225  ;;  %v5220_v40 = vpop.permute.xlu0 %5219  ;;  %7393 = vtanh.f32 %v5313_v11  ;;  %v4998_v11 = vmul.f32 %v9433_v9, %v9288_v7 }
 0x37a   : > { %v5314_v47 = vadd.f32 %v5226_v3, %v4994_v60  ;;  %v5311_v22 = vadd.f32 %v5220_v40, %v4991_v34  ;;  %v4995_v60 = vmul.f32 %v9428_v6, %v9266_v53 }
 0x37c   : > { %5577 = vrot.lane.b32.xlu1 %v5314_v47, %s7545_s15  ;;  %5571 = vrot.lane.b32.xlu0 %v5311_v22, %s7545_s15  ;;  %7395 = vtanh.f32 %v5314_v47  ;;  %v4996_v47 = vmul.f32 %v9437_v41, %v9274_v30 }
 0x37d   : > { %v5222_v21 = vpop.permute.xlu1 %5221  ;;  %v7386_v5 = vpop.eup %7385  ;;  %7397 = vtanh.f32 %v5311_v22 }
 0x37e   : > { %v5312_v13 = vadd.f32 %v5222_v21, %v4992_v20  ;;  %v5232_v61 = vpop.permute.xlu0 %5231 }
 0x37f   : > { %v5317_v50 = vadd.f32 %v5232_v61, %v4997_v44  ;;  %v5002_v44 = vmul.f32 %v9453_v28, %v9316_v38 }
 0x380   : > { %5573 = vrot.lane.b32.xlu1 %v5312_v13, %s7545_s15  ;;  %5407 = vrot.lane.b32.xlu0 %v7386_v5, %s7544_s14  ;;  %7399 = vtanh.f32 %v5312_v13  ;;  %v5001_v13 = vmul.f32 %v9443_v12, %v9309_v16 }
 0x381   : > { %v7388_v51 = vpop.eup %7387  ;;  %7401 = vtanh.f32 %v5317_v50 }
 0x382   : > { %v7390_v27 = vpop.eup %7389  ;;  %v5234_v26 = vpop.permute.xlu1 %5233 }
 0x383   : > { %v5228_v34 = vpop.permute.xlu0 %5227  ;;  %v5318_v14 = vadd.f32 %v5234_v26, %v4998_v11  ;;  %v5000_v26 = vmul.f32 %v9457_v24, %v9302_v46 }
 0x384   : > { %5409 = vrot.lane.b32.xlu1 %v7390_v27, %s7544_s14  ;;  %5403 = vrot.lane.b32.xlu0 %v7388_v51, %s7544_s14  ;;  %v5315_v3 = vadd.f32 %v5228_v34, %v4995_v60  ;;  %v4999_v27 = vmul.f32 %v9449_v39, %v9295_v55 }
 0x385   : > { %v7392_v52 = vpop.eup %7391 }
 0x386   : > { %v5230_v40 = vpop.permute.xlu1 %5229  ;;  %v7394_v53 = vpop.eup %7393  ;;  %7403 = vtanh.f32 %v5315_v3 }
 0x387   : > { %v5316_v22 = vadd.f32 %v5230_v40, %v4996_v47  ;;  %v5240_v7 = vpop.permute.xlu0 %5239  ;;  %7405 = vtanh.f32 %v5318_v14 }
 0x388   : > { %5405 = vrot.lane.b32.xlu1 %v7392_v52, %s7544_s14  ;;  %5583 = vrot.lane.b32.xlu0 %v5317_v50, %s7545_s15  ;;  %v5321_v5 = vadd.f32 %v5240_v7, %v5001_v13 }
 0x389   : > { %v7396_v20 = vpop.eup %7395  ;;  %7407 = vtanh.f32 %v5316_v22 }
 0x38a   : > { %v7398_v21 = vpop.eup %7397  ;;  %v5242_v30 = vpop.permute.xlu1 %5241  ;;  %7409 = vtanh.f32 %v5321_v5 }
 0x38b   : > { %v5236_v51 = vpop.permute.xlu0 %5235  ;;  %v5322_v16 = vadd.f32 %v5242_v30, %v5002_v44 }
 0x38c   : > { %5585 = vrot.lane.b32.xlu1 %v5318_v14, %s7545_s15  ;;  %5579 = vrot.lane.b32.xlu0 %v5315_v3, %s7545_s15  ;;  %v5319_v50 = vadd.f32 %v5236_v51, %v4999_v27  ;;  %v5005_v14 = vmul.f32 %v9463_v17, %v9335_v35 }
 0x38d   : > { %v7400_v61 = vpop.eup %7399 }
 0x38e   : > { %v5238_v52 = vpop.permute.xlu1 %5237  ;;  %v7402_v55 = vpop.eup %7401  ;;  %7411 = vtanh.f32 %v5319_v50 }
 0x38f   : > { %v5320_v34 = vadd.f32 %v5238_v52, %v5000_v26  ;;  %v5248_v38 = vpop.permute.xlu0 %5247  ;;  %7413 = vtanh.f32 %v5322_v16 }
 0x390   : > { %5581 = vrot.lane.b32.xlu1 %v5316_v22, %s7545_s15  ;;  %5415 = vrot.lane.b32.xlu0 %v7394_v53, %s7544_s14  ;;  %v5325_v3 = vadd.f32 %v5248_v38, %v5005_v14  ;;  %v5003_v22 = vmul.f32 %v9467_v15, %v9322_v42  ;;  %v5006_v53 = vmul.f32 %v9471_v43, %v9341_v62 }
 0x391   : > { %7415 = vtanh.f32 %v5320_v34 }
 0x392   : > { %7417 = vtanh.f32 %v5325_v3 }
 0x393   : > { %v7404_v60 = vpop.eup %7403  ;;  %v5244_v47 = vpop.permute.xlu0 %5243 }
 0x394   : > { %5417 = vrot.lane.b32.xlu1 %v7396_v20, %s7544_s14  ;;  %5411 = vrot.lane.b32.xlu0 %v7398_v21, %s7544_s14  ;;  %v7406_v11 = vpop.eup %7405  ;;  %v5323_v7 = vadd.f32 %v5244_v47, %v5003_v22  ;;  %v5004_v21 = vmul.f32 %v9478_v54, %v9330_v57  ;;  %v9998_v47 = vld [vmem:[#allocation18_spill] sm:$0xff]  ;;  %v9999_v22 = vld [vmem:[#allocation19_spill] sm:$0xff] }
 0x395   : > { %v5250_v46 = vpop.permute.xlu1 %5249 }
 0x396   : > { %v7408_v40 = vpop.eup %7407  ;;  %v5326_v35 = vadd.f32 %v5250_v46, %v5006_v53  ;;  %7419 = vtanh.f32 %v5323_v7  ;;  %v5014_v53 = vmul.f32 %v9999_v22, %v9998_v47 }
 0x397   : > { %v7410_v42 = vpop.eup %7409 }
 0x398   : > { %5413 = vrot.lane.b32.xlu1 %v7400_v61, %s7544_s14  ;;  %5591 = vrot.lane.b32.xlu0 %v5321_v5, %s7545_s15  ;;  %v5009_v61 = vmul.f32 %v9482_v32, %v9353_v19  ;;  %7421 = vtanh.f32 %v5326_v35 }
 0x399   : > { %v5246_v20 = vpop.permute.xlu1 %5245  ;;  %v5256_v62 = vpop.permute.xlu0 %5255 }
 0x39a   : > { %v5324_v13 = vadd.f32 %v5246_v20, %v5004_v21  ;;  %v5329_v51 = vadd.f32 %v5256_v62, %v5009_v61  ;;  %v10000_v20 = vld [vmem:[#allocation16_spill] sm:$0xff] }
 0x39b   : > { %v7412_v30 = vpop.eup %7411  ;;  %v5012_v21 = vmul.f32 %v9511_v56, %v10000_v20  ;;  %v10002_v61 = vld [vmem:[#allocation20_spill] sm:$0xff] }
 0x39c   : > { %5593 = vrot.lane.b32.xlu1 %v5322_v16, %s7545_s15  ;;  %5587 = vrot.lane.b32.xlu0 %v5319_v50, %s7545_s15  ;;  %v7414_v5 = vpop.eup %7413  ;;  %v5007_v16 = vmul.f32 %v9487_v1, %v9343_v63  ;;  %v5010_v50 = vmul.f32 %v9490_v25, %v9359_v36  ;;  %7423 = vtanh.f32 %v5324_v13 }
 0x39d   : > { %v5258_v57 = vpop.permute.xlu1 %5257  ;;  %v5252_v44 = vpop.permute.xlu0 %5251  ;;  %7425 = vtanh.f32 %v5329_v51 }
 0x39e   : > { %v7416_v27 = vpop.eup %7415  ;;  %v5330_v19 = vadd.f32 %v5258_v57, %v5010_v50  ;;  %v5327_v52 = vadd.f32 %v5252_v44, %v5007_v16  ;;  %v10003_v50 = vld [vmem:[#allocation15_spill] sm:$0xff] }
 0x39f   : > { %v7418_v63 = vpop.eup %7417 }
 0x3a0   : > { %5589 = vrot.lane.b32.xlu1 %v5320_v34, %s7545_s15  ;;  %5423 = vrot.lane.b32.xlu0 %v7402_v55, %s7544_s14  ;;  %v5008_v34 = vmul.f32 %v9494_v45, %v9350_v4  ;;  %7427 = vtanh.f32 %v5327_v52 }
 0x3a1   : > { %v5254_v26 = vpop.permute.xlu1 %5253  ;;  %7429 = vtanh.f32 %v5330_v19 }
 0x3a2   : > { %v5328_v55 = vadd.f32 %v5254_v26, %v5008_v34  ;;  %v10005_v26 = vld [vmem:[#allocation14_spill] sm:$0xff] }
 0x3a3   : > { %v7420_v38 = vpop.eup %7419  ;;  %v10006_v34 = vld [vmem:[#allocation22_spill] sm:$0xff] }
 0x3a4   : > { %5425 = vrot.lane.b32.xlu1 %v7406_v11, %s7544_s14  ;;  %5419 = vrot.lane.b32.xlu0 %v7404_v60, %s7544_s14  ;;  %v5264_v36 = vpop.permute.xlu0 %5263  ;;  %v5013_v11 = vmul.f32 %v9498_v33, %v9368_v0  ;;  %7431 = vtanh.f32 %v5328_v55 }
 0x3a5   : > { %v7422_v60 = vpop.eup %7421 }
 0x3a6   : > { %v5333_v14 = vadd.f32 %v5264_v36, %v5013_v11 }
 0x3a8   : > { %5421 = vrot.lane.b32.xlu1 %v7408_v40, %s7544_s14  ;;  %5599 = vrot.lane.b32.xlu0 %v5325_v3, %s7545_s15  ;;  %v5266_v4 = vpop.permute.xlu1 %5265  ;;  %v5260_v3 = vpop.permute.xlu0 %5259  ;;  %v5011_v40 = vmul.f32 %v9503_v23, %v9361_v59  ;;  %7433 = vtanh.f32 %v5333_v14 }
 0x3a9   : > { %v7424_v46 = vpop.eup %7423  ;;  %v5334_v0 = vadd.f32 %v5266_v4, %v5014_v53 }
 0x3aa   : > { %v7426_v59 = vpop.eup %7425 }
 0x3ac   : > { %5601 = vrot.lane.b32.xlu1 %v5326_v35, %s7545_s15  ;;  %5595 = vrot.lane.b32.xlu0 %v5323_v7, %s7545_s15  ;;  %v5331_v35 = vadd.f32 %v5260_v3, %v5011_v40  ;;  %v5262_v7 = vpop.permute.xlu1 %5261 }
 0x3ad   : > { %v7428_v62 = vpop.eup %7427 }
 0x3ae   : > { %7435 = vtanh.f32 %v5331_v35 }
 0x3af   : > { %7437 = vtanh.f32 %v5334_v0 }
 0x3b0   : > { %5597 = vrot.lane.b32.xlu1 %v5324_v13, %s7545_s15  ;;  %5431 = vrot.lane.b32.xlu0 %v7410_v42, %s7544_s14  ;;  %v5332_v13 = vadd.f32 %v5262_v7, %v5012_v21  ;;  %v5272_v42 = vpop.permute.xlu0 %5271 }
 0x3b2   : > { %7439 = vtanh.f32 %v5332_v13 }
 0x3b4   : > { %5433 = vrot.lane.b32.xlu1 %v7414_v5, %s7544_s14  ;;  %5427 = vrot.lane.b32.xlu0 %v7412_v30, %s7544_s14  ;;  %v7430_v30 = vpop.eup %7429  ;;  %v10001_v5 = vld [vmem:[#allocation13_spill] sm:$0xff]  ;;  %v5268_v44 = vpop.permute.xlu0 %5267 }
 0x3b5   : > { %v5017_v57 = vmul.f32 %v10002_v61, %v10001_v5  ;;  %v7432_v16 = vpop.eup %7431 }
 0x3b8   : > { %5429 = vrot.lane.b32.xlu1 %v7416_v27, %s7544_s14  ;;  %5607 = vrot.lane.b32.xlu0 %v5329_v51, %s7545_s15  ;;  %v5274_v51 = vpop.permute.xlu1 %5273  ;;  %v5337_v27 = vadd.f32 %v5272_v42, %v5017_v57 }
 0x3ba   : > { %7441 = vtanh.f32 %v5337_v27 }
 0x3bc   : > { %5609 = vrot.lane.b32.xlu1 %v5330_v19, %s7545_s15  ;;  %5603 = vrot.lane.b32.xlu0 %v5327_v52, %s7545_s15  ;;  %v10004_v19 = vld [vmem:[#allocation21_spill] sm:$0xff] }
 0x3bd   : > { %v5015_v52 = vmul.f32 %v10004_v19, %v10003_v50 }
 0x3c0   : > { %5605 = vrot.lane.b32.xlu1 %v5328_v55, %s7545_s15  ;;  %5439 = vrot.lane.b32.xlu0 %v7418_v63, %s7544_s14  ;;  %v5018_v55 = vmul.f32 %v10006_v34, %v10005_v26  ;;  %v5335_v63 = vadd.f32 %v5268_v44, %v5015_v52 }
 0x3c2   : > { %v5338_v36 = vadd.f32 %v5274_v51, %v5018_v55  ;;  %7443 = vtanh.f32 %v5335_v63 }
 0x3c4   : > { %5441 = vrot.lane.b32.xlu1 %v7422_v60, %s7544_s14  ;;  %5435 = vrot.lane.b32.xlu0 %v7420_v38, %s7544_s14  ;;  %v5270_v38 = vpop.permute.xlu1 %5269  ;;  %v10007_v60 = vld [vmem:[#allocation17_spill] sm:$0xff]  ;;  %7445 = vtanh.f32 %v5338_v36 }
 0x3c5   : > { %v5016_v11 = vmul.f32 %v9527_v29, %v10007_v60 }
 0x3c7   : > { %v5336_v4 = vadd.f32 %v5270_v38, %v5016_v11 }
 0x3c8   : > { %5437 = vrot.lane.b32.xlu1 %v7424_v46, %s7544_s14  ;;  %5615 = vrot.lane.b32.xlu0 %v5333_v14, %s7545_s15  ;;  %v7434_v14 = vpop.eup %7433 }
 0x3c9   : > { %v7436_v3 = vpop.eup %7435  ;;  %7447 = vtanh.f32 %v5336_v4 }
 0x3ca   : > { %v7438_v40 = vpop.eup %7437 }
 0x3cb   : > { %v7440_v53 = vpop.eup %7439 }
 0x3cc   : > { %5617 = vrot.lane.b32.xlu1 %v5334_v0, %s7545_s15  ;;  %5611 = vrot.lane.b32.xlu0 %v5331_v35, %s7545_s15  ;;  %v7442_v35 = vpop.eup %7441 }
 0x3cf   : > { %v7444_v7 = vpop.eup %7443 }
 0x3d0   : > { %5613 = vrot.lane.b32.xlu1 %v5332_v13, %s7545_s15  ;;  %5447 = vrot.lane.b32.xlu0 %v7426_v59, %s7544_s14 }
 0x3d1   : > { %v7446_v13 = vpop.eup %7445 }
 0x3d4   : > { %5449 = vrot.lane.b32.xlu1 %v7430_v30, %s7544_s14  ;;  %5443 = vrot.lane.b32.xlu0 %v7428_v62, %s7544_s14 }
 0x3d6   : > { %v7448_v62 = vpop.eup %7447 }
 0x3d8   : > { %5445 = vrot.lane.b32.xlu1 %v7432_v16, %s7544_s14  ;;  %5623 = vrot.lane.b32.xlu0 %v5337_v27, %s7545_s15 }
 0x3dc   : > { %5625 = vrot.lane.b32.xlu1 %v5338_v36, %s7545_s15  ;;  %5619 = vrot.lane.b32.xlu0 %v5335_v63, %s7545_s15 }
 0x3e0   : > { %5621 = vrot.lane.b32.xlu1 %v5336_v4, %s7545_s15  ;;  %5455 = vrot.lane.b32.xlu0 %v7434_v14, %s7544_s14 }
 0x3e2   : > { %v5568_v46 = vpop.permute.xlu0 %5567 }
 0x3e3   : > { %5661 = vst.msk [vmem:[%s7666_s20 + $0x10] sm:$0xff] %vm837_vm1, %v5568_v46 }
 0x3e4   : > { %5457 = vrot.lane.b32.xlu1 %v7438_v40, %s7544_s14  ;;  %5451 = vrot.lane.b32.xlu0 %v7436_v3, %s7544_s14 }
 0x3e6   : > { %v5564_v47 = vpop.permute.xlu0 %5563  ;;  %v5570_v0 = vpop.permute.xlu1 %5569 }
 0x3e7   : > { %5659 = vst.msk [vmem:[%s7666_s20] sm:$0xff] %vm837_vm1, %v5564_v47  ;;  %5662 = vst.msk [vmem:[%s7666_s20 + $0x18] sm:$0xff] %vm837_vm1, %v5570_v0 }
 0x3e8   : > { %5453 = vrot.lane.b32.xlu1 %v7440_v53, %s7544_s14  ;;  %5463 = vrot.lane.b32.xlu0 %v7442_v35, %s7544_s14 }
 0x3ea   : > { %v5566_v20 = vpop.permute.xlu1 %5565  ;;  %v5576_v21 = vpop.permute.xlu0 %5575 }
 0x3eb   : > { %5660 = vst.msk [vmem:[%s7666_s20 + $0x8] sm:$0xff] %vm837_vm1, %v5566_v20  ;;  %5665 = vst.msk [vmem:[%s7666_s20 + $0x30] sm:$0xff] %vm837_vm1, %v5576_v21 }
 0x3ec   : > { %5465 = vrot.lane.b32.xlu1 %v7446_v13, %s7544_s14  ;;  %5459 = vrot.lane.b32.xlu0 %v7444_v7, %s7544_s14 }
 0x3ee   : > { %v5578_v59 = vpop.permute.xlu1 %5577  ;;  %v5572_v42 = vpop.permute.xlu0 %5571 }
 0x3ef   : > { %5666 = vst.msk [vmem:[%s7666_s20 + $0x38] sm:$0xff] %vm837_vm1, %v5578_v59  ;;  %5663 = vst.msk [vmem:[%s7666_s20 + $0x20] sm:$0xff] %vm837_vm1, %v5572_v42 }
 0x3f0   : > { %5461 = vrot.lane.b32.xlu1 %v7448_v62, %s7544_s14 }
 0x3f2   : > { %v5574_v30 = vpop.permute.xlu1 %5573  ;;  %v5408_v5 = vpop.permute.xlu0 %5407 }
 0x3f3   : > { %5664 = vst.msk [vmem:[%s7666_s20 + $0x28] sm:$0xff] %vm837_vm1, %v5574_v30  ;;  %v5501_v57 = vmul.f32 %v9382_v8, %v5408_v5 }
 0x3f5   : > { %5727 = vrot.lane.b32.xlu0 %v5501_v57, %s7546_s16 }
 0x3f6   : > { %v5410_v51 = vpop.permute.xlu1 %5409  ;;  %v5404_v27 = vpop.permute.xlu0 %5403 }
 0x3f7   : > { %v5502_v44 = vmul.f32 %v9392_v2, %v5410_v51  ;;  %v5499_v16 = vmul.f32 %v9390_v31, %v5404_v27 }
 0x3f9   : > { %5729 = vrot.lane.b32.xlu1 %v5502_v44, %s7546_s16  ;;  %5723 = vrot.lane.b32.xlu0 %v5499_v16, %s7546_s16 }
 0x3fa   : > { %v5406_v50 = vpop.permute.xlu1 %5405  ;;  %v5584_v52 = vpop.permute.xlu0 %5583 }
 0x3fb   : > { %v5500_v8 = vmul.f32 %v9398_v18, %v5406_v50  ;;  %5669 = vst.msk [vmem:[%s7666_s20 + $0x50] sm:$0xff] %vm837_vm1, %v5584_v52 }
 0x3fd   : > { %5725 = vrot.lane.b32.xlu1 %v5500_v8, %s7546_s16 }
 0x3fe   : > { %v5586_v26 = vpop.permute.xlu1 %5585  ;;  %v5580_v55 = vpop.permute.xlu0 %5579 }
 0x3ff   : > { %5670 = vst.msk [vmem:[%s7666_s20 + $0x58] sm:$0xff] %vm837_vm1, %v5586_v26  ;;  %5667 = vst.msk [vmem:[%s7666_s20 + $0x40] sm:$0xff] %vm837_vm1, %v5580_v55 }
 0x402   : > { %v5582_v31 = vpop.permute.xlu1 %5581  ;;  %v5416_v2 = vpop.permute.xlu0 %5415 }
 0x403   : > { %5668 = vst.msk [vmem:[%s7666_s20 + $0x48] sm:$0xff] %vm837_vm1, %v5582_v31  ;;  %v5505_v63 = vmul.f32 %v9401_v37, %v5416_v2 }
 0x405   : > { %5735 = vrot.lane.b32.xlu0 %v5505_v63, %s7546_s16 }
 0x406   : > { %v5418_v18 = vpop.permute.xlu1 %5417  ;;  %v5412_v36 = vpop.permute.xlu0 %5411 }
 0x407   : > { %v5506_v38 = vmul.f32 %v9411_v48, %v5418_v18  ;;  %v5503_v60 = vmul.f32 %v9406_v10, %v5412_v36 }
 0x409   : > { %5737 = vrot.lane.b32.xlu1 %v5506_v38, %s7546_s16  ;;  %5731 = vrot.lane.b32.xlu0 %v5503_v60, %s7546_s16 }
 0x40a   : > { %v5414_v11 = vpop.permute.xlu1 %5413  ;;  %v5592_v4 = vpop.permute.xlu0 %5591 }
 0x40b   : > { %v5504_v14 = vmul.f32 %v9416_v49, %v5414_v11  ;;  %5673 = vst.msk [vmem:[%s7666_s20 + $0x70] sm:$0xff] %vm837_vm1, %v5592_v4 }
 0x40d   : > { %5733 = vrot.lane.b32.xlu1 %v5504_v14, %s7546_s16 }
 0x40e   : > { %v5594_v37 = vpop.permute.xlu1 %5593  ;;  %v5588_v46 = vpop.permute.xlu0 %5587 }
 0x40f   : > { %5674 = vst.msk [vmem:[%s7666_s20 + $0x78] sm:$0xff] %vm837_vm1, %v5594_v37  ;;  %5671 = vst.msk [vmem:[%s7666_s20 + $0x60] sm:$0xff] %vm837_vm1, %v5588_v46 }
 0x412   : > { %v5590_v10 = vpop.permute.xlu1 %5589  ;;  %v5424_v48 = vpop.permute.xlu0 %5423 }
 0x413   : > { %5672 = vst.msk [vmem:[%s7666_s20 + $0x68] sm:$0xff] %vm837_vm1, %v5590_v10  ;;  %v5509_v3 = vmul.f32 %v9420_v58, %v5424_v48 }
 0x415   : > { %5743 = vrot.lane.b32.xlu0 %v5509_v3, %s7546_s16 }
 0x416   : > { %v5426_v49 = vpop.permute.xlu1 %5425  ;;  %v5420_v40 = vpop.permute.xlu0 %5419 }
 0x417   : > { %v5510_v47 = vmul.f32 %v9433_v9, %v5426_v49  ;;  %v5507_v53 = vmul.f32 %v9428_v6, %v5420_v40 }
 0x419   : > { %5745 = vrot.lane.b32.xlu1 %v5510_v47, %s7546_s16  ;;  %5739 = vrot.lane.b32.xlu0 %v5507_v53, %s7546_s16 }
 0x41a   : > { %v5422_v0 = vpop.permute.xlu1 %5421  ;;  %v5600_v35 = vpop.permute.xlu0 %5599 }
 0x41b   : > { %v5508_v7 = vmul.f32 %v9437_v41, %v5422_v0  ;;  %5677 = vst.msk [vmem:[%s7666_s20 + $0x90] sm:$0xff] %vm837_vm1, %v5600_v35 }
 0x41d   : > { %5741 = vrot.lane.b32.xlu1 %v5508_v7, %s7546_s16 }
 0x41e   : > { %v5602_v58 = vpop.permute.xlu1 %5601  ;;  %v5596_v20 = vpop.permute.xlu0 %5595 }
 0x41f   : > { %5678 = vst.msk [vmem:[%s7666_s20 + $0x98] sm:$0xff] %vm837_vm1, %v5602_v58  ;;  %5675 = vst.msk [vmem:[%s7666_s20 + $0x80] sm:$0xff] %vm837_vm1, %v5596_v20 }
 0x422   : > { %v5598_v6 = vpop.permute.xlu1 %5597  ;;  %v5432_v9 = vpop.permute.xlu0 %5431 }
 0x423   : > { %5676 = vst.msk [vmem:[%s7666_s20 + $0x88] sm:$0xff] %vm837_vm1, %v5598_v6  ;;  %v5513_v21 = vmul.f32 %v9443_v12, %v5432_v9 }
 0x425   : > { %5751 = vrot.lane.b32.xlu0 %v5513_v21, %s7546_s16 }
 0x426   : > { %v5434_v41 = vpop.permute.xlu1 %5433  ;;  %v5428_v13 = vpop.permute.xlu0 %5427 }
 0x427   : > { %v5514_v59 = vmul.f32 %v9453_v28, %v5434_v41  ;;  %v5511_v42 = vmul.f32 %v9449_v39, %v5428_v13 }
 0x429   : > { %5753 = vrot.lane.b32.xlu1 %v5514_v59, %s7546_s16  ;;  %5747 = vrot.lane.b32.xlu0 %v5511_v42, %s7546_s16 }
 0x42a   : > { %v5430_v62 = vpop.permute.xlu1 %5429  ;;  %v5608_v30 = vpop.permute.xlu0 %5607 }
 0x42b   : > { %v5512_v5 = vmul.f32 %v9457_v24, %v5430_v62  ;;  %5681 = vst.msk [vmem:[%s7666_s20 + $0xb0] sm:$0xff] %vm837_vm1, %v5608_v30 }
 0x42d   : > { %5749 = vrot.lane.b32.xlu1 %v5512_v5, %s7546_s16 }
 0x42e   : > { %v5610_v12 = vpop.permute.xlu1 %5609  ;;  %v5604_v57 = vpop.permute.xlu0 %5603 }
 0x42f   : > { %5682 = vst.msk [vmem:[%s7666_s20 + $0xb8] sm:$0xff] %vm837_vm1, %v5610_v12  ;;  %5679 = vst.msk [vmem:[%s7666_s20 + $0xa0] sm:$0xff] %vm837_vm1, %v5604_v57 }
 0x432   : > { %v5606_v39 = vpop.permute.xlu1 %5605  ;;  %v5440_v28 = vpop.permute.xlu0 %5439 }
 0x433   : > { %5680 = vst.msk [vmem:[%s7666_s20 + $0xa8] sm:$0xff] %vm837_vm1, %v5606_v39  ;;  %v5517_v51 = vmul.f32 %v9463_v17, %v5440_v28 }
 0x435   : > { %5759 = vrot.lane.b32.xlu0 %v5517_v51, %s7546_s16 }
 0x436   : > { %v5442_v24 = vpop.permute.xlu1 %5441  ;;  %v5436_v27 = vpop.permute.xlu0 %5435 }
 0x437   : > { %v5518_v44 = vmul.f32 %v9471_v43, %v5442_v24  ;;  %v5515_v16 = vmul.f32 %v9467_v15, %v5436_v27 }
 0x439   : > { %5761 = vrot.lane.b32.xlu1 %v5518_v44, %s7546_s16  ;;  %5755 = vrot.lane.b32.xlu0 %v5515_v16, %s7546_s16 }
 0x43a   : > { %v5438_v50 = vpop.permute.xlu1 %5437  ;;  %v5616_v52 = vpop.permute.xlu0 %5615 }
 0x43b   : > { %v5516_v8 = vmul.f32 %v9478_v54, %v5438_v50  ;;  %5685 = vst.msk [vmem:[%s7666_s20 + $0xd0] sm:$0xff] %vm837_vm1, %v5616_v52 }
 0x43d   : > { %5757 = vrot.lane.b32.xlu1 %v5516_v8, %s7546_s16 }
 0x43e   : > { %v5618_v17 = vpop.permute.xlu1 %5617  ;;  %v5612_v26 = vpop.permute.xlu0 %5611 }
 0x43f   : > { %5686 = vst.msk [vmem:[%s7666_s20 + $0xd8] sm:$0xff] %vm837_vm1, %v5618_v17  ;;  %5683 = vst.msk [vmem:[%s7666_s20 + $0xc0] sm:$0xff] %vm837_vm1, %v5612_v26 }
 0x442   : > { %v5614_v15 = vpop.permute.xlu1 %5613  ;;  %v5448_v43 = vpop.permute.xlu0 %5447 }
 0x443   : > { %5684 = vst.msk [vmem:[%s7666_s20 + $0xc8] sm:$0xff] %vm837_vm1, %v5614_v15  ;;  %v5521_v55 = vmul.f32 %v9482_v32, %v5448_v43 }
 0x445   : > { %5767 = vrot.lane.b32.xlu0 %v5521_v55, %s7546_s16 }
 0x446   : > { %v5450_v54 = vpop.permute.xlu1 %5449  ;;  %v5444_v31 = vpop.permute.xlu0 %5443 }
 0x447   : > { %v5522_v2 = vmul.f32 %v9490_v25, %v5450_v54  ;;  %v5519_v63 = vmul.f32 %v9487_v1, %v5444_v31 }
 0x449   : > { %5769 = vrot.lane.b32.xlu1 %v5522_v2, %s7546_s16  ;;  %5763 = vrot.lane.b32.xlu0 %v5519_v63, %s7546_s16 }
 0x44a   : > { %v5446_v18 = vpop.permute.xlu1 %5445  ;;  %v5624_v36 = vpop.permute.xlu0 %5623 }
 0x44b   : > { %v5520_v38 = vmul.f32 %v9494_v45, %v5446_v18  ;;  %5689 = vst.msk [vmem:[%s7666_s20 + $0xf0] sm:$0xff] %vm837_vm1, %v5624_v36 }
 0x44d   : > { %5765 = vrot.lane.b32.xlu1 %v5520_v38, %s7546_s16 }
 0x44e   : > { %v5626_v32 = vpop.permute.xlu1 %5625  ;;  %v5620_v60 = vpop.permute.xlu0 %5619 }
 0x44f   : > { %5690 = vst.msk [vmem:[%s7666_s20 + $0xf8] sm:$0xff] %vm837_vm1, %v5626_v32  ;;  %5687 = vst.msk [vmem:[%s7666_s20 + $0xe0] sm:$0xff] %vm837_vm1, %v5620_v60 }
 0x452   : > { %v5622_v1 = vpop.permute.xlu1 %5621  ;;  %v5456_v25 = vpop.permute.xlu0 %5455 }
 0x453   : > { %5688 = vst.msk [vmem:[%s7666_s20 + $0xe8] sm:$0xff] %vm837_vm1, %v5622_v1  ;;  %v5525_v11 = vmul.f32 %v9498_v33, %v5456_v25  ;;  %s7455_s20 = scalar_lea.vmem %s7454_s29, 8192 }
 0x454   : > { %p7457_p6 = scmp.lt.s32.totalorder %s7455_s20, %s7449_s22 }
 0x455   : > { %5775 = vrot.lane.b32.xlu0 %v5525_v11, %s7546_s16 }
 0x456   : > { %v5458_v45 = vpop.permute.xlu1 %5457  ;;  %v5452_v4 = vpop.permute.xlu0 %5451  ;;  %p7458_p7 = por %p7457_p6, %p7456_p5 }
 0x457   : > { %v5526_v14 = vmul.f32 %v9999_v22, %v5458_v45  ;;  %v5523_v37 = vmul.f32 %v9503_v23, %v5452_v4 }
 0x458   : > { %p7459_p8 = pnand %p7458_p7, %p7452_p4 }
 0x459   : > { %5777 = vrot.lane.b32.xlu1 %v5526_v14, %s7546_s16  ;;  %5771 = vrot.lane.b32.xlu0 %v5523_v37, %s7546_s16 }
 0x45a   : > { %v5454_v46 = vpop.permute.xlu1 %5453  ;;  %v5464_v10 = vpop.permute.xlu0 %5463 }
 0x45b   : > { %v5524_v48 = vmul.f32 %v9511_v56, %v5454_v46 }
 0x45d   : > { %5773 = vrot.lane.b32.xlu1 %v5524_v48, %s7546_s16 }
 0x45e   : > { %v5466_v33 = vpop.permute.xlu1 %5465  ;;  %v5460_v23 = vpop.permute.xlu0 %5459 }
 0x45f   : > { %v5527_v22 = vmul.f32 %v10004_v19, %v5460_v23 }
 0x460   : > { %7462 = shalt.err (!%p7459_p8)
}
 0x461   : > { %s7463_s10 = scalar_lea.hbm %s9783_s7, 4096  ;;  %s7467_s12 = scalar_lea.hbm %s9950_s5, 8192 }
 0x462   : > { %p7464_p10 = scmp.ne.s32.totalorder %s9783_s7, %s7463_s10  ;;  %p7468_p13 = scmp.lt.s32.totalorder %s9783_s7, %s9950_s5 }
 0x463   : > { %p7469_p0 = scmp.lt.s32.totalorder %s7467_s12, %s7463_s10 }
 0x464   : > { %p7465_p11 = pnand %p7464_p10, %p7629_p3 }
 0x465   : > { %p7470_p1 = por %p7469_p0, %p7468_p13 }
 0x466   : > { %p7466_p12 = pneg %p7465_p11 }
 0x468   : > { %p7471_p2 = pnand %p7470_p1, %p7466_p12 }
 0x46a   : > { %7474 = shalt.err (!%p7471_p2)
}
 0x46b   : > { %s7548_s15 = smov 128   ;;  %s7549_s17 = smov 8   ;;  %5779 = vrot.lane.b32.xlu0 %v5527_v22, %s7546_s16  ;;  %v5462_v56 = vpop.permute.xlu1 %5461  ;;  %v5529_v19 = vmul.f32 %v10002_v61, %v5464_v10  ;;  %v5530_v49 = vmul.f32 %v10006_v34, %v5466_v33  ;;  %v5728_v40 = vpop.permute.xlu0 %5727 }
 0x46c   : > { %7016 = dma.vmem_to_hbm [thread:$0]  (%p7629_p3), %s9786_s8, 4096, %s9783_s7, %s9791_s23, %s7548_s15, %s7548_s15, %s7549_s17   ;;  %v5528_v3 = vmul.f32 %v9527_v29, %v5462_v56  ;;  %5853 = vst.msk [vmem:[#allocation2 + $0x48] sm:$0xff] %vm837_vm1, %v5728_v40 }
 0x46d   : > { %5821 = vst.msk [vmem:[%s7659_s24 + $0x10] sm:$0xff] %vm837_vm1, %v5728_v40 }
 0x46e   : > { %5781 = vrot.lane.b32.xlu1 %v5528_v3, %s7546_s16 }
 0x46f   : > { %5783 = vrot.lane.b32.xlu0 %v5529_v19, %s7546_s16  ;;  %v5730_v47 = vpop.permute.xlu1 %5729  ;;  %v5724_v61 = vpop.permute.xlu0 %5723 }
 0x470   : > { %5822 = vst.msk [vmem:[%s7659_s24 + $0x18] sm:$0xff] %vm837_vm1, %v5730_v47  ;;  %5854 = vst.msk [vmem:[#allocation2 + $0x50] sm:$0xff] %vm837_vm1, %v5730_v47 }
 0x471   : > { %5819 = vst.msk [vmem:[%s7659_s24] sm:$0xff] %vm837_vm1, %v5724_v61  ;;  %5851 = vst.msk [vmem:[#allocation2 + $0x28] sm:$0xff] %vm837_vm1, %v5724_v61 }
 0x472   : > { %5785 = vrot.lane.b32.xlu1 %v5530_v49, %s7546_s16 }
 0x473   : > { %v5726_v29 = vpop.permute.xlu1 %5725 }
 0x474   : > { %5820 = vst.msk [vmem:[%s7659_s24 + $0x8] sm:$0xff] %vm837_vm1, %v5726_v29  ;;  %5852 = vst.msk [vmem:[#allocation2 + $0x30] sm:$0xff] %vm837_vm1, %v5726_v29 }
 0x477   : > { %v5736_v34 = vpop.permute.xlu0 %5735 }
 0x478   : > { %5825 = vst.msk [vmem:[%s7659_s24 + $0x30] sm:$0xff] %vm837_vm1, %v5736_v34  ;;  %5857 = vst.msk [vmem:[#allocation2 + $0x88] sm:$0xff] %vm837_vm1, %v5736_v34 }
 0x47b   : > { %v5738_v53 = vpop.permute.xlu1 %5737  ;;  %v5732_v0 = vpop.permute.xlu0 %5731 }
 0x47c   : > { %5826 = vst.msk [vmem:[%s7659_s24 + $0x38] sm:$0xff] %vm837_vm1, %v5738_v53  ;;  %5858 = vst.msk [vmem:[#allocation2 + $0x90] sm:$0xff] %vm837_vm1, %v5738_v53 }
 0x47d   : > { %5823 = vst.msk [vmem:[%s7659_s24 + $0x20] sm:$0xff] %vm837_vm1, %v5732_v0  ;;  %5855 = vst.msk [vmem:[#allocation2 + $0x68] sm:$0xff] %vm837_vm1, %v5732_v0 }
 0x47f   : > { %v5734_v35 = vpop.permute.xlu1 %5733 }
 0x480   : > { %5824 = vst.msk [vmem:[%s7659_s24 + $0x28] sm:$0xff] %vm837_vm1, %v5734_v35  ;;  %5856 = vst.msk [vmem:[#allocation2 + $0x70] sm:$0xff] %vm837_vm1, %v5734_v35 }
 0x487   : > { %v5744_v7 = vpop.permute.xlu0 %5743 }
 0x488   : > { %5829 = vst.msk [vmem:[%s7659_s24 + $0x50] sm:$0xff] %vm837_vm1, %v5744_v7  ;;  %5861 = vst.msk [vmem:[#allocation2 + $0xc8] sm:$0xff] %vm837_vm1, %v5744_v7 }
 0x48b   : > { %v5746_v58 = vpop.permute.xlu1 %5745  ;;  %v5740_v20 = vpop.permute.xlu0 %5739 }
 0x48c   : > { %5830 = vst.msk [vmem:[%s7659_s24 + $0x58] sm:$0xff] %vm837_vm1, %v5746_v58  ;;  %5862 = vst.msk [vmem:[#allocation2 + $0xd0] sm:$0xff] %vm837_vm1, %v5746_v58 }
 0x48d   : > { %5827 = vst.msk [vmem:[%s7659_s24 + $0x40] sm:$0xff] %vm837_vm1, %v5740_v20  ;;  %5859 = vst.msk [vmem:[#allocation2 + $0xa8] sm:$0xff] %vm837_vm1, %v5740_v20 }
 0x48f   : > { %v5742_v6 = vpop.permute.xlu1 %5741 }
 0x490   : > { %5828 = vst.msk [vmem:[%s7659_s24 + $0x48] sm:$0xff] %vm837_vm1, %v5742_v6  ;;  %5860 = vst.msk [vmem:[#allocation2 + $0xb0] sm:$0xff] %vm837_vm1, %v5742_v6 }
 0x497   : > { %v5752_v9 = vpop.permute.xlu0 %5751 }
 0x498   : > { %5833 = vst.msk [vmem:[%s7659_s24 + $0x70] sm:$0xff] %vm837_vm1, %v5752_v9  ;;  %5865 = vst.msk [vmem:[#allocation2 + $0x108] sm:$0xff] %vm837_vm1, %v5752_v9 }
 0x49b   : > { %v5754_v21 = vpop.permute.xlu1 %5753  ;;  %v5748_v41 = vpop.permute.xlu0 %5747 }
 0x49c   : > { %5834 = vst.msk [vmem:[%s7659_s24 + $0x78] sm:$0xff] %vm837_vm1, %v5754_v21  ;;  %5866 = vst.msk [vmem:[#allocation2 + $0x110] sm:$0xff] %vm837_vm1, %v5754_v21 }
 0x49d   : > { %5831 = vst.msk [vmem:[%s7659_s24 + $0x60] sm:$0xff] %vm837_vm1, %v5748_v41  ;;  %5863 = vst.msk [vmem:[#allocation2 + $0xe8] sm:$0xff] %vm837_vm1, %v5748_v41 }
 0x49f   : > { %v5750_v13 = vpop.permute.xlu1 %5749 }
 0x4a0   : > { %5832 = vst.msk [vmem:[%s7659_s24 + $0x68] sm:$0xff] %vm837_vm1, %v5750_v13  ;;  %5864 = vst.msk [vmem:[#allocation2 + $0xf0] sm:$0xff] %vm837_vm1, %v5750_v13 }
 0x4a7   : > { %v5760_v59 = vpop.permute.xlu0 %5759 }
 0x4a8   : > { %5837 = vst.msk [vmem:[%s7659_s24 + $0x90] sm:$0xff] %vm837_vm1, %v5760_v59  ;;  %5869 = vst.msk [vmem:[#allocation2 + $0x148] sm:$0xff] %vm837_vm1, %v5760_v59 }
 0x4ab   : > { %v5762_v42 = vpop.permute.xlu1 %5761  ;;  %v5756_v62 = vpop.permute.xlu0 %5755 }
 0x4ac   : > { %5838 = vst.msk [vmem:[%s7659_s24 + $0x98] sm:$0xff] %vm837_vm1, %v5762_v42  ;;  %5870 = vst.msk [vmem:[#allocation2 + $0x150] sm:$0xff] %vm837_vm1, %v5762_v42 }
 0x4ad   : > { %5835 = vst.msk [vmem:[%s7659_s24 + $0x80] sm:$0xff] %vm837_vm1, %v5756_v62  ;;  %5867 = vst.msk [vmem:[#allocation2 + $0x128] sm:$0xff] %vm837_vm1, %v5756_v62 }
 0x4af   : > { %v5758_v30 = vpop.permute.xlu1 %5757 }
 0x4b0   : > { %5836 = vst.msk [vmem:[%s7659_s24 + $0x88] sm:$0xff] %vm837_vm1, %v5758_v30  ;;  %5868 = vst.msk [vmem:[#allocation2 + $0x130] sm:$0xff] %vm837_vm1, %v5758_v30 }
 0x4b7   : > { %v5768_v5 = vpop.permute.xlu0 %5767 }
 0x4b8   : > { %5841 = vst.msk [vmem:[%s7659_s24 + $0xb0] sm:$0xff] %vm837_vm1, %v5768_v5  ;;  %5873 = vst.msk [vmem:[#allocation2 + $0x188] sm:$0xff] %vm837_vm1, %v5768_v5 }
 0x4bb   : > { %v5770_v12 = vpop.permute.xlu1 %5769  ;;  %v5764_v57 = vpop.permute.xlu0 %5763 }
 0x4bc   : > { %5842 = vst.msk [vmem:[%s7659_s24 + $0xb8] sm:$0xff] %vm837_vm1, %v5770_v12  ;;  %5874 = vst.msk [vmem:[#allocation2 + $0x190] sm:$0xff] %vm837_vm1, %v5770_v12 }
 0x4bd   : > { %5839 = vst.msk [vmem:[%s7659_s24 + $0xa0] sm:$0xff] %vm837_vm1, %v5764_v57  ;;  %5871 = vst.msk [vmem:[#allocation2 + $0x168] sm:$0xff] %vm837_vm1, %v5764_v57 }
 0x4bf   : > { %v5766_v39 = vpop.permute.xlu1 %5765 }
 0x4c0   : > { %5840 = vst.msk [vmem:[%s7659_s24 + $0xa8] sm:$0xff] %vm837_vm1, %v5766_v39  ;;  %5872 = vst.msk [vmem:[#allocation2 + $0x170] sm:$0xff] %vm837_vm1, %v5766_v39 }
 0x4c7   : > { %v5776_v28 = vpop.permute.xlu0 %5775 }
 0x4c8   : > { %5845 = vst.msk [vmem:[%s7659_s24 + $0xd0] sm:$0xff] %vm837_vm1, %v5776_v28  ;;  %5877 = vst.msk [vmem:[#allocation2 + $0x1c8] sm:$0xff] %vm837_vm1, %v5776_v28 }
 0x4cb   : > { %v5778_v51 = vpop.permute.xlu1 %5777  ;;  %v5772_v24 = vpop.permute.xlu0 %5771 }
 0x4cc   : > { %5846 = vst.msk [vmem:[%s7659_s24 + $0xd8] sm:$0xff] %vm837_vm1, %v5778_v51  ;;  %5878 = vst.msk [vmem:[#allocation2 + $0x1d0] sm:$0xff] %vm837_vm1, %v5778_v51 }
 0x4cd   : > { %5843 = vst.msk [vmem:[%s7659_s24 + $0xc0] sm:$0xff] %vm837_vm1, %v5772_v24  ;;  %5875 = vst.msk [vmem:[#allocation2 + $0x1a8] sm:$0xff] %vm837_vm1, %v5772_v24 }
 0x4cf   : > { %v5774_v27 = vpop.permute.xlu1 %5773 }
 0x4d0   : > { %5844 = vst.msk [vmem:[%s7659_s24 + $0xc8] sm:$0xff] %vm837_vm1, %v5774_v27  ;;  %5876 = vst.msk [vmem:[#allocation2 + $0x1b0] sm:$0xff] %vm837_vm1, %v5774_v27 }
 0x4dd   : > { %v5780_v44 = vpop.permute.xlu0 %5779 }
 0x4de   : > { %5847 = vst.msk [vmem:[%s7659_s24 + $0xe0] sm:$0xff] %vm837_vm1, %v5780_v44  ;;  %5879 = vst.msk [vmem:[#allocation2 + $0x1e8] sm:$0xff] %vm837_vm1, %v5780_v44 }
 0x4e0   : > { %v5782_v16 = vpop.permute.xlu1 %5781 }
 0x4e1   : > { %v5784_v50 = vpop.permute.xlu0 %5783  ;;  %5848 = vst.msk [vmem:[%s7659_s24 + $0xe8] sm:$0xff] %vm837_vm1, %v5782_v16  ;;  %5880 = vst.msk [vmem:[#allocation2 + $0x1f0] sm:$0xff] %vm837_vm1, %v5782_v16 }
 0x4e2   : > { %5849 = vst.msk [vmem:[%s7659_s24 + $0xf0] sm:$0xff] %vm837_vm1, %v5784_v50  ;;  %5881 = vst.msk [vmem:[#allocation2 + $0x208] sm:$0xff] %vm837_vm1, %v5784_v50 }
 0x4e4   : > { %v5786_v52 = vpop.permute.xlu1 %5785 }
 0x4e5   : > { %5850 = vst.msk [vmem:[%s7659_s24 + $0xf8] sm:$0xff] %vm837_vm1, %v5786_v52  ;;  %5882 = vst.msk [vmem:[#allocation2 + $0x210] sm:$0xff] %vm837_vm1, %v5786_v52 }
 0x4e6 PF: > { %p7022_p3 = scmp.ge.s32.totalorder %s7541_s25, 2  ;;  %s5936_s30 = sand.u32 1, %s7513_s18  }
 0x4e7   : > { %s5937_s16 = scalar_lea.sflag [#allocation5], %s5936_s30 }
 0x4e8   : > { %p7019_p4 = pnand %p7022_p3, %p7639_p9 }
 0x4ea   : > { %p7020_p5 = pneg %p7019_p4 }
 0x4ec   : > { %7508 = dma.done.wait (%p7020_p5), %s5937_s16, 4096  }
 0x4ed   : > { %7510 = vsyncadd (%p7020_p5), %s5937_s16, 4294963200  ;;  %s19_s25 = sadd.s32 1, %s7541_s25   ;;  %s10009_s26 = sld [smem:[#allocation7_spill]] }
 0x4ee   : > { %p16_p6 = scmp.ge.s32.totalorder %s19_s25, 18   ;;  %s10010_s20 = sld [smem:[#allocation12_spill]] }
 0x4ef   : > { %s10011_s21 = sld [smem:[#allocation8_spill]]  ;;  %s10015_s18 = smov %s7517_s19 }
 0x4f0   : > { %s10012_s22 = sld [smem:[#allocation9_spill]]  ;;  %18 = sbr.rel (!%p16_p6) target bundleno = 5 (0x5), region = 97 }
 0x4f1   : > { %s10013_s23 = sld [smem:[#allocation10_spill]] }
 0x4f2   : > { %s10014_s24 = sld [smem:[#allocation11_spill]] }
 0x4f3   : > { %s10016_s19 = smov %s10009_s26 }
 0x4f5   :  { %5942 = vsyncpa [#allocation5], 1 }
 0x4f6   :  { %5944 = vsyncpa [#allocation5 + $0x1], 1 }

</bundles_post_ra>
